<compile_context>
chip_gen: v7x
topology: tpu7x:2x2x1
jax: 0.10.0
libtpu: 0.0.40
codegen_flags: <defaults>
</compile_context>

<pallas_src>
import jax
import jax.numpy as jnp
from jax import lax
from jax.experimental import pallas as pl
from jax.experimental.pallas import tpu as pltpu

B = 2
H0, W0 = 104, 8           # conv1 input spatial size after x.view(B,1,104,8)
C = 4
LANES = B * C * W0        # 64 active lanes: 8 groups (b, c) of 8 spatial cols
LIN_IN, LIN_OUT = 16, 64 ** 2


def _replicate(p0, p1):
    """(rows, 8) planes for batch 0 / batch 1 -> (rows, 64): 4 copies per batch
    (the same input-channel plane feeds all 4 output-channel lane groups)."""
    return jnp.concatenate([p0, p0, p0, p0, p1, p1, p1, p1], axis=1)


def _packed_conv(packed, wlane, blane, hin, hout, padded):
    """4->4 3x3 conv on a lane-packed (hin, 64) tile -> (hout, 64) plus bias.

    `packed` lane group g = b*4 + ci; result lane group g = b*4 + co.
    `wlane` / `blane` are values (already loaded from VMEM), row of `wlane`
    t = ci*9 + ki*3 + kj replicated over the (b, co, j) lane layout.
    For `padded` (conv2) a full zero halo is added; for valid convs the plane
    is only right-padded so the kj column shifts stay 8 lanes wide (the extra
    lanes only feed output lanes beyond the valid width, which are don't-care).
    """
    f32 = jnp.float32
    acc = jnp.zeros((hout, LANES), f32)
    for ci in range(C):
        planes = []
        for b in range(B):
            base = (b * C + ci) * W0
            pln = packed[:, base:base + W0]                       # (hin, 8)
            if padded:                                            # 'same' conv
                zc = jnp.zeros((hin, 1), f32)
                pln = jnp.concatenate([zc, pln, zc], axis=1)      # (hin, 10)
                zr = jnp.zeros((1, 10), f32)
                pln = jnp.concatenate([zr, pln, zr], axis=0)      # (hin+2, 10)
            else:                                                 # 'valid' conv
                z2 = jnp.zeros((hin, 2), f32)
                pln = jnp.concatenate([pln, z2], axis=1)          # (hin, 10)
            planes.append(pln)
        # One slab per kj shift, replicated across the 4 co lane groups.
        slabs = [_replicate(planes[0][:, kj:kj + W0],
                            planes[1][:, kj:kj + W0]) for kj in range(3)]
        for ki in range(3):
            for kj in range(3):
                t = ci * 9 + ki * 3 + kj
                acc = acc + wlane[t:t + 1, :] * slabs[kj][ki:ki + hout, :]
    return acc + blane


def movenet_kernel(
    xslab_ref,               # VMEM (3, 106, 64): conv1 input, one slab per kj
    w1lane_ref,              # VMEM (9, 64):      conv1 weights as lane vectors
    w2lane_ref, b2lane_ref,  # VMEM (36, 64), (1, 64)
    w3lane_ref, b3lane_ref,  # VMEM (36, 64), (1, 64)
    w4lane_ref, b4lane_ref,  # VMEM (36, 64), (1, 64)
    wlin_ref,                # VMEM (16, 4096): linear weight, pre-transposed
    blin_ref,                # VMEM (1, 4096)
    out_ref,                 # VMEM (2, 4096)
):
    f32 = jnp.float32

    # ---- conv1 (1->4, pad=1, no bias) + ReLU: 9 lane-packed taps ----------
    w1lane = w1lane_ref[...]                                  # load once
    acc1 = jnp.zeros((H0, LANES), f32)
    for kj in range(3):
        slab = xslab_ref[kj]                                  # (106, 64)
        for ki in range(3):
            t = ki * 3 + kj
            acc1 = acc1 + w1lane[t:t + 1, :] * slab[ki:ki + H0, :]
    r1 = jnp.maximum(acc1, 0.0)                               # (104, 64)

    # ---- pool1: MaxPool2d((13,1)) over rows, stays in vregs ---------------
    f2 = jnp.concatenate(
        [jnp.max(r1[13 * i:13 * i + 13, :], axis=0, keepdims=True)
         for i in range(8)], axis=0)                          # (8, 64)

    # ---- conv2 (pad=1, bias) + ReLU ---------------------------------------
    r3 = jnp.maximum(
        _packed_conv(f2, w2lane_ref[...], b2lane_ref[...], 8, 8, True), 0.0)
    # ---- conv3 (valid, bias) + ReLU: 8x8 -> 6x6 (group cols >=6 don't-care)
    r4 = jnp.maximum(
        _packed_conv(r3, w3lane_ref[...], b3lane_ref[...], 8, 6, False), 0.0)
    # ---- conv4 (valid, bias): 6x6 -> 4x4 (group cols >=4 don't-care) ------
    f5 = _packed_conv(r4, w4lane_ref[...], b4lane_ref[...], 6, 4, False)

    # ---- pool2 (2x2) + flatten, built entirely in registers ---------------
    top = jnp.maximum(f5[0:1, :], f5[1:2, :])                 # (1, 64) h_p = 0
    bot = jnp.maximum(f5[2:3, :], f5[3:4, :])                 # (1, 64) h_p = 1
    rows = []
    for b in range(B):
        vals = []
        for co in range(C):
            base = (b * C + co) * W0
            tp4 = top[:, base:base + 4]
            bt4 = bot[:, base:base + 4]
            vals += [jnp.maximum(tp4[:, 0:1], tp4[:, 1:2]),   # (h0, w0)
                     jnp.maximum(tp4[:, 2:3], tp4[:, 3:4]),   # (h0, w1)
                     jnp.maximum(bt4[:, 0:1], bt4[:, 1:2]),   # (h1, w0)
                     jnp.maximum(bt4[:, 2:3], bt4[:, 3:4])]   # (h1, w1)
        rows.append(jnp.concatenate(vals, axis=1))            # (1, 16)
    f6 = jnp.concatenate(rows, axis=0)                        # (2, 16)

    # ---- linear 16 -> 4096 on the MXU, lane-dense (2, 4096) store ---------
    y = jnp.dot(f6, wlin_ref[...], preferred_element_type=jnp.float32)
    out_ref[...] = y + blin_ref[...]


def _lane_weights(w):
    """(4,4,3,3) OIHW -> (36,64): row = ci*9+ki*3+kj, lane (b*4+co)*8+j."""
    wt = jnp.transpose(w, (1, 2, 3, 0)).reshape(9 * C, C)     # [(ci,ki,kj), co]
    return jnp.tile(jnp.repeat(wt, W0, axis=1), (1, B))       # (36, 64)


def _lane_bias(bv):
    """(4,) -> (1,64) lane vector matching the (b, co) group layout."""
    return jnp.tile(jnp.repeat(bv.reshape(1, C), W0, axis=1), (1, B))


@jax.jit
def movenet_forward(x, params):
    w1, w2, b2, w3, b3, w4, b4, wlin, blin = params
    assert x.shape[0] == B, "lane packing is specialized to batch=2"

    # -- input layout plumbing (pure XLA): pad once, then build the three
    #    kj-shifted slabs with batch + out-channel replication along lanes. --
    x3 = x.reshape(B, H0, W0).astype(jnp.float32)
    xpad = jnp.pad(x3, ((0, 0), (1, 1), (1, 1)))              # (2, 106, 10)
    cols = jnp.stack([xpad[:, :, kj:kj + W0] for kj in range(3)], axis=0)
    xslab = jnp.concatenate([cols[:, 0]] * C + [cols[:, 1]] * C, axis=-1)  # (3,106,64)

    w1lane = jnp.tile(jnp.repeat(w1.reshape(C, 9).T, W0, axis=1), (1, B))  # (9, 64)
    w2lane, w3lane, w4lane = _lane_weights(w2), _lane_weights(w3), _lane_weights(w4)
    b2lane, b3lane, b4lane = _lane_bias(b2), _lane_bias(b3), _lane_bias(b4)

    wlin_t = wlin.T                                           # (16, 4096) f32
    blin2 = blin.reshape(1, LIN_OUT)

    vmem = pl.BlockSpec(memory_space=pltpu.MemorySpace.VMEM)
    out = pl.pallas_call(
        movenet_kernel,
        out_shape=jax.ShapeDtypeStruct((B, LIN_OUT), jnp.float32),
        in_specs=[vmem] * 10,
        out_specs=vmem,
    )(xslab, w1lane, w2lane, b2lane, w3lane, b3lane, w4lane, b4lane,
      wlin_t, blin2)
    return out


def movenet_ref(x, params):
    """Pure-JAX reference of the PyTorch forward (NCHW)."""
    w1, w2, b2, w3, b3, w4, b4, wlin, blin = params
    b = x.shape[0]
    xi = x.reshape(b, 1, H0, W0).astype(jnp.float32)
    dn = lax.conv_dimension_numbers(xi.shape, w1.shape, ("NCHW", "OIHW", "NCHW"))
    hp = lax.Precision.HIGHEST

    f1 = lax.conv_general_dilated(xi, w1, (1, 1), ((1, 1), (1, 1)),
                                  dimension_numbers=dn, precision=hp)
    f2 = lax.reduce_window(jnp.maximum(f1, 0.0), -jnp.inf, lax.max,
                           (1, 1, 13, 1), (1, 1, 13, 1), "VALID")
    f3 = lax.conv_general_dilated(f2, w2, (1, 1), ((1, 1), (1, 1)),
                                  dimension_numbers=dn, precision=hp) + b2.reshape(1, C, 1, 1)
    f4 = lax.conv_general_dilated(jnp.maximum(f3, 0.0), w3, (1, 1), "VALID",
                                  dimension_numbers=dn, precision=hp) + b3.reshape(1, C, 1, 1)
    f5 = lax.conv_general_dilated(jnp.maximum(f4, 0.0), w4, (1, 1), "VALID",
                                  dimension_numbers=dn, precision=hp) + b4.reshape(1, C, 1, 1)
    f6 = lax.reduce_window(f5, -jnp.inf, lax.max, (1, 1, 2, 2), (1, 1, 2, 2), "VALID")
    f7 = jnp.dot(f6.reshape(b, LIN_IN), wlin.T, precision=hp) + blin
    return f7


def make_params(key):
    ks = jax.random.split(key, 9)
    w1 = 0.3 * jax.random.normal(ks[0], (4, 1, 3, 3), jnp.float32)
    w2 = 0.2 * jax.random.normal(ks[1], (4, 4, 3, 3), jnp.float32)
    b2 = 0.1 * jax.random.normal(ks[2], (4,), jnp.float32)
    w3 = 0.2 * jax.random.normal(ks[3], (4, 4, 3, 3), jnp.float32)
    b3 = 0.1 * jax.random.normal(ks[4], (4,), jnp.float32)
    w4 = 0.2 * jax.random.normal(ks[5], (4, 4, 3, 3), jnp.float32)
    b4 = 0.1 * jax.random.normal(ks[6], (4,), jnp.float32)
    wlin = 0.1 * jax.random.normal(ks[7], (LIN_OUT, LIN_IN), jnp.float32)
    blin = 0.1 * jax.random.normal(ks[8], (LIN_OUT,), jnp.float32)
    return (w1, w2, b2, w3, b3, w4, b4, wlin, blin)


if __name__ == "__main__":
    key = jax.random.PRNGKey(0)
    kx, kp = jax.random.split(key)
    x = jax.random.normal(kx, (B, H0 * W0), jnp.float32)  # x.view(B,1,104,8) in the module
    params = make_params(kp)

    out = jax.block_until_ready(movenet_forward(x, params))
    assert out.shape == (B, LIN_OUT)

    ref = jax.block_until_ready(movenet_ref(x, params))
    err = float(jnp.max(jnp.abs(out - ref)))
    scale = float(jnp.max(jnp.abs(ref))) + 1.0
    if err > 1e-3 * scale:
        raise AssertionError(f"Pallas kernel mismatch: max abs err {err} (scale {scale})")

    print("KERNEL_OK")
</pallas_src>

<mosaic_0001>
module attributes {stable_mosaic.version = 11 : i64} {
  func.func @movenet_kernel(%arg0: memref<3x106x64xf32, #tpu.memory_space<vmem>>, %arg1: memref<9x64xf32, #tpu.memory_space<vmem>>, %arg2: memref<36x64xf32, #tpu.memory_space<vmem>>, %arg3: memref<1x64xf32, #tpu.memory_space<vmem>>, %arg4: memref<36x64xf32, #tpu.memory_space<vmem>>, %arg5: memref<1x64xf32, #tpu.memory_space<vmem>>, %arg6: memref<36x64xf32, #tpu.memory_space<vmem>>, %arg7: memref<1x64xf32, #tpu.memory_space<vmem>>, %arg8: memref<16x4096xf32, #tpu.memory_space<vmem>>, %arg9: memref<1x4096xf32, #tpu.memory_space<vmem>>, %arg10: memref<2x4096xf32, #tpu.memory_space<vmem>>) attributes {dimension_semantics = [], scalar_prefetch = 0 : i64, scratch_operands = 0 : i64, tpu.core_type = #tpu.core_type<tc>} {
    %c0 = arith.constant 0 : index
    %c0_0 = arith.constant 0 : index
    %0 = vector.load %arg1[%c0, %c0_0] : memref<9x64xf32, #tpu.memory_space<vmem>>, vector<9x64xf32>
    %cst = arith.constant 0.000000e+00 : f32
    %1 = vector.broadcast %cst : f32 to vector<104x64xf32>
    %c0_1 = arith.constant 0 : index
    %c0_2 = arith.constant 0 : index
    %c0_3 = arith.constant 0 : index
    %2 = vector.load %arg0[%c0_1, %c0_2, %c0_3] : memref<3x106x64xf32, #tpu.memory_space<vmem>>, vector<1x106x64xf32>
    %3 = vector.shape_cast %2 : vector<1x106x64xf32> to vector<106x64xf32>
    %4 = vector.extract_strided_slice %0 {offsets = [0, 0], sizes = [1, 64], strides = [1, 1]} : vector<9x64xf32> to vector<1x64xf32>
    %5 = vector.extract_strided_slice %3 {offsets = [0, 0], sizes = [104, 64], strides = [1, 1]} : vector<106x64xf32> to vector<104x64xf32>
    %6 = vector.broadcast %4 : vector<1x64xf32> to vector<104x64xf32>
    %7 = arith.mulf %6, %5 : vector<104x64xf32>
    %8 = arith.addf %1, %7 : vector<104x64xf32>
    %9 = vector.extract_strided_slice %0 {offsets = [3, 0], sizes = [1, 64], strides = [1, 1]} : vector<9x64xf32> to vector<1x64xf32>
    %10 = vector.extract_strided_slice %3 {offsets = [1, 0], sizes = [104, 64], strides = [1, 1]} : vector<106x64xf32> to vector<104x64xf32>
    %11 = vector.broadcast %9 : vector<1x64xf32> to vector<104x64xf32>
    %12 = arith.mulf %11, %10 : vector<104x64xf32>
    %13 = arith.addf %8, %12 : vector<104x64xf32>
    %14 = vector.extract_strided_slice %0 {offsets = [6, 0], sizes = [1, 64], strides = [1, 1]} : vector<9x64xf32> to vector<1x64xf32>
    %15 = vector.extract_strided_slice %3 {offsets = [2, 0], sizes = [104, 64], strides = [1, 1]} : vector<106x64xf32> to vector<104x64xf32>
    %16 = vector.broadcast %14 : vector<1x64xf32> to vector<104x64xf32>
    %17 = arith.mulf %16, %15 : vector<104x64xf32>
    %18 = arith.addf %13, %17 : vector<104x64xf32>
    %c1 = arith.constant 1 : index
    %c0_4 = arith.constant 0 : index
    %c0_5 = arith.constant 0 : index
    %19 = vector.load %arg0[%c1, %c0_4, %c0_5] : memref<3x106x64xf32, #tpu.memory_space<vmem>>, vector<1x106x64xf32>
    %20 = vector.shape_cast %19 : vector<1x106x64xf32> to vector<106x64xf32>
    %21 = vector.extract_strided_slice %0 {offsets = [1, 0], sizes = [1, 64], strides = [1, 1]} : vector<9x64xf32> to vector<1x64xf32>
    %22 = vector.extract_strided_slice %20 {offsets = [0, 0], sizes = [104, 64], strides = [1, 1]} : vector<106x64xf32> to vector<104x64xf32>
    %23 = vector.broadcast %21 : vector<1x64xf32> to vector<104x64xf32>
    %24 = arith.mulf %23, %22 : vector<104x64xf32>
    %25 = arith.addf %18, %24 : vector<104x64xf32>
    %26 = vector.extract_strided_slice %0 {offsets = [4, 0], sizes = [1, 64], strides = [1, 1]} : vector<9x64xf32> to vector<1x64xf32>
    %27 = vector.extract_strided_slice %20 {offsets = [1, 0], sizes = [104, 64], strides = [1, 1]} : vector<106x64xf32> to vector<104x64xf32>
    %28 = vector.broadcast %26 : vector<1x64xf32> to vector<104x64xf32>
    %29 = arith.mulf %28, %27 : vector<104x64xf32>
    %30 = arith.addf %25, %29 : vector<104x64xf32>
    %31 = vector.extract_strided_slice %0 {offsets = [7, 0], sizes = [1, 64], strides = [1, 1]} : vector<9x64xf32> to vector<1x64xf32>
    %32 = vector.extract_strided_slice %20 {offsets = [2, 0], sizes = [104, 64], strides = [1, 1]} : vector<106x64xf32> to vector<104x64xf32>
    %33 = vector.broadcast %31 : vector<1x64xf32> to vector<104x64xf32>
    %34 = arith.mulf %33, %32 : vector<104x64xf32>
    %35 = arith.addf %30, %34 : vector<104x64xf32>
    %c2 = arith.constant 2 : index
    %c0_6 = arith.constant 0 : index
    %c0_7 = arith.constant 0 : index
    %36 = vector.load %arg0[%c2, %c0_6, %c0_7] : memref<3x106x64xf32, #tpu.memory_space<vmem>>, vector<1x106x64xf32>
    %37 = vector.shape_cast %36 : vector<1x106x64xf32> to vector<106x64xf32>
    %38 = vector.extract_strided_slice %0 {offsets = [2, 0], sizes = [1, 64], strides = [1, 1]} : vector<9x64xf32> to vector<1x64xf32>
    %39 = vector.extract_strided_slice %37 {offsets = [0, 0], sizes = [104, 64], strides = [1, 1]} : vector<106x64xf32> to vector<104x64xf32>
    %40 = vector.broadcast %38 : vector<1x64xf32> to vector<104x64xf32>
    %41 = arith.mulf %40, %39 : vector<104x64xf32>
    %42 = arith.addf %35, %41 : vector<104x64xf32>
    %43 = vector.extract_strided_slice %0 {offsets = [5, 0], sizes = [1, 64], strides = [1, 1]} : vector<9x64xf32> to vector<1x64xf32>
    %44 = vector.extract_strided_slice %37 {offsets = [1, 0], sizes = [104, 64], strides = [1, 1]} : vector<106x64xf32> to vector<104x64xf32>
    %45 = vector.broadcast %43 : vector<1x64xf32> to vector<104x64xf32>
    %46 = arith.mulf %45, %44 : vector<104x64xf32>
    %47 = arith.addf %42, %46 : vector<104x64xf32>
    %48 = vector.extract_strided_slice %0 {offsets = [8, 0], sizes = [1, 64], strides = [1, 1]} : vector<9x64xf32> to vector<1x64xf32>
    %49 = vector.extract_strided_slice %37 {offsets = [2, 0], sizes = [104, 64], strides = [1, 1]} : vector<106x64xf32> to vector<104x64xf32>
    %50 = vector.broadcast %48 : vector<1x64xf32> to vector<104x64xf32>
    %51 = arith.mulf %50, %49 : vector<104x64xf32>
    %52 = arith.addf %47, %51 : vector<104x64xf32>
    %cst_8 = arith.constant 0.000000e+00 : f32
    %53 = vector.broadcast %cst_8 : f32 to vector<104x64xf32>
    %54 = arith.maximumf %52, %53 : vector<104x64xf32>
    %55 = vector.extract_strided_slice %54 {offsets = [0, 0], sizes = [13, 64], strides = [1, 1]} : vector<104x64xf32> to vector<13x64xf32>
    %cst_9 = arith.constant dense<0xFF800000> : vector<64xf32>
    %56 = vector.multi_reduction <maximumf>, %55, %cst_9 [0] : vector<13x64xf32> to vector<64xf32>
    %57 = vector.shape_cast %56 : vector<64xf32> to vector<1x64xf32>
    %58 = vector.extract_strided_slice %54 {offsets = [13, 0], sizes = [13, 64], strides = [1, 1]} : vector<104x64xf32> to vector<13x64xf32>
    %cst_10 = arith.constant dense<0xFF800000> : vector<64xf32>
    %59 = vector.multi_reduction <maximumf>, %58, %cst_10 [0] : vector<13x64xf32> to vector<64xf32>
    %60 = vector.shape_cast %59 : vector<64xf32> to vector<1x64xf32>
    %61 = vector.extract_strided_slice %54 {offsets = [26, 0], sizes = [13, 64], strides = [1, 1]} : vector<104x64xf32> to vector<13x64xf32>
    %cst_11 = arith.constant dense<0xFF800000> : vector<64xf32>
    %62 = vector.multi_reduction <maximumf>, %61, %cst_11 [0] : vector<13x64xf32> to vector<64xf32>
    %63 = vector.shape_cast %62 : vector<64xf32> to vector<1x64xf32>
    %64 = vector.extract_strided_slice %54 {offsets = [39, 0], sizes = [13, 64], strides = [1, 1]} : vector<104x64xf32> to vector<13x64xf32>
    %cst_12 = arith.constant dense<0xFF800000> : vector<64xf32>
    %65 = vector.multi_reduction <maximumf>, %64, %cst_12 [0] : vector<13x64xf32> to vector<64xf32>
    %66 = vector.shape_cast %65 : vector<64xf32> to vector<1x64xf32>
    %67 = vector.extract_strided_slice %54 {offsets = [52, 0], sizes = [13, 64], strides = [1, 1]} : vector<104x64xf32> to vector<13x64xf32>
    %cst_13 = arith.constant dense<0xFF800000> : vector<64xf32>
    %68 = vector.multi_reduction <maximumf>, %67, %cst_13 [0] : vector<13x64xf32> to vector<64xf32>
    %69 = vector.shape_cast %68 : vector<64xf32> to vector<1x64xf32>
    %70 = vector.extract_strided_slice %54 {offsets = [65, 0], sizes = [13, 64], strides = [1, 1]} : vector<104x64xf32> to vector<13x64xf32>
    %cst_14 = arith.constant dense<0xFF800000> : vector<64xf32>
    %71 = vector.multi_reduction <maximumf>, %70, %cst_14 [0] : vector<13x64xf32> to vector<64xf32>
    %72 = vector.shape_cast %71 : vector<64xf32> to vector<1x64xf32>
    %73 = vector.extract_strided_slice %54 {offsets = [78, 0], sizes = [13, 64], strides = [1, 1]} : vector<104x64xf32> to vector<13x64xf32>
    %cst_15 = arith.constant dense<0xFF800000> : vector<64xf32>
    %74 = vector.multi_reduction <maximumf>, %73, %cst_15 [0] : vector<13x64xf32> to vector<64xf32>
    %75 = vector.shape_cast %74 : vector<64xf32> to vector<1x64xf32>
    %76 = vector.extract_strided_slice %54 {offsets = [91, 0], sizes = [13, 64], strides = [1, 1]} : vector<104x64xf32> to vector<13x64xf32>
    %cst_16 = arith.constant dense<0xFF800000> : vector<64xf32>
    %77 = vector.multi_reduction <maximumf>, %76, %cst_16 [0] : vector<13x64xf32> to vector<64xf32>
    %78 = vector.shape_cast %77 : vector<64xf32> to vector<1x64xf32>
    %79 = tpu.concatenate %57, %60, %63, %66, %69, %72, %75, %78 in 0 : vector<1x64xf32>, vector<1x64xf32>, vector<1x64xf32>, vector<1x64xf32>, vector<1x64xf32>, vector<1x64xf32>, vector<1x64xf32>, vector<1x64xf32> -> vector<8x64xf32>
    %c0_17 = arith.constant 0 : index
    %c0_18 = arith.constant 0 : index
    %80 = vector.load %arg2[%c0_17, %c0_18] : memref<36x64xf32, #tpu.memory_space<vmem>>, vector<36x64xf32>
    %c0_19 = arith.constant 0 : index
    %c0_20 = arith.constant 0 : index
    %81 = vector.load %arg3[%c0_19, %c0_20] : memref<1x64xf32, #tpu.memory_space<vmem>>, vector<1x64xf32>
    %cst_21 = arith.constant 0.000000e+00 : f32
    %82 = vector.broadcast %cst_21 : f32 to vector<8x64xf32>
    %83 = vector.extract_strided_slice %79 {offsets = [0, 0], sizes = [8, 8], strides = [1, 1]} : vector<8x64xf32> to vector<8x8xf32>
    %cst_22 = arith.constant 0.000000e+00 : f32
    %84 = vector.broadcast %cst_22 : f32 to vector<8x1xf32>
    %85 = tpu.concatenate %84, %83, %84 in 1 : vector<8x1xf32>, vector<8x8xf32>, vector<8x1xf32> -> vector<8x10xf32>
    %cst_23 = arith.constant 0.000000e+00 : f32
    %86 = vector.broadcast %cst_23 : f32 to vector<1x10xf32>
    %87 = tpu.concatenate %86, %85, %86 in 0 : vector<1x10xf32>, vector<8x10xf32>, vector<1x10xf32> -> vector<10x10xf32>
    %88 = vector.extract_strided_slice %79 {offsets = [0, 32], sizes = [8, 8], strides = [1, 1]} : vector<8x64xf32> to vector<8x8xf32>
    %cst_24 = arith.constant 0.000000e+00 : f32
    %89 = vector.broadcast %cst_24 : f32 to vector<8x1xf32>
    %90 = tpu.concatenate %89, %88, %89 in 1 : vector<8x1xf32>, vector<8x8xf32>, vector<8x1xf32> -> vector<8x10xf32>
    %cst_25 = arith.constant 0.000000e+00 : f32
    %91 = vector.broadcast %cst_25 : f32 to vector<1x10xf32>
    %92 = tpu.concatenate %91, %90, %91 in 0 : vector<1x10xf32>, vector<8x10xf32>, vector<1x10xf32> -> vector<10x10xf32>
    %93 = vector.extract_strided_slice %87 {offsets = [0, 0], sizes = [10, 8], strides = [1, 1]} : vector<10x10xf32> to vector<10x8xf32>
    %94 = vector.extract_strided_slice %92 {offsets = [0, 0], sizes = [10, 8], strides = [1, 1]} : vector<10x10xf32> to vector<10x8xf32>
    %95 = tpu.concatenate %93, %93, %93, %93, %94, %94, %94, %94 in 1 : vector<10x8xf32>, vector<10x8xf32>, vector<10x8xf32>, vector<10x8xf32>, vector<10x8xf32>, vector<10x8xf32>, vector<10x8xf32>, vector<10x8xf32> -> vector<10x64xf32>
    %96 = vector.extract_strided_slice %87 {offsets = [0, 1], sizes = [10, 8], strides = [1, 1]} : vector<10x10xf32> to vector<10x8xf32>
    %97 = vector.extract_strided_slice %92 {offsets = [0, 1], sizes = [10, 8], strides = [1, 1]} : vector<10x10xf32> to vector<10x8xf32>
    %98 = tpu.concatenate %96, %96, %96, %96, %97, %97, %97, %97 in 1 : vector<10x8xf32>, vector<10x8xf32>, vector<10x8xf32>, vector<10x8xf32>, vector<10x8xf32>, vector<10x8xf32>, vector<10x8xf32>, vector<10x8xf32> -> vector<10x64xf32>
    %99 = vector.extract_strided_slice %87 {offsets = [0, 2], sizes = [10, 8], strides = [1, 1]} : vector<10x10xf32> to vector<10x8xf32>
    %100 = vector.extract_strided_slice %92 {offsets = [0, 2], sizes = [10, 8], strides = [1, 1]} : vector<10x10xf32> to vector<10x8xf32>
    %101 = tpu.concatenate %99, %99, %99, %99, %100, %100, %100, %100 in 1 : vector<10x8xf32>, vector<10x8xf32>, vector<10x8xf32>, vector<10x8xf32>, vector<10x8xf32>, vector<10x8xf32>, vector<10x8xf32>, vector<10x8xf32> -> vector<10x64xf32>
    %102 = vector.extract_strided_slice %80 {offsets = [0, 0], sizes = [1, 64], strides = [1, 1]} : vector<36x64xf32> to vector<1x64xf32>
    %103 = vector.extract_strided_slice %95 {offsets = [0, 0], sizes = [8, 64], strides = [1, 1]} : vector<10x64xf32> to vector<8x64xf32>
    %104 = vector.broadcast %102 : vector<1x64xf32> to vector<8x64xf32>
    %105 = arith.mulf %104, %103 : vector<8x64xf32>
    %106 = arith.addf %82, %105 : vector<8x64xf32>
    %107 = vector.extract_strided_slice %80 {offsets = [1, 0], sizes = [1, 64], strides = [1, 1]} : vector<36x64xf32> to vector<1x64xf32>
    %108 = vector.extract_strided_slice %98 {offsets = [0, 0], sizes = [8, 64], strides = [1, 1]} : vector<10x64xf32> to vector<8x64xf32>
    %109 = vector.broadcast %107 : vector<1x64xf32> to vector<8x64xf32>
    %110 = arith.mulf %109, %108 : vector<8x64xf32>
    %111 = arith.addf %106, %110 : vector<8x64xf32>
    %112 = vector.extract_strided_slice %80 {offsets = [2, 0], sizes = [1, 64], strides = [1, 1]} : vector<36x64xf32> to vector<1x64xf32>
    %113 = vector.extract_strided_slice %101 {offsets = [0, 0], sizes = [8, 64], strides = [1, 1]} : vector<10x64xf32> to vector<8x64xf32>
    %114 = vector.broadcast %112 : vector<1x64xf32> to vector<8x64xf32>
    %115 = arith.mulf %114, %113 : vector<8x64xf32>
    %116 = arith.addf %111, %115 : vector<8x64xf32>
    %117 = vector.extract_strided_slice %80 {offsets = [3, 0], sizes = [1, 64], strides = [1, 1]} : vector<36x64xf32> to vector<1x64xf32>
    %118 = vector.extract_strided_slice %95 {offsets = [1, 0], sizes = [8, 64], strides = [1, 1]} : vector<10x64xf32> to vector<8x64xf32>
    %119 = vector.broadcast %117 : vector<1x64xf32> to vector<8x64xf32>
    %120 = arith.mulf %119, %118 : vector<8x64xf32>
    %121 = arith.addf %116, %120 : vector<8x64xf32>
    %122 = vector.extract_strided_slice %80 {offsets = [4, 0], sizes = [1, 64], strides = [1, 1]} : vector<36x64xf32> to vector<1x64xf32>
    %123 = vector.extract_strided_slice %98 {offsets = [1, 0], sizes = [8, 64], strides = [1, 1]} : vector<10x64xf32> to vector<8x64xf32>
    %124 = vector.broadcast %122 : vector<1x64xf32> to vector<8x64xf32>
    %125 = arith.mulf %124, %123 : vector<8x64xf32>
    %126 = arith.addf %121, %125 : vector<8x64xf32>
    %127 = vector.extract_strided_slice %80 {offsets = [5, 0], sizes = [1, 64], strides = [1, 1]} : vector<36x64xf32> to vector<1x64xf32>
    %128 = vector.extract_strided_slice %101 {offsets = [1, 0], sizes = [8, 64], strides = [1, 1]} : vector<10x64xf32> to vector<8x64xf32>
    %129 = vector.broadcast %127 : vector<1x64xf32> to vector<8x64xf32>
    %130 = arith.mulf %129, %128 : vector<8x64xf32>
    %131 = arith.addf %126, %130 : vector<8x64xf32>
    %132 = vector.extract_strided_slice %80 {offsets = [6, 0], sizes = [1, 64], strides = [1, 1]} : vector<36x64xf32> to vector<1x64xf32>
    %133 = vector.extract_strided_slice %95 {offsets = [2, 0], sizes = [8, 64], strides = [1, 1]} : vector<10x64xf32> to vector<8x64xf32>
    %134 = vector.broadcast %132 : vector<1x64xf32> to vector<8x64xf32>
    %135 = arith.mulf %134, %133 : vector<8x64xf32>
    %136 = arith.addf %131, %135 : vector<8x64xf32>
    %137 = vector.extract_strided_slice %80 {offsets = [7, 0], sizes = [1, 64], strides = [1, 1]} : vector<36x64xf32> to vector<1x64xf32>
    %138 = vector.extract_strided_slice %98 {offsets = [2, 0], sizes = [8, 64], strides = [1, 1]} : vector<10x64xf32> to vector<8x64xf32>
    %139 = vector.broadcast %137 : vector<1x64xf32> to vector<8x64xf32>
    %140 = arith.mulf %139, %138 : vector<8x64xf32>
    %141 = arith.addf %136, %140 : vector<8x64xf32>
    %142 = vector.extract_strided_slice %80 {offsets = [8, 0], sizes = [1, 64], strides = [1, 1]} : vector<36x64xf32> to vector<1x64xf32>
    %143 = vector.extract_strided_slice %101 {offsets = [2, 0], sizes = [8, 64], strides = [1, 1]} : vector<10x64xf32> to vector<8x64xf32>
    %144 = vector.broadcast %142 : vector<1x64xf32> to vector<8x64xf32>
    %145 = arith.mulf %144, %143 : vector<8x64xf32>
    %146 = arith.addf %141, %145 : vector<8x64xf32>
    %147 = vector.extract_strided_slice %79 {offsets = [0, 8], sizes = [8, 8], strides = [1, 1]} : vector<8x64xf32> to vector<8x8xf32>
    %cst_26 = arith.constant 0.000000e+00 : f32
    %148 = vector.broadcast %cst_26 : f32 to vector<8x1xf32>
    %149 = tpu.concatenate %148, %147, %148 in 1 : vector<8x1xf32>, vector<8x8xf32>, vector<8x1xf32> -> vector<8x10xf32>
    %cst_27 = arith.constant 0.000000e+00 : f32
    %150 = vector.broadcast %cst_27 : f32 to vector<1x10xf32>
    %151 = tpu.concatenate %150, %149, %150 in 0 : vector<1x10xf32>, vector<8x10xf32>, vector<1x10xf32> -> vector<10x10xf32>
    %152 = vector.extract_strided_slice %79 {offsets = [0, 40], sizes = [8, 8], strides = [1, 1]} : vector<8x64xf32> to vector<8x8xf32>
    %cst_28 = arith.constant 0.000000e+00 : f32
    %153 = vector.broadcast %cst_28 : f32 to vector<8x1xf32>
    %154 = tpu.concatenate %153, %152, %153 in 1 : vector<8x1xf32>, vector<8x8xf32>, vector<8x1xf32> -> vector<8x10xf32>
    %cst_29 = arith.constant 0.000000e+00 : f32
    %155 = vector.broadcast %cst_29 : f32 to vector<1x10xf32>
    %156 = tpu.concatenate %155, %154, %155 in 0 : vector<1x10xf32>, vector<8x10xf32>, vector<1x10xf32> -> vector<10x10xf32>
    %157 = vector.extract_strided_slice %151 {offsets = [0, 0], sizes = [10, 8], strides = [1, 1]} : vector<10x10xf32> to vector<10x8xf32>
    %158 = vector.extract_strided_slice %156 {offsets = [0, 0], sizes = [10, 8], strides = [1, 1]} : vector<10x10xf32> to vector<10x8xf32>
    %159 = tpu.concatenate %157, %157, %157, %157, %158, %158, %158, %158 in 1 : vector<10x8xf32>, vector<10x8xf32>, vector<10x8xf32>, vector<10x8xf32>, vector<10x8xf32>, vector<10x8xf32>, vector<10x8xf32>, vector<10x8xf32> -> vector<10x64xf32>
    %160 = vector.extract_strided_slice %151 {offsets = [0, 1], sizes = [10, 8], strides = [1, 1]} : vector<10x10xf32> to vector<10x8xf32>
    %161 = vector.extract_strided_slice %156 {offsets = [0, 1], sizes = [10, 8], strides = [1, 1]} : vector<10x10xf32> to vector<10x8xf32>
    %162 = tpu.concatenate %160, %160, %160, %160, %161, %161, %161, %161 in 1 : vector<10x8xf32>, vector<10x8xf32>, vector<10x8xf32>, vector<10x8xf32>, vector<10x8xf32>, vector<10x8xf32>, vector<10x8xf32>, vector<10x8xf32> -> vector<10x64xf32>
    %163 = vector.extract_strided_slice %151 {offsets = [0, 2], sizes = [10, 8], strides = [1, 1]} : vector<10x10xf32> to vector<10x8xf32>
    %164 = vector.extract_strided_slice %156 {offsets = [0, 2], sizes = [10, 8], strides = [1, 1]} : vector<10x10xf32> to vector<10x8xf32>
    %165 = tpu.concatenate %163, %163, %163, %163, %164, %164, %164, %164 in 1 : vector<10x8xf32>, vector<10x8xf32>, vector<10x8xf32>, vector<10x8xf32>, vector<10x8xf32>, vector<10x8xf32>, vector<10x8xf32>, vector<10x8xf32> -> vector<10x64xf32>
    %166 = vector.extract_strided_slice %80 {offsets = [9, 0], sizes = [1, 64], strides = [1, 1]} : vector<36x64xf32> to vector<1x64xf32>
    %167 = vector.extract_strided_slice %159 {offsets = [0, 0], sizes = [8, 64], strides = [1, 1]} : vector<10x64xf32> to vector<8x64xf32>
    %168 = vector.broadcast %166 : vector<1x64xf32> to vector<8x64xf32>
    %169 = arith.mulf %168, %167 : vector<8x64xf32>
    %170 = arith.addf %146, %169 : vector<8x64xf32>
    %171 = vector.extract_strided_slice %80 {offsets = [10, 0], sizes = [1, 64], strides = [1, 1]} : vector<36x64xf32> to vector<1x64xf32>
    %172 = vector.extract_strided_slice %162 {offsets = [0, 0], sizes = [8, 64], strides = [1, 1]} : vector<10x64xf32> to vector<8x64xf32>
    %173 = vector.broadcast %171 : vector<1x64xf32> to vector<8x64xf32>
    %174 = arith.mulf %173, %172 : vector<8x64xf32>
    %175 = arith.addf %170, %174 : vector<8x64xf32>
    %176 = vector.extract_strided_slice %80 {offsets = [11, 0], sizes = [1, 64], strides = [1, 1]} : vector<36x64xf32> to vector<1x64xf32>
    %177 = vector.extract_strided_slice %165 {offsets = [0, 0], sizes = [8, 64], strides = [1, 1]} : vector<10x64xf32> to vector<8x64xf32>
    %178 = vector.broadcast %176 : vector<1x64xf32> to vector<8x64xf32>
    %179 = arith.mulf %178, %177 : vector<8x64xf32>
    %180 = arith.addf %175, %179 : vector<8x64xf32>
    %181 = vector.extract_strided_slice %80 {offsets = [12, 0], sizes = [1, 64], strides = [1, 1]} : vector<36x64xf32> to vector<1x64xf32>
    %182 = vector.extract_strided_slice %159 {offsets = [1, 0], sizes = [8, 64], strides = [1, 1]} : vector<10x64xf32> to vector<8x64xf32>
    %183 = vector.broadcast %181 : vector<1x64xf32> to vector<8x64xf32>
    %184 = arith.mulf %183, %182 : vector<8x64xf32>
    %185 = arith.addf %180, %184 : vector<8x64xf32>
    %186 = vector.extract_strided_slice %80 {offsets = [13, 0], sizes = [1, 64], strides = [1, 1]} : vector<36x64xf32> to vector<1x64xf32>
    %187 = vector.extract_strided_slice %162 {offsets = [1, 0], sizes = [8, 64], strides = [1, 1]} : vector<10x64xf32> to vector<8x64xf32>
    %188 = vector.broadcast %186 : vector<1x64xf32> to vector<8x64xf32>
    %189 = arith.mulf %188, %187 : vector<8x64xf32>
    %190 = arith.addf %185, %189 : vector<8x64xf32>
    %191 = vector.extract_strided_slice %80 {offsets = [14, 0], sizes = [1, 64], strides = [1, 1]} : vector<36x64xf32> to vector<1x64xf32>
    %192 = vector.extract_strided_slice %165 {offsets = [1, 0], sizes = [8, 64], strides = [1, 1]} : vector<10x64xf32> to vector<8x64xf32>
    %193 = vector.broadcast %191 : vector<1x64xf32> to vector<8x64xf32>
    %194 = arith.mulf %193, %192 : vector<8x64xf32>
    %195 = arith.addf %190, %194 : vector<8x64xf32>
    %196 = vector.extract_strided_slice %80 {offsets = [15, 0], sizes = [1, 64], strides = [1, 1]} : vector<36x64xf32> to vector<1x64xf32>
    %197 = vector.extract_strided_slice %159 {offsets = [2, 0], sizes = [8, 64], strides = [1, 1]} : vector<10x64xf32> to vector<8x64xf32>
    %198 = vector.broadcast %196 : vector<1x64xf32> to vector<8x64xf32>
    %199 = arith.mulf %198, %197 : vector<8x64xf32>
    %200 = arith.addf %195, %199 : vector<8x64xf32>
    %201 = vector.extract_strided_slice %80 {offsets = [16, 0], sizes = [1, 64], strides = [1, 1]} : vector<36x64xf32> to vector<1x64xf32>
    %202 = vector.extract_strided_slice %162 {offsets = [2, 0], sizes = [8, 64], strides = [1, 1]} : vector<10x64xf32> to vector<8x64xf32>
    %203 = vector.broadcast %201 : vector<1x64xf32> to vector<8x64xf32>
    %204 = arith.mulf %203, %202 : vector<8x64xf32>
    %205 = arith.addf %200, %204 : vector<8x64xf32>
    %206 = vector.extract_strided_slice %80 {offsets = [17, 0], sizes = [1, 64], strides = [1, 1]} : vector<36x64xf32> to vector<1x64xf32>
    %207 = vector.extract_strided_slice %165 {offsets = [2, 0], sizes = [8, 64], strides = [1, 1]} : vector<10x64xf32> to vector<8x64xf32>
    %208 = vector.broadcast %206 : vector<1x64xf32> to vector<8x64xf32>
    %209 = arith.mulf %208, %207 : vector<8x64xf32>
    %210 = arith.addf %205, %209 : vector<8x64xf32>
    %211 = vector.extract_strided_slice %79 {offsets = [0, 16], sizes = [8, 8], strides = [1, 1]} : vector<8x64xf32> to vector<8x8xf32>
    %cst_30 = arith.constant 0.000000e+00 : f32
    %212 = vector.broadcast %cst_30 : f32 to vector<8x1xf32>
    %213 = tpu.concatenate %212, %211, %212 in 1 : vector<8x1xf32>, vector<8x8xf32>, vector<8x1xf32> -> vector<8x10xf32>
    %cst_31 = arith.constant 0.000000e+00 : f32
    %214 = vector.broadcast %cst_31 : f32 to vector<1x10xf32>
    %215 = tpu.concatenate %214, %213, %214 in 0 : vector<1x10xf32>, vector<8x10xf32>, vector<1x10xf32> -> vector<10x10xf32>
    %216 = vector.extract_strided_slice %79 {offsets = [0, 48], sizes = [8, 8], strides = [1, 1]} : vector<8x64xf32> to vector<8x8xf32>
    %cst_32 = arith.constant 0.000000e+00 : f32
    %217 = vector.broadcast %cst_32 : f32 to vector<8x1xf32>
    %218 = tpu.concatenate %217, %216, %217 in 1 : vector<8x1xf32>, vector<8x8xf32>, vector<8x1xf32> -> vector<8x10xf32>
    %cst_33 = arith.constant 0.000000e+00 : f32
    %219 = vector.broadcast %cst_33 : f32 to vector<1x10xf32>
    %220 = tpu.concatenate %219, %218, %219 in 0 : vector<1x10xf32>, vector<8x10xf32>, vector<1x10xf32> -> vector<10x10xf32>
    %221 = vector.extract_strided_slice %215 {offsets = [0, 0], sizes = [10, 8], strides = [1, 1]} : vector<10x10xf32> to vector<10x8xf32>
    %222 = vector.extract_strided_slice %220 {offsets = [0, 0], sizes = [10, 8], strides = [1, 1]} : vector<10x10xf32> to vector<10x8xf32>
    %223 = tpu.concatenate %221, %221, %221, %221, %222, %222, %222, %222 in 1 : vector<10x8xf32>, vector<10x8xf32>, vector<10x8xf32>, vector<10x8xf32>, vector<10x8xf32>, vector<10x8xf32>, vector<10x8xf32>, vector<10x8xf32> -> vector<10x64xf32>
    %224 = vector.extract_strided_slice %215 {offsets = [0, 1], sizes = [10, 8], strides = [1, 1]} : vector<10x10xf32> to vector<10x8xf32>
    %225 = vector.extract_strided_slice %220 {offsets = [0, 1], sizes = [10, 8], strides = [1, 1]} : vector<10x10xf32> to vector<10x8xf32>
    %226 = tpu.concatenate %224, %224, %224, %224, %225, %225, %225, %225 in 1 : vector<10x8xf32>, vector<10x8xf32>, vector<10x8xf32>, vector<10x8xf32>, vector<10x8xf32>, vector<10x8xf32>, vector<10x8xf32>, vector<10x8xf32> -> vector<10x64xf32>
    %227 = vector.extract_strided_slice %215 {offsets = [0, 2], sizes = [10, 8], strides = [1, 1]} : vector<10x10xf32> to vector<10x8xf32>
    %228 = vector.extract_strided_slice %220 {offsets = [0, 2], sizes = [10, 8], strides = [1, 1]} : vector<10x10xf32> to vector<10x8xf32>
    %229 = tpu.concatenate %227, %227, %227, %227, %228, %228, %228, %228 in 1 : vector<10x8xf32>, vector<10x8xf32>, vector<10x8xf32>, vector<10x8xf32>, vector<10x8xf32>, vector<10x8xf32>, vector<10x8xf32>, vector<10x8xf32> -> vector<10x64xf32>
    %230 = vector.extract_strided_slice %80 {offsets = [18, 0], sizes = [1, 64], strides = [1, 1]} : vector<36x64xf32> to vector<1x64xf32>
    %231 = vector.extract_strided_slice %223 {offsets = [0, 0], sizes = [8, 64], strides = [1, 1]} : vector<10x64xf32> to vector<8x64xf32>
    %232 = vector.broadcast %230 : vector<1x64xf32> to vector<8x64xf32>
    %233 = arith.mulf %232, %231 : vector<8x64xf32>
    %234 = arith.addf %210, %233 : vector<8x64xf32>
    %235 = vector.extract_strided_slice %80 {offsets = [19, 0], sizes = [1, 64], strides = [1, 1]} : vector<36x64xf32> to vector<1x64xf32>
    %236 = vector.extract_strided_slice %226 {offsets = [0, 0], sizes = [8, 64], strides = [1, 1]} : vector<10x64xf32> to vector<8x64xf32>
    %237 = vector.broadcast %235 : vector<1x64xf32> to vector<8x64xf32>
    %238 = arith.mulf %237, %236 : vector<8x64xf32>
    %239 = arith.addf %234, %238 : vector<8x64xf32>
    %240 = vector.extract_strided_slice %80 {offsets = [20, 0], sizes = [1, 64], strides = [1, 1]} : vector<36x64xf32> to vector<1x64xf32>
    %241 = vector.extract_strided_slice %229 {offsets = [0, 0], sizes = [8, 64], strides = [1, 1]} : vector<10x64xf32> to vector<8x64xf32>
    %242 = vector.broadcast %240 : vector<1x64xf32> to vector<8x64xf32>
    %243 = arith.mulf %242, %241 : vector<8x64xf32>
    %244 = arith.addf %239, %243 : vector<8x64xf32>
    %245 = vector.extract_strided_slice %80 {offsets = [21, 0], sizes = [1, 64], strides = [1, 1]} : vector<36x64xf32> to vector<1x64xf32>
    %246 = vector.extract_strided_slice %223 {offsets = [1, 0], sizes = [8, 64], strides = [1, 1]} : vector<10x64xf32> to vector<8x64xf32>
    %247 = vector.broadcast %245 : vector<1x64xf32> to vector<8x64xf32>
    %248 = arith.mulf %247, %246 : vector<8x64xf32>
    %249 = arith.addf %244, %248 : vector<8x64xf32>
    %250 = vector.extract_strided_slice %80 {offsets = [22, 0], sizes = [1, 64], strides = [1, 1]} : vector<36x64xf32> to vector<1x64xf32>
    %251 = vector.extract_strided_slice %226 {offsets = [1, 0], sizes = [8, 64], strides = [1, 1]} : vector<10x64xf32> to vector<8x64xf32>
    %252 = vector.broadcast %250 : vector<1x64xf32> to vector<8x64xf32>
    %253 = arith.mulf %252, %251 : vector<8x64xf32>
    %254 = arith.addf %249, %253 : vector<8x64xf32>
    %255 = vector.extract_strided_slice %80 {offsets = [23, 0], sizes = [1, 64], strides = [1, 1]} : vector<36x64xf32> to vector<1x64xf32>
    %256 = vector.extract_strided_slice %229 {offsets = [1, 0], sizes = [8, 64], strides = [1, 1]} : vector<10x64xf32> to vector<8x64xf32>
    %257 = vector.broadcast %255 : vector<1x64xf32> to vector<8x64xf32>
    %258 = arith.mulf %257, %256 : vector<8x64xf32>
    %259 = arith.addf %254, %258 : vector<8x64xf32>
    %260 = vector.extract_strided_slice %80 {offsets = [24, 0], sizes = [1, 64], strides = [1, 1]} : vector<36x64xf32> to vector<1x64xf32>
    %261 = vector.extract_strided_slice %223 {offsets = [2, 0], sizes = [8, 64], strides = [1, 1]} : vector<10x64xf32> to vector<8x64xf32>
    %262 = vector.broadcast %260 : vector<1x64xf32> to vector<8x64xf32>
    %263 = arith.mulf %262, %261 : vector<8x64xf32>
    %264 = arith.addf %259, %263 : vector<8x64xf32>
    %265 = vector.extract_strided_slice %80 {offsets = [25, 0], sizes = [1, 64], strides = [1, 1]} : vector<36x64xf32> to vector<1x64xf32>
    %266 = vector.extract_strided_slice %226 {offsets = [2, 0], sizes = [8, 64], strides = [1, 1]} : vector<10x64xf32> to vector<8x64xf32>
    %267 = vector.broadcast %265 : vector<1x64xf32> to vector<8x64xf32>
    %268 = arith.mulf %267, %266 : vector<8x64xf32>
    %269 = arith.addf %264, %268 : vector<8x64xf32>
    %270 = vector.extract_strided_slice %80 {offsets = [26, 0], sizes = [1, 64], strides = [1, 1]} : vector<36x64xf32> to vector<1x64xf32>
    %271 = vector.extract_strided_slice %229 {offsets = [2, 0], sizes = [8, 64], strides = [1, 1]} : vector<10x64xf32> to vector<8x64xf32>
    %272 = vector.broadcast %270 : vector<1x64xf32> to vector<8x64xf32>
    %273 = arith.mulf %272, %271 : vector<8x64xf32>
    %274 = arith.addf %269, %273 : vector<8x64xf32>
    %275 = vector.extract_strided_slice %79 {offsets = [0, 24], sizes = [8, 8], strides = [1, 1]} : vector<8x64xf32> to vector<8x8xf32>
    %cst_34 = arith.constant 0.000000e+00 : f32
    %276 = vector.broadcast %cst_34 : f32 to vector<8x1xf32>
    %277 = tpu.concatenate %276, %275, %276 in 1 : vector<8x1xf32>, vector<8x8xf32>, vector<8x1xf32> -> vector<8x10xf32>
    %cst_35 = arith.constant 0.000000e+00 : f32
    %278 = vector.broadcast %cst_35 : f32 to vector<1x10xf32>
    %279 = tpu.concatenate %278, %277, %278 in 0 : vector<1x10xf32>, vector<8x10xf32>, vector<1x10xf32> -> vector<10x10xf32>
    %280 = vector.extract_strided_slice %79 {offsets = [0, 56], sizes = [8, 8], strides = [1, 1]} : vector<8x64xf32> to vector<8x8xf32>
    %cst_36 = arith.constant 0.000000e+00 : f32
    %281 = vector.broadcast %cst_36 : f32 to vector<8x1xf32>
    %282 = tpu.concatenate %281, %280, %281 in 1 : vector<8x1xf32>, vector<8x8xf32>, vector<8x1xf32> -> vector<8x10xf32>
    %cst_37 = arith.constant 0.000000e+00 : f32
    %283 = vector.broadcast %cst_37 : f32 to vector<1x10xf32>
    %284 = tpu.concatenate %283, %282, %283 in 0 : vector<1x10xf32>, vector<8x10xf32>, vector<1x10xf32> -> vector<10x10xf32>
    %285 = vector.extract_strided_slice %279 {offsets = [0, 0], sizes = [10, 8], strides = [1, 1]} : vector<10x10xf32> to vector<10x8xf32>
    %286 = vector.extract_strided_slice %284 {offsets = [0, 0], sizes = [10, 8], strides = [1, 1]} : vector<10x10xf32> to vector<10x8xf32>
    %287 = tpu.concatenate %285, %285, %285, %285, %286, %286, %286, %286 in 1 : vector<10x8xf32>, vector<10x8xf32>, vector<10x8xf32>, vector<10x8xf32>, vector<10x8xf32>, vector<10x8xf32>, vector<10x8xf32>, vector<10x8xf32> -> vector<10x64xf32>
    %288 = vector.extract_strided_slice %279 {offsets = [0, 1], sizes = [10, 8], strides = [1, 1]} : vector<10x10xf32> to vector<10x8xf32>
    %289 = vector.extract_strided_slice %284 {offsets = [0, 1], sizes = [10, 8], strides = [1, 1]} : vector<10x10xf32> to vector<10x8xf32>
    %290 = tpu.concatenate %288, %288, %288, %288, %289, %289, %289, %289 in 1 : vector<10x8xf32>, vector<10x8xf32>, vector<10x8xf32>, vector<10x8xf32>, vector<10x8xf32>, vector<10x8xf32>, vector<10x8xf32>, vector<10x8xf32> -> vector<10x64xf32>
    %291 = vector.extract_strided_slice %279 {offsets = [0, 2], sizes = [10, 8], strides = [1, 1]} : vector<10x10xf32> to vector<10x8xf32>
    %292 = vector.extract_strided_slice %284 {offsets = [0, 2], sizes = [10, 8], strides = [1, 1]} : vector<10x10xf32> to vector<10x8xf32>
    %293 = tpu.concatenate %291, %291, %291, %291, %292, %292, %292, %292 in 1 : vector<10x8xf32>, vector<10x8xf32>, vector<10x8xf32>, vector<10x8xf32>, vector<10x8xf32>, vector<10x8xf32>, vector<10x8xf32>, vector<10x8xf32> -> vector<10x64xf32>
    %294 = vector.extract_strided_slice %80 {offsets = [27, 0], sizes = [1, 64], strides = [1, 1]} : vector<36x64xf32> to vector<1x64xf32>
    %295 = vector.extract_strided_slice %287 {offsets = [0, 0], sizes = [8, 64], strides = [1, 1]} : vector<10x64xf32> to vector<8x64xf32>
    %296 = vector.broadcast %294 : vector<1x64xf32> to vector<8x64xf32>
    %297 = arith.mulf %296, %295 : vector<8x64xf32>
    %298 = arith.addf %274, %297 : vector<8x64xf32>
    %299 = vector.extract_strided_slice %80 {offsets = [28, 0], sizes = [1, 64], strides = [1, 1]} : vector<36x64xf32> to vector<1x64xf32>
    %300 = vector.extract_strided_slice %290 {offsets = [0, 0], sizes = [8, 64], strides = [1, 1]} : vector<10x64xf32> to vector<8x64xf32>
    %301 = vector.broadcast %299 : vector<1x64xf32> to vector<8x64xf32>
    %302 = arith.mulf %301, %300 : vector<8x64xf32>
    %303 = arith.addf %298, %302 : vector<8x64xf32>
    %304 = vector.extract_strided_slice %80 {offsets = [29, 0], sizes = [1, 64], strides = [1, 1]} : vector<36x64xf32> to vector<1x64xf32>
    %305 = vector.extract_strided_slice %293 {offsets = [0, 0], sizes = [8, 64], strides = [1, 1]} : vector<10x64xf32> to vector<8x64xf32>
    %306 = vector.broadcast %304 : vector<1x64xf32> to vector<8x64xf32>
    %307 = arith.mulf %306, %305 : vector<8x64xf32>
    %308 = arith.addf %303, %307 : vector<8x64xf32>
    %309 = vector.extract_strided_slice %80 {offsets = [30, 0], sizes = [1, 64], strides = [1, 1]} : vector<36x64xf32> to vector<1x64xf32>
    %310 = vector.extract_strided_slice %287 {offsets = [1, 0], sizes = [8, 64], strides = [1, 1]} : vector<10x64xf32> to vector<8x64xf32>
    %311 = vector.broadcast %309 : vector<1x64xf32> to vector<8x64xf32>
    %312 = arith.mulf %311, %310 : vector<8x64xf32>
    %313 = arith.addf %308, %312 : vector<8x64xf32>
    %314 = vector.extract_strided_slice %80 {offsets = [31, 0], sizes = [1, 64], strides = [1, 1]} : vector<36x64xf32> to vector<1x64xf32>
    %315 = vector.extract_strided_slice %290 {offsets = [1, 0], sizes = [8, 64], strides = [1, 1]} : vector<10x64xf32> to vector<8x64xf32>
    %316 = vector.broadcast %314 : vector<1x64xf32> to vector<8x64xf32>
    %317 = arith.mulf %316, %315 : vector<8x64xf32>
    %318 = arith.addf %313, %317 : vector<8x64xf32>
    %319 = vector.extract_strided_slice %80 {offsets = [32, 0], sizes = [1, 64], strides = [1, 1]} : vector<36x64xf32> to vector<1x64xf32>
    %320 = vector.extract_strided_slice %293 {offsets = [1, 0], sizes = [8, 64], strides = [1, 1]} : vector<10x64xf32> to vector<8x64xf32>
    %321 = vector.broadcast %319 : vector<1x64xf32> to vector<8x64xf32>
    %322 = arith.mulf %321, %320 : vector<8x64xf32>
    %323 = arith.addf %318, %322 : vector<8x64xf32>
    %324 = vector.extract_strided_slice %80 {offsets = [33, 0], sizes = [1, 64], strides = [1, 1]} : vector<36x64xf32> to vector<1x64xf32>
    %325 = vector.extract_strided_slice %287 {offsets = [2, 0], sizes = [8, 64], strides = [1, 1]} : vector<10x64xf32> to vector<8x64xf32>
    %326 = vector.broadcast %324 : vector<1x64xf32> to vector<8x64xf32>
    %327 = arith.mulf %326, %325 : vector<8x64xf32>
    %328 = arith.addf %323, %327 : vector<8x64xf32>
    %329 = vector.extract_strided_slice %80 {offsets = [34, 0], sizes = [1, 64], strides = [1, 1]} : vector<36x64xf32> to vector<1x64xf32>
    %330 = vector.extract_strided_slice %290 {offsets = [2, 0], sizes = [8, 64], strides = [1, 1]} : vector<10x64xf32> to vector<8x64xf32>
    %331 = vector.broadcast %329 : vector<1x64xf32> to vector<8x64xf32>
    %332 = arith.mulf %331, %330 : vector<8x64xf32>
    %333 = arith.addf %328, %332 : vector<8x64xf32>
    %334 = vector.extract_strided_slice %80 {offsets = [35, 0], sizes = [1, 64], strides = [1, 1]} : vector<36x64xf32> to vector<1x64xf32>
    %335 = vector.extract_strided_slice %293 {offsets = [2, 0], sizes = [8, 64], strides = [1, 1]} : vector<10x64xf32> to vector<8x64xf32>
    %336 = vector.broadcast %334 : vector<1x64xf32> to vector<8x64xf32>
    %337 = arith.mulf %336, %335 : vector<8x64xf32>
    %338 = arith.addf %333, %337 : vector<8x64xf32>
    %339 = vector.broadcast %81 : vector<1x64xf32> to vector<8x64xf32>
    %340 = arith.addf %338, %339 : vector<8x64xf32>
    %cst_38 = arith.constant 0.000000e+00 : f32
    %341 = vector.broadcast %cst_38 : f32 to vector<8x64xf32>
    %342 = arith.maximumf %340, %341 : vector<8x64xf32>
    %c0_39 = arith.constant 0 : index
    %c0_40 = arith.constant 0 : index
    %343 = vector.load %arg4[%c0_39, %c0_40] : memref<36x64xf32, #tpu.memory_space<vmem>>, vector<36x64xf32>
    %c0_41 = arith.constant 0 : index
    %c0_42 = arith.constant 0 : index
    %344 = vector.load %arg5[%c0_41, %c0_42] : memref<1x64xf32, #tpu.memory_space<vmem>>, vector<1x64xf32>
    %cst_43 = arith.constant 0.000000e+00 : f32
    %345 = vector.broadcast %cst_43 : f32 to vector<6x64xf32>
    %346 = vector.extract_strided_slice %342 {offsets = [0, 0], sizes = [8, 8], strides = [1, 1]} : vector<8x64xf32> to vector<8x8xf32>
    %cst_44 = arith.constant 0.000000e+00 : f32
    %347 = vector.broadcast %cst_44 : f32 to vector<8x2xf32>
    %348 = tpu.concatenate %346, %347 in 1 : vector<8x8xf32>, vector<8x2xf32> -> vector<8x10xf32>
    %349 = vector.extract_strided_slice %342 {offsets = [0, 32], sizes = [8, 8], strides = [1, 1]} : vector<8x64xf32> to vector<8x8xf32>
    %cst_45 = arith.constant 0.000000e+00 : f32
    %350 = vector.broadcast %cst_45 : f32 to vector<8x2xf32>
    %351 = tpu.concatenate %349, %350 in 1 : vector<8x8xf32>, vector<8x2xf32> -> vector<8x10xf32>
    %352 = vector.extract_strided_slice %348 {offsets = [0, 0], sizes = [8, 8], strides = [1, 1]} : vector<8x10xf32> to vector<8x8xf32>
    %353 = vector.extract_strided_slice %351 {offsets = [0, 0], sizes = [8, 8], strides = [1, 1]} : vector<8x10xf32> to vector<8x8xf32>
    %354 = tpu.concatenate %352, %352, %352, %352, %353, %353, %353, %353 in 1 : vector<8x8xf32>, vector<8x8xf32>, vector<8x8xf32>, vector<8x8xf32>, vector<8x8xf32>, vector<8x8xf32>, vector<8x8xf32>, vector<8x8xf32> -> vector<8x64xf32>
    %355 = vector.extract_strided_slice %348 {offsets = [0, 1], sizes = [8, 8], strides = [1, 1]} : vector<8x10xf32> to vector<8x8xf32>
    %356 = vector.extract_strided_slice %351 {offsets = [0, 1], sizes = [8, 8], strides = [1, 1]} : vector<8x10xf32> to vector<8x8xf32>
    %357 = tpu.concatenate %355, %355, %355, %355, %356, %356, %356, %356 in 1 : vector<8x8xf32>, vector<8x8xf32>, vector<8x8xf32>, vector<8x8xf32>, vector<8x8xf32>, vector<8x8xf32>, vector<8x8xf32>, vector<8x8xf32> -> vector<8x64xf32>
    %358 = vector.extract_strided_slice %348 {offsets = [0, 2], sizes = [8, 8], strides = [1, 1]} : vector<8x10xf32> to vector<8x8xf32>
    %359 = vector.extract_strided_slice %351 {offsets = [0, 2], sizes = [8, 8], strides = [1, 1]} : vector<8x10xf32> to vector<8x8xf32>
    %360 = tpu.concatenate %358, %358, %358, %358, %359, %359, %359, %359 in 1 : vector<8x8xf32>, vector<8x8xf32>, vector<8x8xf32>, vector<8x8xf32>, vector<8x8xf32>, vector<8x8xf32>, vector<8x8xf32>, vector<8x8xf32> -> vector<8x64xf32>
    %361 = vector.extract_strided_slice %343 {offsets = [0, 0], sizes = [1, 64], strides = [1, 1]} : vector<36x64xf32> to vector<1x64xf32>
    %362 = vector.extract_strided_slice %354 {offsets = [0, 0], sizes = [6, 64], strides = [1, 1]} : vector<8x64xf32> to vector<6x64xf32>
    %363 = vector.broadcast %361 : vector<1x64xf32> to vector<6x64xf32>
    %364 = arith.mulf %363, %362 : vector<6x64xf32>
    %365 = arith.addf %345, %364 : vector<6x64xf32>
    %366 = vector.extract_strided_slice %343 {offsets = [1, 0], sizes = [1, 64], strides = [1, 1]} : vector<36x64xf32> to vector<1x64xf32>
    %367 = vector.extract_strided_slice %357 {offsets = [0, 0], sizes = [6, 64], strides = [1, 1]} : vector<8x64xf32> to vector<6x64xf32>
    %368 = vector.broadcast %366 : vector<1x64xf32> to vector<6x64xf32>
    %369 = arith.mulf %368, %367 : vector<6x64xf32>
    %370 = arith.addf %365, %369 : vector<6x64xf32>
    %371 = vector.extract_strided_slice %343 {offsets = [2, 0], sizes = [1, 64], strides = [1, 1]} : vector<36x64xf32> to vector<1x64xf32>
    %372 = vector.extract_strided_slice %360 {offsets = [0, 0], sizes = [6, 64], strides = [1, 1]} : vector<8x64xf32> to vector<6x64xf32>
    %373 = vector.broadcast %371 : vector<1x64xf32> to vector<6x64xf32>
    %374 = arith.mulf %373, %372 : vector<6x64xf32>
    %375 = arith.addf %370, %374 : vector<6x64xf32>
    %376 = vector.extract_strided_slice %343 {offsets = [3, 0], sizes = [1, 64], strides = [1, 1]} : vector<36x64xf32> to vector<1x64xf32>
    %377 = vector.extract_strided_slice %354 {offsets = [1, 0], sizes = [6, 64], strides = [1, 1]} : vector<8x64xf32> to vector<6x64xf32>
    %378 = vector.broadcast %376 : vector<1x64xf32> to vector<6x64xf32>
    %379 = arith.mulf %378, %377 : vector<6x64xf32>
    %380 = arith.addf %375, %379 : vector<6x64xf32>
    %381 = vector.extract_strided_slice %343 {offsets = [4, 0], sizes = [1, 64], strides = [1, 1]} : vector<36x64xf32> to vector<1x64xf32>
    %382 = vector.extract_strided_slice %357 {offsets = [1, 0], sizes = [6, 64], strides = [1, 1]} : vector<8x64xf32> to vector<6x64xf32>
    %383 = vector.broadcast %381 : vector<1x64xf32> to vector<6x64xf32>
    %384 = arith.mulf %383, %382 : vector<6x64xf32>
    %385 = arith.addf %380, %384 : vector<6x64xf32>
    %386 = vector.extract_strided_slice %343 {offsets = [5, 0], sizes = [1, 64], strides = [1, 1]} : vector<36x64xf32> to vector<1x64xf32>
    %387 = vector.extract_strided_slice %360 {offsets = [1, 0], sizes = [6, 64], strides = [1, 1]} : vector<8x64xf32> to vector<6x64xf32>
    %388 = vector.broadcast %386 : vector<1x64xf32> to vector<6x64xf32>
    %389 = arith.mulf %388, %387 : vector<6x64xf32>
    %390 = arith.addf %385, %389 : vector<6x64xf32>
    %391 = vector.extract_strided_slice %343 {offsets = [6, 0], sizes = [1, 64], strides = [1, 1]} : vector<36x64xf32> to vector<1x64xf32>
    %392 = vector.extract_strided_slice %354 {offsets = [2, 0], sizes = [6, 64], strides = [1, 1]} : vector<8x64xf32> to vector<6x64xf32>
    %393 = vector.broadcast %391 : vector<1x64xf32> to vector<6x64xf32>
    %394 = arith.mulf %393, %392 : vector<6x64xf32>
    %395 = arith.addf %390, %394 : vector<6x64xf32>
    %396 = vector.extract_strided_slice %343 {offsets = [7, 0], sizes = [1, 64], strides = [1, 1]} : vector<36x64xf32> to vector<1x64xf32>
    %397 = vector.extract_strided_slice %357 {offsets = [2, 0], sizes = [6, 64], strides = [1, 1]} : vector<8x64xf32> to vector<6x64xf32>
    %398 = vector.broadcast %396 : vector<1x64xf32> to vector<6x64xf32>
    %399 = arith.mulf %398, %397 : vector<6x64xf32>
    %400 = arith.addf %395, %399 : vector<6x64xf32>
    %401 = vector.extract_strided_slice %343 {offsets = [8, 0], sizes = [1, 64], strides = [1, 1]} : vector<36x64xf32> to vector<1x64xf32>
    %402 = vector.extract_strided_slice %360 {offsets = [2, 0], sizes = [6, 64], strides = [1, 1]} : vector<8x64xf32> to vector<6x64xf32>
    %403 = vector.broadcast %401 : vector<1x64xf32> to vector<6x64xf32>
    %404 = arith.mulf %403, %402 : vector<6x64xf32>
    %405 = arith.addf %400, %404 : vector<6x64xf32>
    %406 = vector.extract_strided_slice %342 {offsets = [0, 8], sizes = [8, 8], strides = [1, 1]} : vector<8x64xf32> to vector<8x8xf32>
    %cst_46 = arith.constant 0.000000e+00 : f32
    %407 = vector.broadcast %cst_46 : f32 to vector<8x2xf32>
    %408 = tpu.concatenate %406, %407 in 1 : vector<8x8xf32>, vector<8x2xf32> -> vector<8x10xf32>
    %409 = vector.extract_strided_slice %342 {offsets = [0, 40], sizes = [8, 8], strides = [1, 1]} : vector<8x64xf32> to vector<8x8xf32>
    %cst_47 = arith.constant 0.000000e+00 : f32
    %410 = vector.broadcast %cst_47 : f32 to vector<8x2xf32>
    %411 = tpu.concatenate %409, %410 in 1 : vector<8x8xf32>, vector<8x2xf32> -> vector<8x10xf32>
    %412 = vector.extract_strided_slice %408 {offsets = [0, 0], sizes = [8, 8], strides = [1, 1]} : vector<8x10xf32> to vector<8x8xf32>
    %413 = vector.extract_strided_slice %411 {offsets = [0, 0], sizes = [8, 8], strides = [1, 1]} : vector<8x10xf32> to vector<8x8xf32>
    %414 = tpu.concatenate %412, %412, %412, %412, %413, %413, %413, %413 in 1 : vector<8x8xf32>, vector<8x8xf32>, vector<8x8xf32>, vector<8x8xf32>, vector<8x8xf32>, vector<8x8xf32>, vector<8x8xf32>, vector<8x8xf32> -> vector<8x64xf32>
    %415 = vector.extract_strided_slice %408 {offsets = [0, 1], sizes = [8, 8], strides = [1, 1]} : vector<8x10xf32> to vector<8x8xf32>
    %416 = vector.extract_strided_slice %411 {offsets = [0, 1], sizes = [8, 8], strides = [1, 1]} : vector<8x10xf32> to vector<8x8xf32>
    %417 = tpu.concatenate %415, %415, %415, %415, %416, %416, %416, %416 in 1 : vector<8x8xf32>, vector<8x8xf32>, vector<8x8xf32>, vector<8x8xf32>, vector<8x8xf32>, vector<8x8xf32>, vector<8x8xf32>, vector<8x8xf32> -> vector<8x64xf32>
    %418 = vector.extract_strided_slice %408 {offsets = [0, 2], sizes = [8, 8], strides = [1, 1]} : vector<8x10xf32> to vector<8x8xf32>
    %419 = vector.extract_strided_slice %411 {offsets = [0, 2], sizes = [8, 8], strides = [1, 1]} : vector<8x10xf32> to vector<8x8xf32>
    %420 = tpu.concatenate %418, %418, %418, %418, %419, %419, %419, %419 in 1 : vector<8x8xf32>, vector<8x8xf32>, vector<8x8xf32>, vector<8x8xf32>, vector<8x8xf32>, vector<8x8xf32>, vector<8x8xf32>, vector<8x8xf32> -> vector<8x64xf32>
    %421 = vector.extract_strided_slice %343 {offsets = [9, 0], sizes = [1, 64], strides = [1, 1]} : vector<36x64xf32> to vector<1x64xf32>
    %422 = vector.extract_strided_slice %414 {offsets = [0, 0], sizes = [6, 64], strides = [1, 1]} : vector<8x64xf32> to vector<6x64xf32>
    %423 = vector.broadcast %421 : vector<1x64xf32> to vector<6x64xf32>
    %424 = arith.mulf %423, %422 : vector<6x64xf32>
    %425 = arith.addf %405, %424 : vector<6x64xf32>
    %426 = vector.extract_strided_slice %343 {offsets = [10, 0], sizes = [1, 64], strides = [1, 1]} : vector<36x64xf32> to vector<1x64xf32>
    %427 = vector.extract_strided_slice %417 {offsets = [0, 0], sizes = [6, 64], strides = [1, 1]} : vector<8x64xf32> to vector<6x64xf32>
    %428 = vector.broadcast %426 : vector<1x64xf32> to vector<6x64xf32>
    %429 = arith.mulf %428, %427 : vector<6x64xf32>
    %430 = arith.addf %425, %429 : vector<6x64xf32>
    %431 = vector.extract_strided_slice %343 {offsets = [11, 0], sizes = [1, 64], strides = [1, 1]} : vector<36x64xf32> to vector<1x64xf32>
    %432 = vector.extract_strided_slice %420 {offsets = [0, 0], sizes = [6, 64], strides = [1, 1]} : vector<8x64xf32> to vector<6x64xf32>
    %433 = vector.broadcast %431 : vector<1x64xf32> to vector<6x64xf32>
    %434 = arith.mulf %433, %432 : vector<6x64xf32>
    %435 = arith.addf %430, %434 : vector<6x64xf32>
    %436 = vector.extract_strided_slice %343 {offsets = [12, 0], sizes = [1, 64], strides = [1, 1]} : vector<36x64xf32> to vector<1x64xf32>
    %437 = vector.extract_strided_slice %414 {offsets = [1, 0], sizes = [6, 64], strides = [1, 1]} : vector<8x64xf32> to vector<6x64xf32>
    %438 = vector.broadcast %436 : vector<1x64xf32> to vector<6x64xf32>
    %439 = arith.mulf %438, %437 : vector<6x64xf32>
    %440 = arith.addf %435, %439 : vector<6x64xf32>
    %441 = vector.extract_strided_slice %343 {offsets = [13, 0], sizes = [1, 64], strides = [1, 1]} : vector<36x64xf32> to vector<1x64xf32>
    %442 = vector.extract_strided_slice %417 {offsets = [1, 0], sizes = [6, 64], strides = [1, 1]} : vector<8x64xf32> to vector<6x64xf32>
    %443 = vector.broadcast %441 : vector<1x64xf32> to vector<6x64xf32>
    %444 = arith.mulf %443, %442 : vector<6x64xf32>
    %445 = arith.addf %440, %444 : vector<6x64xf32>
    %446 = vector.extract_strided_slice %343 {offsets = [14, 0], sizes = [1, 64], strides = [1, 1]} : vector<36x64xf32> to vector<1x64xf32>
    %447 = vector.extract_strided_slice %420 {offsets = [1, 0], sizes = [6, 64], strides = [1, 1]} : vector<8x64xf32> to vector<6x64xf32>
    %448 = vector.broadcast %446 : vector<1x64xf32> to vector<6x64xf32>
    %449 = arith.mulf %448, %447 : vector<6x64xf32>
    %450 = arith.addf %445, %449 : vector<6x64xf32>
    %451 = vector.extract_strided_slice %343 {offsets = [15, 0], sizes = [1, 64], strides = [1, 1]} : vector<36x64xf32> to vector<1x64xf32>
    %452 = vector.extract_strided_slice %414 {offsets = [2, 0], sizes = [6, 64], strides = [1, 1]} : vector<8x64xf32> to vector<6x64xf32>
    %453 = vector.broadcast %451 : vector<1x64xf32> to vector<6x64xf32>
    %454 = arith.mulf %453, %452 : vector<6x64xf32>
    %455 = arith.addf %450, %454 : vector<6x64xf32>
    %456 = vector.extract_strided_slice %343 {offsets = [16, 0], sizes = [1, 64], strides = [1, 1]} : vector<36x64xf32> to vector<1x64xf32>
    %457 = vector.extract_strided_slice %417 {offsets = [2, 0], sizes = [6, 64], strides = [1, 1]} : vector<8x64xf32> to vector<6x64xf32>
    %458 = vector.broadcast %456 : vector<1x64xf32> to vector<6x64xf32>
    %459 = arith.mulf %458, %457 : vector<6x64xf32>
    %460 = arith.addf %455, %459 : vector<6x64xf32>
    %461 = vector.extract_strided_slice %343 {offsets = [17, 0], sizes = [1, 64], strides = [1, 1]} : vector<36x64xf32> to vector<1x64xf32>
    %462 = vector.extract_strided_slice %420 {offsets = [2, 0], sizes = [6, 64], strides = [1, 1]} : vector<8x64xf32> to vector<6x64xf32>
    %463 = vector.broadcast %461 : vector<1x64xf32> to vector<6x64xf32>
    %464 = arith.mulf %463, %462 : vector<6x64xf32>
    %465 = arith.addf %460, %464 : vector<6x64xf32>
    %466 = vector.extract_strided_slice %342 {offsets = [0, 16], sizes = [8, 8], strides = [1, 1]} : vector<8x64xf32> to vector<8x8xf32>
    %cst_48 = arith.constant 0.000000e+00 : f32
    %467 = vector.broadcast %cst_48 : f32 to vector<8x2xf32>
    %468 = tpu.concatenate %466, %467 in 1 : vector<8x8xf32>, vector<8x2xf32> -> vector<8x10xf32>
    %469 = vector.extract_strided_slice %342 {offsets = [0, 48], sizes = [8, 8], strides = [1, 1]} : vector<8x64xf32> to vector<8x8xf32>
    %cst_49 = arith.constant 0.000000e+00 : f32
    %470 = vector.broadcast %cst_49 : f32 to vector<8x2xf32>
    %471 = tpu.concatenate %469, %470 in 1 : vector<8x8xf32>, vector<8x2xf32> -> vector<8x10xf32>
    %472 = vector.extract_strided_slice %468 {offsets = [0, 0], sizes = [8, 8], strides = [1, 1]} : vector<8x10xf32> to vector<8x8xf32>
    %473 = vector.extract_strided_slice %471 {offsets = [0, 0], sizes = [8, 8], strides = [1, 1]} : vector<8x10xf32> to vector<8x8xf32>
    %474 = tpu.concatenate %472, %472, %472, %472, %473, %473, %473, %473 in 1 : vector<8x8xf32>, vector<8x8xf32>, vector<8x8xf32>, vector<8x8xf32>, vector<8x8xf32>, vector<8x8xf32>, vector<8x8xf32>, vector<8x8xf32> -> vector<8x64xf32>
    %475 = vector.extract_strided_slice %468 {offsets = [0, 1], sizes = [8, 8], strides = [1, 1]} : vector<8x10xf32> to vector<8x8xf32>
    %476 = vector.extract_strided_slice %471 {offsets = [0, 1], sizes = [8, 8], strides = [1, 1]} : vector<8x10xf32> to vector<8x8xf32>
    %477 = tpu.concatenate %475, %475, %475, %475, %476, %476, %476, %476 in 1 : vector<8x8xf32>, vector<8x8xf32>, vector<8x8xf32>, vector<8x8xf32>, vector<8x8xf32>, vector<8x8xf32>, vector<8x8xf32>, vector<8x8xf32> -> vector<8x64xf32>
    %478 = vector.extract_strided_slice %468 {offsets = [0, 2], sizes = [8, 8], strides = [1, 1]} : vector<8x10xf32> to vector<8x8xf32>
    %479 = vector.extract_strided_slice %471 {offsets = [0, 2], sizes = [8, 8], strides = [1, 1]} : vector<8x10xf32> to vector<8x8xf32>
    %480 = tpu.concatenate %478, %478, %478, %478, %479, %479, %479, %479 in 1 : vector<8x8xf32>, vector<8x8xf32>, vector<8x8xf32>, vector<8x8xf32>, vector<8x8xf32>, vector<8x8xf32>, vector<8x8xf32>, vector<8x8xf32> -> vector<8x64xf32>
    %481 = vector.extract_strided_slice %343 {offsets = [18, 0], sizes = [1, 64], strides = [1, 1]} : vector<36x64xf32> to vector<1x64xf32>
    %482 = vector.extract_strided_slice %474 {offsets = [0, 0], sizes = [6, 64], strides = [1, 1]} : vector<8x64xf32> to vector<6x64xf32>
    %483 = vector.broadcast %481 : vector<1x64xf32> to vector<6x64xf32>
    %484 = arith.mulf %483, %482 : vector<6x64xf32>
    %485 = arith.addf %465, %484 : vector<6x64xf32>
    %486 = vector.extract_strided_slice %343 {offsets = [19, 0], sizes = [1, 64], strides = [1, 1]} : vector<36x64xf32> to vector<1x64xf32>
    %487 = vector.extract_strided_slice %477 {offsets = [0, 0], sizes = [6, 64], strides = [1, 1]} : vector<8x64xf32> to vector<6x64xf32>
    %488 = vector.broadcast %486 : vector<1x64xf32> to vector<6x64xf32>
    %489 = arith.mulf %488, %487 : vector<6x64xf32>
    %490 = arith.addf %485, %489 : vector<6x64xf32>
    %491 = vector.extract_strided_slice %343 {offsets = [20, 0], sizes = [1, 64], strides = [1, 1]} : vector<36x64xf32> to vector<1x64xf32>
    %492 = vector.extract_strided_slice %480 {offsets = [0, 0], sizes = [6, 64], strides = [1, 1]} : vector<8x64xf32> to vector<6x64xf32>
    %493 = vector.broadcast %491 : vector<1x64xf32> to vector<6x64xf32>
    %494 = arith.mulf %493, %492 : vector<6x64xf32>
    %495 = arith.addf %490, %494 : vector<6x64xf32>
    %496 = vector.extract_strided_slice %343 {offsets = [21, 0], sizes = [1, 64], strides = [1, 1]} : vector<36x64xf32> to vector<1x64xf32>
    %497 = vector.extract_strided_slice %474 {offsets = [1, 0], sizes = [6, 64], strides = [1, 1]} : vector<8x64xf32> to vector<6x64xf32>
    %498 = vector.broadcast %496 : vector<1x64xf32> to vector<6x64xf32>
    %499 = arith.mulf %498, %497 : vector<6x64xf32>
    %500 = arith.addf %495, %499 : vector<6x64xf32>
    %501 = vector.extract_strided_slice %343 {offsets = [22, 0], sizes = [1, 64], strides = [1, 1]} : vector<36x64xf32> to vector<1x64xf32>
    %502 = vector.extract_strided_slice %477 {offsets = [1, 0], sizes = [6, 64], strides = [1, 1]} : vector<8x64xf32> to vector<6x64xf32>
    %503 = vector.broadcast %501 : vector<1x64xf32> to vector<6x64xf32>
    %504 = arith.mulf %503, %502 : vector<6x64xf32>
    %505 = arith.addf %500, %504 : vector<6x64xf32>
    %506 = vector.extract_strided_slice %343 {offsets = [23, 0], sizes = [1, 64], strides = [1, 1]} : vector<36x64xf32> to vector<1x64xf32>
    %507 = vector.extract_strided_slice %480 {offsets = [1, 0], sizes = [6, 64], strides = [1, 1]} : vector<8x64xf32> to vector<6x64xf32>
    %508 = vector.broadcast %506 : vector<1x64xf32> to vector<6x64xf32>
    %509 = arith.mulf %508, %507 : vector<6x64xf32>
    %510 = arith.addf %505, %509 : vector<6x64xf32>
    %511 = vector.extract_strided_slice %343 {offsets = [24, 0], sizes = [1, 64], strides = [1, 1]} : vector<36x64xf32> to vector<1x64xf32>
    %512 = vector.extract_strided_slice %474 {offsets = [2, 0], sizes = [6, 64], strides = [1, 1]} : vector<8x64xf32> to vector<6x64xf32>
    %513 = vector.broadcast %511 : vector<1x64xf32> to vector<6x64xf32>
    %514 = arith.mulf %513, %512 : vector<6x64xf32>
    %515 = arith.addf %510, %514 : vector<6x64xf32>
    %516 = vector.extract_strided_slice %343 {offsets = [25, 0], sizes = [1, 64], strides = [1, 1]} : vector<36x64xf32> to vector<1x64xf32>
    %517 = vector.extract_strided_slice %477 {offsets = [2, 0], sizes = [6, 64], strides = [1, 1]} : vector<8x64xf32> to vector<6x64xf32>
    %518 = vector.broadcast %516 : vector<1x64xf32> to vector<6x64xf32>
    %519 = arith.mulf %518, %517 : vector<6x64xf32>
    %520 = arith.addf %515, %519 : vector<6x64xf32>
    %521 = vector.extract_strided_slice %343 {offsets = [26, 0], sizes = [1, 64], strides = [1, 1]} : vector<36x64xf32> to vector<1x64xf32>
    %522 = vector.extract_strided_slice %480 {offsets = [2, 0], sizes = [6, 64], strides = [1, 1]} : vector<8x64xf32> to vector<6x64xf32>
    %523 = vector.broadcast %521 : vector<1x64xf32> to vector<6x64xf32>
    %524 = arith.mulf %523, %522 : vector<6x64xf32>
    %525 = arith.addf %520, %524 : vector<6x64xf32>
    %526 = vector.extract_strided_slice %342 {offsets = [0, 24], sizes = [8, 8], strides = [1, 1]} : vector<8x64xf32> to vector<8x8xf32>
    %cst_50 = arith.constant 0.000000e+00 : f32
    %527 = vector.broadcast %cst_50 : f32 to vector<8x2xf32>
    %528 = tpu.concatenate %526, %527 in 1 : vector<8x8xf32>, vector<8x2xf32> -> vector<8x10xf32>
    %529 = vector.extract_strided_slice %342 {offsets = [0, 56], sizes = [8, 8], strides = [1, 1]} : vector<8x64xf32> to vector<8x8xf32>
    %cst_51 = arith.constant 0.000000e+00 : f32
    %530 = vector.broadcast %cst_51 : f32 to vector<8x2xf32>
    %531 = tpu.concatenate %529, %530 in 1 : vector<8x8xf32>, vector<8x2xf32> -> vector<8x10xf32>
    %532 = vector.extract_strided_slice %528 {offsets = [0, 0], sizes = [8, 8], strides = [1, 1]} : vector<8x10xf32> to vector<8x8xf32>
    %533 = vector.extract_strided_slice %531 {offsets = [0, 0], sizes = [8, 8], strides = [1, 1]} : vector<8x10xf32> to vector<8x8xf32>
    %534 = tpu.concatenate %532, %532, %532, %532, %533, %533, %533, %533 in 1 : vector<8x8xf32>, vector<8x8xf32>, vector<8x8xf32>, vector<8x8xf32>, vector<8x8xf32>, vector<8x8xf32>, vector<8x8xf32>, vector<8x8xf32> -> vector<8x64xf32>
    %535 = vector.extract_strided_slice %528 {offsets = [0, 1], sizes = [8, 8], strides = [1, 1]} : vector<8x10xf32> to vector<8x8xf32>
    %536 = vector.extract_strided_slice %531 {offsets = [0, 1], sizes = [8, 8], strides = [1, 1]} : vector<8x10xf32> to vector<8x8xf32>
    %537 = tpu.concatenate %535, %535, %535, %535, %536, %536, %536, %536 in 1 : vector<8x8xf32>, vector<8x8xf32>, vector<8x8xf32>, vector<8x8xf32>, vector<8x8xf32>, vector<8x8xf32>, vector<8x8xf32>, vector<8x8xf32> -> vector<8x64xf32>
    %538 = vector.extract_strided_slice %528 {offsets = [0, 2], sizes = [8, 8], strides = [1, 1]} : vector<8x10xf32> to vector<8x8xf32>
    %539 = vector.extract_strided_slice %531 {offsets = [0, 2], sizes = [8, 8], strides = [1, 1]} : vector<8x10xf32> to vector<8x8xf32>
    %540 = tpu.concatenate %538, %538, %538, %538, %539, %539, %539, %539 in 1 : vector<8x8xf32>, vector<8x8xf32>, vector<8x8xf32>, vector<8x8xf32>, vector<8x8xf32>, vector<8x8xf32>, vector<8x8xf32>, vector<8x8xf32> -> vector<8x64xf32>
    %541 = vector.extract_strided_slice %343 {offsets = [27, 0], sizes = [1, 64], strides = [1, 1]} : vector<36x64xf32> to vector<1x64xf32>
    %542 = vector.extract_strided_slice %534 {offsets = [0, 0], sizes = [6, 64], strides = [1, 1]} : vector<8x64xf32> to vector<6x64xf32>
    %543 = vector.broadcast %541 : vector<1x64xf32> to vector<6x64xf32>
    %544 = arith.mulf %543, %542 : vector<6x64xf32>
    %545 = arith.addf %525, %544 : vector<6x64xf32>
    %546 = vector.extract_strided_slice %343 {offsets = [28, 0], sizes = [1, 64], strides = [1, 1]} : vector<36x64xf32> to vector<1x64xf32>
    %547 = vector.extract_strided_slice %537 {offsets = [0, 0], sizes = [6, 64], strides = [1, 1]} : vector<8x64xf32> to vector<6x64xf32>
    %548 = vector.broadcast %546 : vector<1x64xf32> to vector<6x64xf32>
    %549 = arith.mulf %548, %547 : vector<6x64xf32>
    %550 = arith.addf %545, %549 : vector<6x64xf32>
    %551 = vector.extract_strided_slice %343 {offsets = [29, 0], sizes = [1, 64], strides = [1, 1]} : vector<36x64xf32> to vector<1x64xf32>
    %552 = vector.extract_strided_slice %540 {offsets = [0, 0], sizes = [6, 64], strides = [1, 1]} : vector<8x64xf32> to vector<6x64xf32>
    %553 = vector.broadcast %551 : vector<1x64xf32> to vector<6x64xf32>
    %554 = arith.mulf %553, %552 : vector<6x64xf32>
    %555 = arith.addf %550, %554 : vector<6x64xf32>
    %556 = vector.extract_strided_slice %343 {offsets = [30, 0], sizes = [1, 64], strides = [1, 1]} : vector<36x64xf32> to vector<1x64xf32>
    %557 = vector.extract_strided_slice %534 {offsets = [1, 0], sizes = [6, 64], strides = [1, 1]} : vector<8x64xf32> to vector<6x64xf32>
    %558 = vector.broadcast %556 : vector<1x64xf32> to vector<6x64xf32>
    %559 = arith.mulf %558, %557 : vector<6x64xf32>
    %560 = arith.addf %555, %559 : vector<6x64xf32>
    %561 = vector.extract_strided_slice %343 {offsets = [31, 0], sizes = [1, 64], strides = [1, 1]} : vector<36x64xf32> to vector<1x64xf32>
    %562 = vector.extract_strided_slice %537 {offsets = [1, 0], sizes = [6, 64], strides = [1, 1]} : vector<8x64xf32> to vector<6x64xf32>
    %563 = vector.broadcast %561 : vector<1x64xf32> to vector<6x64xf32>
    %564 = arith.mulf %563, %562 : vector<6x64xf32>
    %565 = arith.addf %560, %564 : vector<6x64xf32>
    %566 = vector.extract_strided_slice %343 {offsets = [32, 0], sizes = [1, 64], strides = [1, 1]} : vector<36x64xf32> to vector<1x64xf32>
    %567 = vector.extract_strided_slice %540 {offsets = [1, 0], sizes = [6, 64], strides = [1, 1]} : vector<8x64xf32> to vector<6x64xf32>
    %568 = vector.broadcast %566 : vector<1x64xf32> to vector<6x64xf32>
    %569 = arith.mulf %568, %567 : vector<6x64xf32>
    %570 = arith.addf %565, %569 : vector<6x64xf32>
    %571 = vector.extract_strided_slice %343 {offsets = [33, 0], sizes = [1, 64], strides = [1, 1]} : vector<36x64xf32> to vector<1x64xf32>
    %572 = vector.extract_strided_slice %534 {offsets = [2, 0], sizes = [6, 64], strides = [1, 1]} : vector<8x64xf32> to vector<6x64xf32>
    %573 = vector.broadcast %571 : vector<1x64xf32> to vector<6x64xf32>
    %574 = arith.mulf %573, %572 : vector<6x64xf32>
    %575 = arith.addf %570, %574 : vector<6x64xf32>
    %576 = vector.extract_strided_slice %343 {offsets = [34, 0], sizes = [1, 64], strides = [1, 1]} : vector<36x64xf32> to vector<1x64xf32>
    %577 = vector.extract_strided_slice %537 {offsets = [2, 0], sizes = [6, 64], strides = [1, 1]} : vector<8x64xf32> to vector<6x64xf32>
    %578 = vector.broadcast %576 : vector<1x64xf32> to vector<6x64xf32>
    %579 = arith.mulf %578, %577 : vector<6x64xf32>
    %580 = arith.addf %575, %579 : vector<6x64xf32>
    %581 = vector.extract_strided_slice %343 {offsets = [35, 0], sizes = [1, 64], strides = [1, 1]} : vector<36x64xf32> to vector<1x64xf32>
    %582 = vector.extract_strided_slice %540 {offsets = [2, 0], sizes = [6, 64], strides = [1, 1]} : vector<8x64xf32> to vector<6x64xf32>
    %583 = vector.broadcast %581 : vector<1x64xf32> to vector<6x64xf32>
    %584 = arith.mulf %583, %582 : vector<6x64xf32>
    %585 = arith.addf %580, %584 : vector<6x64xf32>
    %586 = vector.broadcast %344 : vector<1x64xf32> to vector<6x64xf32>
    %587 = arith.addf %585, %586 : vector<6x64xf32>
    %cst_52 = arith.constant 0.000000e+00 : f32
    %588 = vector.broadcast %cst_52 : f32 to vector<6x64xf32>
    %589 = arith.maximumf %587, %588 : vector<6x64xf32>
    %c0_53 = arith.constant 0 : index
    %c0_54 = arith.constant 0 : index
    %590 = vector.load %arg6[%c0_53, %c0_54] : memref<36x64xf32, #tpu.memory_space<vmem>>, vector<36x64xf32>
    %c0_55 = arith.constant 0 : index
    %c0_56 = arith.constant 0 : index
    %591 = vector.load %arg7[%c0_55, %c0_56] : memref<1x64xf32, #tpu.memory_space<vmem>>, vector<1x64xf32>
    %cst_57 = arith.constant 0.000000e+00 : f32
    %592 = vector.broadcast %cst_57 : f32 to vector<4x64xf32>
    %593 = vector.extract_strided_slice %589 {offsets = [0, 0], sizes = [6, 8], strides = [1, 1]} : vector<6x64xf32> to vector<6x8xf32>
    %cst_58 = arith.constant 0.000000e+00 : f32
    %594 = vector.broadcast %cst_58 : f32 to vector<6x2xf32>
    %595 = tpu.concatenate %593, %594 in 1 : vector<6x8xf32>, vector<6x2xf32> -> vector<6x10xf32>
    %596 = vector.extract_strided_slice %589 {offsets = [0, 32], sizes = [6, 8], strides = [1, 1]} : vector<6x64xf32> to vector<6x8xf32>
    %cst_59 = arith.constant 0.000000e+00 : f32
    %597 = vector.broadcast %cst_59 : f32 to vector<6x2xf32>
    %598 = tpu.concatenate %596, %597 in 1 : vector<6x8xf32>, vector<6x2xf32> -> vector<6x10xf32>
    %599 = vector.extract_strided_slice %595 {offsets = [0, 0], sizes = [6, 8], strides = [1, 1]} : vector<6x10xf32> to vector<6x8xf32>
    %600 = vector.extract_strided_slice %598 {offsets = [0, 0], sizes = [6, 8], strides = [1, 1]} : vector<6x10xf32> to vector<6x8xf32>
    %601 = tpu.concatenate %599, %599, %599, %599, %600, %600, %600, %600 in 1 : vector<6x8xf32>, vector<6x8xf32>, vector<6x8xf32>, vector<6x8xf32>, vector<6x8xf32>, vector<6x8xf32>, vector<6x8xf32>, vector<6x8xf32> -> vector<6x64xf32>
    %602 = vector.extract_strided_slice %595 {offsets = [0, 1], sizes = [6, 8], strides = [1, 1]} : vector<6x10xf32> to vector<6x8xf32>
    %603 = vector.extract_strided_slice %598 {offsets = [0, 1], sizes = [6, 8], strides = [1, 1]} : vector<6x10xf32> to vector<6x8xf32>
    %604 = tpu.concatenate %602, %602, %602, %602, %603, %603, %603, %603 in 1 : vector<6x8xf32>, vector<6x8xf32>, vector<6x8xf32>, vector<6x8xf32>, vector<6x8xf32>, vector<6x8xf32>, vector<6x8xf32>, vector<6x8xf32> -> vector<6x64xf32>
    %605 = vector.extract_strided_slice %595 {offsets = [0, 2], sizes = [6, 8], strides = [1, 1]} : vector<6x10xf32> to vector<6x8xf32>
    %606 = vector.extract_strided_slice %598 {offsets = [0, 2], sizes = [6, 8], strides = [1, 1]} : vector<6x10xf32> to vector<6x8xf32>
    %607 = tpu.concatenate %605, %605, %605, %605, %606, %606, %606, %606 in 1 : vector<6x8xf32>, vector<6x8xf32>, vector<6x8xf32>, vector<6x8xf32>, vector<6x8xf32>, vector<6x8xf32>, vector<6x8xf32>, vector<6x8xf32> -> vector<6x64xf32>
    %608 = vector.extract_strided_slice %590 {offsets = [0, 0], sizes = [1, 64], strides = [1, 1]} : vector<36x64xf32> to vector<1x64xf32>
    %609 = vector.extract_strided_slice %601 {offsets = [0, 0], sizes = [4, 64], strides = [1, 1]} : vector<6x64xf32> to vector<4x64xf32>
    %610 = vector.broadcast %608 : vector<1x64xf32> to vector<4x64xf32>
    %611 = arith.mulf %610, %609 : vector<4x64xf32>
    %612 = arith.addf %592, %611 : vector<4x64xf32>
    %613 = vector.extract_strided_slice %590 {offsets = [1, 0], sizes = [1, 64], strides = [1, 1]} : vector<36x64xf32> to vector<1x64xf32>
    %614 = vector.extract_strided_slice %604 {offsets = [0, 0], sizes = [4, 64], strides = [1, 1]} : vector<6x64xf32> to vector<4x64xf32>
    %615 = vector.broadcast %613 : vector<1x64xf32> to vector<4x64xf32>
    %616 = arith.mulf %615, %614 : vector<4x64xf32>
    %617 = arith.addf %612, %616 : vector<4x64xf32>
    %618 = vector.extract_strided_slice %590 {offsets = [2, 0], sizes = [1, 64], strides = [1, 1]} : vector<36x64xf32> to vector<1x64xf32>
    %619 = vector.extract_strided_slice %607 {offsets = [0, 0], sizes = [4, 64], strides = [1, 1]} : vector<6x64xf32> to vector<4x64xf32>
    %620 = vector.broadcast %618 : vector<1x64xf32> to vector<4x64xf32>
    %621 = arith.mulf %620, %619 : vector<4x64xf32>
    %622 = arith.addf %617, %621 : vector<4x64xf32>
    %623 = vector.extract_strided_slice %590 {offsets = [3, 0], sizes = [1, 64], strides = [1, 1]} : vector<36x64xf32> to vector<1x64xf32>
    %624 = vector.extract_strided_slice %601 {offsets = [1, 0], sizes = [4, 64], strides = [1, 1]} : vector<6x64xf32> to vector<4x64xf32>
    %625 = vector.broadcast %623 : vector<1x64xf32> to vector<4x64xf32>
    %626 = arith.mulf %625, %624 : vector<4x64xf32>
    %627 = arith.addf %622, %626 : vector<4x64xf32>
    %628 = vector.extract_strided_slice %590 {offsets = [4, 0], sizes = [1, 64], strides = [1, 1]} : vector<36x64xf32> to vector<1x64xf32>
    %629 = vector.extract_strided_slice %604 {offsets = [1, 0], sizes = [4, 64], strides = [1, 1]} : vector<6x64xf32> to vector<4x64xf32>
    %630 = vector.broadcast %628 : vector<1x64xf32> to vector<4x64xf32>
    %631 = arith.mulf %630, %629 : vector<4x64xf32>
    %632 = arith.addf %627, %631 : vector<4x64xf32>
    %633 = vector.extract_strided_slice %590 {offsets = [5, 0], sizes = [1, 64], strides = [1, 1]} : vector<36x64xf32> to vector<1x64xf32>
    %634 = vector.extract_strided_slice %607 {offsets = [1, 0], sizes = [4, 64], strides = [1, 1]} : vector<6x64xf32> to vector<4x64xf32>
    %635 = vector.broadcast %633 : vector<1x64xf32> to vector<4x64xf32>
    %636 = arith.mulf %635, %634 : vector<4x64xf32>
    %637 = arith.addf %632, %636 : vector<4x64xf32>
    %638 = vector.extract_strided_slice %590 {offsets = [6, 0], sizes = [1, 64], strides = [1, 1]} : vector<36x64xf32> to vector<1x64xf32>
    %639 = vector.extract_strided_slice %601 {offsets = [2, 0], sizes = [4, 64], strides = [1, 1]} : vector<6x64xf32> to vector<4x64xf32>
    %640 = vector.broadcast %638 : vector<1x64xf32> to vector<4x64xf32>
    %641 = arith.mulf %640, %639 : vector<4x64xf32>
    %642 = arith.addf %637, %641 : vector<4x64xf32>
    %643 = vector.extract_strided_slice %590 {offsets = [7, 0], sizes = [1, 64], strides = [1, 1]} : vector<36x64xf32> to vector<1x64xf32>
    %644 = vector.extract_strided_slice %604 {offsets = [2, 0], sizes = [4, 64], strides = [1, 1]} : vector<6x64xf32> to vector<4x64xf32>
    %645 = vector.broadcast %643 : vector<1x64xf32> to vector<4x64xf32>
    %646 = arith.mulf %645, %644 : vector<4x64xf32>
    %647 = arith.addf %642, %646 : vector<4x64xf32>
    %648 = vector.extract_strided_slice %590 {offsets = [8, 0], sizes = [1, 64], strides = [1, 1]} : vector<36x64xf32> to vector<1x64xf32>
    %649 = vector.extract_strided_slice %607 {offsets = [2, 0], sizes = [4, 64], strides = [1, 1]} : vector<6x64xf32> to vector<4x64xf32>
    %650 = vector.broadcast %648 : vector<1x64xf32> to vector<4x64xf32>
    %651 = arith.mulf %650, %649 : vector<4x64xf32>
    %652 = arith.addf %647, %651 : vector<4x64xf32>
    %653 = vector.extract_strided_slice %589 {offsets = [0, 8], sizes = [6, 8], strides = [1, 1]} : vector<6x64xf32> to vector<6x8xf32>
    %cst_60 = arith.constant 0.000000e+00 : f32
    %654 = vector.broadcast %cst_60 : f32 to vector<6x2xf32>
    %655 = tpu.concatenate %653, %654 in 1 : vector<6x8xf32>, vector<6x2xf32> -> vector<6x10xf32>
    %656 = vector.extract_strided_slice %589 {offsets = [0, 40], sizes = [6, 8], strides = [1, 1]} : vector<6x64xf32> to vector<6x8xf32>
    %cst_61 = arith.constant 0.000000e+00 : f32
    %657 = vector.broadcast %cst_61 : f32 to vector<6x2xf32>
    %658 = tpu.concatenate %656, %657 in 1 : vector<6x8xf32>, vector<6x2xf32> -> vector<6x10xf32>
    %659 = vector.extract_strided_slice %655 {offsets = [0, 0], sizes = [6, 8], strides = [1, 1]} : vector<6x10xf32> to vector<6x8xf32>
    %660 = vector.extract_strided_slice %658 {offsets = [0, 0], sizes = [6, 8], strides = [1, 1]} : vector<6x10xf32> to vector<6x8xf32>
    %661 = tpu.concatenate %659, %659, %659, %659, %660, %660, %660, %660 in 1 : vector<6x8xf32>, vector<6x8xf32>, vector<6x8xf32>, vector<6x8xf32>, vector<6x8xf32>, vector<6x8xf32>, vector<6x8xf32>, vector<6x8xf32> -> vector<6x64xf32>
    %662 = vector.extract_strided_slice %655 {offsets = [0, 1], sizes = [6, 8], strides = [1, 1]} : vector<6x10xf32> to vector<6x8xf32>
    %663 = vector.extract_strided_slice %658 {offsets = [0, 1], sizes = [6, 8], strides = [1, 1]} : vector<6x10xf32> to vector<6x8xf32>
    %664 = tpu.concatenate %662, %662, %662, %662, %663, %663, %663, %663 in 1 : vector<6x8xf32>, vector<6x8xf32>, vector<6x8xf32>, vector<6x8xf32>, vector<6x8xf32>, vector<6x8xf32>, vector<6x8xf32>, vector<6x8xf32> -> vector<6x64xf32>
    %665 = vector.extract_strided_slice %655 {offsets = [0, 2], sizes = [6, 8], strides = [1, 1]} : vector<6x10xf32> to vector<6x8xf32>
    %666 = vector.extract_strided_slice %658 {offsets = [0, 2], sizes = [6, 8], strides = [1, 1]} : vector<6x10xf32> to vector<6x8xf32>
    %667 = tpu.concatenate %665, %665, %665, %665, %666, %666, %666, %666 in 1 : vector<6x8xf32>, vector<6x8xf32>, vector<6x8xf32>, vector<6x8xf32>, vector<6x8xf32>, vector<6x8xf32>, vector<6x8xf32>, vector<6x8xf32> -> vector<6x64xf32>
    %668 = vector.extract_strided_slice %590 {offsets = [9, 0], sizes = [1, 64], strides = [1, 1]} : vector<36x64xf32> to vector<1x64xf32>
    %669 = vector.extract_strided_slice %661 {offsets = [0, 0], sizes = [4, 64], strides = [1, 1]} : vector<6x64xf32> to vector<4x64xf32>
    %670 = vector.broadcast %668 : vector<1x64xf32> to vector<4x64xf32>
    %671 = arith.mulf %670, %669 : vector<4x64xf32>
    %672 = arith.addf %652, %671 : vector<4x64xf32>
    %673 = vector.extract_strided_slice %590 {offsets = [10, 0], sizes = [1, 64], strides = [1, 1]} : vector<36x64xf32> to vector<1x64xf32>
    %674 = vector.extract_strided_slice %664 {offsets = [0, 0], sizes = [4, 64], strides = [1, 1]} : vector<6x64xf32> to vector<4x64xf32>
    %675 = vector.broadcast %673 : vector<1x64xf32> to vector<4x64xf32>
    %676 = arith.mulf %675, %674 : vector<4x64xf32>
    %677 = arith.addf %672, %676 : vector<4x64xf32>
    %678 = vector.extract_strided_slice %590 {offsets = [11, 0], sizes = [1, 64], strides = [1, 1]} : vector<36x64xf32> to vector<1x64xf32>
    %679 = vector.extract_strided_slice %667 {offsets = [0, 0], sizes = [4, 64], strides = [1, 1]} : vector<6x64xf32> to vector<4x64xf32>
    %680 = vector.broadcast %678 : vector<1x64xf32> to vector<4x64xf32>
    %681 = arith.mulf %680, %679 : vector<4x64xf32>
    %682 = arith.addf %677, %681 : vector<4x64xf32>
    %683 = vector.extract_strided_slice %590 {offsets = [12, 0], sizes = [1, 64], strides = [1, 1]} : vector<36x64xf32> to vector<1x64xf32>
    %684 = vector.extract_strided_slice %661 {offsets = [1, 0], sizes = [4, 64], strides = [1, 1]} : vector<6x64xf32> to vector<4x64xf32>
    %685 = vector.broadcast %683 : vector<1x64xf32> to vector<4x64xf32>
    %686 = arith.mulf %685, %684 : vector<4x64xf32>
    %687 = arith.addf %682, %686 : vector<4x64xf32>
    %688 = vector.extract_strided_slice %590 {offsets = [13, 0], sizes = [1, 64], strides = [1, 1]} : vector<36x64xf32> to vector<1x64xf32>
    %689 = vector.extract_strided_slice %664 {offsets = [1, 0], sizes = [4, 64], strides = [1, 1]} : vector<6x64xf32> to vector<4x64xf32>
    %690 = vector.broadcast %688 : vector<1x64xf32> to vector<4x64xf32>
    %691 = arith.mulf %690, %689 : vector<4x64xf32>
    %692 = arith.addf %687, %691 : vector<4x64xf32>
    %693 = vector.extract_strided_slice %590 {offsets = [14, 0], sizes = [1, 64], strides = [1, 1]} : vector<36x64xf32> to vector<1x64xf32>
    %694 = vector.extract_strided_slice %667 {offsets = [1, 0], sizes = [4, 64], strides = [1, 1]} : vector<6x64xf32> to vector<4x64xf32>
    %695 = vector.broadcast %693 : vector<1x64xf32> to vector<4x64xf32>
    %696 = arith.mulf %695, %694 : vector<4x64xf32>
    %697 = arith.addf %692, %696 : vector<4x64xf32>
    %698 = vector.extract_strided_slice %590 {offsets = [15, 0], sizes = [1, 64], strides = [1, 1]} : vector<36x64xf32> to vector<1x64xf32>
    %699 = vector.extract_strided_slice %661 {offsets = [2, 0], sizes = [4, 64], strides = [1, 1]} : vector<6x64xf32> to vector<4x64xf32>
    %700 = vector.broadcast %698 : vector<1x64xf32> to vector<4x64xf32>
    %701 = arith.mulf %700, %699 : vector<4x64xf32>
    %702 = arith.addf %697, %701 : vector<4x64xf32>
    %703 = vector.extract_strided_slice %590 {offsets = [16, 0], sizes = [1, 64], strides = [1, 1]} : vector<36x64xf32> to vector<1x64xf32>
    %704 = vector.extract_strided_slice %664 {offsets = [2, 0], sizes = [4, 64], strides = [1, 1]} : vector<6x64xf32> to vector<4x64xf32>
    %705 = vector.broadcast %703 : vector<1x64xf32> to vector<4x64xf32>
    %706 = arith.mulf %705, %704 : vector<4x64xf32>
    %707 = arith.addf %702, %706 : vector<4x64xf32>
    %708 = vector.extract_strided_slice %590 {offsets = [17, 0], sizes = [1, 64], strides = [1, 1]} : vector<36x64xf32> to vector<1x64xf32>
    %709 = vector.extract_strided_slice %667 {offsets = [2, 0], sizes = [4, 64], strides = [1, 1]} : vector<6x64xf32> to vector<4x64xf32>
    %710 = vector.broadcast %708 : vector<1x64xf32> to vector<4x64xf32>
    %711 = arith.mulf %710, %709 : vector<4x64xf32>
    %712 = arith.addf %707, %711 : vector<4x64xf32>
    %713 = vector.extract_strided_slice %589 {offsets = [0, 16], sizes = [6, 8], strides = [1, 1]} : vector<6x64xf32> to vector<6x8xf32>
    %cst_62 = arith.constant 0.000000e+00 : f32
    %714 = vector.broadcast %cst_62 : f32 to vector<6x2xf32>
    %715 = tpu.concatenate %713, %714 in 1 : vector<6x8xf32>, vector<6x2xf32> -> vector<6x10xf32>
    %716 = vector.extract_strided_slice %589 {offsets = [0, 48], sizes = [6, 8], strides = [1, 1]} : vector<6x64xf32> to vector<6x8xf32>
    %cst_63 = arith.constant 0.000000e+00 : f32
    %717 = vector.broadcast %cst_63 : f32 to vector<6x2xf32>
    %718 = tpu.concatenate %716, %717 in 1 : vector<6x8xf32>, vector<6x2xf32> -> vector<6x10xf32>
    %719 = vector.extract_strided_slice %715 {offsets = [0, 0], sizes = [6, 8], strides = [1, 1]} : vector<6x10xf32> to vector<6x8xf32>
    %720 = vector.extract_strided_slice %718 {offsets = [0, 0], sizes = [6, 8], strides = [1, 1]} : vector<6x10xf32> to vector<6x8xf32>
    %721 = tpu.concatenate %719, %719, %719, %719, %720, %720, %720, %720 in 1 : vector<6x8xf32>, vector<6x8xf32>, vector<6x8xf32>, vector<6x8xf32>, vector<6x8xf32>, vector<6x8xf32>, vector<6x8xf32>, vector<6x8xf32> -> vector<6x64xf32>
    %722 = vector.extract_strided_slice %715 {offsets = [0, 1], sizes = [6, 8], strides = [1, 1]} : vector<6x10xf32> to vector<6x8xf32>
    %723 = vector.extract_strided_slice %718 {offsets = [0, 1], sizes = [6, 8], strides = [1, 1]} : vector<6x10xf32> to vector<6x8xf32>
    %724 = tpu.concatenate %722, %722, %722, %722, %723, %723, %723, %723 in 1 : vector<6x8xf32>, vector<6x8xf32>, vector<6x8xf32>, vector<6x8xf32>, vector<6x8xf32>, vector<6x8xf32>, vector<6x8xf32>, vector<6x8xf32> -> vector<6x64xf32>
    %725 = vector.extract_strided_slice %715 {offsets = [0, 2], sizes = [6, 8], strides = [1, 1]} : vector<6x10xf32> to vector<6x8xf32>
    %726 = vector.extract_strided_slice %718 {offsets = [0, 2], sizes = [6, 8], strides = [1, 1]} : vector<6x10xf32> to vector<6x8xf32>
    %727 = tpu.concatenate %725, %725, %725, %725, %726, %726, %726, %726 in 1 : vector<6x8xf32>, vector<6x8xf32>, vector<6x8xf32>, vector<6x8xf32>, vector<6x8xf32>, vector<6x8xf32>, vector<6x8xf32>, vector<6x8xf32> -> vector<6x64xf32>
    %728 = vector.extract_strided_slice %590 {offsets = [18, 0], sizes = [1, 64], strides = [1, 1]} : vector<36x64xf32> to vector<1x64xf32>
    %729 = vector.extract_strided_slice %721 {offsets = [0, 0], sizes = [4, 64], strides = [1, 1]} : vector<6x64xf32> to vector<4x64xf32>
    %730 = vector.broadcast %728 : vector<1x64xf32> to vector<4x64xf32>
    %731 = arith.mulf %730, %729 : vector<4x64xf32>
    %732 = arith.addf %712, %731 : vector<4x64xf32>
    %733 = vector.extract_strided_slice %590 {offsets = [19, 0], sizes = [1, 64], strides = [1, 1]} : vector<36x64xf32> to vector<1x64xf32>
    %734 = vector.extract_strided_slice %724 {offsets = [0, 0], sizes = [4, 64], strides = [1, 1]} : vector<6x64xf32> to vector<4x64xf32>
    %735 = vector.broadcast %733 : vector<1x64xf32> to vector<4x64xf32>
    %736 = arith.mulf %735, %734 : vector<4x64xf32>
    %737 = arith.addf %732, %736 : vector<4x64xf32>
    %738 = vector.extract_strided_slice %590 {offsets = [20, 0], sizes = [1, 64], strides = [1, 1]} : vector<36x64xf32> to vector<1x64xf32>
    %739 = vector.extract_strided_slice %727 {offsets = [0, 0], sizes = [4, 64], strides = [1, 1]} : vector<6x64xf32> to vector<4x64xf32>
    %740 = vector.broadcast %738 : vector<1x64xf32> to vector<4x64xf32>
    %741 = arith.mulf %740, %739 : vector<4x64xf32>
    %742 = arith.addf %737, %741 : vector<4x64xf32>
    %743 = vector.extract_strided_slice %590 {offsets = [21, 0], sizes = [1, 64], strides = [1, 1]} : vector<36x64xf32> to vector<1x64xf32>
    %744 = vector.extract_strided_slice %721 {offsets = [1, 0], sizes = [4, 64], strides = [1, 1]} : vector<6x64xf32> to vector<4x64xf32>
    %745 = vector.broadcast %743 : vector<1x64xf32> to vector<4x64xf32>
    %746 = arith.mulf %745, %744 : vector<4x64xf32>
    %747 = arith.addf %742, %746 : vector<4x64xf32>
    %748 = vector.extract_strided_slice %590 {offsets = [22, 0], sizes = [1, 64], strides = [1, 1]} : vector<36x64xf32> to vector<1x64xf32>
    %749 = vector.extract_strided_slice %724 {offsets = [1, 0], sizes = [4, 64], strides = [1, 1]} : vector<6x64xf32> to vector<4x64xf32>
    %750 = vector.broadcast %748 : vector<1x64xf32> to vector<4x64xf32>
    %751 = arith.mulf %750, %749 : vector<4x64xf32>
    %752 = arith.addf %747, %751 : vector<4x64xf32>
    %753 = vector.extract_strided_slice %590 {offsets = [23, 0], sizes = [1, 64], strides = [1, 1]} : vector<36x64xf32> to vector<1x64xf32>
    %754 = vector.extract_strided_slice %727 {offsets = [1, 0], sizes = [4, 64], strides = [1, 1]} : vector<6x64xf32> to vector<4x64xf32>
    %755 = vector.broadcast %753 : vector<1x64xf32> to vector<4x64xf32>
    %756 = arith.mulf %755, %754 : vector<4x64xf32>
    %757 = arith.addf %752, %756 : vector<4x64xf32>
    %758 = vector.extract_strided_slice %590 {offsets = [24, 0], sizes = [1, 64], strides = [1, 1]} : vector<36x64xf32> to vector<1x64xf32>
    %759 = vector.extract_strided_slice %721 {offsets = [2, 0], sizes = [4, 64], strides = [1, 1]} : vector<6x64xf32> to vector<4x64xf32>
    %760 = vector.broadcast %758 : vector<1x64xf32> to vector<4x64xf32>
    %761 = arith.mulf %760, %759 : vector<4x64xf32>
    %762 = arith.addf %757, %761 : vector<4x64xf32>
    %763 = vector.extract_strided_slice %590 {offsets = [25, 0], sizes = [1, 64], strides = [1, 1]} : vector<36x64xf32> to vector<1x64xf32>
    %764 = vector.extract_strided_slice %724 {offsets = [2, 0], sizes = [4, 64], strides = [1, 1]} : vector<6x64xf32> to vector<4x64xf32>
    %765 = vector.broadcast %763 : vector<1x64xf32> to vector<4x64xf32>
    %766 = arith.mulf %765, %764 : vector<4x64xf32>
    %767 = arith.addf %762, %766 : vector<4x64xf32>
    %768 = vector.extract_strided_slice %590 {offsets = [26, 0], sizes = [1, 64], strides = [1, 1]} : vector<36x64xf32> to vector<1x64xf32>
    %769 = vector.extract_strided_slice %727 {offsets = [2, 0], sizes = [4, 64], strides = [1, 1]} : vector<6x64xf32> to vector<4x64xf32>
    %770 = vector.broadcast %768 : vector<1x64xf32> to vector<4x64xf32>
    %771 = arith.mulf %770, %769 : vector<4x64xf32>
    %772 = arith.addf %767, %771 : vector<4x64xf32>
    %773 = vector.extract_strided_slice %589 {offsets = [0, 24], sizes = [6, 8], strides = [1, 1]} : vector<6x64xf32> to vector<6x8xf32>
    %cst_64 = arith.constant 0.000000e+00 : f32
    %774 = vector.broadcast %cst_64 : f32 to vector<6x2xf32>
    %775 = tpu.concatenate %773, %774 in 1 : vector<6x8xf32>, vector<6x2xf32> -> vector<6x10xf32>
    %776 = vector.extract_strided_slice %589 {offsets = [0, 56], sizes = [6, 8], strides = [1, 1]} : vector<6x64xf32> to vector<6x8xf32>
    %cst_65 = arith.constant 0.000000e+00 : f32
    %777 = vector.broadcast %cst_65 : f32 to vector<6x2xf32>
    %778 = tpu.concatenate %776, %777 in 1 : vector<6x8xf32>, vector<6x2xf32> -> vector<6x10xf32>
    %779 = vector.extract_strided_slice %775 {offsets = [0, 0], sizes = [6, 8], strides = [1, 1]} : vector<6x10xf32> to vector<6x8xf32>
    %780 = vector.extract_strided_slice %778 {offsets = [0, 0], sizes = [6, 8], strides = [1, 1]} : vector<6x10xf32> to vector<6x8xf32>
    %781 = tpu.concatenate %779, %779, %779, %779, %780, %780, %780, %780 in 1 : vector<6x8xf32>, vector<6x8xf32>, vector<6x8xf32>, vector<6x8xf32>, vector<6x8xf32>, vector<6x8xf32>, vector<6x8xf32>, vector<6x8xf32> -> vector<6x64xf32>
    %782 = vector.extract_strided_slice %775 {offsets = [0, 1], sizes = [6, 8], strides = [1, 1]} : vector<6x10xf32> to vector<6x8xf32>
    %783 = vector.extract_strided_slice %778 {offsets = [0, 1], sizes = [6, 8], strides = [1, 1]} : vector<6x10xf32> to vector<6x8xf32>
    %784 = tpu.concatenate %782, %782, %782, %782, %783, %783, %783, %783 in 1 : vector<6x8xf32>, vector<6x8xf32>, vector<6x8xf32>, vector<6x8xf32>, vector<6x8xf32>, vector<6x8xf32>, vector<6x8xf32>, vector<6x8xf32> -> vector<6x64xf32>
    %785 = vector.extract_strided_slice %775 {offsets = [0, 2], sizes = [6, 8], strides = [1, 1]} : vector<6x10xf32> to vector<6x8xf32>
    %786 = vector.extract_strided_slice %778 {offsets = [0, 2], sizes = [6, 8], strides = [1, 1]} : vector<6x10xf32> to vector<6x8xf32>
    %787 = tpu.concatenate %785, %785, %785, %785, %786, %786, %786, %786 in 1 : vector<6x8xf32>, vector<6x8xf32>, vector<6x8xf32>, vector<6x8xf32>, vector<6x8xf32>, vector<6x8xf32>, vector<6x8xf32>, vector<6x8xf32> -> vector<6x64xf32>
    %788 = vector.extract_strided_slice %590 {offsets = [27, 0], sizes = [1, 64], strides = [1, 1]} : vector<36x64xf32> to vector<1x64xf32>
    %789 = vector.extract_strided_slice %781 {offsets = [0, 0], sizes = [4, 64], strides = [1, 1]} : vector<6x64xf32> to vector<4x64xf32>
    %790 = vector.broadcast %788 : vector<1x64xf32> to vector<4x64xf32>
    %791 = arith.mulf %790, %789 : vector<4x64xf32>
    %792 = arith.addf %772, %791 : vector<4x64xf32>
    %793 = vector.extract_strided_slice %590 {offsets = [28, 0], sizes = [1, 64], strides = [1, 1]} : vector<36x64xf32> to vector<1x64xf32>
    %794 = vector.extract_strided_slice %784 {offsets = [0, 0], sizes = [4, 64], strides = [1, 1]} : vector<6x64xf32> to vector<4x64xf32>
    %795 = vector.broadcast %793 : vector<1x64xf32> to vector<4x64xf32>
    %796 = arith.mulf %795, %794 : vector<4x64xf32>
    %797 = arith.addf %792, %796 : vector<4x64xf32>
    %798 = vector.extract_strided_slice %590 {offsets = [29, 0], sizes = [1, 64], strides = [1, 1]} : vector<36x64xf32> to vector<1x64xf32>
    %799 = vector.extract_strided_slice %787 {offsets = [0, 0], sizes = [4, 64], strides = [1, 1]} : vector<6x64xf32> to vector<4x64xf32>
    %800 = vector.broadcast %798 : vector<1x64xf32> to vector<4x64xf32>
    %801 = arith.mulf %800, %799 : vector<4x64xf32>
    %802 = arith.addf %797, %801 : vector<4x64xf32>
    %803 = vector.extract_strided_slice %590 {offsets = [30, 0], sizes = [1, 64], strides = [1, 1]} : vector<36x64xf32> to vector<1x64xf32>
    %804 = vector.extract_strided_slice %781 {offsets = [1, 0], sizes = [4, 64], strides = [1, 1]} : vector<6x64xf32> to vector<4x64xf32>
    %805 = vector.broadcast %803 : vector<1x64xf32> to vector<4x64xf32>
    %806 = arith.mulf %805, %804 : vector<4x64xf32>
    %807 = arith.addf %802, %806 : vector<4x64xf32>
    %808 = vector.extract_strided_slice %590 {offsets = [31, 0], sizes = [1, 64], strides = [1, 1]} : vector<36x64xf32> to vector<1x64xf32>
    %809 = vector.extract_strided_slice %784 {offsets = [1, 0], sizes = [4, 64], strides = [1, 1]} : vector<6x64xf32> to vector<4x64xf32>
    %810 = vector.broadcast %808 : vector<1x64xf32> to vector<4x64xf32>
    %811 = arith.mulf %810, %809 : vector<4x64xf32>
    %812 = arith.addf %807, %811 : vector<4x64xf32>
    %813 = vector.extract_strided_slice %590 {offsets = [32, 0], sizes = [1, 64], strides = [1, 1]} : vector<36x64xf32> to vector<1x64xf32>
    %814 = vector.extract_strided_slice %787 {offsets = [1, 0], sizes = [4, 64], strides = [1, 1]} : vector<6x64xf32> to vector<4x64xf32>
    %815 = vector.broadcast %813 : vector<1x64xf32> to vector<4x64xf32>
    %816 = arith.mulf %815, %814 : vector<4x64xf32>
    %817 = arith.addf %812, %816 : vector<4x64xf32>
    %818 = vector.extract_strided_slice %590 {offsets = [33, 0], sizes = [1, 64], strides = [1, 1]} : vector<36x64xf32> to vector<1x64xf32>
    %819 = vector.extract_strided_slice %781 {offsets = [2, 0], sizes = [4, 64], strides = [1, 1]} : vector<6x64xf32> to vector<4x64xf32>
    %820 = vector.broadcast %818 : vector<1x64xf32> to vector<4x64xf32>
    %821 = arith.mulf %820, %819 : vector<4x64xf32>
    %822 = arith.addf %817, %821 : vector<4x64xf32>
    %823 = vector.extract_strided_slice %590 {offsets = [34, 0], sizes = [1, 64], strides = [1, 1]} : vector<36x64xf32> to vector<1x64xf32>
    %824 = vector.extract_strided_slice %784 {offsets = [2, 0], sizes = [4, 64], strides = [1, 1]} : vector<6x64xf32> to vector<4x64xf32>
    %825 = vector.broadcast %823 : vector<1x64xf32> to vector<4x64xf32>
    %826 = arith.mulf %825, %824 : vector<4x64xf32>
    %827 = arith.addf %822, %826 : vector<4x64xf32>
    %828 = vector.extract_strided_slice %590 {offsets = [35, 0], sizes = [1, 64], strides = [1, 1]} : vector<36x64xf32> to vector<1x64xf32>
    %829 = vector.extract_strided_slice %787 {offsets = [2, 0], sizes = [4, 64], strides = [1, 1]} : vector<6x64xf32> to vector<4x64xf32>
    %830 = vector.broadcast %828 : vector<1x64xf32> to vector<4x64xf32>
    %831 = arith.mulf %830, %829 : vector<4x64xf32>
    %832 = arith.addf %827, %831 : vector<4x64xf32>
    %833 = vector.broadcast %591 : vector<1x64xf32> to vector<4x64xf32>
    %834 = arith.addf %832, %833 : vector<4x64xf32>
    %835 = vector.extract_strided_slice %834 {offsets = [0, 0], sizes = [1, 64], strides = [1, 1]} : vector<4x64xf32> to vector<1x64xf32>
    %836 = vector.extract_strided_slice %834 {offsets = [1, 0], sizes = [1, 64], strides = [1, 1]} : vector<4x64xf32> to vector<1x64xf32>
    %837 = arith.maximumf %835, %836 : vector<1x64xf32>
    %838 = vector.extract_strided_slice %834 {offsets = [2, 0], sizes = [1, 64], strides = [1, 1]} : vector<4x64xf32> to vector<1x64xf32>
    %839 = vector.extract_strided_slice %834 {offsets = [3, 0], sizes = [1, 64], strides = [1, 1]} : vector<4x64xf32> to vector<1x64xf32>
    %840 = arith.maximumf %838, %839 : vector<1x64xf32>
    %841 = vector.extract_strided_slice %837 {offsets = [0, 0], sizes = [1, 4], strides = [1, 1]} : vector<1x64xf32> to vector<1x4xf32>
    %842 = vector.extract_strided_slice %840 {offsets = [0, 0], sizes = [1, 4], strides = [1, 1]} : vector<1x64xf32> to vector<1x4xf32>
    %843 = vector.extract_strided_slice %841 {offsets = [0, 0], sizes = [1, 1], strides = [1, 1]} : vector<1x4xf32> to vector<1x1xf32>
    %844 = vector.extract_strided_slice %841 {offsets = [0, 1], sizes = [1, 1], strides = [1, 1]} : vector<1x4xf32> to vector<1x1xf32>
    %845 = arith.maximumf %843, %844 : vector<1x1xf32>
    %846 = vector.extract_strided_slice %841 {offsets = [0, 2], sizes = [1, 1], strides = [1, 1]} : vector<1x4xf32> to vector<1x1xf32>
    %847 = vector.extract_strided_slice %841 {offsets = [0, 3], sizes = [1, 1], strides = [1, 1]} : vector<1x4xf32> to vector<1x1xf32>
    %848 = arith.maximumf %846, %847 : vector<1x1xf32>
    %849 = vector.extract_strided_slice %842 {offsets = [0, 0], sizes = [1, 1], strides = [1, 1]} : vector<1x4xf32> to vector<1x1xf32>
    %850 = vector.extract_strided_slice %842 {offsets = [0, 1], sizes = [1, 1], strides = [1, 1]} : vector<1x4xf32> to vector<1x1xf32>
    %851 = arith.maximumf %849, %850 : vector<1x1xf32>
    %852 = vector.extract_strided_slice %842 {offsets = [0, 2], sizes = [1, 1], strides = [1, 1]} : vector<1x4xf32> to vector<1x1xf32>
    %853 = vector.extract_strided_slice %842 {offsets = [0, 3], sizes = [1, 1], strides = [1, 1]} : vector<1x4xf32> to vector<1x1xf32>
    %854 = arith.maximumf %852, %853 : vector<1x1xf32>
    %855 = vector.extract_strided_slice %837 {offsets = [0, 8], sizes = [1, 4], strides = [1, 1]} : vector<1x64xf32> to vector<1x4xf32>
    %856 = vector.extract_strided_slice %840 {offsets = [0, 8], sizes = [1, 4], strides = [1, 1]} : vector<1x64xf32> to vector<1x4xf32>
    %857 = vector.extract_strided_slice %855 {offsets = [0, 0], sizes = [1, 1], strides = [1, 1]} : vector<1x4xf32> to vector<1x1xf32>
    %858 = vector.extract_strided_slice %855 {offsets = [0, 1], sizes = [1, 1], strides = [1, 1]} : vector<1x4xf32> to vector<1x1xf32>
    %859 = arith.maximumf %857, %858 : vector<1x1xf32>
    %860 = vector.extract_strided_slice %855 {offsets = [0, 2], sizes = [1, 1], strides = [1, 1]} : vector<1x4xf32> to vector<1x1xf32>
    %861 = vector.extract_strided_slice %855 {offsets = [0, 3], sizes = [1, 1], strides = [1, 1]} : vector<1x4xf32> to vector<1x1xf32>
    %862 = arith.maximumf %860, %861 : vector<1x1xf32>
    %863 = vector.extract_strided_slice %856 {offsets = [0, 0], sizes = [1, 1], strides = [1, 1]} : vector<1x4xf32> to vector<1x1xf32>
    %864 = vector.extract_strided_slice %856 {offsets = [0, 1], sizes = [1, 1], strides = [1, 1]} : vector<1x4xf32> to vector<1x1xf32>
    %865 = arith.maximumf %863, %864 : vector<1x1xf32>
    %866 = vector.extract_strided_slice %856 {offsets = [0, 2], sizes = [1, 1], strides = [1, 1]} : vector<1x4xf32> to vector<1x1xf32>
    %867 = vector.extract_strided_slice %856 {offsets = [0, 3], sizes = [1, 1], strides = [1, 1]} : vector<1x4xf32> to vector<1x1xf32>
    %868 = arith.maximumf %866, %867 : vector<1x1xf32>
    %869 = vector.extract_strided_slice %837 {offsets = [0, 16], sizes = [1, 4], strides = [1, 1]} : vector<1x64xf32> to vector<1x4xf32>
    %870 = vector.extract_strided_slice %840 {offsets = [0, 16], sizes = [1, 4], strides = [1, 1]} : vector<1x64xf32> to vector<1x4xf32>
    %871 = vector.extract_strided_slice %869 {offsets = [0, 0], sizes = [1, 1], strides = [1, 1]} : vector<1x4xf32> to vector<1x1xf32>
    %872 = vector.extract_strided_slice %869 {offsets = [0, 1], sizes = [1, 1], strides = [1, 1]} : vector<1x4xf32> to vector<1x1xf32>
    %873 = arith.maximumf %871, %872 : vector<1x1xf32>
    %874 = vector.extract_strided_slice %869 {offsets = [0, 2], sizes = [1, 1], strides = [1, 1]} : vector<1x4xf32> to vector<1x1xf32>
    %875 = vector.extract_strided_slice %869 {offsets = [0, 3], sizes = [1, 1], strides = [1, 1]} : vector<1x4xf32> to vector<1x1xf32>
    %876 = arith.maximumf %874, %875 : vector<1x1xf32>
    %877 = vector.extract_strided_slice %870 {offsets = [0, 0], sizes = [1, 1], strides = [1, 1]} : vector<1x4xf32> to vector<1x1xf32>
    %878 = vector.extract_strided_slice %870 {offsets = [0, 1], sizes = [1, 1], strides = [1, 1]} : vector<1x4xf32> to vector<1x1xf32>
    %879 = arith.maximumf %877, %878 : vector<1x1xf32>
    %880 = vector.extract_strided_slice %870 {offsets = [0, 2], sizes = [1, 1], strides = [1, 1]} : vector<1x4xf32> to vector<1x1xf32>
    %881 = vector.extract_strided_slice %870 {offsets = [0, 3], sizes = [1, 1], strides = [1, 1]} : vector<1x4xf32> to vector<1x1xf32>
    %882 = arith.maximumf %880, %881 : vector<1x1xf32>
    %883 = vector.extract_strided_slice %837 {offsets = [0, 24], sizes = [1, 4], strides = [1, 1]} : vector<1x64xf32> to vector<1x4xf32>
    %884 = vector.extract_strided_slice %840 {offsets = [0, 24], sizes = [1, 4], strides = [1, 1]} : vector<1x64xf32> to vector<1x4xf32>
    %885 = vector.extract_strided_slice %883 {offsets = [0, 0], sizes = [1, 1], strides = [1, 1]} : vector<1x4xf32> to vector<1x1xf32>
    %886 = vector.extract_strided_slice %883 {offsets = [0, 1], sizes = [1, 1], strides = [1, 1]} : vector<1x4xf32> to vector<1x1xf32>
    %887 = arith.maximumf %885, %886 : vector<1x1xf32>
    %888 = vector.extract_strided_slice %883 {offsets = [0, 2], sizes = [1, 1], strides = [1, 1]} : vector<1x4xf32> to vector<1x1xf32>
    %889 = vector.extract_strided_slice %883 {offsets = [0, 3], sizes = [1, 1], strides = [1, 1]} : vector<1x4xf32> to vector<1x1xf32>
    %890 = arith.maximumf %888, %889 : vector<1x1xf32>
    %891 = vector.extract_strided_slice %884 {offsets = [0, 0], sizes = [1, 1], strides = [1, 1]} : vector<1x4xf32> to vector<1x1xf32>
    %892 = vector.extract_strided_slice %884 {offsets = [0, 1], sizes = [1, 1], strides = [1, 1]} : vector<1x4xf32> to vector<1x1xf32>
    %893 = arith.maximumf %891, %892 : vector<1x1xf32>
    %894 = vector.extract_strided_slice %884 {offsets = [0, 2], sizes = [1, 1], strides = [1, 1]} : vector<1x4xf32> to vector<1x1xf32>
    %895 = vector.extract_strided_slice %884 {offsets = [0, 3], sizes = [1, 1], strides = [1, 1]} : vector<1x4xf32> to vector<1x1xf32>
    %896 = arith.maximumf %894, %895 : vector<1x1xf32>
    %897 = tpu.concatenate %845, %848, %851, %854, %859, %862, %865, %868, %873, %876, %879, %882, %887, %890, %893, %896 in 1 : vector<1x1xf32>, vector<1x1xf32>, vector<1x1xf32>, vector<1x1xf32>, vector<1x1xf32>, vector<1x1xf32>, vector<1x1xf32>, vector<1x1xf32>, vector<1x1xf32>, vector<1x1xf32>, vector<1x1xf32>, vector<1x1xf32>, vector<1x1xf32>, vector<1x1xf32>, vector<1x1xf32>, vector<1x1xf32> -> vector<1x16xf32>
    %898 = vector.extract_strided_slice %837 {offsets = [0, 32], sizes = [1, 4], strides = [1, 1]} : vector<1x64xf32> to vector<1x4xf32>
    %899 = vector.extract_strided_slice %840 {offsets = [0, 32], sizes = [1, 4], strides = [1, 1]} : vector<1x64xf32> to vector<1x4xf32>
    %900 = vector.extract_strided_slice %898 {offsets = [0, 0], sizes = [1, 1], strides = [1, 1]} : vector<1x4xf32> to vector<1x1xf32>
    %901 = vector.extract_strided_slice %898 {offsets = [0, 1], sizes = [1, 1], strides = [1, 1]} : vector<1x4xf32> to vector<1x1xf32>
    %902 = arith.maximumf %900, %901 : vector<1x1xf32>
    %903 = vector.extract_strided_slice %898 {offsets = [0, 2], sizes = [1, 1], strides = [1, 1]} : vector<1x4xf32> to vector<1x1xf32>
    %904 = vector.extract_strided_slice %898 {offsets = [0, 3], sizes = [1, 1], strides = [1, 1]} : vector<1x4xf32> to vector<1x1xf32>
    %905 = arith.maximumf %903, %904 : vector<1x1xf32>
    %906 = vector.extract_strided_slice %899 {offsets = [0, 0], sizes = [1, 1], strides = [1, 1]} : vector<1x4xf32> to vector<1x1xf32>
    %907 = vector.extract_strided_slice %899 {offsets = [0, 1], sizes = [1, 1], strides = [1, 1]} : vector<1x4xf32> to vector<1x1xf32>
    %908 = arith.maximumf %906, %907 : vector<1x1xf32>
    %909 = vector.extract_strided_slice %899 {offsets = [0, 2], sizes = [1, 1], strides = [1, 1]} : vector<1x4xf32> to vector<1x1xf32>
    %910 = vector.extract_strided_slice %899 {offsets = [0, 3], sizes = [1, 1], strides = [1, 1]} : vector<1x4xf32> to vector<1x1xf32>
    %911 = arith.maximumf %909, %910 : vector<1x1xf32>
    %912 = vector.extract_strided_slice %837 {offsets = [0, 40], sizes = [1, 4], strides = [1, 1]} : vector<1x64xf32> to vector<1x4xf32>
    %913 = vector.extract_strided_slice %840 {offsets = [0, 40], sizes = [1, 4], strides = [1, 1]} : vector<1x64xf32> to vector<1x4xf32>
    %914 = vector.extract_strided_slice %912 {offsets = [0, 0], sizes = [1, 1], strides = [1, 1]} : vector<1x4xf32> to vector<1x1xf32>
    %915 = vector.extract_strided_slice %912 {offsets = [0, 1], sizes = [1, 1], strides = [1, 1]} : vector<1x4xf32> to vector<1x1xf32>
    %916 = arith.maximumf %914, %915 : vector<1x1xf32>
    %917 = vector.extract_strided_slice %912 {offsets = [0, 2], sizes = [1, 1], strides = [1, 1]} : vector<1x4xf32> to vector<1x1xf32>
    %918 = vector.extract_strided_slice %912 {offsets = [0, 3], sizes = [1, 1], strides = [1, 1]} : vector<1x4xf32> to vector<1x1xf32>
    %919 = arith.maximumf %917, %918 : vector<1x1xf32>
    %920 = vector.extract_strided_slice %913 {offsets = [0, 0], sizes = [1, 1], strides = [1, 1]} : vector<1x4xf32> to vector<1x1xf32>
    %921 = vector.extract_strided_slice %913 {offsets = [0, 1], sizes = [1, 1], strides = [1, 1]} : vector<1x4xf32> to vector<1x1xf32>
    %922 = arith.maximumf %920, %921 : vector<1x1xf32>
    %923 = vector.extract_strided_slice %913 {offsets = [0, 2], sizes = [1, 1], strides = [1, 1]} : vector<1x4xf32> to vector<1x1xf32>
    %924 = vector.extract_strided_slice %913 {offsets = [0, 3], sizes = [1, 1], strides = [1, 1]} : vector<1x4xf32> to vector<1x1xf32>
    %925 = arith.maximumf %923, %924 : vector<1x1xf32>
    %926 = vector.extract_strided_slice %837 {offsets = [0, 48], sizes = [1, 4], strides = [1, 1]} : vector<1x64xf32> to vector<1x4xf32>
    %927 = vector.extract_strided_slice %840 {offsets = [0, 48], sizes = [1, 4], strides = [1, 1]} : vector<1x64xf32> to vector<1x4xf32>
    %928 = vector.extract_strided_slice %926 {offsets = [0, 0], sizes = [1, 1], strides = [1, 1]} : vector<1x4xf32> to vector<1x1xf32>
    %929 = vector.extract_strided_slice %926 {offsets = [0, 1], sizes = [1, 1], strides = [1, 1]} : vector<1x4xf32> to vector<1x1xf32>
    %930 = arith.maximumf %928, %929 : vector<1x1xf32>
    %931 = vector.extract_strided_slice %926 {offsets = [0, 2], sizes = [1, 1], strides = [1, 1]} : vector<1x4xf32> to vector<1x1xf32>
    %932 = vector.extract_strided_slice %926 {offsets = [0, 3], sizes = [1, 1], strides = [1, 1]} : vector<1x4xf32> to vector<1x1xf32>
    %933 = arith.maximumf %931, %932 : vector<1x1xf32>
    %934 = vector.extract_strided_slice %927 {offsets = [0, 0], sizes = [1, 1], strides = [1, 1]} : vector<1x4xf32> to vector<1x1xf32>
    %935 = vector.extract_strided_slice %927 {offsets = [0, 1], sizes = [1, 1], strides = [1, 1]} : vector<1x4xf32> to vector<1x1xf32>
    %936 = arith.maximumf %934, %935 : vector<1x1xf32>
    %937 = vector.extract_strided_slice %927 {offsets = [0, 2], sizes = [1, 1], strides = [1, 1]} : vector<1x4xf32> to vector<1x1xf32>
    %938 = vector.extract_strided_slice %927 {offsets = [0, 3], sizes = [1, 1], strides = [1, 1]} : vector<1x4xf32> to vector<1x1xf32>
    %939 = arith.maximumf %937, %938 : vector<1x1xf32>
    %940 = vector.extract_strided_slice %837 {offsets = [0, 56], sizes = [1, 4], strides = [1, 1]} : vector<1x64xf32> to vector<1x4xf32>
    %941 = vector.extract_strided_slice %840 {offsets = [0, 56], sizes = [1, 4], strides = [1, 1]} : vector<1x64xf32> to vector<1x4xf32>
    %942 = vector.extract_strided_slice %940 {offsets = [0, 0], sizes = [1, 1], strides = [1, 1]} : vector<1x4xf32> to vector<1x1xf32>
    %943 = vector.extract_strided_slice %940 {offsets = [0, 1], sizes = [1, 1], strides = [1, 1]} : vector<1x4xf32> to vector<1x1xf32>
    %944 = arith.maximumf %942, %943 : vector<1x1xf32>
    %945 = vector.extract_strided_slice %940 {offsets = [0, 2], sizes = [1, 1], strides = [1, 1]} : vector<1x4xf32> to vector<1x1xf32>
    %946 = vector.extract_strided_slice %940 {offsets = [0, 3], sizes = [1, 1], strides = [1, 1]} : vector<1x4xf32> to vector<1x1xf32>
    %947 = arith.maximumf %945, %946 : vector<1x1xf32>
    %948 = vector.extract_strided_slice %941 {offsets = [0, 0], sizes = [1, 1], strides = [1, 1]} : vector<1x4xf32> to vector<1x1xf32>
    %949 = vector.extract_strided_slice %941 {offsets = [0, 1], sizes = [1, 1], strides = [1, 1]} : vector<1x4xf32> to vector<1x1xf32>
    %950 = arith.maximumf %948, %949 : vector<1x1xf32>
    %951 = vector.extract_strided_slice %941 {offsets = [0, 2], sizes = [1, 1], strides = [1, 1]} : vector<1x4xf32> to vector<1x1xf32>
    %952 = vector.extract_strided_slice %941 {offsets = [0, 3], sizes = [1, 1], strides = [1, 1]} : vector<1x4xf32> to vector<1x1xf32>
    %953 = arith.maximumf %951, %952 : vector<1x1xf32>
    %954 = tpu.concatenate %902, %905, %908, %911, %916, %919, %922, %925, %930, %933, %936, %939, %944, %947, %950, %953 in 1 : vector<1x1xf32>, vector<1x1xf32>, vector<1x1xf32>, vector<1x1xf32>, vector<1x1xf32>, vector<1x1xf32>, vector<1x1xf32>, vector<1x1xf32>, vector<1x1xf32>, vector<1x1xf32>, vector<1x1xf32>, vector<1x1xf32>, vector<1x1xf32>, vector<1x1xf32>, vector<1x1xf32>, vector<1x1xf32> -> vector<1x16xf32>
    %955 = tpu.concatenate %897, %954 in 0 : vector<1x16xf32>, vector<1x16xf32> -> vector<2x16xf32>
    %c0_66 = arith.constant 0 : index
    %c0_67 = arith.constant 0 : index
    %956 = vector.load %arg8[%c0_66, %c0_67] : memref<16x4096xf32, #tpu.memory_space<vmem>>, vector<16x4096xf32>
    %cst_68 = arith.constant dense<0.000000e+00> : vector<2x4096xf32>
    %957 = tpu.matmul %955, %956, %cst_68 {dimension_numbers = #tpu.dot_dimension_numbers<[1], [0], [0], [1], [0, 0, 1, 1], [], []>} : vector<2x16xf32>, vector<16x4096xf32>, vector<2x4096xf32> -> vector<2x4096xf32>
    %c0_69 = arith.constant 0 : index
    %c0_70 = arith.constant 0 : index
    %958 = vector.load %arg9[%c0_69, %c0_70] : memref<1x4096xf32, #tpu.memory_space<vmem>>, vector<1x4096xf32>
    %959 = vector.broadcast %958 : vector<1x4096xf32> to vector<2x4096xf32>
    %960 = arith.addf %957, %959 : vector<2x4096xf32>
    %c0_71 = arith.constant 0 : index
    %c0_72 = arith.constant 0 : index
    %961 = vector.load %arg10[%c0_71, %c0_72] : memref<2x4096xf32, #tpu.memory_space<vmem>>, vector<2x4096xf32>
    tpu.vector_store %arg10[%c0_71, %c0_72], %960 {strides = array<i32>} : memref<2x4096xf32, #tpu.memory_space<vmem>>, vector<2x4096xf32>,
    return
  }
}

</mosaic_0001>

<bundles_post_ra>
// kernel: tile.35
= control target key start
LH: loop header
LB: loop body
LE: loop exit
PB: predicated region body
PF: predicated region fallthrough
CT: control target
= control target key end

     0   :  { %vm182_vm0 = vcmask 1047556   ;;  %s349_s10 = smov 32   ;;  %vm184_vm1 = vcmask 261120   ;;  %vm226_vm2 = vcmask 523520   ;;  %s519_s0 = inlined_call_operand.vmem [shape: f32[36,2,32], index: 0, kind: input, shape index: {}]   ;;  %s520_s1 = inlined_call_operand.vmem [shape: f32[36,64], index: 1, kind: output, shape index: {}]  }
   0x1   :  { %v332_v0 = vld [vmem:[%s519_s0 + $0xe] sm:$0x3]  ;;  %v333_v1 = vld [vmem:[%s519_s0 + $0xc] sm:$0x3]  ;;  %v334_v2 = vld [vmem:[%s519_s0 + $0xa] sm:$0x3] }
   0x2   :  { %148 = vst [vmem:[#allocation0 + $0x38] sm:$0x3] %v332_v0  ;;  %153 = vst [vmem:[#allocation0 + $0x30] sm:$0x3] %v333_v1  ;;  %v335_v3 = vld [vmem:[%s519_s0 + $0x8] sm:$0x3] }
   0x3   :  { %158 = vst [vmem:[#allocation0 + $0x28] sm:$0x3] %v334_v2  ;;  %v336_v4 = vld [vmem:[%s519_s0 + $0x6] sm:$0x3]  ;;  %v337_v5 = vld [vmem:[%s519_s0 + $0x4] sm:$0x3] }
   0x4   :  { %163 = vst [vmem:[#allocation0 + $0x20] sm:$0x3] %v335_v3  ;;  %168 = vst [vmem:[#allocation0 + $0x18] sm:$0x3] %v336_v4  ;;  %v338_v6 = vld [vmem:[%s519_s0 + $0x2] sm:$0x3] }
   0x5   :  { %173 = vst [vmem:[#allocation0 + $0x10] sm:$0x3] %v337_v5  ;;  %v178_v7 = vld [vmem:[%s519_s0] sm:$0x3]  ;;  %177 = vst [vmem:[#allocation0 + $0x8] sm:$0x3] %v338_v6 }
   0x6   :  { %179 = vst [vmem:[#allocation0] sm:$0x3] %v178_v7  ;;  %v320_v8 = vld [vmem:[%s519_s0 + $0x26] sm:$0x3]  ;;  %v321_v9 = vld [vmem:[%s519_s0 + $0x24] sm:$0x3] }
   0x7   :  { %v322_v10 = vld [vmem:[%s519_s0 + $0x22] sm:$0x3]  ;;  %88 = vst [vmem:[#allocation0 + $0x98] sm:$0x3] %v320_v8  ;;  %93 = vst [vmem:[#allocation0 + $0x90] sm:$0x3] %v321_v9 }
   0x8   :  { %98 = vst [vmem:[#allocation0 + $0x88] sm:$0x3] %v322_v10  ;;  %v323_v11 = vld [vmem:[%s519_s0 + $0x20] sm:$0x3]  ;;  %v324_v12 = vld [vmem:[%s519_s0 + $0x1e] sm:$0x3] }
   0x9   :  { %v325_v13 = vld [vmem:[%s519_s0 + $0x1c] sm:$0x3]  ;;  %103 = vst [vmem:[#allocation0 + $0x80] sm:$0x3] %v323_v11  ;;  %108 = vst [vmem:[#allocation0 + $0x78] sm:$0x3] %v324_v12 }
   0xa   :  { %113 = vst [vmem:[#allocation0 + $0x70] sm:$0x3] %v325_v13  ;;  %v326_v14 = vld [vmem:[%s519_s0 + $0x1a] sm:$0x3]  ;;  %v327_v15 = vld [vmem:[%s519_s0 + $0x18] sm:$0x3] }
   0xb   :  { %v304_v16 = vld [vmem:[%s519_s0 + $0x46] sm:$0x3]  ;;  %118 = vst [vmem:[#allocation0 + $0x68] sm:$0x3] %v326_v14  ;;  %123 = vst [vmem:[#allocation0 + $0x60] sm:$0x3] %v327_v15 }
   0xc   :  { %8 = vst [vmem:[#allocation0 + $0x118] sm:$0x3] %v304_v16  ;;  %v305_v17 = vld [vmem:[%s519_s0 + $0x44] sm:$0x3]  ;;  %v306_v18 = vld [vmem:[%s519_s0 + $0x42] sm:$0x3] }
   0xd   :  { %v307_v19 = vld [vmem:[%s519_s0 + $0x40] sm:$0x3]  ;;  %13 = vst [vmem:[#allocation0 + $0x110] sm:$0x3] %v305_v17  ;;  %18 = vst [vmem:[#allocation0 + $0x108] sm:$0x3] %v306_v18 }
   0xe   :  { %23 = vst [vmem:[#allocation0 + $0x100] sm:$0x3] %v307_v19  ;;  %v328_v20 = vld [vmem:[%s519_s0 + $0x16] sm:$0x3]  ;;  %v329_v21 = vld [vmem:[%s519_s0 + $0x14] sm:$0x3] }
   0xf   :  { %v330_v22 = vld [vmem:[%s519_s0 + $0x12] sm:$0x3]  ;;  %128 = vst [vmem:[#allocation0 + $0x58] sm:$0x3] %v328_v20  ;;  %133 = vst [vmem:[#allocation0 + $0x50] sm:$0x3] %v329_v21 }
  0x10   :  { %138 = vst [vmem:[#allocation0 + $0x48] sm:$0x3] %v330_v22  ;;  %v331_v23 = vld [vmem:[%s519_s0 + $0x10] sm:$0x3]  ;;  %v312_v24 = vld [vmem:[%s519_s0 + $0x36] sm:$0x3] }
  0x11   :  { %v313_v25 = vld [vmem:[%s519_s0 + $0x34] sm:$0x3]  ;;  %v221_v26 = vld [vmem:[#allocation0 + $0x1] ss:$8 sm:$0xf0]  }
  0x12   :  { %143 = vst [vmem:[#allocation0 + $0x40] sm:$0x3] %v331_v23  ;;  %48 = vst [vmem:[#allocation0 + $0xd8] sm:$0x3] %v312_v24  ;;  %v314_v27 = vld [vmem:[%s519_s0 + $0x32] sm:$0x3] }
  0x13   :  { %53 = vst [vmem:[#allocation0 + $0xd0] sm:$0x3] %v313_v25  ;;  %v219_v28 = vld [vmem:[#allocation0 + $0x1] ss:$8 sm:$0xf]  }
  0x14   :  { %58 = vst [vmem:[#allocation0 + $0xc8] sm:$0x3] %v314_v27  ;;  %v315_v29 = vld [vmem:[%s519_s0 + $0x30] sm:$0x3]  ;;  %v223_v30 = vsel %vm182_vm0, %v221_v26, %v219_v28  ;;  %v316_v31 = vld [vmem:[%s519_s0 + $0x2e] sm:$0x3] }
  0x15   :  { %63 = vst [vmem:[#allocation0 + $0xc0] sm:$0x3] %v315_v29  ;;  %v317_v32 = vld [vmem:[%s519_s0 + $0x2c] sm:$0x3]  ;;  %v318_v33 = vld [vmem:[%s519_s0 + $0x2a] sm:$0x3]  ;;  %224 = vrot.lane.b32.xlu0 %v223_v30, %s349_s10 }
  0x16   :  { %v244_v34 = vld [vmem:[#allocation0 + $0x61] ss:$8 sm:$0xf0]   ;;  %68 = vst [vmem:[#allocation0 + $0xb8] sm:$0x3] %v316_v31 }
  0x17   :  { %73 = vst [vmem:[#allocation0 + $0xb0] sm:$0x3] %v317_v32  ;;  %78 = vst [vmem:[#allocation0 + $0xa8] sm:$0x3] %v318_v33  ;;  %v319_v35 = vld [vmem:[%s519_s0 + $0x28] sm:$0x3] }
  0x18   :  { %v242_v36 = vld [vmem:[#allocation0 + $0x61] ss:$8 sm:$0xf]   ;;  %83 = vst [vmem:[#allocation0 + $0xa0] sm:$0x3] %v319_v35 }
  0x19   :  { %v308_v37 = vld [vmem:[%s519_s0 + $0x3e] sm:$0x3]  ;;  %v246_v38 = vsel %vm182_vm0, %v244_v34, %v242_v36  ;;  %v229_v39 = vld [vmem:[#allocation0 + $0x101] ss:$8 sm:$0xf]  }
  0x1a   :  { %28 = vst [vmem:[#allocation0 + $0xf8] sm:$0x3] %v308_v37  ;;  %v309_v40 = vld [vmem:[%s519_s0 + $0x3c] sm:$0x3]  ;;  %247 = vrot.lane.b32.xlu1 %v246_v38, %s349_s10  ;;  %v310_v41 = vld [vmem:[%s519_s0 + $0x3a] sm:$0x3] }
  0x1b   :  { %33 = vst [vmem:[#allocation0 + $0xf0] sm:$0x3] %v309_v40  ;;  %v311_v42 = vld [vmem:[%s519_s0 + $0x38] sm:$0x3]  ;;  %38 = vst [vmem:[#allocation0 + $0xe8] sm:$0x3] %v310_v41 }
  0x1c   :  { %v231_v43 = vld [vmem:[#allocation0 + $0x21] ss:$8 sm:$0xf0]   ;;  %43 = vst [vmem:[#allocation0 + $0xe0] sm:$0x3] %v311_v42 }
  0x1d   :  { %v180_v44 = vld [vmem:[#allocation0] ss:$8 sm:$0xf]   ;;  %v233_v45 = vsel %vm182_vm0, %v231_v43, %v229_v39  ;;  %v255_v48 = vld [vmem:[#allocation0 + $0xa1] ss:$8 sm:$0xf0]  }
  0x1e   :  { %v181_v46 = vld [vmem:[#allocation0] ss:$8 sm:$0xf0]   ;;  %234 = vrot.lane.b32.xlu0 %v233_v45, %s349_s10 }
  0x1f   :  { %v187_v47 = vld [vmem:[#allocation0 + $0x40] ss:$8 sm:$0xf]   ;;  %v183_v49 = vsel %vm182_vm0, %v181_v46, %v180_v44  ;;  %v253_v54 = vld [vmem:[#allocation0 + $0xa1] ss:$8 sm:$0xf]  }
  0x20   :  { %v189_v50 = vld [vmem:[#allocation0 + $0x40] ss:$8 sm:$0xf0]   ;;  %185 = vst.msk [vmem:[%s520_s1] sm:$0xff] %vm184_vm1, %v183_v49   ;;  %v257_v56 = vsel %vm182_vm0, %v255_v48, %v253_v54 }
  0x21   :  { %v191_v51 = vsel %vm182_vm0, %v189_v50, %v187_v47  ;;  %v196_v52 = vld [vmem:[#allocation0 + $0x80] ss:$8 sm:$0xf]   ;;  %258 = vrot.lane.b32.xlu1 %v257_v56, %s349_s10 }
  0x22   :  { %v214_v53 = vld [vmem:[#allocation0 + $0x100] ss:$8 sm:$0xf]   ;;  %339 = vst.msk [vmem:[%s520_s1 + $0x8] sm:$0xff] %vm184_vm1, %v191_v51  }
  0x23   :  { %v198_v55 = vld [vmem:[#allocation0 + $0x80] ss:$8 sm:$0xf0]   ;;  %342 = vst.msk [vmem:[%s520_s1 + $0x20] sm:$0xf] %vm184_vm1, %v214_v53  }
  0x24   :  { %v200_v57 = vsel %vm182_vm0, %v198_v55, %v196_v52  ;;  %v205_v58 = vld [vmem:[#allocation0 + $0xc0] ss:$8 sm:$0xf]   ;;  %v264_v59 = vld [vmem:[#allocation0 + $0xe1] ss:$8 sm:$0xf]  }
  0x25   :  { %340 = vst.msk [vmem:[%s520_s1 + $0x10] sm:$0xff] %vm184_vm1, %v200_v57   ;;  %v207_v60 = vld [vmem:[#allocation0 + $0xc0] ss:$8 sm:$0xf0]   ;;  %265 = vrot.lane.b32.xlu0 %v264_v59, %s349_s10 }
  0x26   :  { %v209_v61 = vsel %vm182_vm0, %v207_v60, %v205_v58 }
  0x27   :  { %341 = vst.msk [vmem:[%s520_s1 + $0x18] sm:$0xff] %vm184_vm1, %v209_v61  }
  0x87   :  { %v225_v62 = vpop.permute.xlu0 %224  }
  0x88   :  { %227 = vst.msk [vmem:[%s520_s1] sm:$0xff] %vm226_vm2, %v225_v62  }
  0x8c   :  { %v248_v63 = vpop.permute.xlu1 %247  }
  0x8d   :  { %345 = vst.msk [vmem:[%s520_s1 + $0xc] sm:$0xff] %vm226_vm2, %v248_v63  }
  0x90   :  { %v235_v0 = vpop.permute.xlu0 %234  }
  0x91   :  { %343 = vst.msk [vmem:[%s520_s1 + $0x20] sm:$0xf] %vm226_vm2, %v235_v0   ;;  %344 = vst.msk [vmem:[%s520_s1 + $0x4] sm:$0xf0] %vm226_vm2, %v235_v0  }
  0x93   :  { %v259_v1 = vpop.permute.xlu1 %258  }
  0x94   :  { %346 = vst.msk [vmem:[%s520_s1 + $0x14] sm:$0xff] %vm226_vm2, %v259_v1  }
  0x97   :  { %v266_v2 = vpop.permute.xlu0 %265  }
  0x98   :  { %347 = vst.msk [vmem:[%s520_s1 + $0x1c] sm:$0xf] %vm226_vm2, %v266_v2  }

// kernel: tile.31
= control target key start
LH: loop header
LB: loop body
LE: loop exit
PB: predicated region body
PF: predicated region fallthrough
CT: control target
= control target key end

     0   :  { %vm47_vm0 = vcmask 1047556   ;;  %vm49_vm1 = vcmask 261120   ;;  %vm64_vm2 = vcmask 523520   ;;  %s141_s0 = inlined_call_operand.vmem [shape: f32[9,2,32], index: 0, kind: input, shape index: {}]   ;;  %s142_s1 = inlined_call_operand.vmem [shape: f32[9,64], index: 1, kind: output, shape index: {}]  }
   0x1   :  { %v81_v0 = vld [vmem:[%s141_s0 + $0xe] sm:$0x3]  ;;  %v82_v1 = vld [vmem:[%s141_s0 + $0xc] sm:$0x3]  ;;  %v83_v2 = vld [vmem:[%s141_s0 + $0xa] sm:$0x3] }
   0x2   :  { %13 = vst [vmem:[#allocation0 + $0x38] sm:$0x3] %v81_v0  ;;  %18 = vst [vmem:[#allocation0 + $0x30] sm:$0x3] %v82_v1  ;;  %v84_v3 = vld [vmem:[%s141_s0 + $0x8] sm:$0x3] }
   0x3   :  { %23 = vst [vmem:[#allocation0 + $0x28] sm:$0x3] %v83_v2  ;;  %v85_v4 = vld [vmem:[%s141_s0 + $0x6] sm:$0x3]  ;;  %v86_v5 = vld [vmem:[%s141_s0 + $0x4] sm:$0x3] }
   0x4   :  { %28 = vst [vmem:[#allocation0 + $0x20] sm:$0x3] %v84_v3  ;;  %33 = vst [vmem:[#allocation0 + $0x18] sm:$0x3] %v85_v4  ;;  %v87_v6 = vld [vmem:[%s141_s0 + $0x2] sm:$0x3] }
   0x5   :  { %38 = vst [vmem:[#allocation0 + $0x10] sm:$0x3] %v86_v5  ;;  %v43_v7 = vld [vmem:[%s141_s0] sm:$0x3]  ;;  %42 = vst [vmem:[#allocation0 + $0x8] sm:$0x3] %v87_v6 }
   0x6   :  { %44 = vst [vmem:[#allocation0] sm:$0x3] %v43_v7  ;;  %v80_v8 = vld [vmem:[%s141_s0 + $0x10] sm:$0x3]  ;;  %s91_s0 = smov 32  }
   0x7   :  { %8 = vst [vmem:[#allocation0 + $0x40] sm:$0x3] %v80_v8 }
   0xb   :  { %v59_v9 = vld [vmem:[#allocation0 + $0x1] ss:$8 sm:$0xf0]   ;;  %v46_v10 = vld [vmem:[#allocation0] ss:$8 sm:$0xf0]  }
   0xd   :  { %v45_v11 = vld [vmem:[#allocation0] ss:$8 sm:$0xf]   ;;  %v57_v12 = vld [vmem:[#allocation0 + $0x1] ss:$8 sm:$0xf]  }
   0xe   :  { %v61_v13 = vsel %vm47_vm0, %v59_v9, %v57_v12  ;;  %v48_v14 = vsel %vm47_vm0, %v46_v10, %v45_v11  ;;  %v52_v15 = vld [vmem:[#allocation0 + $0x40] sm:$0x1]   ;;  %v67_v16 = vld [vmem:[#allocation0 + $0x41] sm:$0x1]  }
   0xf   :  { %62 = vrot.lane.b32.xlu0 %v61_v13, %s91_s0  ;;  %50 = vst.msk [vmem:[%s142_s1] sm:$0xff] %vm49_vm1, %v48_v14   ;;  %88 = vst.msk [vmem:[%s142_s1 + $0x8] sm:$0x1] %vm49_vm1, %v52_v15  }
  0x13   :  { %68 = vrot.lane.b32.xlu0 %v67_v16, %s91_s0 }
  0x81   :  { %v63_v17 = vpop.permute.xlu0 %62  }
  0x82   :  { %65 = vst.msk [vmem:[%s142_s1] sm:$0xff] %vm64_vm2, %v63_v17  }
  0x85   :  { %v69_v18 = vpop.permute.xlu0 %68  }
  0x86   :  { %89 = vst.msk [vmem:[%s142_s1 + $0x8] sm:$0x1] %vm64_vm2, %v69_v18  }

// kernel: movenet_forward.1
= control target key start
LH: loop header
LB: loop body
LE: loop exit
PB: predicated region body
PF: predicated region fallthrough
CT: control target
= control target key end

     0   :  { %v52_v0 = vlaneseq  ;;  %vm114_vm0 = vcmask 1046528   ;;  %s8511_s0 = inlined_call_operand.vmem [shape: f32[3,106,64], index: 0, kind: input, shape index: {}]   ;;  %s8512_s1 = inlined_call_operand.vmem [shape: f32[9,64], index: 1, kind: input, shape index: {}]   ;;  %s8513_s2 = inlined_call_operand.vmem [shape: f32[36,64], index: 2, kind: input, shape index: {}]   ;;  %s8514_s3 = inlined_call_operand.vmem [shape: f32[1,64], index: 3, kind: input, shape index: {}]   ;;  %s8515_s4 = inlined_call_operand.vmem [shape: f32[36,64], index: 4, kind: input, shape index: {}]   ;;  %s8516_s5 = inlined_call_operand.vmem [shape: f32[1,64], index: 5, kind: input, shape index: {}]   ;;  %s8517_s6 = inlined_call_operand.vmem [shape: f32[36,64], index: 6, kind: input, shape index: {}]   ;;  %s8518_s7 = inlined_call_operand.vmem [shape: f32[1,64], index: 7, kind: input, shape index: {}]   ;;  %s8519_s8 = inlined_call_operand.vmem [shape: f32[16,4096], index: 8, kind: input, shape index: {}]   ;;  %s8520_s9 = inlined_call_operand.vmem [shape: f32[1,4096], index: 9, kind: input, shape index: {}]   ;;  %s8521_s10 = inlined_call_operand.hbm [shape: f32[2,4096], index: 10, kind: output, shape index: {}]  }
   0x1   :  { %v5468_v2 = vld [vmem:[%s8512_s1] sm:$0xff]  ;;  %v5493_v9 = vld [vmem:[%s8511_s0 + $0x8] sm:$0xff]  ;;  %v5498_v10 = vld [vmem:[%s8511_s0 + $0x10] sm:$0xff] }
   0x2   :  { %v5463_v1 = vshrl.u32 %v52_v0, 7  ;;  %v5488_v8 = vld [vmem:[%s8511_s0] sm:$0xff]  ;;  %v5514_v15 = vld [vmem:[%s8511_s0 + $0x18] sm:$0xff]  ;;  %v5524_v17 = vld [vmem:[%s8511_s0 + $0x28] sm:$0xff] }
   0x3   :  { %v5519_v16 = vld [vmem:[%s8511_s0 + $0x20] sm:$0xff]  ;;  %v5543_v22 = vld [vmem:[%s8511_s0 + $0x30] sm:$0xff]  ;;  %v5548_v23 = vld [vmem:[%s8511_s0 + $0x38] sm:$0xff] }
   0x4   :  { %8588 = vst [vmem:[#allocation5_spill] sm:$0xff] %v5463_v1  ;;  %v5471_v3 = vsub.s32 0, %v5463_v1  ;;  %v5474_v4 = vsub.s32 3, %v5463_v1  ;;  %v5477_v5 = vsub.s32 6, %v5463_v1  ;;  %v5480_v6 = vsub.s32 1, %v5463_v1  ;;  %v5553_v24 = vld [vmem:[%s8511_s0 + $0x40] sm:$0xff] }
   0x5   :  { %v5483_v7 = vsub.s32 4, %v5463_v1  ;;  %v5509_v14 = vsub.s32 7, %v5463_v1  ;;  %v5535_v20 = vsub.s32 2, %v5463_v1  ;;  %v5538_v21 = vsub.s32 5, %v5463_v1  ;;  %v5562_v29 = vld [vmem:[%s8511_s0 + $0x48] sm:$0xff]  ;;  %v5567_v30 = vld [vmem:[%s8511_s0 + $0x50] sm:$0xff] }
   0x6   :  { %8589 = vst [vmem:[#allocation6_spill] sm:$0xff] %v5471_v3  ;;  %8590 = vst [vmem:[#allocation7_spill] sm:$0xff] %v5474_v4  ;;  %v55_v11 = vrot.slane %v5468_v2, %v5471_v3  ;;  %v85_v12 = vrot.slane %v5468_v2, %v5474_v4  ;;  %v5506_v13 = vrot.slane %v5468_v2, %v5477_v5  ;;  %v5572_v31 = vld [vmem:[%s8511_s0 + $0x58] sm:$0xff]  ;;  %v5581_v36 = vld [vmem:[%s8511_s0 + $0x60] sm:$0xff] }
   0x7   :  { %8591 = vst [vmem:[#allocation8_spill] sm:$0xff] %v5477_v5  ;;  %8592 = vst [vmem:[#allocation9_spill] sm:$0xff] %v5480_v6  ;;  %v5528_v18 = vrot.slane %v5468_v2, %v5480_v6  ;;  %v5532_v19 = vrot.slane %v5468_v2, %v5483_v7  ;;  %v5590_v41 = vld [vmem:[%s8511_s0 + $0x68] sm:$0x3] }
   0x8   :  { %8593 = vst [vmem:[#allocation10_spill] sm:$0xff] %v5483_v7  ;;  %8594 = vst [vmem:[#allocation11_spill] sm:$0xff] %v5535_v20  ;;  %v56_v25 = vmul.f32 %v55_v11, %v5488_v8  ;;  %v57_v26 = vmul.f32 %v55_v11, %v5493_v9  ;;  %v58_v27 = vmul.f32 %v55_v11, %v5498_v10 }
   0x9   :  { %v59_v28 = vmul.f32 %v55_v11, %v5514_v15  ;;  %v60_v32 = vmul.f32 %v55_v11, %v5519_v16  ;;  %v61_v33 = vmul.f32 %v55_v11, %v5524_v17  ;;  %v62_v34 = vmul.f32 %v55_v11, %v5543_v22 }
   0xa   :  { %v63_v35 = vmul.f32 %v55_v11, %v5548_v23  ;;  %v64_v37 = vmul.f32 %v55_v11, %v5553_v24  ;;  %v65_v38 = vmul.f32 %v55_v11, %v5562_v29  ;;  %v66_v39 = vmul.f32 %v55_v11, %v5567_v30 }
   0xb   :  { %v67_v40 = vmul.f32 %v55_v11, %v5572_v31  ;;  %v68_v42 = vmul.f32 %v55_v11, %v5581_v36  ;;  %v86_v43 = vmul.f32 %v85_v12, %v5488_v8  ;;  %v87_v44 = vmul.f32 %v85_v12, %v5493_v9 }
   0xc   :  { %v88_v45 = vmul.f32 %v85_v12, %v5498_v10  ;;  %v89_v46 = vmul.f32 %v85_v12, %v5514_v15  ;;  %v90_v47 = vmul.f32 %v85_v12, %v5519_v16  ;;  %v91_v48 = vmul.f32 %v85_v12, %v5524_v17 }
   0xd   :  { %v92_v49 = vmul.f32 %v85_v12, %v5543_v22  ;;  %v93_v50 = vmul.f32 %v85_v12, %v5548_v23  ;;  %v94_v51 = vmul.f32 %v85_v12, %v5553_v24  ;;  %v95_v52 = vmul.f32 %v85_v12, %v5562_v29 }
   0xe   :  { %v96_v53 = vmul.f32 %v85_v12, %v5567_v30  ;;  %v97_v54 = vmul.f32 %v85_v12, %v5572_v31  ;;  %v98_v55 = vmul.f32 %v85_v12, %v5581_v36  ;;  %v99_v56 = vmul.f32 %v85_v12, %v5590_v41 }
   0xf   :  { %v115_v57 = vrot.slane %v86_v43, 1  ;;  %v116_v58 = vrot.slane %v87_v44, 1  ;;  %v118_v59 = vrot.slane %v88_v45, 1  ;;  %v120_v60 = vrot.slane %v89_v46, 1 }
  0x10   :  { %v122_v61 = vrot.slane %v90_v47, 1 }
  0x11   :  { %15 = vsyncpa [#allocation3], 0  ;;  %v124_v62 = vrot.slane %v91_v48, 1  ;;  %v126_v63 = vrot.slane %v92_v49, 1  ;;  %v128_v0 = vrot.slane %v93_v50, 1  ;;  %v130_v11 = vrot.slane %v94_v51, 1 }
  0x12   :  { %v117_v1 = vsel %vm114_vm0, %v115_v57, %v116_v58  ;;  %v119_v5 = vsel %vm114_vm0, %v116_v58, %v118_v59  ;;  %v121_v7 = vsel %vm114_vm0, %v118_v59, %v120_v60  ;;  %v123_v4 = vsel %vm114_vm0, %v120_v60, %v122_v61  ;;  %s8531_s19 = smov 121   ;;  %s8534_s20 = smov 97  }
  0x13   :  { %v125_v12 = vsel %vm114_vm0, %v122_v61, %v124_v62  ;;  %v127_v43 = vsel %vm114_vm0, %v124_v62, %v126_v63  ;;  %v129_v44 = vsel %vm114_vm0, %v126_v63, %v128_v0  ;;  %v131_v45 = vsel %vm114_vm0, %v128_v0, %v130_v11  ;;  %s8532_s21 = smov 89   ;;  %s5349_s22 = smov 81  }
  0x14   :  { %v132_v46 = vrot.slane %v95_v52, 1  ;;  %v134_v47 = vrot.slane %v96_v53, 1  ;;  %v136_v48 = vrot.slane %v97_v54, 1  ;;  %v138_v49 = vrot.slane %v98_v55, 1  ;;  %s5350_s23 = smov 113   ;;  %s5351_s24 = smov 73  }
  0x15   :  { %vm200_vm1 = vcmask 1045504   ;;  %v140_v50 = vrot.slane %v99_v56, 1  ;;  %v155_v51 = vadd.f32 %v117_v1, %v56_v25  ;;  %v156_v57 = vadd.f32 %v119_v5, %v57_v26  ;;  %s5352_s25 = smov 105   ;;  %s5353_s26 = smov 127  }
  0x16   :  { %v157_v58 = vadd.f32 %v121_v7, %v58_v27  ;;  %v133_v59 = vsel %vm114_vm0, %v130_v11, %v132_v46  ;;  %v135_v60 = vsel %vm114_vm0, %v132_v46, %v134_v47  ;;  %v137_v61 = vsel %vm114_vm0, %v134_v47, %v136_v48  ;;  %s5354_s27 = smov 8   ;;  %s5355_s28 = smov 7  }
  0x17   :  { %v139_v62 = vsel %vm114_vm0, %v136_v48, %v138_v49  ;;  %v141_v63 = vsel %vm114_vm0, %v138_v49, %v140_v50  ;;  %v158_v0 = vadd.f32 %v123_v4, %v59_v28  ;;  %v159_v52 = vadd.f32 %v125_v12, %v60_v32  ;;  %s5356_s29 = smov 15   ;;  %s8547_s30 = smov 16  }
  0x18   :  { %v160_v53 = vadd.f32 %v127_v43, %v61_v33  ;;  %v161_v54 = vadd.f32 %v129_v44, %v62_v34  ;;  %v162_v55 = vadd.f32 %v131_v45, %v63_v35  ;;  %v163_v6 = vadd.f32 %v133_v59, %v64_v37  ;;  %s8537_s11 = smov 24   ;;  %s5359_s12 = smov 126  }
  0x19   :  { %v164_v56 = vadd.f32 %v135_v60, %v65_v38  ;;  %v165_v1 = vadd.f32 %v137_v61, %v66_v39  ;;  %v166_v5 = vadd.f32 %v139_v62, %v67_v40  ;;  %v167_v7 = vadd.f32 %v141_v63, %v68_v42  ;;  %s5360_s13 = smov 23   ;;  %s8586_s14 = smov 6  }
  0x1a   :  { %v172_v25 = vmul.f32 %v5506_v13, %v5488_v8  ;;  %v173_v26 = vmul.f32 %v5506_v13, %v5493_v9  ;;  %v174_v27 = vmul.f32 %v5506_v13, %v5498_v10  ;;  %v175_v4 = vmul.f32 %v5506_v13, %v5514_v15  ;;  %s8580_s15 = smov 31   ;;  %s8535_s16 = smov 14  }
  0x1b   :  { %v176_v28 = vmul.f32 %v5506_v13, %v5519_v16  ;;  %v177_v32 = vmul.f32 %v5506_v13, %v5524_v17  ;;  %v178_v33 = vmul.f32 %v5506_v13, %v5543_v22  ;;  %v179_v8 = vmul.f32 %v5506_v13, %v5548_v23  ;;  %s8576_s17 = smov 40   ;;  %s8584_s18 = smov 22  }
  0x1c   :  { %v180_v9 = vmul.f32 %v5506_v13, %v5553_v24  ;;  %v181_v10 = vmul.f32 %v5506_v13, %v5562_v29  ;;  %v182_v15 = vmul.f32 %v5506_v13, %v5567_v30  ;;  %v183_v16 = vmul.f32 %v5506_v13, %v5572_v31 }
  0x1d   :  { %v184_v17 = vmul.f32 %v5506_v13, %v5581_v36  ;;  %v185_v22 = vmul.f32 %v5506_v13, %v5590_v41  ;;  %v201_v34 = vrot.slane %v172_v25, 2  ;;  %v202_v23 = vrot.slane %v173_v26, 2  ;;  %v5664_v26 = vld [vmem:[%s8511_s0 + $0x70] sm:$0xff] }
  0x1e   :  { %v204_v35 = vrot.slane %v174_v27, 2  ;;  %v206_v37 = vrot.slane %v175_v4, 2  ;;  %v208_v24 = vrot.slane %v176_v28, 2  ;;  %v210_v38 = vrot.slane %v177_v32, 2  ;;  %v5684_v32 = vld [vmem:[%s8511_s0 + $0x98] sm:$0xff] }
  0x1f   :  { %v212_v39 = vrot.slane %v178_v33, 2  ;;  %v203_v29 = vsel %vm200_vm1, %v201_v34, %v202_v23  ;;  %v214_v40 = vrot.slane %v179_v8, 2  ;;  %v216_v42 = vrot.slane %v180_v9, 2 }
  0x20   :  { %v205_v30 = vsel %vm200_vm1, %v202_v23, %v204_v35  ;;  %v207_v31 = vsel %vm200_vm1, %v204_v35, %v206_v37  ;;  %v209_v36 = vsel %vm200_vm1, %v206_v37, %v208_v24  ;;  %v211_v11 = vsel %vm200_vm1, %v208_v24, %v210_v38  ;;  %v5733_v23 = vld [vmem:[%s8511_s0 + $0xc8] sm:$0xff]  ;;  %v5738_v35 = vld [vmem:[%s8511_s0 + $0xd0] sm:$0xff] }
  0x21   :  { %v213_v13 = vsel %vm200_vm1, %v210_v38, %v212_v39  ;;  %v215_v41 = vsel %vm200_vm1, %v212_v39, %v214_v40  ;;  %v217_v12 = vsel %vm200_vm1, %v214_v40, %v216_v42  ;;  %v218_v43 = vrot.slane %v181_v10, 2 }
  0x22   :  { %v220_v44 = vrot.slane %v182_v15, 2  ;;  %v222_v45 = vrot.slane %v183_v16, 2  ;;  %v224_v46 = vrot.slane %v184_v17, 2  ;;  %v226_v47 = vrot.slane %v185_v22, 2 }
  0x23   :  { %v241_v48 = vadd.f32 %v203_v29, %v155_v51  ;;  %v219_v49 = vsel %vm200_vm1, %v216_v42, %v218_v43  ;;  %v242_v59 = vadd.f32 %v205_v30, %v156_v57  ;;  %v243_v60 = vadd.f32 %v207_v31, %v157_v58  ;;  %v5669_v51 = vld [vmem:[%s8511_s0 + $0x78] sm:$0xff]  ;;  %v5674_v57 = vld [vmem:[%s8511_s0 + $0x80] sm:$0xff] }
  0x24   :  { %v221_v50 = vsel %vm200_vm1, %v218_v43, %v220_v44  ;;  %v223_v61 = vsel %vm200_vm1, %v220_v44, %v222_v45  ;;  %v225_v62 = vsel %vm200_vm1, %v222_v45, %v224_v46  ;;  %v227_v63 = vsel %vm200_vm1, %v224_v46, %v226_v47 }
  0x25   :  { %v244_v25 = vadd.f32 %v209_v36, %v158_v0  ;;  %v245_v58 = vadd.f32 %v211_v11, %v159_v52  ;;  %v246_v27 = vadd.f32 %v213_v13, %v160_v53  ;;  %v247_v4 = vadd.f32 %v215_v41, %v161_v54  ;;  %v5679_v0 = vld [vmem:[%s8511_s0 + $0x90] sm:$0xff]  ;;  %v5689_v52 = vld [vmem:[%s8511_s0 + $0xa8] sm:$0xff]  ;;  %v5694_v53 = vld [vmem:[%s8511_s0 + $0xb8] sm:$0xff] }
  0x26   :  { %v248_v28 = vadd.f32 %v217_v12, %v162_v55  ;;  %v249_v33 = vadd.f32 %v219_v49, %v163_v6  ;;  %v250_v8 = vadd.f32 %v221_v50, %v164_v56  ;;  %v251_v9 = vadd.f32 %v223_v61, %v165_v1  ;;  %v5699_v54 = vld [vmem:[%s8511_s0 + $0xc0] sm:$0xff]  ;;  %v5704_v6 = vld [vmem:[%s8511_s0 + $0x88] sm:$0xff] }
  0x27   :  { %v252_v10 = vadd.f32 %v225_v62, %v166_v5  ;;  %v253_v55 = vadd.f32 %v227_v63, %v167_v7  ;;  %v5709_v56 = vld [vmem:[%s8511_s0 + $0xa0] sm:$0xff]  ;;  %v273_v1 = vmul.f32 %v5664_v26, %v5528_v18  ;;  %v274_v5 = vmul.f32 %v5669_v51, %v5528_v18  ;;  %v5720_v7 = vld [vmem:[%s8511_s0 + $0xb0] sm:$0xff] }
  0x28   :  { %v275_v15 = vmul.f32 %v5674_v57, %v5528_v18  ;;  %v276_v16 = vmul.f32 %v5704_v6, %v5528_v18  ;;  %v277_v17 = vmul.f32 %v5679_v0, %v5528_v18  ;;  %v278_v22 = vmul.f32 %v5684_v32, %v5528_v18 }
  0x29   :  { %v279_v34 = vmul.f32 %v5709_v56, %v5528_v18  ;;  %v280_v37 = vmul.f32 %v5689_v52, %v5528_v18  ;;  %v281_v24 = vmul.f32 %v5720_v7, %v5528_v18  ;;  %v282_v38 = vmul.f32 %v5694_v53, %v5528_v18 }
  0x2a   :  { %v283_v39 = vmul.f32 %v5699_v54, %v5528_v18  ;;  %v284_v29 = vmul.f32 %v5733_v23, %v5528_v18  ;;  %v285_v30 = vmul.f32 %v5738_v35, %v5528_v18  ;;  %v286_v40 = vadd.f32 %v273_v1, %v241_v48  ;;  %v5757_v18 = vld [vmem:[%s8511_s0 + $0xd8] sm:$0x3] }
  0x2b   :  { %v287_v42 = vadd.f32 %v274_v5, %v242_v59  ;;  %v288_v31 = vadd.f32 %v275_v15, %v243_v60  ;;  %v289_v36 = vadd.f32 %v276_v16, %v244_v25  ;;  %v290_v11 = vadd.f32 %v277_v17, %v245_v58 }
  0x2c   :  { %v291_v13 = vadd.f32 %v278_v22, %v246_v27  ;;  %v292_v41 = vadd.f32 %v279_v34, %v247_v4  ;;  %v293_v12 = vadd.f32 %v280_v37, %v248_v28  ;;  %v294_v43 = vadd.f32 %v281_v24, %v249_v33 }
  0x2d   :  { %v295_v44 = vadd.f32 %v282_v38, %v250_v8  ;;  %v296_v45 = vadd.f32 %v283_v39, %v251_v9  ;;  %v297_v46 = vadd.f32 %v284_v29, %v252_v10  ;;  %v298_v47 = vadd.f32 %v285_v30, %v253_v55 }
  0x2e   :  { %v303_v49 = vmul.f32 %v5664_v26, %v5532_v19  ;;  %v304_v48 = vmul.f32 %v5669_v51, %v5532_v19  ;;  %v305_v50 = vmul.f32 %v5674_v57, %v5532_v19  ;;  %v306_v59 = vmul.f32 %v5704_v6, %v5532_v19 }
  0x2f   :  { %v307_v60 = vmul.f32 %v5679_v0, %v5532_v19  ;;  %v308_v61 = vmul.f32 %v5684_v32, %v5532_v19  ;;  %v309_v62 = vmul.f32 %v5709_v56, %v5532_v19  ;;  %v310_v63 = vmul.f32 %v5689_v52, %v5532_v19 }
  0x30   :  { %v311_v25 = vmul.f32 %v5720_v7, %v5532_v19  ;;  %v312_v58 = vmul.f32 %v5694_v53, %v5532_v19  ;;  %v313_v27 = vmul.f32 %v5699_v54, %v5532_v19  ;;  %v314_v4 = vmul.f32 %v5733_v23, %v5532_v19 }
  0x31   :  { %v315_v28 = vmul.f32 %v5738_v35, %v5532_v19  ;;  %v316_v33 = vmul.f32 %v5757_v18, %v5532_v19  ;;  %v331_v8 = vrot.slane %v303_v49, 1  ;;  %v332_v9 = vrot.slane %v304_v48, 1 }
  0x32   :  { %v334_v10 = vrot.slane %v305_v50, 1  ;;  %v336_v55 = vrot.slane %v306_v59, 1  ;;  %v338_v1 = vrot.slane %v307_v60, 1  ;;  %v340_v5 = vrot.slane %v308_v61, 1 }
  0x33   :  { %v342_v15 = vrot.slane %v309_v62, 1  ;;  %v333_v16 = vsel %vm114_vm0, %v331_v8, %v332_v9  ;;  %v344_v22 = vrot.slane %v310_v63, 1  ;;  %v346_v34 = vrot.slane %v311_v25, 1 }
  0x34   :  { %v335_v17 = vsel %vm114_vm0, %v332_v9, %v334_v10  ;;  %v337_v37 = vsel %vm114_vm0, %v334_v10, %v336_v55  ;;  %v339_v24 = vsel %vm114_vm0, %v336_v55, %v338_v1  ;;  %v341_v38 = vsel %vm114_vm0, %v338_v1, %v340_v5  ;;  %v5830_v1 = vld [vmem:[%s8511_s0 + $0xe0] sm:$0xff] }
  0x35   :  { %v343_v19 = vsel %vm114_vm0, %v340_v5, %v342_v15  ;;  %v345_v39 = vsel %vm114_vm0, %v342_v15, %v344_v22  ;;  %v347_v29 = vsel %vm114_vm0, %v344_v22, %v346_v34  ;;  %v348_v30 = vrot.slane %v312_v58, 1 }
  0x36   :  { %v350_v49 = vrot.slane %v313_v27, 1  ;;  %v352_v48 = vrot.slane %v314_v4, 1  ;;  %v354_v50 = vrot.slane %v315_v28, 1  ;;  %v356_v59 = vrot.slane %v316_v33, 1 }
  0x37   :  { %v5793_v60 = vadd.f32 %v333_v16, %v286_v40  ;;  %v349_v61 = vsel %vm114_vm0, %v346_v34, %v348_v30  ;;  %v5797_v63 = vadd.f32 %v335_v17, %v287_v42  ;;  %v5799_v25 = vadd.f32 %v337_v37, %v288_v31  ;;  %v5809_v40 = vld [vmem:[%s8512_s1 + $0x8] ss:$0 sm:$0xff]  ;;  %s8582_s1 = smov 32  }
  0x38   :  { %v351_v62 = vsel %vm114_vm0, %v348_v30, %v350_v49  ;;  %v353_v8 = vsel %vm114_vm0, %v350_v49, %v352_v48  ;;  %v355_v9 = vsel %vm114_vm0, %v352_v48, %v354_v50  ;;  %v357_v58 = vsel %vm114_vm0, %v354_v50, %v356_v59 }
  0x39   :  { %v5804_v27 = vadd.f32 %v339_v24, %v289_v36  ;;  %v5811_v4 = vadd.f32 %v341_v38, %v290_v11  ;;  %v5813_v28 = vadd.f32 %v343_v19, %v291_v13  ;;  %v5815_v42 = vadd.f32 %v345_v39, %v292_v41  ;;  %v5839_v41 = vld [vmem:[%s8511_s0 + $0xe8] sm:$0xff] }
  0x3a   :  { %v5817_v31 = vadd.f32 %v347_v29, %v293_v12  ;;  %v5819_v33 = vadd.f32 %v349_v61, %v294_v43  ;;  %v5821_v10 = vadd.f32 %v351_v62, %v295_v44  ;;  %v5823_v55 = vadd.f32 %v353_v8, %v296_v45  ;;  %v5844_v12 = vld [vmem:[%s8511_s0 + $0xf0] sm:$0xff]  ;;  %v5849_v43 = vld [vmem:[%s8511_s0 + $0xf8] sm:$0xff] }
  0x3b   :  { %v5825_v36 = vadd.f32 %v355_v9, %v297_v46  ;;  %v5832_v11 = vadd.f32 %v357_v58, %v298_v47  ;;  %v387_v13 = vrot.slane %v5468_v2, %v5509_v14  ;;  %v5853_v44 = vrot.slane %v5468_v2, %v5535_v20 }
  0x3c   :  { %v5857_v45 = vrot.slane %v5468_v2, %v5538_v21  ;;  %v5861_v46 = vmul.f32 %v5809_v40, %v5830_v1  ;;  %v5865_v47 = vmul.f32 %v5809_v40, %v5839_v41  ;;  %v5869_v5 = vmul.f32 %v5809_v40, %v5844_v12 }
  0x3d   :  { %v5873_v15 = vmul.f32 %v5809_v40, %v5849_v43  ;;  %v388_v16 = vmul.f32 %v5664_v26, %v387_v13  ;;  %v389_v2 = vmul.f32 %v5669_v51, %v387_v13  ;;  %v390_v17 = vmul.f32 %v5674_v57, %v387_v13 }
  0x3e   :  { %v391_v22 = vmul.f32 %v5704_v6, %v387_v13  ;;  %v392_v34 = vmul.f32 %v5679_v0, %v387_v13  ;;  %v393_v37 = vmul.f32 %v5684_v32, %v387_v13  ;;  %v394_v24 = vmul.f32 %v5709_v56, %v387_v13 }
  0x3f   :  { %v395_v38 = vmul.f32 %v5689_v52, %v387_v13  ;;  %v396_v19 = vmul.f32 %v5720_v7, %v387_v13  ;;  %v397_v39 = vmul.f32 %v5694_v53, %v387_v13  ;;  %v398_v26 = vmul.f32 %v5699_v54, %v387_v13 }
  0x40   :  { %v399_v51 = vmul.f32 %v5733_v23, %v387_v13  ;;  %v400_v57 = vmul.f32 %v5738_v35, %v387_v13  ;;  %v401_v6 = vmul.f32 %v5757_v18, %v387_v13  ;;  %v416_v29 = vrot.slane %v388_v16, 2 }
  0x41   :  { %v417_v0 = vrot.slane %v389_v2, 2  ;;  %v419_v30 = vrot.slane %v390_v17, 2  ;;  %v421_v32 = vrot.slane %v391_v22, 2  ;;  %v423_v49 = vrot.slane %v392_v34, 2 }
  0x42   :  { %v425_v56 = vrot.slane %v393_v37, 2  ;;  %v427_v48 = vrot.slane %v394_v24, 2  ;;  %v429_v7 = vrot.slane %v395_v38, 2  ;;  %v431_v50 = vrot.slane %v396_v19, 2 }
  0x43   :  { %v418_v52 = vsel %vm200_vm1, %v416_v29, %v417_v0  ;;  %v420_v53 = vsel %vm200_vm1, %v417_v0, %v419_v30  ;;  %v422_v54 = vsel %vm200_vm1, %v419_v30, %v421_v32  ;;  %v424_v23 = vsel %vm200_vm1, %v421_v32, %v423_v49  ;;  %v5947_v29 = vld [vmem:[%s8511_s0 + $0x110] sm:$0xff] }
  0x44   :  { %v426_v35 = vsel %vm200_vm1, %v423_v49, %v425_v56  ;;  %v428_v18 = vsel %vm200_vm1, %v425_v56, %v427_v48  ;;  %v430_v59 = vsel %vm200_vm1, %v427_v48, %v429_v7  ;;  %v432_v61 = vsel %vm200_vm1, %v429_v7, %v431_v50  ;;  %v5965_v49 = vld [vmem:[%s8511_s0 + $0x138] sm:$0xff]  ;;  %v5970_v56 = vld [vmem:[%s8511_s0 + $0x140] sm:$0xff] }
  0x45   :  { %v433_v62 = vrot.slane %v397_v39, 2  ;;  %v435_v8 = vrot.slane %v398_v26, 2  ;;  %v437_v9 = vrot.slane %v399_v51, 2  ;;  %v439_v58 = vrot.slane %v400_v57, 2  ;;  %v5931_v57 = vld [vmem:[%s8511_s0 + $0x128] sm:$0xff] }
  0x46   :  { %v441_v13 = vrot.slane %v401_v6, 2  ;;  %v456_v2 = vadd.f32 %v418_v52, %v5793_v60  ;;  %v457_v17 = vadd.f32 %v420_v53, %v5797_v63  ;;  %v458_v22 = vadd.f32 %v422_v54, %v5799_v25  ;;  %v5912_v63 = vld [vmem:[%s8511_s0 + $0x100] sm:$0xff]  ;;  %v5917_v25 = vld [vmem:[%s8511_s0 + $0x108] sm:$0xff] }
  0x47   :  { %v434_v16 = vsel %vm200_vm1, %v431_v50, %v433_v62  ;;  %v436_v34 = vsel %vm200_vm1, %v433_v62, %v435_v8  ;;  %v438_v37 = vsel %vm200_vm1, %v435_v8, %v437_v9  ;;  %v440_v24 = vsel %vm200_vm1, %v437_v9, %v439_v58 }
  0x48   :  { %v442_v38 = vsel %vm200_vm1, %v439_v58, %v441_v13  ;;  %v459_v19 = vadd.f32 %v424_v23, %v5804_v27  ;;  %v460_v39 = vadd.f32 %v426_v35, %v5811_v4  ;;  %v461_v26 = vadd.f32 %v428_v18, %v5813_v28 }
  0x49   :  { %v462_v60 = vadd.f32 %v430_v59, %v5815_v42  ;;  %v463_v51 = vadd.f32 %v432_v61, %v5817_v31  ;;  %v464_v27 = vadd.f32 %v434_v16, %v5819_v33  ;;  %v465_v4 = vadd.f32 %v436_v34, %v5821_v10  ;;  %v5926_v42 = vld [vmem:[%s8511_s0 + $0x118] sm:$0xff]  ;;  %v5938_v33 = vld [vmem:[%s8511_s0 + $0x130] sm:$0xff] }
  0x4a   :  { %v466_v28 = vadd.f32 %v438_v37, %v5823_v55  ;;  %v467_v6 = vadd.f32 %v440_v24, %v5825_v36  ;;  %v468_v31 = vadd.f32 %v442_v38, %v5832_v11  ;;  %v488_v10 = vmul.f32 %v5830_v1, %v5853_v44  ;;  %v5952_v36 = vld [vmem:[%s8511_s0 + $0x120] sm:$0xff]  ;;  %v5989_v38 = vld [vmem:[%s8511_s0 + $0x148] sm:$0x3]  ;;  %s8533_s0 = smov 1  }
  0x4b   :  { %v489_v55 = vmul.f32 %v5839_v41, %v5853_v44  ;;  %v490_v11 = vmul.f32 %v5844_v12, %v5853_v44  ;;  %v491_v0 = vmul.f32 %v5849_v43, %v5853_v44  ;;  %v492_v30 = vmul.f32 %v5912_v63, %v5853_v44 }
  0x4c   :  { %v493_v32 = vmul.f32 %v5917_v25, %v5853_v44  ;;  %v494_v52 = vmul.f32 %v5947_v29, %v5853_v44  ;;  %v495_v48 = vmul.f32 %v5926_v42, %v5853_v44  ;;  %v496_v7 = vmul.f32 %v5952_v36, %v5853_v44 }
  0x4d   :  { %v497_v50 = vmul.f32 %v5931_v57, %v5853_v44  ;;  %v498_v53 = vmul.f32 %v5938_v33, %v5853_v44  ;;  %v499_v54 = vmul.f32 %v5965_v49, %v5853_v44  ;;  %v500_v23 = vmul.f32 %v5970_v56, %v5853_v44 }
  0x4e   :  { %v501_v35 = vadd.f32 %v488_v10, %v456_v2  ;;  %v502_v18 = vadd.f32 %v489_v55, %v457_v17  ;;  %v503_v59 = vadd.f32 %v490_v11, %v458_v22  ;;  %v504_v61 = vadd.f32 %v491_v0, %v459_v19 }
  0x4f   :  { %v505_v62 = vadd.f32 %v492_v30, %v460_v39  ;;  %v506_v8 = vadd.f32 %v493_v32, %v461_v26  ;;  %v507_v9 = vadd.f32 %v494_v52, %v462_v60  ;;  %v508_v58 = vadd.f32 %v495_v48, %v463_v51 }
  0x50   :  { %v509_v13 = vadd.f32 %v496_v7, %v464_v27  ;;  %v510_v16 = vadd.f32 %v497_v50, %v465_v4  ;;  %v511_v34 = vadd.f32 %v498_v53, %v466_v28  ;;  %v512_v37 = vadd.f32 %v499_v54, %v467_v6 }
  0x51   :  { %v513_v24 = vadd.f32 %v500_v23, %v468_v31  ;;  %v518_v44 = vmul.f32 %v5830_v1, %v5857_v45  ;;  %v519_v2 = vmul.f32 %v5839_v41, %v5857_v45  ;;  %v520_v17 = vmul.f32 %v5844_v12, %v5857_v45 }
  0x52   :  { %v521_v22 = vmul.f32 %v5849_v43, %v5857_v45  ;;  %v522_v19 = vmul.f32 %v5912_v63, %v5857_v45  ;;  %v523_v39 = vmul.f32 %v5917_v25, %v5857_v45  ;;  %v524_v26 = vmul.f32 %v5947_v29, %v5857_v45 }
  0x53   :  { %v525_v1 = vmul.f32 %v5926_v42, %v5857_v45  ;;  %v526_v41 = vmul.f32 %v5952_v36, %v5857_v45  ;;  %v527_v12 = vmul.f32 %v5931_v57, %v5857_v45  ;;  %v528_v43 = vmul.f32 %v5938_v33, %v5857_v45 }
  0x54   :  { %v529_v60 = vmul.f32 %v5965_v49, %v5857_v45  ;;  %v530_v51 = vmul.f32 %v5970_v56, %v5857_v45  ;;  %v531_v27 = vmul.f32 %v5989_v38, %v5857_v45  ;;  %v546_v4 = vrot.slane %v518_v44, 1 }
  0x55   :  { %v547_v28 = vrot.slane %v519_v2, 1  ;;  %v549_v6 = vrot.slane %v520_v17, 1  ;;  %v551_v31 = vrot.slane %v521_v22, 1  ;;  %v553_v10 = vrot.slane %v522_v19, 1 }
  0x56   :  { %v555_v55 = vrot.slane %v523_v39, 1  ;;  %v557_v0 = vrot.slane %v524_v26, 1  ;;  %v559_v30 = vrot.slane %v525_v1, 1  ;;  %v561_v32 = vrot.slane %v526_v41, 1 }
  0x57   :  { %v548_v11 = vsel %vm114_vm0, %v546_v4, %v547_v28  ;;  %v550_v52 = vsel %vm114_vm0, %v547_v28, %v549_v6  ;;  %v552_v48 = vsel %vm114_vm0, %v549_v6, %v551_v31  ;;  %v554_v7 = vsel %vm114_vm0, %v551_v31, %v553_v10 }
  0x58   :  { %v556_v50 = vsel %vm114_vm0, %v553_v10, %v555_v55  ;;  %v558_v45 = vsel %vm114_vm0, %v555_v55, %v557_v0  ;;  %v560_v53 = vsel %vm114_vm0, %v557_v0, %v559_v30  ;;  %v562_v54 = vsel %vm114_vm0, %v559_v30, %v561_v32 }
  0x59   :  { %v563_v23 = vrot.slane %v527_v12, 1  ;;  %v565_v44 = vrot.slane %v528_v43, 1  ;;  %v567_v2 = vrot.slane %v529_v60, 1  ;;  %v569_v17 = vrot.slane %v530_v51, 1 }
  0x5a   :  { %v571_v22 = vrot.slane %v531_v27, 1  ;;  %v586_v39 = vadd.f32 %v548_v11, %v501_v35  ;;  %v587_v26 = vadd.f32 %v550_v52, %v502_v18  ;;  %v588_v1 = vadd.f32 %v552_v48, %v503_v59 }
  0x5b   :  { %v564_v19 = vsel %vm114_vm0, %v561_v32, %v563_v23  ;;  %v566_v41 = vsel %vm114_vm0, %v563_v23, %v565_v44  ;;  %v568_v4 = vsel %vm114_vm0, %v565_v44, %v567_v2  ;;  %v570_v28 = vsel %vm114_vm0, %v567_v2, %v569_v17 }
  0x5c   :  { %v572_v6 = vsel %vm114_vm0, %v569_v17, %v571_v22  ;;  %v589_v31 = vadd.f32 %v554_v7, %v504_v61  ;;  %v590_v10 = vadd.f32 %v556_v50, %v505_v62  ;;  %v591_v12 = vadd.f32 %v558_v45, %v506_v8 }
  0x5d   :  { %v592_v43 = vadd.f32 %v560_v53, %v507_v9  ;;  %v593_v60 = vadd.f32 %v562_v54, %v508_v58  ;;  %v594_v51 = vadd.f32 %v564_v19, %v509_v13  ;;  %v595_v27 = vadd.f32 %v566_v41, %v510_v16 }
  0x5e   :  { %v596_v55 = vadd.f32 %v568_v4, %v511_v34  ;;  %v597_v0 = vadd.f32 %v570_v28, %v512_v37  ;;  %v598_v35 = vadd.f32 %v572_v6, %v513_v24  ;;  %v607_v18 = vmul.f32 %v5809_v40, %v5912_v63 }
  0x5f   :  { %v608_v59 = vmul.f32 %v5809_v40, %v5917_v25  ;;  %v609_v11 = vmul.f32 %v5809_v40, %v5947_v29  ;;  %v610_v61 = vmul.f32 %v5809_v40, %v5926_v42  ;;  %v611_v62 = vmul.f32 %v5809_v40, %v5952_v36 }
  0x60   :  { %v612_v8 = vmul.f32 %v5809_v40, %v5931_v57  ;;  %v613_v9 = vmul.f32 %v5809_v40, %v5938_v33  ;;  %v614_v63 = vmul.f32 %v5809_v40, %v5965_v49  ;;  %v615_v25 = vmul.f32 %v5809_v40, %v5970_v56 }
  0x61   :  { %v616_v29 = vmul.f32 %v5809_v40, %v5989_v38  ;;  %v631_v42 = vrot.slane %v5861_v46, 2  ;;  %v632_v58 = vrot.slane %v5865_v47, 2  ;;  %v634_v36 = vrot.slane %v5869_v5, 2 }
  0x62   :  { %v636_v57 = vrot.slane %v5873_v15, 2  ;;  %v638_v13 = vrot.slane %v607_v18, 2  ;;  %v640_v16 = vrot.slane %v608_v59, 2  ;;  %v642_v33 = vrot.slane %v609_v11, 2 }
  0x63   :  { %v644_v34 = vrot.slane %v610_v61, 2  ;;  %v633_v49 = vsel %vm200_vm1, %v631_v42, %v632_v58  ;;  %v635_v37 = vsel %vm200_vm1, %v632_v58, %v634_v36  ;;  %v646_v24 = vrot.slane %v611_v62, 2 }
  0x64   :  { %v637_v56 = vsel %vm200_vm1, %v634_v36, %v636_v57  ;;  %vm699_vm2 = vcmask 520192   ;;  %vm708_vm3 = vcmask 523269   ;;  %v639_v40 = vsel %vm200_vm1, %v636_v57, %v638_v13 }
  0x65   :  { %v641_v46 = vsel %vm200_vm1, %v638_v13, %v640_v16  ;;  %v643_v47 = vsel %vm200_vm1, %v640_v16, %v642_v33  ;;  %v645_v5 = vsel %vm200_vm1, %v642_v33, %v644_v34  ;;  %vm697_vm4 = vcmask 523264  }
  0x66   :  { %vm711_vm5 = vcmask 517120   ;;  %vm721_vm6 = vcmask 523266   ;;  %v647_v15 = vsel %vm200_vm1, %v644_v34, %v646_v24  ;;  %v648_v38 = vrot.slane %v612_v8, 2 }
  0x67   :  { %v650_v30 = vrot.slane %v613_v9, 2  ;;  %v652_v32 = vrot.slane %v614_v63, 2  ;;  %vm723_vm7 = vcmask 522240   ;;  %vm732_vm8 = vcmask 523271  }
  0x68   :  { %v654_v52 = vrot.slane %v615_v25, 2  ;;  %v656_v48 = vrot.slane %v616_v29, 2  ;;  %v671_v7 = vadd.f32 %v633_v49, %v586_v39  ;;  %v672_v50 = vadd.f32 %v635_v37, %v587_v26 }
  0x69   :  { %vm735_vm9 = vcmask 519168   ;;  %v649_v45 = vsel %vm200_vm1, %v646_v24, %v648_v38  ;;  %v651_v53 = vsel %vm200_vm1, %v648_v38, %v650_v30  ;;  %v653_v54 = vsel %vm200_vm1, %v650_v30, %v652_v32 }
  0x6a   :  { %v673_v23 = vadd.f32 %v637_v56, %v588_v1  ;;  %v655_v44 = vsel %vm200_vm1, %v652_v32, %v654_v52  ;;  %v657_v2 = vsel %vm200_vm1, %v654_v52, %v656_v48  ;;  %v674_v17 = vadd.f32 %v639_v40, %v589_v31 }
  0x6b   :  { %v675_v22 = vadd.f32 %v641_v46, %v590_v10  ;;  %v676_v19 = vadd.f32 %v643_v47, %v591_v12  ;;  %v677_v41 = vadd.f32 %v645_v5, %v592_v43  ;;  %v678_v4 = vadd.f32 %v647_v15, %v593_v60 }
  0x6c   :  { %v679_v28 = vadd.f32 %v649_v45, %v594_v51  ;;  %v680_v39 = vadd.f32 %v651_v53, %v595_v27  ;;  %v6069_v26 = vadd.f32 %v653_v54, %v596_v55  ;;  %v6071_v6 = vadd.f32 %v655_v44, %v597_v0 }
  0x6d   :  { %v6073_v18 = vadd.f32 %v657_v2, %v598_v35  ;;  %v684_v59 = vmax.f32 %v671_v7, 0.0  ;;  %v685_v11 = vmax.f32 %v672_v50, 0.0  ;;  %v686_v1 = vmax.f32 %v673_v23, 0.0 }
  0x6e   :  { %v687_v61 = vmax.f32 %v674_v17, 0.0  ;;  %v688_v62 = vmax.f32 %v675_v22, 0.0  ;;  %v689_v8 = vmax.f32 %v676_v19, 0.0  ;;  %v690_v9 = vmax.f32 %v677_v41, 0.0 }
  0x6f   :  { %v691_v31 = vmax.f32 %v678_v4, 0.0  ;;  %v692_v10 = vmax.f32 %v679_v28, 0.0  ;;  %v693_v12 = vmax.f32 %v680_v39, 0.0  ;;  %v694_v43 = vmax.f32 %v6069_v26, 0.0 }
  0x70   :  { %v695_v60 = vmax.f32 %v6071_v6, 0.0  ;;  %v696_v51 = vmax.f32 %v6073_v18, 0.0  ;;  %v698_v27 = vsel %vm697_vm4, %v684_v59, -inf  ;;  %v700_v55 = vsel %vm699_vm2, %v685_v11, -inf }
  0x71   :  { %v709_v0 = vsel %vm708_vm3, %v685_v11, -inf  ;;  %v701_v35 = vmax.f32 %v698_v27, %v700_v55  ;;  %v710_v63 = vsel %vm697_vm4, %v686_v1, -inf  ;;  %v712_v25 = vsel %vm711_vm5, %v687_v61, -inf }
  0x72   :  { %v722_v29 = vsel %vm721_vm6, %v687_v61, -inf  ;;  %v713_v42 = vmax.f32 %v709_v0, %v710_v63  ;;  %v724_v58 = vsel %vm723_vm7, %v688_v62, -inf  ;;  %v733_v36 = vsel %vm732_vm8, %v688_v62, -inf }
  0x73   :  { %v734_v57 = vsel %vm697_vm4, %v689_v8, -inf  ;;  %v702_v13 = vrot.slane %v701_v35, 4  ;;  %v725_v16 = vmax.f32 %v722_v29, %v724_v58  ;;  %v736_v33 = vsel %vm735_vm9, %v690_v9, -inf }
  0x74   :  { %v737_v34 = vmax.f32 %v733_v36, %v734_v57  ;;  %v714_v49 = vmax.f32 %v713_v42, %v712_v25  ;;  %vm745_vm10 = vcmask 523268   ;;  %v747_v37 = vsel %vm697_vm4, %v691_v31, -inf }
  0x75   :  { %vm748_vm11 = vcmask 516096   ;;  %v703_v56 = vmax.f32 %v701_v35, %v702_v13  ;;  %v726_v24 = vrot.slane %v725_v16, 4  ;;  %v746_v46 = vsel %vm745_vm10, %v690_v9, -inf }
  0x76   :  { %v738_v40 = vmax.f32 %v737_v34, %v736_v33  ;;  %v715_v47 = vrot.slane %v714_v49, 4  ;;  %v749_v5 = vsel %vm748_vm11, %v692_v10, -inf  ;;  %v750_v15 = vmax.f32 %v746_v46, %v747_v37 }
  0x77   :  { %vm758_vm12 = vcmask 523265   ;;  %v704_v38 = vrot.slane %v703_v56, 2  ;;  %v727_v30 = vmax.f32 %v725_v16, %v726_v24  ;;  %vm760_vm13 = vcmask 521216  }
  0x78   :  { %v739_v32 = vrot.slane %v738_v40, 4  ;;  %v759_v52 = vsel %vm758_vm12, %v692_v10, -inf  ;;  %v716_v48 = vmax.f32 %v714_v49, %v715_v47  ;;  %v751_v7 = vmax.f32 %v750_v15, %v749_v5 }
  0x79   :  { %vm769_vm14 = vcmask 523270   ;;  %v705_v50 = vmax.f32 %v703_v56, %v704_v38  ;;  %v728_v45 = vrot.slane %v727_v30, 2  ;;  %v761_v54 = vsel %vm760_vm13, %v693_v12, -inf }
  0x7a   :  { %v740_v53 = vmax.f32 %v738_v40, %v739_v32  ;;  %v717_v23 = vrot.slane %v716_v48, 2  ;;  %v752_v44 = vrot.slane %v751_v7, 4  ;;  %v762_v2 = vmax.f32 %v759_v52, %v761_v54 }
  0x7b   :  { %v770_v17 = vsel %vm769_vm14, %v693_v12, -inf  ;;  %v706_v22 = vrot.slane %v705_v50, 1  ;;  %v729_v19 = vmax.f32 %v727_v30, %v728_v45  ;;  %v771_v4 = vsel %vm697_vm4, %v694_v43, -inf }
  0x7c   :  { %v741_v41 = vrot.slane %v740_v53, 2  ;;  %v718_v28 = vmax.f32 %v716_v48, %v717_v23  ;;  %v753_v39 = vmax.f32 %v751_v7, %v752_v44  ;;  %v763_v26 = vrot.slane %v762_v2, 4 }
  0x7d   :  { %vm772_vm15 = vcmask 518144   ;;  %v707_v59 = vmax.f32 %v705_v50, %v706_v22  ;;  %v730_v11 = vrot.slane %v729_v19, 1  ;;  %v774_v31 = vmax.f32 %v770_v17, %v771_v4 }
  0x7e   :  { %v742_v1 = vmax.f32 %v740_v53, %v741_v41  ;;  %v773_v61 = vsel %vm772_vm15, %v695_v60, -inf  ;;  %v719_v62 = vrot.slane %v718_v28, 1  ;;  %v754_v8 = vrot.slane %v753_v39, 2 }
  0x7f   :  { %v764_v9 = vmax.f32 %v762_v2, %v763_v26  ;;  %v731_v10 = vmax.f32 %v729_v19, %v730_v11  ;;  %vm782_vm2 = vcmask 523267   ;;  %v784_v43 = vsel %vm697_vm4, %v696_v51, -inf }
  0x80   :  { %v743_v12 = vrot.slane %v742_v1, 1  ;;  %v720_v27 = vmax.f32 %v718_v28, %v719_v62  ;;  %v755_v55 = vmax.f32 %v753_v39, %v754_v8  ;;  %v775_v35 = vmax.f32 %v774_v31, %v773_v61 }
  0x81   :  { %v765_v0 = vrot.slane %v764_v9, 2  ;;  %v783_v25 = vsel %vm782_vm2, %v695_v60, -inf  ;;  %vm792_vm3 = vcmask 1040384   ;;  %vm794_vm5 = vcmask 1041408  }
  0x82   :  { %v744_v63 = vmax.f32 %v742_v1, %v743_v12  ;;  %v756_v29 = vrot.slane %v755_v55, 1  ;;  %v776_v58 = vrot.slane %v775_v35, 4  ;;  %v785_v36 = vmax.f32 %v783_v25, %v784_v43 }
  0x83   :  { %v766_v42 = vmax.f32 %v764_v9, %v765_v0  ;;  %v793_v57 = vsel %vm792_vm3, %v707_v59, %v720_v27  ;;  %vm796_vm6 = vcmask 1042432   ;;  %vm798_vm4 = vcmask 1043456  }
  0x84   :  { %v757_v18 = vmax.f32 %v755_v55, %v756_v29  ;;  %v777_v51 = vmax.f32 %v775_v35, %v776_v58  ;;  %v786_v16 = vrot.slane %v785_v36, 4  ;;  %v795_v33 = vsel %vm794_vm5, %v793_v57, %v731_v10 }
  0x85   :  { %v767_v13 = vrot.slane %v766_v42, 1  ;;  %v797_v37 = vsel %vm796_vm6, %v795_v33, %v744_v63  ;;  %vm800_vm7 = vcmask 1044480   ;;  %vm814_vm8 = vcmask 7168  }
  0x86   :  { %v778_v34 = vrot.slane %v777_v51, 2  ;;  %v787_v49 = vmax.f32 %v785_v36, %v786_v16  ;;  %v799_v24 = vsel %vm798_vm4, %v797_v37, %v757_v18  ;;  %vm816_vm9 = vcmask 72704  }
  0x87   :  { %v768_v6 = vmax.f32 %v766_v42, %v767_v13  ;;  %vm879_vm10 = vcmask 64512   ;;  %vm882_vm11 = vcmask 130048   ;;  %vm885_vm12 = vcmask 195584  }
  0x88   :  { %v779_v60 = vmax.f32 %v777_v51, %v778_v34  ;;  %v788_v56 = vrot.slane %v787_v49, 2  ;;  %vm888_vm13 = vcmask 261120   ;;  %vm891_vm14 = vcmask 326656  }
  0x89   :  { %v801_v47 = vsel %vm800_vm7, %v799_v24, %v768_v6  ;;  %vm894_vm15 = vcmask 392192   ;;  %vm897_vm2 = vcmask 457728   ;;  %vm3488_vm5 = vcmask 31744  }
  0x8a   :  { %v780_v40 = vrot.slane %v779_v60, 1  ;;  %v789_v46 = vmax.f32 %v787_v49, %v788_v56  ;;  %vm3490_vm6 = vcmask 39936   ;;  %vm3492_vm4 = vcmask 48128  }
  0x8b   :  { %vm3494_vm7 = vcmask 56320  }
  0x8c   :  { %v781_v5 = vmax.f32 %v779_v60, %v780_v40  ;;  %v790_v15 = vrot.slane %v789_v46, 1 }
  0x8e   :  { %v791_v38 = vmax.f32 %v789_v46, %v790_v15  ;;  %v802_v30 = vsel %vm200_vm1, %v801_v47, %v781_v5 }
  0x90   :  { %v803_v32 = vsel %vm114_vm0, %v802_v30, %v791_v38 }
  0x91   :  { %811 = vrot.lane.b32.xlu0 %v803_v32, %s8533_s0  ;;  %1120 = vrot.lane.b32.xlu1 %v803_v32, %s8531_s19  ;;  %s8544_s19 = smov 56   ;;  %s8562_s0 = smov 38  }
  0x95   :  { %823 = vrot.lane.b32.xlu0 %v803_v32, %s8534_s20  ;;  %1130 = vrot.lane.b32.xlu1 %v803_v32, %s8532_s21  ;;  %s8564_s21 = smov 55   ;;  %s8560_s20 = smov 46  }
  0x99   :  { %1430 = vrot.lane.b32.xlu1 %v803_v32, %s5349_s22  ;;  %1420 = vrot.lane.b32.xlu0 %v803_v32, %s5350_s23  ;;  %s8578_s22 = smov 39   ;;  %s8566_s23 = smov 48  }
  0x9d   :  { %1730 = vrot.lane.b32.xlu1 %v803_v32, %s5351_s24  ;;  %1720 = vrot.lane.b32.xlu0 %v803_v32, %s5352_s25  ;;  %s8553_s24 = smov 47   ;;  %s8551_s25 = smov 30  }
 0x103   :  { %v812_v52 = vpop.permute.xlu0 %811  ;;  %v1121_v19 = vpop.permute.xlu1 %1120 }
 0x104   :  { %v815_v48 = vsel %vm814_vm8, 0.0, %v812_v52  ;;  %v1123_v41 = vsel %vm814_vm8, 0.0, %v1121_v19 }
 0x105   :  { %v817_v7 = vsel %vm816_vm9, %v815_v48, 0.0  ;;  %v1124_v4 = vsel %vm816_vm9, %v1123_v41, 0.0 }
 0x106   :  { %v819_v50 = vrot.slane %v817_v7, 7  ;;  %v1126_v28 = vrot.slane %v1124_v4, 7 }
 0x107   :  { %v824_v54 = vpop.permute.xlu0 %823  ;;  %v1131_v39 = vpop.permute.xlu1 %1130 }
 0x108   :  { %v6107_v45 = vsel %vm792_vm3, 0.0, %v819_v50  ;;  %v6114_v53 = vsel %vm792_vm3, %v819_v50, 0.0  ;;  %v826_v23 = vsel %vm814_vm8, 0.0, %v824_v54  ;;  %v6187_v26 = vsel %vm792_vm3, 0.0, %v1126_v28 }
 0x109   :  { %900 = vrot.lane.b32.xlu1 %v6107_v45, %s5353_s26  ;;  %835 = vrot.lane.b32.xlu0 %v6107_v45, %s5354_s27  ;;  %v827_v44 = vsel %vm816_vm9, %v826_v23, 0.0  ;;  %8595 = vst [vmem:[#allocation12_spill] sm:$0xff] %v6187_v26  ;;  %v1133_v59 = vsel %vm814_vm8, 0.0, %v1131_v39  ;;  %v6200_v61 = vsel %vm792_vm3, %v1126_v28, 0.0 }
 0x10a   :  { %v829_v2 = vrot.slane %v827_v44, 7  ;;  %v1134_v11 = vsel %vm816_vm9, %v1133_v59, 0.0  ;;  %8596 = vst [vmem:[#allocation13_spill] sm:$0xff] %v6200_v61 }
 0x10b   :  { %v1136_v1 = vrot.slane %v1134_v11, 7  ;;  %v6209_v8 = vpop.permute.xlu1 %1430  ;;  %v6211_v9 = vpop.permute.xlu0 %1420 }
 0x10c   :  { %v831_v17 = vsel %vm792_vm3, 0.0, %v829_v2  ;;  %v832_v22 = vsel %vm792_vm3, %v829_v2, 0.0  ;;  %v1423_v30 = vsel %vm814_vm8, 0.0, %v6211_v9 }
 0x10d   :  { %837 = vrot.lane.b32.xlu1 %v6114_v53, %s5354_s27  ;;  %906 = vrot.lane.b32.xlu0 %v6107_v45, %s5355_s28  ;;  %v6207_v62 = vsel %vm792_vm3, 0.0, %v1136_v1  ;;  %v1139_v29 = vsel %vm792_vm3, %v1136_v1, 0.0  ;;  %v1424_v48 = vsel %vm816_vm9, %v1423_v30, 0.0 }
 0x10e   :  { %v1426_v54 = vrot.slane %v1424_v48, 7 }
 0x10f   :  { %v6221_v31 = vpop.permute.xlu1 %1730  ;;  %v6223_v10 = vpop.permute.xlu0 %1720 }
 0x110   :  { %v6362_v2 = vsel %vm792_vm3, 0.0, %v1426_v54  ;;  %v6384_v59 = vsel %vm792_vm3, %v1426_v54, 0.0 }
 0x111   :  { %912 = vrot.lane.b32.xlu1 %v6107_v45, %s5356_s29  ;;  %841 = vrot.lane.b32.xlu0 %v6107_v45, %s8547_s30  ;;  %8598 = vst [vmem:[#allocation14_spill] sm:$0xff] %v6362_v2  ;;  %8600 = vst [vmem:[#allocation15_spill] sm:$0xff] %v6384_v59 }
 0x115   :  { %847 = vrot.lane.b32.xlu1 %v6107_v45, %s8537_s11  ;;  %843 = vrot.lane.b32.xlu0 %v6114_v53, %s8547_s30 }
 0x119   :  { %962 = vrot.lane.b32.xlu1 %v6107_v45, %s5359_s12  ;;  %918 = vrot.lane.b32.xlu0 %v6107_v45, %s5360_s13 }
 0x11d   :  { %849 = vrot.lane.b32.xlu1 %v6114_v53, %s8537_s11  ;;  %968 = vrot.lane.b32.xlu0 %v6107_v45, %s8586_s14 }
 0x121   :  { %902 = vrot.lane.b32.xlu1 %v6114_v53, %s5353_s26  ;;  %855 = vrot.lane.b32.xlu0 %v831_v17, %s8582_s1 }
 0x125   :  { %924 = vrot.lane.b32.xlu1 %v831_v17, %s8580_s15  ;;  %908 = vrot.lane.b32.xlu0 %v6114_v53, %s5355_s28 }
 0x129   :  { %857 = vrot.lane.b32.xlu1 %v832_v22, %s8582_s1  ;;  %974 = vrot.lane.b32.xlu0 %v6107_v45, %s8535_s16 }
 0x12d   :  { %914 = vrot.lane.b32.xlu1 %v6114_v53, %s5356_s29  ;;  %861 = vrot.lane.b32.xlu0 %v831_v17, %s8576_s17 }
 0x131   :  { %980 = vrot.lane.b32.xlu1 %v6107_v45, %s8584_s18  ;;  %930 = vrot.lane.b32.xlu0 %v831_v17, %s8578_s22 }
 0x135   :  { %867 = vrot.lane.b32.xlu1 %v831_v17, %s8566_s23  ;;  %863 = vrot.lane.b32.xlu0 %v832_v22, %s8576_s17 }
 0x139   :  { %936 = vrot.lane.b32.xlu1 %v831_v17, %s8553_s24  ;;  %920 = vrot.lane.b32.xlu0 %v6114_v53, %s5360_s13 }
 0x13d   :  { %970 = vrot.lane.b32.xlu1 %v6114_v53, %s8586_s14  ;;  %964 = vrot.lane.b32.xlu0 %v6114_v53, %s5359_s12 }
 0x141   :  { %869 = vrot.lane.b32.xlu1 %v832_v22, %s8566_s23  ;;  %986 = vrot.lane.b32.xlu0 %v831_v17, %s8551_s25 }
 0x145   :  { %926 = vrot.lane.b32.xlu1 %v832_v22, %s8580_s15  ;;  %873 = vrot.lane.b32.xlu0 %v831_v17, %s8544_s19 }
 0x149   :  { %976 = vrot.lane.b32.xlu1 %v6114_v53, %s8535_s16  ;;  %942 = vrot.lane.b32.xlu0 %v831_v17, %s8564_s21  ;;  %s8539_s16 = smov 54  }
 0x14d   :  { %875 = vrot.lane.b32.xlu1 %v832_v22, %s8544_s19  ;;  %992 = vrot.lane.b32.xlu0 %v831_v17, %s8562_s0 }
 0x151   :  { %982 = vrot.lane.b32.xlu1 %v6114_v53, %s8584_s18  ;;  %932 = vrot.lane.b32.xlu0 %v832_v22, %s8578_s22 }
 0x155   :  { %938 = vrot.lane.b32.xlu1 %v832_v22, %s8553_s24  ;;  %998 = vrot.lane.b32.xlu0 %v831_v17, %s8560_s20 }
 0x159   :  { %1004 = vrot.lane.b32.xlu1 %v831_v17, %s8539_s16  ;;  %988 = vrot.lane.b32.xlu0 %v832_v22, %s8551_s25  ;;  %v1433_v17 = vsel %vm814_vm8, 0.0, %v6209_v8 }
 0x15a   :  { %v1434_v41 = vsel %vm816_vm9, %v1433_v17, 0.0 }
 0x15b   :  { %v1436_v39 = vrot.slane %v1434_v41, 7 }
 0x15d   :  { %994 = vrot.lane.b32.xlu1 %v832_v22, %s8562_s0  ;;  %944 = vrot.lane.b32.xlu0 %v832_v22, %s8564_s21 }
 0x161   :  { %1006 = vrot.lane.b32.xlu1 %v832_v22, %s8539_s16  ;;  %1000 = vrot.lane.b32.xlu0 %v832_v22, %s8560_s20 }
 0x165   :  { %1148 = vrot.lane.b32.xlu1 %v6187_v26, %s8547_s30  ;;  %1142 = vrot.lane.b32.xlu0 %v6187_v26, %s5354_s27 }
 0x169   :  { %1200 = vrot.lane.b32.xlu1 %v6187_v26, %s5353_s26  ;;  %1154 = vrot.lane.b32.xlu0 %v6187_v26, %s8537_s11 }
 0x16d   :  { %1144 = vrot.lane.b32.xlu1 %v6200_v61, %s5354_s27  ;;  %1206 = vrot.lane.b32.xlu0 %v6187_v26, %s5355_s28 }
 0x171   :  { %1212 = vrot.lane.b32.xlu1 %v6187_v26, %s5356_s29  ;;  %1162 = vrot.lane.b32.xlu0 %v6207_v62, %s8582_s1 }
 0x175   :  { %1168 = vrot.lane.b32.xlu1 %v6207_v62, %s8576_s17  ;;  %1150 = vrot.lane.b32.xlu0 %v6200_v61, %s8547_s30 }
 0x179   :  { %1262 = vrot.lane.b32.xlu1 %v6187_v26, %s5359_s12  ;;  %1218 = vrot.lane.b32.xlu0 %v6187_v26, %s5360_s13 }
 0x17b   :  { %v6229_v12 = vpop.permute.xlu1 %900  ;;  %v6231_v43 = vpop.permute.xlu0 %835 }
 0x17d   :  { %1156 = vrot.lane.b32.xlu1 %v6200_v61, %s8537_s11  ;;  %1268 = vrot.lane.b32.xlu0 %v6187_v26, %s8586_s14  ;;  %s8597_s11 = smov 14  }
 0x17f   :  { %v6237_v27 = vpop.permute.xlu1 %837  ;;  %v6239_v55 = vpop.permute.xlu0 %906 }
 0x181   :  { %1202 = vrot.lane.b32.xlu1 %v6200_v61, %s5353_s26  ;;  %1174 = vrot.lane.b32.xlu0 %v6207_v62, %s8566_s23 }
 0x183   :  { %v6245_v0 = vpop.permute.xlu1 %912  ;;  %v6247_v35 = vpop.permute.xlu0 %841 }
 0x185   :  { %1224 = vrot.lane.b32.xlu1 %v6207_v62, %s8580_s15  ;;  %1208 = vrot.lane.b32.xlu0 %v6200_v61, %s5355_s28 }
 0x187   :  { %v6253_v63 = vpop.permute.xlu1 %847  ;;  %v6255_v25 = vpop.permute.xlu0 %843 }
 0x189   :  { %1164 = vrot.lane.b32.xlu1 %v1139_v29, %s8582_s1  ;;  %1274 = vrot.lane.b32.xlu0 %v6187_v26, %s8597_s11 }
 0x18b   :  { %v6261_v42 = vpop.permute.xlu1 %962  ;;  %v6263_v58 = vpop.permute.xlu0 %918 }
 0x18d   :  { %1214 = vrot.lane.b32.xlu1 %v6200_v61, %s5356_s29  ;;  %1180 = vrot.lane.b32.xlu0 %v6207_v62, %s8544_s19 }
 0x18f   :  { %v6269_v36 = vpop.permute.xlu1 %849  ;;  %v6271_v57 = vpop.permute.xlu0 %968 }
 0x191   :  { %1280 = vrot.lane.b32.xlu1 %v6187_v26, %s8584_s18  ;;  %1230 = vrot.lane.b32.xlu0 %v6207_v62, %s8578_s22 }
 0x193   :  { %v6277_v18 = vpop.permute.xlu1 %902  ;;  %v6279_v13 = vpop.permute.xlu0 %855 }
 0x195   :  { %1220 = vrot.lane.b32.xlu1 %v6200_v61, %s5360_s13  ;;  %1170 = vrot.lane.b32.xlu0 %v1139_v29, %s8576_s17 }
 0x197   :  { %v6284_v51 = vpop.permute.xlu1 %924  ;;  %v6286_v16 = vpop.permute.xlu0 %908 }
 0x199   :  { %1264 = vrot.lane.b32.xlu1 %v6200_v61, %s5359_s12  ;;  %1236 = vrot.lane.b32.xlu0 %v6207_v62, %s8553_s24 }
 0x19b   :  { %v6292_v33 = vpop.permute.xlu1 %857  ;;  %v6294_v34 = vpop.permute.xlu0 %974 }
 0x19d   :  { %1286 = vrot.lane.b32.xlu1 %v6207_v62, %s8551_s25  ;;  %1270 = vrot.lane.b32.xlu0 %v6200_v61, %s8586_s14 }
 0x19f   :  { %v6300_v49 = vpop.permute.xlu1 %914  ;;  %v6302_v37 = vpop.permute.xlu0 %861 }
 0x1a1   :  { %1226 = vrot.lane.b32.xlu1 %v1139_v29, %s8580_s15  ;;  %1176 = vrot.lane.b32.xlu0 %v1139_v29, %s8566_s23 }
 0x1a3   :  { %v6306_v6 = vpop.permute.xlu1 %980  ;;  %v6308_v60 = vpop.permute.xlu0 %930 }
 0x1a5   :  { %1276 = vrot.lane.b32.xlu1 %v6200_v61, %s8597_s11  ;;  %1242 = vrot.lane.b32.xlu0 %v6207_v62, %s8564_s21 }
 0x1a7   :  { %v6314_v56 = vpop.permute.xlu1 %867  ;;  %v6316_v24 = vpop.permute.xlu0 %863 }
 0x1a9   :  { %1182 = vrot.lane.b32.xlu1 %v1139_v29, %s8544_s19  ;;  %1292 = vrot.lane.b32.xlu0 %v6207_v62, %s8562_s0 }
 0x1ab   :  { %v6321_v40 = vpop.permute.xlu1 %936  ;;  %v6323_v46 = vpop.permute.xlu0 %920 }
 0x1ad   :  { %1282 = vrot.lane.b32.xlu1 %v6200_v61, %s8584_s18  ;;  %1232 = vrot.lane.b32.xlu0 %v1139_v29, %s8578_s22 }
 0x1af   :  { %v6328_v47 = vpop.permute.xlu1 %970  ;;  %v6330_v5 = vpop.permute.xlu0 %964 }
 0x1b1   :  { %1238 = vrot.lane.b32.xlu1 %v1139_v29, %s8553_s24  ;;  %1298 = vrot.lane.b32.xlu0 %v6207_v62, %s8560_s20 }
 0x1b3   :  { %v6335_v15 = vpop.permute.xlu1 %869  ;;  %v6337_v38 = vpop.permute.xlu0 %986 }
 0x1b5   :  { %1304 = vrot.lane.b32.xlu1 %v6207_v62, %s8539_s16  ;;  %1288 = vrot.lane.b32.xlu0 %v1139_v29, %s8551_s25  ;;  %v6395_v62 = vsel %vm792_vm3, 0.0, %v1436_v39 }
 0x1b7   :  { %v6344_v32 = vpop.permute.xlu1 %926  ;;  %v6346_v52 = vpop.permute.xlu0 %873 }
 0x1b9   :  { %1294 = vrot.lane.b32.xlu1 %v1139_v29, %s8562_s0  ;;  %1244 = vrot.lane.b32.xlu0 %v1139_v29, %s8564_s21 }
 0x1bb   :  { %v6351_v7 = vpop.permute.xlu1 %976  ;;  %v6353_v50 = vpop.permute.xlu0 %942 }
 0x1bd   :  { %1306 = vrot.lane.b32.xlu1 %v1139_v29, %s8539_s16  ;;  %1300 = vrot.lane.b32.xlu0 %v1139_v29, %s8560_s20  ;;  %s8599_s16 = smov 24  }
 0x1bf   :  { %v6357_v23 = vpop.permute.xlu1 %875  ;;  %v6359_v44 = vpop.permute.xlu0 %992 }
 0x1c1   :  { %1448 = vrot.lane.b32.xlu1 %v6362_v2, %s8547_s30  ;;  %1442 = vrot.lane.b32.xlu0 %v6362_v2, %s5354_s27 }
 0x1c3   :  { %v6370_v22 = vpop.permute.xlu1 %982  ;;  %v6372_v19 = vpop.permute.xlu0 %932 }
 0x1c5   :  { %1500 = vrot.lane.b32.xlu1 %v6362_v2, %s5353_s26  ;;  %1454 = vrot.lane.b32.xlu0 %v6362_v2, %s8599_s16 }
 0x1c7   :  { %v6379_v4 = vpop.permute.xlu1 %938  ;;  %v6381_v28 = vpop.permute.xlu0 %998 }
 0x1c9   :  { %1444 = vrot.lane.b32.xlu1 %v6384_v59, %s5354_s27  ;;  %1506 = vrot.lane.b32.xlu0 %v6362_v2, %s5355_s28 }
 0x1cb   :  { %v6390_v11 = vpop.permute.xlu1 %1004  ;;  %v6392_v1 = vpop.permute.xlu0 %988 }
 0x1cd   :  { %1512 = vrot.lane.b32.xlu1 %v6362_v2, %s5356_s29  ;;  %1462 = vrot.lane.b32.xlu0 %v6395_v62, %s8582_s1 }
 0x1cf   :  { %v6401_v8 = vpop.permute.xlu1 %994  ;;  %v6403_v9 = vpop.permute.xlu0 %944 }
 0x1d1   :  { %1468 = vrot.lane.b32.xlu1 %v6395_v62, %s8576_s17  ;;  %1450 = vrot.lane.b32.xlu0 %v6384_v59, %s8547_s30 }
 0x1d3   :  { %v6409_v29 = vpop.permute.xlu1 %1006  ;;  %v6411_v30 = vpop.permute.xlu0 %1000 }
 0x1d5   :  { %1562 = vrot.lane.b32.xlu1 %v6362_v2, %s5359_s12  ;;  %1518 = vrot.lane.b32.xlu0 %v6362_v2, %s5360_s13 }
 0x1d7   :  { %v6417_v48 = vpop.permute.xlu1 %1148  ;;  %v6419_v54 = vpop.permute.xlu0 %1142 }
 0x1d8   :  { %8601 = vst [vmem:[#allocation16_spill] sm:$0xff] %v6417_v48 }
 0x1d9   :  { %1456 = vrot.lane.b32.xlu1 %v6384_v59, %s8599_s16  ;;  %1568 = vrot.lane.b32.xlu0 %v6362_v2, %s8586_s14 }
 0x1db   :  { %v6425_v17 = vpop.permute.xlu1 %1200  ;;  %v6427_v41 = vpop.permute.xlu0 %1154 }
 0x1dc   :  { %8602 = vst [vmem:[#allocation17_spill] sm:$0xff] %v6425_v17  ;;  %8603 = vst [vmem:[#allocation18_spill] sm:$0xff] %v6427_v41  ;;  %v1439_v41 = vsel %vm792_vm3, %v1436_v39, 0.0 }
 0x1dd   :  { %1502 = vrot.lane.b32.xlu1 %v6384_v59, %s5353_s26  ;;  %1474 = vrot.lane.b32.xlu0 %v6395_v62, %s8566_s23 }
 0x1df   :  { %v6433_v61 = vpop.permute.xlu1 %1144  ;;  %v6435_v48 = vpop.permute.xlu0 %1206 }
 0x1e0   :  { %8604 = vst [vmem:[#allocation19_spill] sm:$0xff] %v6433_v61  ;;  %8605 = vst [vmem:[#allocation20_spill] sm:$0xff] %v6435_v48 }
 0x1e1   :  { %1524 = vrot.lane.b32.xlu1 %v6395_v62, %s8580_s15  ;;  %1508 = vrot.lane.b32.xlu0 %v6384_v59, %s5355_s28 }
 0x1e3   :  { %v6441_v26 = vpop.permute.xlu1 %1212  ;;  %v6443_v17 = vpop.permute.xlu0 %1162 }
 0x1e4   :  { %8606 = vst [vmem:[#allocation21_spill] sm:$0xff] %v6441_v26  ;;  %8607 = vst [vmem:[#allocation22_spill] sm:$0xff] %v6443_v17 }
 0x1e5   :  { %1464 = vrot.lane.b32.xlu1 %v1439_v41, %s8582_s1  ;;  %1574 = vrot.lane.b32.xlu0 %v6362_v2, %s8597_s11 }
 0x1e7   :  { %v6449_v61 = vpop.permute.xlu1 %1168  ;;  %v6451_v48 = vpop.permute.xlu0 %1150 }
 0x1e8   :  { %8608 = vst [vmem:[#allocation23_spill] sm:$0xff] %v6449_v61  ;;  %8609 = vst [vmem:[#allocation24_spill] sm:$0xff] %v6451_v48 }
 0x1e9   :  { %1514 = vrot.lane.b32.xlu1 %v6384_v59, %s5356_s29  ;;  %1480 = vrot.lane.b32.xlu0 %v6395_v62, %s8544_s19 }
 0x1eb   :  { %v6457_v26 = vpop.permute.xlu1 %1262  ;;  %v6459_v17 = vpop.permute.xlu0 %1218 }
 0x1ec   :  { %8610 = vst [vmem:[#allocation25_spill] sm:$0xff] %v6457_v26  ;;  %8611 = vst [vmem:[#allocation26_spill] sm:$0xff] %v6459_v17 }
 0x1ed   :  { %1580 = vrot.lane.b32.xlu1 %v6362_v2, %s8584_s18  ;;  %1530 = vrot.lane.b32.xlu0 %v6395_v62, %s8578_s22 }
 0x1ef   :  { %v6465_v39 = vpop.permute.xlu1 %1156  ;;  %v6467_v61 = vpop.permute.xlu0 %1268 }
 0x1f0   :  { %8612 = vst [vmem:[#allocation27_spill] sm:$0xff] %v6465_v39  ;;  %8613 = vst [vmem:[#allocation28_spill] sm:$0xff] %v6467_v61 }
 0x1f1   :  { %1520 = vrot.lane.b32.xlu1 %v6384_v59, %s5360_s13  ;;  %1470 = vrot.lane.b32.xlu0 %v1439_v41, %s8576_s17 }
 0x1f3   :  { %v6472_v48 = vpop.permute.xlu1 %1202  ;;  %v6474_v26 = vpop.permute.xlu0 %1174 }
 0x1f4   :  { %8614 = vst [vmem:[#allocation29_spill] sm:$0xff] %v6472_v48  ;;  %8615 = vst [vmem:[#allocation30_spill] sm:$0xff] %v6474_v26 }
 0x1f5   :  { %1564 = vrot.lane.b32.xlu1 %v6384_v59, %s5359_s12  ;;  %1536 = vrot.lane.b32.xlu0 %v6395_v62, %s8553_s24 }
 0x1f7   :  { %v6480_v2 = vpop.permute.xlu1 %1224  ;;  %v6482_v39 = vpop.permute.xlu0 %1208 }
 0x1f8   :  { %8616 = vst [vmem:[#allocation31_spill] sm:$0xff] %v6480_v2  ;;  %8617 = vst [vmem:[#allocation32_spill] sm:$0xff] %v6482_v39 }
 0x1f9   :  { %1586 = vrot.lane.b32.xlu1 %v6395_v62, %s8551_s25  ;;  %1570 = vrot.lane.b32.xlu0 %v6384_v59, %s8586_s14 }
 0x1fb   :  { %v6488_v61 = vpop.permute.xlu1 %1164  ;;  %v6490_v48 = vpop.permute.xlu0 %1274 }
 0x1fc   :  { %8618 = vst [vmem:[#allocation33_spill] sm:$0xff] %v6488_v61  ;;  %8619 = vst [vmem:[#allocation34_spill] sm:$0xff] %v6490_v48 }
 0x1fd   :  { %1526 = vrot.lane.b32.xlu1 %v1439_v41, %s8580_s15  ;;  %1476 = vrot.lane.b32.xlu0 %v1439_v41, %s8566_s23 }
 0x1ff   :  { %v6494_v26 = vpop.permute.xlu1 %1214  ;;  %v6496_v17 = vpop.permute.xlu0 %1180 }
 0x200   :  { %8620 = vst [vmem:[#allocation35_spill] sm:$0xff] %v6494_v26  ;;  %8621 = vst [vmem:[#allocation36_spill] sm:$0xff] %v6496_v17 }
 0x201   :  { %1576 = vrot.lane.b32.xlu1 %v6384_v59, %s8597_s11  ;;  %1542 = vrot.lane.b32.xlu0 %v6395_v62, %s8564_s21 }
 0x203   :  { %v6502_v39 = vpop.permute.xlu1 %1280  ;;  %v6504_v2 = vpop.permute.xlu0 %1230 }
 0x204   :  { %8622 = vst [vmem:[#allocation37_spill] sm:$0xff] %v6502_v39  ;;  %8623 = vst [vmem:[#allocation38_spill] sm:$0xff] %v6504_v2 }
 0x205   :  { %1482 = vrot.lane.b32.xlu1 %v1439_v41, %s8544_s19  ;;  %1592 = vrot.lane.b32.xlu0 %v6395_v62, %s8562_s0  ;;  %s8630_s19 = smov 54  }
 0x207   :  { %v6509_v48 = vpop.permute.xlu1 %1220  ;;  %v6511_v26 = vpop.permute.xlu0 %1170 }
 0x208   :  { %8624 = vst [vmem:[#allocation39_spill] sm:$0xff] %v6509_v48  ;;  %8625 = vst [vmem:[#allocation40_spill] sm:$0xff] %v6511_v26 }
 0x209   :  { %1582 = vrot.lane.b32.xlu1 %v6384_v59, %s8584_s18  ;;  %1532 = vrot.lane.b32.xlu0 %v1439_v41, %s8578_s22  ;;  %v1723_v59 = vsel %vm814_vm8, 0.0, %v6223_v10 }
 0x20a   :  { %v1724_v48 = vsel %vm816_vm9, %v1723_v59, 0.0  ;;  %v1733_v59 = vsel %vm814_vm8, 0.0, %v6221_v31 }
 0x20b   :  { %v6516_v17 = vpop.permute.xlu1 %1264  ;;  %v6518_v61 = vpop.permute.xlu0 %1236 }
 0x20c   :  { %8626 = vst [vmem:[#allocation41_spill] sm:$0xff] %v6516_v17  ;;  %8627 = vst [vmem:[#allocation42_spill] sm:$0xff] %v6518_v61 }
 0x20d   :  { %1538 = vrot.lane.b32.xlu1 %v1439_v41, %s8553_s24  ;;  %1598 = vrot.lane.b32.xlu0 %v6395_v62, %s8560_s20 }
 0x20f   :  { %v6523_v2 = vpop.permute.xlu1 %1286  ;;  %v6525_v39 = vpop.permute.xlu0 %1270 }
 0x210   :  { %8628 = vst [vmem:[#allocation43_spill] sm:$0xff] %v6523_v2  ;;  %8629 = vst [vmem:[#allocation44_spill] sm:$0xff] %v6525_v39 }
 0x211   :  { %1604 = vrot.lane.b32.xlu1 %v6395_v62, %s8630_s19  ;;  %1588 = vrot.lane.b32.xlu0 %v1439_v41, %s8551_s25  ;;  %v1726_v62 = vrot.slane %v1724_v48, 7 }
 0x213   :  { %v6532_v26 = vpop.permute.xlu1 %1226  ;;  %v6534_v61 = vpop.permute.xlu0 %1176  ;;  %v6572_v39 = vsel %vm792_vm3, %v1726_v62, 0.0 }
 0x214   :  { %8631 = vst [vmem:[#allocation45_spill] sm:$0xff] %v6532_v26  ;;  %8632 = vst [vmem:[#allocation46_spill] sm:$0xff] %v6534_v61  ;;  %v6550_v61 = vsel %vm792_vm3, 0.0, %v1726_v62 }
 0x215   :  { %1594 = vrot.lane.b32.xlu1 %v1439_v41, %s8562_s0  ;;  %1544 = vrot.lane.b32.xlu0 %v1439_v41, %s8564_s21  ;;  %8637 = vst [vmem:[#allocation51_spill] sm:$0xff] %v6550_v61  ;;  %8641 = vst [vmem:[#allocation55_spill] sm:$0xff] %v6572_v39 }
 0x217   :  { %v6539_v2 = vpop.permute.xlu1 %1276  ;;  %v6541_v17 = vpop.permute.xlu0 %1242 }
 0x218   :  { %8633 = vst [vmem:[#allocation47_spill] sm:$0xff] %v6539_v2  ;;  %8634 = vst [vmem:[#allocation48_spill] sm:$0xff] %v6541_v17 }
 0x219   :  { %1606 = vrot.lane.b32.xlu1 %v1439_v41, %s8630_s19  ;;  %1600 = vrot.lane.b32.xlu0 %v1439_v41, %s8560_s20  ;;  %v1734_v41 = vsel %vm816_vm9, %v1733_v59, 0.0 }
 0x21a   :  { %v1736_v2 = vrot.slane %v1734_v41, 7 }
 0x21b   :  { %v6545_v10 = vpop.permute.xlu1 %1182  ;;  %v6547_v26 = vpop.permute.xlu0 %1292 }
 0x21c   :  { %8635 = vst [vmem:[#allocation49_spill] sm:$0xff] %v6545_v10  ;;  %8636 = vst [vmem:[#allocation50_spill] sm:$0xff] %v6547_v26 }
 0x21d   :  { %1748 = vrot.lane.b32.xlu1 %v6550_v61, %s8547_s30  ;;  %1742 = vrot.lane.b32.xlu0 %v6550_v61, %s5354_s27 }
 0x21f   :  { %v6558_v48 = vpop.permute.xlu1 %1282  ;;  %v6560_v17 = vpop.permute.xlu0 %1232 }
 0x220   :  { %8638 = vst [vmem:[#allocation52_spill] sm:$0xff] %v6560_v17  ;;  %v6583_v17 = vsel %vm792_vm3, 0.0, %v1736_v2 }
 0x221   :  { %1800 = vrot.lane.b32.xlu1 %v6550_v61, %s5353_s26  ;;  %1754 = vrot.lane.b32.xlu0 %v6550_v61, %s8599_s16 }
 0x223   :  { %v6567_v10 = vpop.permute.xlu1 %1238  ;;  %v6569_v26 = vpop.permute.xlu0 %1298 }
 0x224   :  { %8639 = vst [vmem:[#allocation53_spill] sm:$0xff] %v6567_v10  ;;  %8640 = vst [vmem:[#allocation54_spill] sm:$0xff] %v6569_v26 }
 0x225   :  { %1744 = vrot.lane.b32.xlu1 %v6572_v39, %s5354_s27  ;;  %1806 = vrot.lane.b32.xlu0 %v6550_v61, %s5355_s28 }
 0x227   :  { %v6578_v31 = vpop.permute.xlu1 %1304  ;;  %v6580_v59 = vpop.permute.xlu0 %1288 }
 0x228   :  { %8642 = vst [vmem:[#allocation56_spill] sm:$0xff] %v6578_v31 }
 0x229   :  { %1812 = vrot.lane.b32.xlu1 %v6550_v61, %s5356_s29  ;;  %1762 = vrot.lane.b32.xlu0 %v6583_v17, %s8582_s1 }
 0x22b   :  { %v6589_v62 = vpop.permute.xlu1 %1294  ;;  %v6591_v41 = vpop.permute.xlu0 %1244 }
 0x22c   :  { %8643 = vst [vmem:[#allocation57_spill] sm:$0xff] %v6589_v62  ;;  %8644 = vst [vmem:[#allocation58_spill] sm:$0xff] %v6591_v41 }
 0x22d   :  { %1768 = vrot.lane.b32.xlu1 %v6583_v17, %s8576_s17  ;;  %1750 = vrot.lane.b32.xlu0 %v6572_v39, %s8547_s30  ;;  %s8657_s30 = smov 56  }
 0x22f   :  { %v6597_v31 = vpop.permute.xlu1 %1306  ;;  %v6599_v26 = vpop.permute.xlu0 %1300 }
 0x230   :  { %8645 = vst [vmem:[#allocation59_spill] sm:$0xff] %v6597_v31  ;;  %8646 = vst [vmem:[#allocation60_spill] sm:$0xff] %v6599_v26 }
 0x231   :  { %1862 = vrot.lane.b32.xlu1 %v6550_v61, %s5359_s12  ;;  %1818 = vrot.lane.b32.xlu0 %v6550_v61, %s5360_s13 }
 0x233   :  { %v6605_v10 = vpop.permute.xlu1 %1448  ;;  %v6607_v62 = vpop.permute.xlu0 %1442 }
 0x234   :  { %8647 = vst [vmem:[#allocation61_spill] sm:$0xff] %v6605_v10  ;;  %8648 = vst [vmem:[#allocation62_spill] sm:$0xff] %v6607_v62 }
 0x235   :  { %1756 = vrot.lane.b32.xlu1 %v6572_v39, %s8599_s16  ;;  %1868 = vrot.lane.b32.xlu0 %v6550_v61, %s8586_s14 }
 0x237   :  { %v6613_v41 = vpop.permute.xlu1 %1500  ;;  %v6615_v31 = vpop.permute.xlu0 %1454 }
 0x238   :  { %8649 = vst [vmem:[#allocation63_spill] sm:$0xff] %v6613_v41  ;;  %8650 = vst [vmem:[#allocation64_spill] sm:$0xff] %v6615_v31  ;;  %v1739_v31 = vsel %vm792_vm3, %v1736_v2, 0.0 }
 0x239   :  { %1802 = vrot.lane.b32.xlu1 %v6572_v39, %s5353_s26  ;;  %1774 = vrot.lane.b32.xlu0 %v6583_v17, %s8566_s23 }
 0x23b   :  { %v6621_v26 = vpop.permute.xlu1 %1444  ;;  %v6623_v10 = vpop.permute.xlu0 %1506 }
 0x23c   :  { %8651 = vst [vmem:[#allocation65_spill] sm:$0xff] %v6621_v26  ;;  %8652 = vst [vmem:[#allocation66_spill] sm:$0xff] %v6623_v10 }
 0x23d   :  { %1824 = vrot.lane.b32.xlu1 %v6583_v17, %s8580_s15  ;;  %1808 = vrot.lane.b32.xlu0 %v6572_v39, %s5355_s28 }
 0x23f   :  { %v6629_v62 = vpop.permute.xlu1 %1512  ;;  %v6631_v41 = vpop.permute.xlu0 %1462 }
 0x240   :  { %8653 = vst [vmem:[#allocation67_spill] sm:$0xff] %v6629_v62  ;;  %8654 = vst [vmem:[#allocation68_spill] sm:$0xff] %v6631_v41 }
 0x241   :  { %1764 = vrot.lane.b32.xlu1 %v1739_v31, %s8582_s1  ;;  %1874 = vrot.lane.b32.xlu0 %v6550_v61, %s8597_s11 }
 0x243   :  { %v6637_v26 = vpop.permute.xlu1 %1468  ;;  %v6639_v10 = vpop.permute.xlu0 %1450 }
 0x244   :  { %8655 = vst [vmem:[#allocation69_spill] sm:$0xff] %v6637_v26  ;;  %8656 = vst [vmem:[#allocation70_spill] sm:$0xff] %v6639_v10 }
 0x245   :  { %1814 = vrot.lane.b32.xlu1 %v6572_v39, %s5356_s29  ;;  %1780 = vrot.lane.b32.xlu0 %v6583_v17, %s8657_s30 }
 0x247   :  { %v6645_v62 = vpop.permute.xlu1 %1562  ;;  %v6647_v41 = vpop.permute.xlu0 %1518 }
 0x248   :  { %8658 = vst [vmem:[#allocation71_spill] sm:$0xff] %v6645_v62  ;;  %8659 = vst [vmem:[#allocation72_spill] sm:$0xff] %v6647_v41 }
 0x249   :  { %1880 = vrot.lane.b32.xlu1 %v6550_v61, %s8584_s18  ;;  %1830 = vrot.lane.b32.xlu0 %v6583_v17, %s8578_s22 }
 0x24b   :  { %v6653_v2 = vpop.permute.xlu1 %1456  ;;  %v6655_v26 = vpop.permute.xlu0 %1568 }
 0x24c   :  { %8660 = vst [vmem:[#allocation73_spill] sm:$0xff] %v6653_v2  ;;  %8661 = vst [vmem:[#allocation74_spill] sm:$0xff] %v6655_v26 }
 0x24d   :  { %1820 = vrot.lane.b32.xlu1 %v6572_v39, %s5360_s13  ;;  %1770 = vrot.lane.b32.xlu0 %v1739_v31, %s8576_s17 }
 0x24f   :  { %v6660_v10 = vpop.permute.xlu1 %1502  ;;  %v6662_v62 = vpop.permute.xlu0 %1474 }
 0x250   :  { %8662 = vst [vmem:[#allocation75_spill] sm:$0xff] %v6660_v10  ;;  %8663 = vst [vmem:[#allocation76_spill] sm:$0xff] %v6662_v62 }
 0x251   :  { %1864 = vrot.lane.b32.xlu1 %v6572_v39, %s5359_s12  ;;  %1836 = vrot.lane.b32.xlu0 %v6583_v17, %s8553_s24 }
 0x253   :  { %v6668_v61 = vpop.permute.xlu1 %1524  ;;  %v6670_v2 = vpop.permute.xlu0 %1508 }
 0x254   :  { %8664 = vst [vmem:[#allocation77_spill] sm:$0xff] %v6668_v61  ;;  %8665 = vst [vmem:[#allocation78_spill] sm:$0xff] %v6670_v2 }
 0x255   :  { %1886 = vrot.lane.b32.xlu1 %v6583_v17, %s8551_s25  ;;  %1870 = vrot.lane.b32.xlu0 %v6572_v39, %s8586_s14 }
 0x257   :  { %v6676_v26 = vpop.permute.xlu1 %1464  ;;  %v6678_v10 = vpop.permute.xlu0 %1574 }
 0x258   :  { %8666 = vst [vmem:[#allocation79_spill] sm:$0xff] %v6676_v26  ;;  %8667 = vst [vmem:[#allocation80_spill] sm:$0xff] %v6678_v10 }
 0x259   :  { %1826 = vrot.lane.b32.xlu1 %v1739_v31, %s8580_s15  ;;  %1776 = vrot.lane.b32.xlu0 %v1739_v31, %s8566_s23  ;;  %s8570_s23 = smov 104  }
 0x25b   :  { %v6682_v62 = vpop.permute.xlu1 %1514  ;;  %v6684_v41 = vpop.permute.xlu0 %1480 }
 0x25c   :  { %8668 = vst [vmem:[#allocation81_spill] sm:$0xff] %v6682_v62  ;;  %8669 = vst [vmem:[#allocation82_spill] sm:$0xff] %v6684_v41 }
 0x25d   :  { %1876 = vrot.lane.b32.xlu1 %v6572_v39, %s8597_s11  ;;  %1842 = vrot.lane.b32.xlu0 %v6583_v17, %s8564_s21 }
 0x25f   :  { %v6690_v2 = vpop.permute.xlu1 %1580  ;;  %v6692_v61 = vpop.permute.xlu0 %1530 }
 0x260   :  { %8670 = vst [vmem:[#allocation83_spill] sm:$0xff] %v6690_v2  ;;  %8671 = vst [vmem:[#allocation84_spill] sm:$0xff] %v6692_v61 }
 0x261   :  { %1782 = vrot.lane.b32.xlu1 %v1739_v31, %s8657_s30  ;;  %1892 = vrot.lane.b32.xlu0 %v6583_v17, %s8562_s0 }
 0x263   :  { %v6697_v10 = vpop.permute.xlu1 %1520  ;;  %v6699_v62 = vpop.permute.xlu0 %1470 }
 0x264   :  { %8672 = vst [vmem:[#allocation85_spill] sm:$0xff] %v6697_v10  ;;  %8673 = vst [vmem:[#allocation86_spill] sm:$0xff] %v6699_v62 }
 0x265   :  { %1882 = vrot.lane.b32.xlu1 %v6572_v39, %s8584_s18  ;;  %1832 = vrot.lane.b32.xlu0 %v1739_v31, %s8578_s22 }
 0x267   :  { %v6704_v41 = vpop.permute.xlu1 %1564  ;;  %v6706_v26 = vpop.permute.xlu0 %1536 }
 0x268   :  { %8674 = vst [vmem:[#allocation87_spill] sm:$0xff] %v6704_v41  ;;  %8675 = vst [vmem:[#allocation88_spill] sm:$0xff] %v6706_v26 }
 0x269   :  { %1838 = vrot.lane.b32.xlu1 %v1739_v31, %s8553_s24  ;;  %1898 = vrot.lane.b32.xlu0 %v6583_v17, %s8560_s20  ;;  %s8796_s24 = smov 16  }
 0x26b   :  { %v6711_v61 = vpop.permute.xlu1 %1586  ;;  %v6713_v2 = vpop.permute.xlu0 %1570 }
 0x26c   :  { %8676 = vst [vmem:[#allocation89_spill] sm:$0xff] %v6711_v61  ;;  %8677 = vst [vmem:[#allocation90_spill] sm:$0xff] %v6713_v2 }
 0x26d   :  { %1904 = vrot.lane.b32.xlu1 %v6583_v17, %s8630_s19  ;;  %1888 = vrot.lane.b32.xlu0 %v1739_v31, %s8551_s25  ;;  %s5376_s25 = smov 120  }
 0x26f   :  { %v6718_v39 = vpop.permute.xlu1 %1526  ;;  %v6720_v62 = vpop.permute.xlu0 %1476 }
 0x270   :  { %8678 = vst [vmem:[#allocation91_spill] sm:$0xff] %v6718_v39  ;;  %8679 = vst [vmem:[#allocation92_spill] sm:$0xff] %v6720_v62  ;;  %v6737_v62 = vld [vmem:[%s8513_s2] sm:$0xff]  ;;  %v881_v39 = vsel %vm879_vm10, %v6114_v53, %v6237_v27 }
 0x271   :  { %1894 = vrot.lane.b32.xlu1 %v1739_v31, %s8562_s0  ;;  %1844 = vrot.lane.b32.xlu0 %v1739_v31, %s8564_s21  ;;  %v1039_v53 = vrot.slane %v6737_v62, %v5535_v20  ;;  %s8573_s0 = smov 112   ;;  %s8571_s21 = smov 88  }
 0x273   :  { %v6724_v26 = vpop.permute.xlu1 %1576  ;;  %v6726_v10 = vpop.permute.xlu0 %1542 }
 0x274   :  { %8680 = vst [vmem:[#allocation93_spill] sm:$0xff] %v6724_v26  ;;  %8681 = vst [vmem:[#allocation94_spill] sm:$0xff] %v6726_v10  ;;  %v880_v10 = vsel %vm879_vm10, %v6107_v45, %v6231_v43  ;;  %v948_v26 = vsel %vm879_vm10, %v6229_v12, %v6239_v55  ;;  %v8686_v43 = vld [vmem:[#allocation9_spill] sm:$0xff]  ;;  %v1010_v55 = vsel %vm879_vm10, %v6261_v42, %v6271_v57 }
 0x275   :  { %1906 = vrot.lane.b32.xlu1 %v1739_v31, %s8630_s19  ;;  %1900 = vrot.lane.b32.xlu0 %v1739_v31, %s8560_s20  ;;  %v1027_v31 = vrot.slane %v6737_v62, %v5471_v3  ;;  %v883_v45 = vsel %vm882_vm11, %v880_v10, %v6247_v35  ;;  %v1033_v41 = vrot.slane %v6737_v62, %v8686_v43  ;;  %s8574_s20 = smov 96  }
 0x276   :  { %v950_v2 = vsel %vm882_vm11, %v948_v26, %v6245_v0  ;;  %v949_v35 = vsel %vm879_vm10, %v6277_v18, %v6286_v16 }
 0x277   :  { %v6730_v61 = vpop.permute.xlu1 %1482  ;;  %v6732_v17 = vpop.permute.xlu0 %1592  ;;  %v952_v12 = vsel %vm885_vm12, %v950_v2, %v6263_v58  ;;  %v1012_v58 = vsel %vm882_vm11, %v1010_v55, %v6294_v34 }
 0x278   :  { %8682 = vst [vmem:[#allocation95_spill] sm:$0xff] %v6730_v61  ;;  %8683 = vst [vmem:[#allocation96_spill] sm:$0xff] %v6732_v17  ;;  %v954_v0 = vsel %vm888_vm13, %v952_v12, %v6284_v51 }
 0x279   :  { %v956_v51 = vsel %vm891_vm14, %v954_v0, %v6308_v60 }
 0x27b   :  { %v6744_v61 = vpop.permute.xlu1 %1582  ;;  %v6746_v17 = vpop.permute.xlu0 %1532 }
 0x27c   :  { %8684 = vst [vmem:[#allocation97_spill] sm:$0xff] %v6744_v61  ;;  %8685 = vst [vmem:[#allocation98_spill] sm:$0xff] %v6746_v17  ;;  %v886_v17 = vsel %vm885_vm12, %v883_v45, %v6253_v63  ;;  %v884_v61 = vsel %vm882_vm11, %v881_v39, %v6255_v25  ;;  %v8688_v39 = vld [vmem:[#allocation10_spill] sm:$0xff] }
 0x27d   :  { %v887_v27 = vsel %vm885_vm12, %v884_v61, %v6269_v36  ;;  %v889_v26 = vsel %vm888_vm13, %v886_v17, %v6279_v13  ;;  %v1011_v61 = vsel %vm879_vm10, %v6330_v5, %v6328_v47  ;;  %v951_v36 = vsel %vm882_vm11, %v949_v35, %v6300_v49 }
 0x27e   :  { %v890_v63 = vsel %vm888_vm13, %v887_v27, %v6292_v33  ;;  %v892_v57 = vsel %vm891_vm14, %v889_v26, %v6302_v37  ;;  %v1013_v18 = vsel %vm882_vm11, %v1011_v61, %v6351_v7  ;;  %v1014_v13 = vsel %vm885_vm12, %v1012_v58, %v6306_v6  ;;  %v8689_v58 = vld [vmem:[#allocation8_spill] sm:$0xff] }
 0x27f   :  { %v6785_v25 = vpop.permute.xlu1 %1538  ;;  %v6787_v42 = vpop.permute.xlu0 %1598  ;;  %v953_v16 = vsel %vm885_vm12, %v951_v36, %v6323_v46  ;;  %v1015_v33 = vsel %vm885_vm12, %v1013_v18, %v6370_v22  ;;  %v893_v34 = vsel %vm891_vm14, %v890_v63, %v6316_v24  ;;  %v958_v49 = vsel %vm894_vm15, %v956_v51, %v6321_v40 }
 0x280   :  { %v955_v37 = vsel %vm888_vm13, %v953_v16, %v6344_v32  ;;  %v1017_v6 = vsel %vm888_vm13, %v1015_v33, %v6392_v1  ;;  %v896_v60 = vsel %vm894_vm15, %v893_v34, %v6335_v15  ;;  %v1016_v46 = vsel %vm888_vm13, %v1014_v13, %v6337_v38  ;;  %v6871_v33 = vld [vmem:[%s8513_s2 + $0x8] sm:$0xff] }
 0x281   :  { %v957_v47 = vsel %vm891_vm14, %v955_v37, %v6372_v19  ;;  %v1019_v24 = vsel %vm891_vm14, %v1017_v6, %v6401_v8  ;;  %v960_v32 = vsel %vm897_vm2, %v958_v49, %v6353_v50  ;;  %v1018_v7 = vsel %vm891_vm14, %v1016_v46, %v6359_v44  ;;  %v8687_v8 = vld [vmem:[#allocation7_spill] sm:$0xff] }
 0x282   :  { %v959_v15 = vsel %vm894_vm15, %v957_v47, %v6379_v4  ;;  %v1021_v38 = vsel %vm894_vm15, %v1019_v24, %v6411_v30  ;;  %v895_v22 = vsel %vm894_vm15, %v892_v57, %v6314_v56  ;;  %v899_v19 = vsel %vm897_vm2, %v896_v60, %v6357_v23 }
 0x283   :  { %v6821_v5 = vpop.permute.xlu1 %1604  ;;  %v6823_v40 = vpop.permute.xlu0 %1588  ;;  %v1020_v1 = vsel %vm894_vm15, %v1018_v7, %v6381_v28  ;;  %v961_v50 = vsel %vm897_vm2, %v959_v15, %v6403_v9  ;;  %v1045_v44 = vrot.slane %v6737_v62, %v8687_v8  ;;  %v898_v4 = vsel %vm897_vm2, %v895_v22, %v6346_v52 }
 0x284   :  { %v1058_v30 = vrot.slane %v6737_v62, %v8688_v39  ;;  %v1022_v56 = vsel %vm897_vm2, %v1020_v1, %v6390_v11  ;;  %v1034_v10 = vmul.f32 %v1033_v41, %v960_v32  ;;  %v1023_v23 = vsel %vm897_vm2, %v1021_v38, %v6409_v29 }
 0x285   :  { %v1047_v9 = vmul.f32 %v1045_v44, %v899_v19  ;;  %v1071_v17 = vrot.slane %v6737_v62, %v5538_v21  ;;  %v1028_v52 = vmul.f32 %v1027_v31, %v898_v4  ;;  %v1040_v12 = vmul.f32 %v1039_v53, %v1022_v56 }
 0x286   :  { %v1060_v45 = vmul.f32 %v1058_v30, %v961_v50  ;;  %v1046_v27 = vmul.f32 %v1045_v44, %v898_v4  ;;  %v1059_v55 = vmul.f32 %v1058_v30, %v960_v32  ;;  %v1084_v36 = vrot.slane %v6737_v62, %v8689_v58 }
 0x287   :  { %v6851_v28 = vpop.permute.xlu1 %1594  ;;  %v6853_v2 = vpop.permute.xlu0 %1544  ;;  %v1073_v26 = vmul.f32 %v1071_v17, %v1023_v23  ;;  %v1035_v0 = vadd.f32 %v1034_v10, %v1028_v52  ;;  %v1051_v29 = vrot.slane %v1047_v9, 1  ;;  %v1072_v35 = vmul.f32 %v1071_v17, %v1022_v56 }
 0x288   :  { %v1064_v63 = vrot.slane %v1060_v45, 1  ;;  %v1050_v57 = vrot.slane %v1046_v27, 1  ;;  %v1063_v18 = vrot.slane %v1059_v55, 1  ;;  %v1086_v16 = vmul.f32 %v1084_v36, %v899_v19  ;;  %v8691_v27 = vld [vmem:[#allocation16_spill] sm:$0xff] }
 0x289   :  { %v1041_v61 = vadd.f32 %v1040_v12, %v1035_v0  ;;  %v1077_v13 = vrot.slane %v1073_v26, 1  ;;  %v1076_v34 = vrot.slane %v1072_v35, 1  ;;  %v1097_v37 = vrot.slane %v6737_v62, %v5509_v14  ;;  %v8692_v0 = vld [vmem:[#allocation18_spill] sm:$0xff] }
 0x28a   :  { %v1052_v51 = vsel %vm114_vm0, %v1050_v57, %v1051_v29  ;;  %v1065_v49 = vsel %vm114_vm0, %v1063_v18, %v1064_v63  ;;  %v1085_v60 = vmul.f32 %v1084_v36, %v898_v4  ;;  %v1110_v47 = vrot.slane %v6871_v33, %v5471_v3  ;;  %v8690_v4 = vld [vmem:[#allocation12_spill] sm:$0xff]  ;;  %v8693_v36 = vld [vmem:[#allocation19_spill] sm:$0xff]  ;;  %v8694_v57 = vld [vmem:[#allocation13_spill] sm:$0xff] }
 0x28b   :  { %v6857_v11 = vpop.permute.xlu1 %1606  ;;  %v6859_v41 = vpop.permute.xlu0 %1600  ;;  %v1054_v6 = vadd.f32 %v1052_v51, %v1041_v61  ;;  %v1078_v46 = vsel %vm114_vm0, %v1076_v34, %v1077_v13  ;;  %v1099_v7 = vmul.f32 %v1097_v37, %v961_v50  ;;  %v1090_v22 = vrot.slane %v1086_v16, 2  ;;  %v8695_v13 = vld [vmem:[#allocation20_spill] sm:$0xff]  ;;  %v8696_v51 = vld [vmem:[#allocation17_spill] sm:$0xff]  ;;  %v8697_v34 = vld [vmem:[#allocation22_spill] sm:$0xff] }
 0x28c   :  { %v1098_v19 = vmul.f32 %v1097_v37, %v960_v32  ;;  %v1089_v44 = vrot.slane %v1085_v60, 2  ;;  %v6883_v30 = vmul.f32 %v1110_v47, %v1022_v56  ;;  %v1186_v10 = vsel %vm879_vm10, %v8690_v4, %v6419_v54  ;;  %v8698_v37 = vld [vmem:[#allocation21_spill] sm:$0xff]  ;;  %v8699_v60 = vld [vmem:[#allocation23_spill] sm:$0xff] }
 0x28d   :  { %v1067_v24 = vadd.f32 %v1065_v49, %v1054_v6  ;;  %v1103_v62 = vrot.slane %v1099_v7, 2  ;;  %v1112_v45 = vmul.f32 %v1110_v47, %v1023_v23  ;;  %v1188_v32 = vsel %vm882_vm11, %v1186_v10, %v8691_v27  ;;  %v8700_v47 = vld [vmem:[#allocation24_spill] sm:$0xff]  ;;  %v8705_v10 = vld [vmem:[#allocation30_spill] sm:$0xff] }
 0x28e   :  { %v1091_v50 = vsel %vm200_vm1, %v1089_v44, %v1090_v22  ;;  %v1102_v52 = vrot.slane %v1098_v19, 2  ;;  %v1327_v56 = vrot.slane %v6871_v33, %v8686_v43  ;;  %v1333_v55 = vrot.slane %v6871_v33, %v5535_v20  ;;  %v8701_v22 = vld [vmem:[#allocation26_spill] sm:$0xff]  ;;  %v8707_v27 = vld [vmem:[#allocation32_spill] sm:$0xff] }
 0x28f   :  { %v6863_v31 = vpop.permute.xlu1 %1748  ;;  %v6865_v53 = vpop.permute.xlu0 %1742  ;;  %v1080_v1 = vadd.f32 %v1078_v46, %v1067_v24  ;;  %v1115_v54 = vrot.slane %v6883_v30, 2  ;;  %v1190_v29 = vsel %vm885_vm12, %v1188_v32, %v8692_v0  ;;  %v1339_v23 = vrot.slane %v6871_v33, %v8687_v8  ;;  %v8703_v30 = vld [vmem:[#allocation28_spill] sm:$0xff]  ;;  %v8708_v32 = vld [vmem:[#allocation29_spill] sm:$0xff] }
 0x290   :  { %v1104_v26 = vsel %vm200_vm1, %v1102_v52, %v1103_v62  ;;  %v1116_v61 = vrot.slane %v1112_v45, 2  ;;  %v1187_v18 = vsel %vm879_vm10, %v8694_v57, %v8693_v36  ;;  %v1248_v16 = vsel %vm879_vm10, %v8696_v51, %v8695_v13  ;;  %v8704_v62 = vld [vmem:[#allocation25_spill] sm:$0xff]  ;;  %v8706_v45 = vld [vmem:[#allocation31_spill] sm:$0xff]  ;;  %v8712_v51 = vld [vmem:[#allocation34_spill] sm:$0xff] }
 0x291   :  { %v1093_v12 = vadd.f32 %v1091_v50, %v1080_v1  ;;  %v1192_v49 = vsel %vm888_vm13, %v1190_v29, %v8697_v34  ;;  %v1250_v6 = vsel %vm882_vm11, %v1248_v16, %v8698_v37  ;;  %v1189_v24 = vsel %vm882_vm11, %v1187_v18, %v8700_v47  ;;  %v8702_v1 = vld [vmem:[#allocation27_spill] sm:$0xff]  ;;  %v8710_v29 = vld [vmem:[#allocation44_spill] sm:$0xff]  ;;  %v8711_v36 = vld [vmem:[#allocation41_spill] sm:$0xff] }
 0x292   :  { %v1194_v46 = vsel %vm891_vm14, %v1192_v49, %v8699_v60  ;;  %v1252_v19 = vsel %vm885_vm12, %v1250_v6, %v8701_v22  ;;  %v1191_v44 = vsel %vm885_vm12, %v1189_v24, %v8702_v1  ;;  %v1310_v4 = vsel %vm879_vm10, %v8704_v62, %v8703_v30  ;;  %v8713_v34 = vld [vmem:[#allocation35_spill] sm:$0xff]  ;;  %v8714_v37 = vld [vmem:[#allocation36_spill] sm:$0xff]  ;;  %v8716_v47 = vld [vmem:[#allocation37_spill] sm:$0xff] }
 0x293   :  { %v6879_v15 = vpop.permute.xlu1 %1800  ;;  %v6881_v38 = vpop.permute.xlu0 %1754  ;;  %v1106_v7 = vadd.f32 %v1104_v26, %v1093_v12  ;;  %v1196_v50 = vsel %vm894_vm15, %v1194_v46, %v8705_v10  ;;  %v1254_v52 = vsel %vm888_vm13, %v1252_v19, %v8706_v45  ;;  %v1249_v12 = vsel %vm879_vm10, %v8708_v32, %v8707_v27  ;;  %v8709_v26 = vld [vmem:[#allocation33_spill] sm:$0xff]  ;;  %v8715_v60 = vld [vmem:[#allocation47_spill] sm:$0xff]  ;;  %v8717_v22 = vld [vmem:[#allocation38_spill] sm:$0xff] }
 0x294   :  { %v1193_v0 = vsel %vm888_vm13, %v1191_v44, %v8709_v26  ;;  %v1311_v57 = vsel %vm879_vm10, %v8711_v36, %v8710_v29  ;;  %v1312_v16 = vsel %vm882_vm11, %v1310_v4, %v8712_v51  ;;  %v1251_v49 = vsel %vm882_vm11, %v1249_v12, %v8713_v34  ;;  %v8718_v1 = vld [vmem:[#allocation39_spill] sm:$0xff]  ;;  %v8719_v62 = vld [vmem:[#allocation40_spill] sm:$0xff]  ;;  %v8720_v10 = vld [vmem:[#allocation42_spill] sm:$0xff] }
 0x295   :  { %v1198_v6 = vsel %vm897_vm2, %v1196_v50, %v8714_v37  ;;  %v1313_v46 = vsel %vm882_vm11, %v1311_v57, %v8715_v60  ;;  %v1314_v24 = vsel %vm885_vm12, %v1312_v16, %v8716_v47  ;;  %v1256_v19 = vsel %vm891_vm14, %v1254_v52, %v8717_v22  ;;  %v8721_v45 = vld [vmem:[#allocation45_spill] sm:$0xff]  ;;  %v8722_v12 = vld [vmem:[#allocation43_spill] sm:$0xff]  ;;  %v8723_v26 = vld [vmem:[#allocation46_spill] sm:$0xff] }
 0x296   :  { %v1253_v44 = vsel %vm885_vm12, %v1251_v49, %v8718_v1  ;;  %v1315_v30 = vsel %vm885_vm12, %v1313_v46, %v6558_v48  ;;  %v1195_v4 = vsel %vm891_vm14, %v1193_v0, %v8719_v62  ;;  %v1258_v50 = vsel %vm894_vm15, %v1256_v19, %v8720_v10  ;;  %v8724_v36 = vld [vmem:[#allocation52_spill] sm:$0xff]  ;;  %v8725_v57 = vld [vmem:[#allocation57_spill] sm:$0xff]  ;;  %v8732_v62 = vld [vmem:[#allocation58_spill] sm:$0xff] }
 0x297   :  { %v6888_v9 = vpop.permute.xlu1 %1744  ;;  %v6890_v17 = vpop.permute.xlu0 %1806  ;;  %v1255_v27 = vsel %vm888_vm13, %v1253_v44, %v8721_v45  ;;  %v1317_v32 = vsel %vm888_vm13, %v1315_v30, %v6580_v59  ;;  %v1316_v52 = vsel %vm888_vm13, %v1314_v24, %v8722_v12  ;;  %v1197_v29 = vsel %vm894_vm15, %v1195_v4, %v8723_v26  ;;  %v8726_v34 = vld [vmem:[#allocation48_spill] sm:$0xff]  ;;  %v8727_v59 = vld [vmem:[#allocation50_spill] sm:$0xff]  ;;  %v8728_v60 = vld [vmem:[#allocation53_spill] sm:$0xff] }
 0x298   :  { %v1257_v48 = vsel %vm891_vm14, %v1255_v27, %v8724_v36  ;;  %v1319_v0 = vsel %vm891_vm14, %v1317_v32, %v8725_v57  ;;  %v1260_v49 = vsel %vm897_vm2, %v1258_v50, %v8726_v34  ;;  %v1318_v37 = vsel %vm891_vm14, %v1316_v52, %v8727_v59  ;;  %v8729_v47 = vld [vmem:[#allocation60_spill] sm:$0xff]  ;;  %v8730_v19 = vld [vmem:[#allocation49_spill] sm:$0xff]  ;;  %v8731_v44 = vld [vmem:[#allocation54_spill] sm:$0xff] }
 0x299   :  { %v1259_v46 = vsel %vm894_vm15, %v1257_v48, %v8728_v60  ;;  %v1321_v24 = vsel %vm894_vm15, %v1319_v0, %v8729_v47  ;;  %v1328_v22 = vmul.f32 %v1327_v56, %v1198_v6  ;;  %v1199_v1 = vsel %vm897_vm2, %v1197_v29, %v8730_v19  ;;  %v8733_v27 = vld [vmem:[#allocation56_spill] sm:$0xff]  ;;  %v8734_v52 = vld [vmem:[#allocation59_spill] sm:$0xff] }
 0x29a   :  { %v1320_v30 = vsel %vm894_vm15, %v1318_v37, %v8731_v44  ;;  %v1261_v4 = vsel %vm897_vm2, %v1259_v46, %v8732_v62  ;;  %v1117_v10 = vsel %vm200_vm1, %v1115_v54, %v1116_v61  ;;  %v1345_v50 = vrot.slane %v6871_v33, %v8688_v39 }
 0x29b   :  { %v6905_v35 = vpop.permute.xlu1 %1812  ;;  %v6907_v63 = vpop.permute.xlu0 %1762  ;;  %v1358_v45 = vrot.slane %v6871_v33, %v5538_v21  ;;  %v1322_v56 = vsel %vm897_vm2, %v1320_v30, %v8733_v27  ;;  %v1119_v32 = vadd.f32 %v1117_v10, %v1106_v7  ;;  %v1334_v12 = vmul.f32 %v1333_v55, %v1260_v49 }
 0x29c   :  { %v1323_v26 = vsel %vm897_vm2, %v1321_v24, %v8734_v52  ;;  %v1347_v48 = vmul.f32 %v1345_v50, %v1199_v1  ;;  %v1371_v54 = vrot.slane %v6871_v33, %v8689_v58  ;;  %v1340_v0 = vmul.f32 %v1339_v23, %v1322_v56  ;;  %v7020_v23 = vld [vmem:[%s8513_s2 + $0x10] sm:$0xff] }
 0x29d   :  { %v1360_v61 = vmul.f32 %v1358_v45, %v1261_v4  ;;  %v1329_v57 = vadd.f32 %v1328_v22, %v1119_v32  ;;  %v1346_v34 = vmul.f32 %v1345_v50, %v1198_v6  ;;  %v1359_v59 = vmul.f32 %v1358_v45, %v1260_v49 }
 0x29e   :  { %v1373_v37 = vmul.f32 %v1371_v54, %v1323_v26  ;;  %v1351_v46 = vrot.slane %v1347_v48, 1  ;;  %v1372_v47 = vmul.f32 %v1371_v54, %v1322_v56  ;;  %v1384_v44 = vrot.slane %v6871_v33, %v5509_v14 }
 0x29f   :  { %v6942_v18 = vpop.permute.xlu1 %1768  ;;  %v6944_v13 = vpop.permute.xlu0 %1750  ;;  %v1335_v60 = vadd.f32 %v1334_v12, %v1329_v57  ;;  %v1364_v24 = vrot.slane %v1360_v61, 1  ;;  %v1350_v30 = vrot.slane %v1346_v34, 1  ;;  %v1363_v22 = vrot.slane %v1359_v59, 1 }
 0x2a0   :  { %v1377_v62 = vrot.slane %v1373_v37, 1  ;;  %v1386_v27 = vmul.f32 %v1384_v44, %v1199_v1  ;;  %v1376_v32 = vrot.slane %v1372_v47, 1  ;;  %v1397_v33 = vrot.slane %v7020_v23, %v5471_v3 }
 0x2a1   :  { %v1341_v19 = vadd.f32 %v1340_v0, %v1335_v60  ;;  %v1352_v45 = vsel %vm114_vm0, %v1350_v30, %v1351_v46  ;;  %v1365_v12 = vsel %vm114_vm0, %v1363_v22, %v1364_v24  ;;  %v1385_v48 = vmul.f32 %v1384_v44, %v1198_v6  ;;  %v8738_v6 = vld [vmem:[#allocation14_spill] sm:$0xff] }
 0x2a2   :  { %v1378_v54 = vsel %vm114_vm0, %v1376_v32, %v1377_v62  ;;  %v1410_v61 = vrot.slane %v7020_v23, %v8686_v43  ;;  %v1399_v0 = vmul.f32 %v1397_v33, %v1261_v4  ;;  %v1390_v1 = vrot.slane %v1386_v27, 2  ;;  %v8740_v27 = vld [vmem:[#allocation61_spill] sm:$0xff] }
 0x2a3   :  { %v6978_v51 = vpop.permute.xlu1 %1862  ;;  %v6980_v16 = vpop.permute.xlu0 %1818  ;;  %v1354_v52 = vadd.f32 %v1352_v45, %v1341_v19  ;;  %v1398_v37 = vmul.f32 %v1397_v33, %v1260_v49  ;;  %v1389_v46 = vrot.slane %v1385_v48, 2  ;;  %v8737_v19 = vld [vmem:[#allocation62_spill] sm:$0xff]  ;;  %v8741_v48 = vld [vmem:[#allocation64_spill] sm:$0xff] }
 0x2a4   :  { %v7037_v47 = vmul.f32 %v1410_v61, %v1322_v56  ;;  %v1403_v24 = vrot.slane %v1399_v0, 2  ;;  %v1486_v44 = vsel %vm879_vm10, %v8738_v6, %v8737_v19  ;;  %v1412_v62 = vmul.f32 %v1410_v61, %v1323_v26  ;;  %v8746_v19 = vld [vmem:[#allocation63_spill] sm:$0xff] }
 0x2a5   :  { %v1367_v57 = vadd.f32 %v1365_v12, %v1354_v52  ;;  %v1391_v4 = vsel %vm200_vm1, %v1389_v46, %v1390_v1  ;;  %v1402_v45 = vrot.slane %v1398_v37, 2  ;;  %v1488_v49 = vsel %vm882_vm11, %v1486_v44, %v8740_v27  ;;  %v8743_v1 = vld [vmem:[#allocation65_spill] sm:$0xff]  ;;  %v8744_v37 = vld [vmem:[#allocation15_spill] sm:$0xff]  ;;  %v8745_v46 = vld [vmem:[#allocation66_spill] sm:$0xff] }
 0x2a6   :  { %v1627_v56 = vrot.slane %v7020_v23, %v5535_v20  ;;  %v1633_v12 = vrot.slane %v7020_v23, %v8687_v8  ;;  %v1415_v33 = vrot.slane %v7037_v47, 2  ;;  %v1639_v26 = vrot.slane %v7020_v23, %v8688_v39  ;;  %v8748_v44 = vld [vmem:[#allocation67_spill] sm:$0xff] }
 0x2a7   :  { %v7005_v29 = vpop.permute.xlu1 %1756  ;;  %v7007_v36 = vpop.permute.xlu0 %1868  ;;  %v1380_v60 = vadd.f32 %v1378_v54, %v1367_v57  ;;  %v1404_v52 = vsel %vm200_vm1, %v1402_v45, %v1403_v24  ;;  %v1490_v54 = vsel %vm885_vm12, %v1488_v49, %v8741_v48  ;;  %v1416_v0 = vrot.slane %v1412_v62, 2  ;;  %v8747_v24 = vld [vmem:[#allocation68_spill] sm:$0xff]  ;;  %v8749_v45 = vld [vmem:[#allocation69_spill] sm:$0xff]  ;;  %v8750_v49 = vld [vmem:[#allocation70_spill] sm:$0xff] }
 0x2a8   :  { %v1548_v47 = vsel %vm879_vm10, %v8746_v19, %v8745_v46  ;;  %v1492_v6 = vsel %vm888_vm13, %v1490_v54, %v8747_v24  ;;  %v8753_v46 = vld [vmem:[#allocation74_spill] sm:$0xff]  ;;  %v8754_v19 = vld [vmem:[#allocation71_spill] sm:$0xff]  ;;  %v8755_v24 = vld [vmem:[#allocation76_spill] sm:$0xff] }
 0x2a9   :  { %v1393_v32 = vadd.f32 %v1391_v4, %v1380_v60  ;;  %v1487_v60 = vsel %vm879_vm10, %v8744_v37, %v8743_v1  ;;  %v1550_v4 = vsel %vm882_vm11, %v1548_v47, %v8748_v44  ;;  %v1494_v27 = vsel %vm891_vm14, %v1492_v6, %v8749_v45  ;;  %v8752_v37 = vld [vmem:[#allocation73_spill] sm:$0xff]  ;;  %v8757_v45 = vld [vmem:[#allocation78_spill] sm:$0xff] }
 0x2aa   :  { %v1489_v62 = vsel %vm882_vm11, %v1487_v60, %v8750_v49  ;;  %v1610_v54 = vsel %vm879_vm10, %v8754_v19, %v8753_v46  ;;  %v1496_v47 = vsel %vm894_vm15, %v1494_v27, %v8755_v24  ;;  %v8756_v44 = vld [vmem:[#allocation77_spill] sm:$0xff]  ;;  %v8760_v60 = vld [vmem:[#allocation90_spill] sm:$0xff]  ;;  %v8764_v46 = vld [vmem:[#allocation80_spill] sm:$0xff] }
 0x2ab   :  { %v7011_v7 = vpop.permute.xlu1 %1802  ;;  %v7013_v55 = vpop.permute.xlu0 %1774  ;;  %v1406_v48 = vadd.f32 %v1404_v52, %v1393_v32  ;;  %v8759_v52 = vld [vmem:[#allocation79_spill] sm:$0xff]  ;;  %v1612_v27 = vsel %vm882_vm11, %v1610_v54, %v8764_v46  ;;  %v8765_v19 = vld [vmem:[#allocation81_spill] sm:$0xff]  ;;  %v8766_v24 = vld [vmem:[#allocation82_spill] sm:$0xff] }
 0x2ac   :  { %8735 = vst [vmem:[#allocation7_spill] sm:$0xff] %v7011_v7  ;;  %v1491_v7 = vsel %vm885_vm12, %v1489_v62, %v8752_v37  ;;  %v8772_v46 = vld [vmem:[#allocation86_spill] sm:$0xff] }
 0x2af   :  { %v7022_v10 = vpop.permute.xlu1 %1824  ;;  %v7024_v50 = vpop.permute.xlu0 %1808 }
 0x2b0   :  { %8736 = vst [vmem:[#allocation10_spill] sm:$0xff] %v7024_v50  ;;  %v8758_v50 = vld [vmem:[#allocation75_spill] sm:$0xff] }
 0x2b1   :  { %v1549_v32 = vsel %vm879_vm10, %v8758_v50, %v8757_v45  ;;  %v1498_v50 = vsel %vm897_vm2, %v1496_v47, %v8766_v24  ;;  %v8768_v45 = vld [vmem:[#allocation83_spill] sm:$0xff] }
 0x2b2   :  { %v8774_v24 = vld [vmem:[#allocation91_spill] sm:$0xff] }
 0x2b3   :  { %v7033_v34 = vpop.permute.xlu1 %1764  ;;  %v7035_v59 = vpop.permute.xlu0 %1874 }
 0x2b7   :  { %v7042_v30 = vpop.permute.xlu1 %1814  ;;  %v7044_v22 = vpop.permute.xlu0 %1780 }
 0x2b8   :  { %8739 = vst [vmem:[#allocation8_spill] sm:$0xff] %v7042_v30  ;;  %v8751_v30 = vld [vmem:[#allocation72_spill] sm:$0xff] }
 0x2b9   :  { %v1552_v1 = vsel %vm885_vm12, %v1550_v4, %v8751_v30  ;;  %v1493_v30 = vsel %vm888_vm13, %v1491_v7, %v8759_v52  ;;  %v8761_v4 = vld [vmem:[#allocation87_spill] sm:$0xff]  ;;  %v1614_v52 = vsel %vm885_vm12, %v1612_v27, %v8768_v45  ;;  %v8776_v45 = vld [vmem:[#allocation92_spill] sm:$0xff] }
 0x2ba   :  { %v1554_v6 = vsel %vm888_vm13, %v1552_v1, %v8756_v44  ;;  %v1611_v49 = vsel %vm879_vm10, %v8761_v4, %v8760_v60  ;;  %v1551_v1 = vsel %vm882_vm11, %v1549_v32, %v8765_v19  ;;  %v8767_v44 = vld [vmem:[#allocation93_spill] sm:$0xff]  ;;  %v8769_v60 = vld [vmem:[#allocation84_spill] sm:$0xff]  ;;  %v1495_v32 = vsel %vm891_vm14, %v1493_v30, %v8772_v46 }
 0x2bb   :  { %v7059_v61 = vpop.permute.xlu1 %1880  ;;  %v7061_v57 = vpop.permute.xlu0 %1830  ;;  %v1613_v7 = vsel %vm882_vm11, %v1611_v49, %v8767_v44  ;;  %v1556_v4 = vsel %vm891_vm14, %v1554_v6, %v8769_v60  ;;  %v8773_v19 = vld [vmem:[#allocation88_spill] sm:$0xff]  ;;  %v8775_v44 = vld [vmem:[#allocation89_spill] sm:$0xff] }
 0x2bc   :  { %8742 = vst [vmem:[#allocation12_spill] sm:$0xff] %v7061_v57  ;;  %v8771_v57 = vld [vmem:[#allocation97_spill] sm:$0xff]  ;;  %v1558_v47 = vsel %vm894_vm15, %v1556_v4, %v8773_v19  ;;  %v1616_v6 = vsel %vm888_vm13, %v1614_v52, %v8775_v44  ;;  %v8781_v19 = vld [vmem:[#allocation95_spill] sm:$0xff] }
 0x2bd   :  { %v1615_v54 = vsel %vm885_vm12, %v1613_v7, %v8771_v57 }
 0x2be   :  { %v1617_v27 = vsel %vm888_vm13, %v1615_v54, %v6823_v40  ;;  %v8780_v40 = vld [vmem:[#allocation96_spill] sm:$0xff] }
 0x2bf   :  { %v7096_v62 = vpop.permute.xlu1 %1820  ;;  %v7098_v37 = vpop.permute.xlu0 %1770  ;;  %v1619_v30 = vsel %vm891_vm14, %v1617_v27, %v6851_v28  ;;  %v1618_v54 = vsel %vm891_vm14, %v1616_v6, %v8780_v40  ;;  %v1645_v27 = vrot.slane %v7020_v23, %v5538_v21 }
 0x2c0   :  { %8762 = vst [vmem:[#allocation16_spill] sm:$0xff] %v7096_v62  ;;  %8763 = vst [vmem:[#allocation18_spill] sm:$0xff] %v7098_v37  ;;  %v8770_v62 = vld [vmem:[#allocation85_spill] sm:$0xff]  ;;  %v1621_v46 = vsel %vm894_vm15, %v1619_v30, %v6859_v41 }
 0x2c1   :  { %v1553_v37 = vsel %vm885_vm12, %v1551_v1, %v8770_v62  ;;  %v1497_v62 = vsel %vm894_vm15, %v1495_v32, %v8776_v45  ;;  %v8777_v1 = vld [vmem:[#allocation98_spill] sm:$0xff]  ;;  %v1628_v32 = vmul.f32 %v1627_v56, %v1498_v50  ;;  %v1623_v6 = vsel %vm897_vm2, %v1621_v46, %v6857_v11 }
 0x2c2   :  { %v1555_v49 = vsel %vm888_vm13, %v1553_v37, %v8774_v24  ;;  %v8779_v37 = vld [vmem:[#allocation94_spill] sm:$0xff]  ;;  %v1499_v28 = vsel %vm897_vm2, %v1497_v62, %v8781_v19  ;;  %v1620_v24 = vsel %vm894_vm15, %v1618_v54, %v6787_v42 }
 0x2c3   :  { %v1557_v57 = vsel %vm891_vm14, %v1555_v49, %v8777_v1  ;;  %v7132_v7 = vpop.permute.xlu1 %1864  ;;  %v7134_v60 = vpop.permute.xlu0 %1836  ;;  %v1560_v4 = vsel %vm897_vm2, %v1558_v47, %v8779_v37  ;;  %v1417_v47 = vsel %vm200_vm1, %v1415_v33, %v1416_v0  ;;  %v1622_v41 = vsel %vm897_vm2, %v1620_v24, %v6821_v5  ;;  %v7168_v5 = vld [vmem:[%s8513_s2 + $0x18] sm:$0xff] }
 0x2c4   :  { %8778 = vst [vmem:[#allocation19_spill] sm:$0xff] %v7132_v7  ;;  %v1559_v52 = vsel %vm894_vm15, %v1557_v57, %v6785_v25  ;;  %v1658_v25 = vrot.slane %v7020_v23, %v8689_v58  ;;  %v1419_v56 = vadd.f32 %v1417_v47, %v1406_v48  ;;  %v1634_v44 = vmul.f32 %v1633_v12, %v1560_v4 }
 0x2c5   :  { %v1561_v49 = vsel %vm897_vm2, %v1559_v52, %v6853_v2  ;;  %v1647_v2 = vmul.f32 %v1645_v27, %v1499_v28  ;;  %v1671_v33 = vrot.slane %v7020_v23, %v5509_v14  ;;  %v1640_v1 = vmul.f32 %v1639_v26, %v1622_v41 }
 0x2c6   :  { %v1660_v0 = vmul.f32 %v1658_v25, %v1561_v49  ;;  %v1629_v62 = vadd.f32 %v1628_v32, %v1419_v56  ;;  %v1646_v12 = vmul.f32 %v1645_v27, %v1498_v50  ;;  %v1659_v48 = vmul.f32 %v1658_v25, %v1560_v4 }
 0x2c7   :  { %v7159_v42 = vpop.permute.xlu1 %1886  ;;  %v7161_v45 = vpop.permute.xlu0 %1870  ;;  %v1673_v57 = vmul.f32 %v1671_v33, %v1623_v6  ;;  %v1651_v40 = vrot.slane %v1647_v2, 1  ;;  %v1672_v54 = vmul.f32 %v1671_v33, %v1622_v41  ;;  %v1684_v23 = vrot.slane %v7168_v5, %v5471_v3 }
 0x2c8   :  { %v1635_v11 = vadd.f32 %v1634_v44, %v1629_v62  ;;  %v1664_v52 = vrot.slane %v1660_v0, 1  ;;  %v1650_v46 = vrot.slane %v1646_v12, 1  ;;  %v1697_v32 = vrot.slane %v7168_v5, %v8686_v43 }
 0x2c9   :  { %v1663_v19 = vrot.slane %v1659_v48, 1  ;;  %v1677_v24 = vrot.slane %v1673_v57, 1  ;;  %v1686_v47 = vmul.f32 %v1684_v23, %v1499_v28  ;;  %v1710_v27 = vrot.slane %v7168_v5, %v5535_v20 }
 0x2ca   :  { %v1641_v26 = vadd.f32 %v1640_v1, %v1635_v11  ;;  %v1652_v44 = vsel %vm114_vm0, %v1650_v46, %v1651_v40  ;;  %v1676_v2 = vrot.slane %v1672_v54, 1  ;;  %v1699_v0 = vmul.f32 %v1697_v32, %v1561_v49 }
 0x2cb   :  { %v7170_v30 = vpop.permute.xlu1 %1826  ;;  %v7172_v37 = vpop.permute.xlu0 %1776  ;;  %v1665_v33 = vsel %vm114_vm0, %v1663_v19, %v1664_v52  ;;  %v1685_v62 = vmul.f32 %v1684_v23, %v1498_v50  ;;  %v1698_v12 = vmul.f32 %v1697_v32, %v1560_v4  ;;  %v1690_v48 = vrot.slane %v1686_v47, 2 }
 0x2cc   :  { %v1654_v1 = vadd.f32 %v1652_v44, %v1641_v26  ;;  %v1678_v11 = vsel %vm114_vm0, %v1676_v2, %v1677_v24  ;;  %v1711_v57 = vmul.f32 %v1710_v27, %v1622_v41  ;;  %v1703_v20 = vrot.slane %v1699_v0, 2 }
 0x2cd   :  { %v1712_v7 = vmul.f32 %v1710_v27, %v1623_v6  ;;  %v1689_v54 = vrot.slane %v1685_v62, 2  ;;  %v1702_v52 = vrot.slane %v1698_v12, 2  ;;  %v1927_v50 = vrot.slane %v7168_v5, %v8687_v8  ;;  %v8786_v62 = vld [vmem:[#allocation18_spill] sm:$0xff]  ;;  %v8788_v12 = vld [vmem:[#allocation7_spill] sm:$0xff] }
 0x2ce   :  { %v1667_v28 = vadd.f32 %v1665_v33, %v1654_v1  ;;  %v1945_v4 = vrot.slane %v7168_v5, %v8689_v58  ;;  %v1933_v49 = vrot.slane %v7168_v5, %v8688_v39  ;;  %v1715_v23 = vrot.slane %v1711_v57, 2  ;;  %v8789_v57 = vld [vmem:[#allocation8_spill] sm:$0xff] }
 0x2cf   :  { %v7180_v25 = vpop.permute.xlu1 %1876  ;;  %v1843_v56 = vpop.permute.xlu0 %1842  ;;  %v1691_v41 = vsel %vm200_vm1, %v1689_v54, %v1690_v48  ;;  %v1939_v32 = vrot.slane %v7168_v5, %v5538_v21  ;;  %v1704_v19 = vsel %vm200_vm1, %v1702_v52, %v1703_v20  ;;  %v1716_v24 = vrot.slane %v1712_v7, 2 }
 0x2d0   :  { %8782 = vst [vmem:[#allocation13_spill] sm:$0xff] %v7180_v25  ;;  %v8783_v25 = vld [vmem:[#allocation51_spill] sm:$0xff]  ;;  %v1680_v46 = vadd.f32 %v1678_v11, %v1667_v28  ;;  %v1848_v27 = vsel %vm879_vm10, %v6879_v15, %v6890_v17 }
 0x2d1   :  { %v1786_v40 = vsel %vm879_vm10, %v8783_v25, %v6865_v53  ;;  %v8784_v25 = vld [vmem:[#allocation55_spill] sm:$0xff]  ;;  %v1850_v44 = vsel %vm882_vm11, %v1848_v27, %v6905_v35  ;;  %v1717_v52 = vsel %vm200_vm1, %v1715_v23, %v1716_v24 }
 0x2d2   :  { %v1788_v6 = vsel %vm882_vm11, %v1786_v40, %v6863_v31  ;;  %v1787_v31 = vsel %vm879_vm10, %v8784_v25, %v6888_v9  ;;  %v1693_v33 = vadd.f32 %v1691_v41, %v1680_v46  ;;  %v1852_v15 = vsel %vm885_vm12, %v1850_v44, %v6980_v16  ;;  %v8790_v41 = vld [vmem:[#allocation16_spill] sm:$0xff]  ;;  %v8791_v25 = vld [vmem:[#allocation19_spill] sm:$0xff] }
 0x2d3   :  { %v1783_v43 = vpop.permute.xlu1 %1782  ;;  %v1893_v3 = vpop.permute.xlu0 %1892  ;;  %v1790_v47 = vsel %vm885_vm12, %v1788_v6, %v6881_v38  ;;  %v1789_v38 = vsel %vm882_vm11, %v1787_v31, %v6944_v13  ;;  %v1910_v9 = vsel %vm879_vm10, %v6978_v51, %v7007_v36  ;;  %v8785_v36 = vld [vmem:[#allocation12_spill] sm:$0xff] }
 0x2d4   :  { %v1792_v2 = vsel %vm888_vm13, %v1790_v47, %v6907_v63  ;;  %v1791_v17 = vsel %vm885_vm12, %v1789_v38, %v7005_v29  ;;  %v1854_v63 = vsel %vm888_vm13, %v1852_v15, %v7022_v10  ;;  %v1706_v0 = vadd.f32 %v1704_v19, %v1693_v33  ;;  %v8793_v38 = vld [vmem:[#allocation6_spill] sm:$0xff] }
 0x2d5   :  { %v1794_v20 = vsel %vm891_vm14, %v1792_v2, %v6942_v18  ;;  %v1912_v18 = vsel %vm882_vm11, %v1910_v9, %v7035_v59  ;;  %v1793_v16 = vsel %vm888_vm13, %v1791_v17, %v7033_v34  ;;  %v8787_v34 = vld [vmem:[#allocation10_spill] sm:$0xff]  ;;  %v8794_v9 = vld [vmem:[#allocation9_spill] sm:$0xff] }
 0x2d6   :  { %v1796_v35 = vsel %vm894_vm15, %v1794_v20, %v7013_v55  ;;  %v1914_v29 = vsel %vm885_vm12, %v1912_v18, %v7059_v61  ;;  %v1856_v55 = vsel %vm891_vm14, %v1854_v63, %v8785_v36  ;;  %v1795_v10 = vsel %vm891_vm14, %v1793_v16, %v8786_v62  ;;  %v8795_v63 = vld [vmem:[#allocation11_spill] sm:$0xff] }
 0x2d7   :  { %v7197_v26 = vpop.permute.xlu1 %1882  ;;  %v1833_v53 = vpop.permute.xlu0 %1832  ;;  %v1798_v51 = vsel %vm897_vm2, %v1796_v35, %v7044_v22  ;;  %v1858_v59 = vsel %vm894_vm15, %v1856_v55, %v7134_v60  ;;  %v1916_v1 = vsel %vm888_vm13, %v1914_v29, %v7159_v42  ;;  %v1849_v22 = vsel %vm879_vm10, %v8788_v12, %v8787_v34 }
 0x2d8   :  { %v1797_v61 = vsel %vm894_vm15, %v1795_v10, %v7172_v37  ;;  %v1860_v11 = vsel %vm897_vm2, %v1858_v59, %v1843_v56  ;;  %v1918_v48 = vsel %vm891_vm14, %v1916_v1, %v1893_v3  ;;  %v1851_v28 = vsel %vm882_vm11, %v1849_v22, %v8789_v57 }
 0x2d9   :  { %v1928_v40 = vmul.f32 %v1927_v50, %v1798_v51  ;;  %v1799_v60 = vsel %vm897_vm2, %v1797_v61, %v1783_v43  ;;  %v1853_v6 = vsel %vm885_vm12, %v1851_v28, %v8790_v41  ;;  %v1958_v37 = vrot.slane %v7168_v5, %v5509_v14  ;;  %v808_v43 = vld [vmem:[%s8513_s2 + $0x20] sm:$0xf]  ;;  %s8568_s2 = smov 72  }
 0x2da   :  { %v1719_v56 = vadd.f32 %v1717_v52, %v1706_v0  ;;  %v1855_v50 = vsel %vm888_vm13, %v1853_v6, %v7170_v30  ;;  %v1934_v19 = vmul.f32 %v1933_v49, %v1860_v11  ;;  %v1946_v47 = vmul.f32 %v1945_v4, %v1798_v51  ;;  %v8792_v30 = vld [vmem:[#allocation13_spill] sm:$0xff] }
 0x2db   :  { %v1839_v13 = vpop.permute.xlu1 %1838  ;;  %v1899_v7 = vpop.permute.xlu0 %1898  ;;  %v1947_v27 = vmul.f32 %v1945_v4, %v1799_v60  ;;  %v1857_v23 = vsel %vm891_vm14, %v1855_v50, %v1833_v53  ;;  %v1911_v5 = vsel %vm879_vm10, %v8791_v25, %v7161_v45  ;;  %v1959_v20 = vmul.f32 %v1958_v37, %v1860_v11 }
 0x2dc   :  { %v1920_v54 = vsel %vm894_vm15, %v1918_v48, %v1899_v7  ;;  %v1929_v24 = vadd.f32 %v1928_v40, %v1719_v56  ;;  %v1859_v31 = vsel %vm894_vm15, %v1857_v23, %v1839_v13  ;;  %v1913_v49 = vsel %vm882_vm11, %v1911_v5, %v8792_v30 }
 0x2dd   :  { %v1971_v15 = vrot.slane %v808_v43, %v8793_v38  ;;  %v1984_v53 = vrot.slane %v808_v43, %v8794_v9  ;;  %v1915_v35 = vsel %vm885_vm12, %v1913_v49, %v7197_v26  ;;  %v1997_v18 = vrot.slane %v808_v43, %v8795_v63 }
 0x2de   :  { %v1935_v17 = vadd.f32 %v1934_v19, %v1929_v24  ;;  %v1950_v7 = vrot.slane %v1946_v47, 1  ;;  %v1963_v62 = vrot.slane %v1959_v20, 1  ;;  %v2010_v26 = vrot.slane %v808_v43, %v8687_v8  ;;  %v5175_v24 = vld [vmem:[%s8514_s3] ss:$0 sm:$0xff]  ;;  %s8569_s3 = smov 80  }
 0x2df   :  { %v1905_v42 = vpop.permute.xlu1 %1904  ;;  %v1889_v46 = vpop.permute.xlu0 %1888  ;;  %v1986_v10 = vmul.f32 %v1984_v53, %v1799_v60  ;;  %v1985_v34 = vmul.f32 %v1984_v53, %v1798_v51  ;;  %v1998_v28 = vmul.f32 %v1997_v18, %v1860_v11 }
 0x2e0   :  { %v1922_v3 = vsel %vm897_vm2, %v1920_v54, %v1905_v42  ;;  %v1917_v13 = vsel %vm888_vm13, %v1915_v35, %v1889_v46 }
 0x2e1   :  { %v1940_v44 = vmul.f32 %v1939_v32, %v1922_v3  ;;  %v1951_v32 = vrot.slane %v1947_v27, 1  ;;  %v1972_v59 = vmul.f32 %v1971_v15, %v1922_v3  ;;  %v1990_v54 = vrot.slane %v1986_v10, 2 }
 0x2e2   :  { %v1989_v41 = vrot.slane %v1985_v34, 2  ;;  %v2011_v6 = vmul.f32 %v2010_v26, %v1922_v3  ;;  %v2002_v50 = vrot.slane %v1998_v28, 2 }
 0x2e3   :  { %v1895_v2 = vpop.permute.xlu1 %1894  ;;  %v1845_v33 = vpop.permute.xlu0 %1844  ;;  %v1941_v16 = vadd.f32 %v1940_v44, %v1935_v17  ;;  %v1952_v22 = vsel %vm114_vm0, %v1950_v7, %v1951_v32  ;;  %v1976_v42 = vrot.slane %v1972_v59, 1 }
 0x2e4   :  { %v1861_v4 = vsel %vm897_vm2, %v1859_v31, %v1845_v33  ;;  %v1919_v29 = vsel %vm891_vm14, %v1917_v13, %v1895_v2  ;;  %v1991_v19 = vsel %vm200_vm1, %v1989_v41, %v1990_v54  ;;  %v2015_v27 = vrot.slane %v2011_v6, 2 }
 0x2e5   :  { %v1960_v45 = vmul.f32 %v1958_v37, %v1861_v4  ;;  %v1999_v48 = vmul.f32 %v1997_v18, %v1861_v4  ;;  %v1954_v40 = vadd.f32 %v1952_v22, %v1941_v16 }
 0x2e7   :  { %v1964_v36 = vrot.slane %v1960_v45, 1  ;;  %v1907_v55 = vpop.permute.xlu1 %1906  ;;  %v1901_v0 = vpop.permute.xlu0 %1900  ;;  %v2003_v51 = vrot.slane %v1999_v48, 2 }
 0x2e8   :  { %v1921_v1 = vsel %vm894_vm15, %v1919_v29, %v1901_v0 }
 0x2e9   :  { %v1923_v12 = vsel %vm897_vm2, %v1921_v1, %v1907_v55  ;;  %v1965_v61 = vsel %vm114_vm0, %v1963_v62, %v1964_v36  ;;  %v2004_v11 = vsel %vm200_vm1, %v2002_v50, %v2003_v51 }
 0x2ea   :  { %v1973_v57 = vmul.f32 %v1971_v15, %v1923_v12  ;;  %v2012_v60 = vmul.f32 %v2010_v26, %v1923_v12  ;;  %v1967_v52 = vadd.f32 %v1965_v61, %v1954_v40 }
 0x2ec   :  { %v1977_v46 = vrot.slane %v1973_v57, 1  ;;  %v2016_v43 = vrot.slane %v2012_v60, 2 }
 0x2ee   :  { %v1978_v37 = vsel %vm114_vm0, %v1976_v42, %v1977_v46  ;;  %v2017_v25 = vsel %vm200_vm1, %v2015_v27, %v2016_v43  ;;  %vm3484_vm0 = vcmask 15360   ;;  %vm3486_vm1 = vcmask 23552  }
 0x2ef   :  { %v1980_v56 = vadd.f32 %v1978_v37, %v1967_v52 }
 0x2f1   :  { %v1993_v47 = vadd.f32 %v1991_v19, %v1980_v56 }
 0x2f3   :  { %v2006_v23 = vadd.f32 %v2004_v11, %v1993_v47 }
 0x2f5   :  { %v2019_v3 = vadd.f32 %v2017_v25, %v2006_v23 }
 0x2f7   :  { %v2026_v5 = vadd.f32 %v5175_v24, %v2019_v3 }
 0x2f9   :  { %v2027_v31 = vmax.f32 %v2026_v5, 0.0 }
 0x2fb   :  { %2204 = vrot.lane.b32.xlu1 %v2027_v31, %s5376_s25  ;;  %2036 = vrot.lane.b32.xlu0 %v2027_v31, %s8574_s20  ;;  %v7301_v44 = vsel %vm879_vm10, %v2027_v31, 0.0  ;;  %s8802_s20 = smov 46  }
 0x2ff   :  { %2376 = vrot.lane.b32.xlu1 %v2027_v31, %s8573_s0  ;;  %2208 = vrot.lane.b32.xlu0 %v2027_v31, %s8571_s21  ;;  %s8800_s21 = smov 55   ;;  %s8801_s0 = smov 38  }
 0x303   :  { %2548 = vrot.lane.b32.xlu1 %v2027_v31, %s8570_s23  ;;  %2380 = vrot.lane.b32.xlu0 %v2027_v31, %s8569_s3  ;;  %s8798_s3 = smov 47   ;;  %s8799_s23 = smov 30  }
 0x307   :  { %2552 = vrot.lane.b32.xlu0 %v2027_v31, %s8568_s2  ;;  %2041 = vrot.lane.b32.xlu1 %v7301_v44, %s5354_s27  ;;  %s8797_s2 = smov 48  }
 0x30b   :  { %2070 = vrot.lane.b32.xlu0 %v7301_v44, %s5353_s26  ;;  %2073 = vrot.lane.b32.xlu1 %v7301_v44, %s5355_s28 }
 0x30f   :  { %2044 = vrot.lane.b32.xlu0 %v7301_v44, %s8796_s24  ;;  %2076 = vrot.lane.b32.xlu1 %v7301_v44, %s5356_s29 }
 0x313   :  { %2047 = vrot.lane.b32.xlu0 %v7301_v44, %s8599_s16  ;;  %2079 = vrot.lane.b32.xlu1 %v7301_v44, %s5360_s13 }
 0x317   :  { %2101 = vrot.lane.b32.xlu0 %v7301_v44, %s5359_s12  ;;  %2104 = vrot.lane.b32.xlu1 %v7301_v44, %s8586_s14 }
 0x31b   :  { %2107 = vrot.lane.b32.xlu0 %v7301_v44, %s8597_s11  ;;  %2110 = vrot.lane.b32.xlu1 %v7301_v44, %s8584_s18 }
 0x36d   :  { %v2037_v2 = vpop.permute.xlu0 %2036  ;;  %v2205_v30 = vpop.permute.xlu1 %2204 }
 0x36e   :  { %v2039_v33 = vsel %vm879_vm10, %v2037_v2, 0.0  ;;  %v7340_v49 = vsel %vm879_vm10, %v2205_v30, 0.0 }
 0x36f   :  { %2051 = vrot.lane.b32.xlu0 %v2039_v33, %s8582_s1  ;;  %2082 = vrot.lane.b32.xlu1 %v2039_v33, %s8580_s15 }
 0x371   :  { %v2209_v20 = vpop.permute.xlu0 %2208  ;;  %v2377_v4 = vpop.permute.xlu1 %2376 }
 0x372   :  { %v2211_v15 = vsel %vm879_vm10, %v2209_v20, 0.0  ;;  %v7377_v53 = vsel %vm879_vm10, %v2377_v4, 0.0 }
 0x373   :  { %2085 = vrot.lane.b32.xlu0 %v2039_v33, %s8578_s22  ;;  %2054 = vrot.lane.b32.xlu1 %v2039_v33, %s8576_s17 }
 0x375   :  { %v2549_v17 = vpop.permute.xlu1 %2548  ;;  %v2381_v35 = vpop.permute.xlu0 %2380 }
 0x376   :  { %v2383_v45 = vsel %vm879_vm10, %v2381_v35, 0.0  ;;  %v7440_v26 = vsel %vm879_vm10, %v2549_v17, 0.0 }
 0x377   :  { %2057 = vrot.lane.b32.xlu0 %v2039_v33, %s8797_s2  ;;  %2088 = vrot.lane.b32.xlu1 %v2039_v33, %s8798_s3 }
 0x379   :  { %v2553_v18 = vpop.permute.xlu0 %2552  ;;  %v7391_v32 = vpop.permute.xlu1 %2041 }
 0x37a   :  { %v2555_v57 = vsel %vm879_vm10, %v2553_v18, 0.0  ;;  %v2063_v17 = vsel %vm879_vm10, %v7301_v44, %v7391_v32  ;;  %v2028_v32 = vld [vmem:[%s8515_s4] sm:$0xff] }
 0x37b   :  { %2113 = vrot.lane.b32.xlu0 %v2039_v33, %s8799_s23  ;;  %2060 = vrot.lane.b32.xlu1 %v2039_v33, %s8657_s30 }
 0x37d   :  { %v7399_v13 = vpop.permute.xlu0 %2070  ;;  %v7401_v7 = vpop.permute.xlu1 %2073 }
 0x37e   :  { %v2094_v30 = vsel %vm879_vm10, %v7399_v13, %v7401_v7 }
 0x37f   :  { %2091 = vrot.lane.b32.xlu0 %v2039_v33, %s8800_s21  ;;  %2116 = vrot.lane.b32.xlu1 %v2039_v33, %s8801_s0 }
 0x381   :  { %v7407_v16 = vpop.permute.xlu0 %2044  ;;  %v7409_v29 = vpop.permute.xlu1 %2076 }
 0x382   :  { %v2095_v20 = vsel %vm882_vm11, %v2094_v30, %v7409_v29  ;;  %v2064_v18 = vsel %vm882_vm11, %v2063_v17, %v7407_v16 }
 0x383   :  { %2119 = vrot.lane.b32.xlu0 %v2039_v33, %s8802_s20  ;;  %2122 = vrot.lane.b32.xlu1 %v2039_v33, %s8630_s19 }
 0x385   :  { %v7416_v36 = vpop.permute.xlu0 %2047  ;;  %v7418_v55 = vpop.permute.xlu1 %2079 }
 0x386   :  { %v2096_v35 = vsel %vm885_vm12, %v2095_v20, %v7418_v55  ;;  %v2065_v29 = vsel %vm885_vm12, %v2064_v18, %v7416_v36 }
 0x387   :  { %2213 = vrot.lane.b32.xlu0 %v7340_v49, %s5354_s27  ;;  %2216 = vrot.lane.b32.xlu1 %v7340_v49, %s8796_s24 }
 0x389   :  { %v7423_v0 = vpop.permute.xlu0 %2101  ;;  %v7425_v62 = vpop.permute.xlu1 %2104 }
 0x38a   :  { %v2125_v2 = vsel %vm879_vm10, %v7423_v0, %v7425_v62  ;;  %v2141_v62 = vrot.slane %v2028_v32, %v8794_v9 }
 0x38b   :  { %2219 = vrot.lane.b32.xlu0 %v7340_v49, %s8599_s16  ;;  %2242 = vrot.lane.b32.xlu1 %v7340_v49, %s5353_s26 }
 0x38d   :  { %v2108_v10 = vpop.permute.xlu0 %2107  ;;  %v7431_v59 = vpop.permute.xlu1 %2110 }
 0x38e   :  { %v2126_v33 = vsel %vm882_vm11, %v2125_v2, %v2108_v10 }
 0x38f   :  { %2245 = vrot.lane.b32.xlu0 %v7340_v49, %s5355_s28  ;;  %2223 = vrot.lane.b32.xlu1 %v2211_v15, %s8582_s1 }
 0x393   :  { %2248 = vrot.lane.b32.xlu0 %v7340_v49, %s5356_s29  ;;  %2226 = vrot.lane.b32.xlu1 %v2211_v15, %s8576_s17 }
 0x397   :  { %2251 = vrot.lane.b32.xlu0 %v7340_v49, %s5360_s13  ;;  %2273 = vrot.lane.b32.xlu1 %v7340_v49, %s5359_s12 }
 0x39b   :  { %2276 = vrot.lane.b32.xlu0 %v7340_v49, %s8586_s14  ;;  %2229 = vrot.lane.b32.xlu1 %v2211_v15, %s8797_s2 }
 0x39f   :  { %2254 = vrot.lane.b32.xlu0 %v2211_v15, %s8580_s15  ;;  %2279 = vrot.lane.b32.xlu1 %v7340_v49, %s8597_s11 }
 0x3a3   :  { %2232 = vrot.lane.b32.xlu0 %v2211_v15, %s8657_s30  ;;  %2257 = vrot.lane.b32.xlu1 %v2211_v15, %s8578_s22 }
 0x3a7   :  { %2282 = vrot.lane.b32.xlu0 %v7340_v49, %s8584_s18  ;;  %2260 = vrot.lane.b32.xlu1 %v2211_v15, %s8798_s3 }
 0x3ab   :  { %2285 = vrot.lane.b32.xlu0 %v2211_v15, %s8799_s23  ;;  %2263 = vrot.lane.b32.xlu1 %v2211_v15, %s8800_s21 }
 0x3af   :  { %2288 = vrot.lane.b32.xlu0 %v2211_v15, %s8801_s0  ;;  %2291 = vrot.lane.b32.xlu1 %v2211_v15, %s8802_s20 }
 0x3b3   :  { %2294 = vrot.lane.b32.xlu0 %v2211_v15, %s8630_s19  ;;  %2385 = vrot.lane.b32.xlu1 %v7377_v53, %s5354_s27 }
 0x3b7   :  { %2388 = vrot.lane.b32.xlu0 %v7377_v53, %s8796_s24  ;;  %2391 = vrot.lane.b32.xlu1 %v7377_v53, %s8599_s16 }
 0x3bb   :  { %2414 = vrot.lane.b32.xlu0 %v7377_v53, %s5353_s26  ;;  %2417 = vrot.lane.b32.xlu1 %v7377_v53, %s5355_s28 }
 0x3bf   :  { %2395 = vrot.lane.b32.xlu0 %v2383_v45, %s8582_s1  ;;  %2420 = vrot.lane.b32.xlu1 %v7377_v53, %s5356_s29 }
 0x3c3   :  { %2398 = vrot.lane.b32.xlu0 %v2383_v45, %s8576_s17  ;;  %2423 = vrot.lane.b32.xlu1 %v7377_v53, %s5360_s13 }
 0x3c7   :  { %2445 = vrot.lane.b32.xlu0 %v7377_v53, %s5359_s12  ;;  %2448 = vrot.lane.b32.xlu1 %v7377_v53, %s8586_s14 }
 0x3cb   :  { %2401 = vrot.lane.b32.xlu0 %v2383_v45, %s8797_s2  ;;  %2426 = vrot.lane.b32.xlu1 %v2383_v45, %s8580_s15 }
 0x3cf   :  { %2451 = vrot.lane.b32.xlu0 %v7377_v53, %s8597_s11  ;;  %2404 = vrot.lane.b32.xlu1 %v2383_v45, %s8657_s30 }
 0x3d3   :  { %2429 = vrot.lane.b32.xlu0 %v2383_v45, %s8578_s22  ;;  %2454 = vrot.lane.b32.xlu1 %v7377_v53, %s8584_s18 }
 0x3d7   :  { %2432 = vrot.lane.b32.xlu0 %v2383_v45, %s8798_s3  ;;  %2457 = vrot.lane.b32.xlu1 %v2383_v45, %s8799_s23 }
 0x3db   :  { %2435 = vrot.lane.b32.xlu0 %v2383_v45, %s8800_s21  ;;  %2460 = vrot.lane.b32.xlu1 %v2383_v45, %s8801_s0 }
 0x3df   :  { %2463 = vrot.lane.b32.xlu0 %v2383_v45, %s8802_s20  ;;  %2466 = vrot.lane.b32.xlu1 %v2383_v45, %s8630_s19  ;;  %v2127_v45 = vsel %vm885_vm12, %v2126_v33, %v7431_v59 }
 0x3e1   :  { %v7435_v1 = vpop.permute.xlu0 %2051  ;;  %v7437_v34 = vpop.permute.xlu1 %2082 }
 0x3e2   :  { %v2097_v13 = vsel %vm888_vm13, %v2096_v35, %v7437_v34  ;;  %v2066_v16 = vsel %vm888_vm13, %v2065_v29, %v7435_v1  ;;  %v2135_v1 = vrot.slane %v2028_v32, %v8793_v38 }
 0x3e3   :  { %2557 = vrot.lane.b32.xlu0 %v7440_v26, %s5354_s27  ;;  %2560 = vrot.lane.b32.xlu1 %v7440_v26, %s8796_s24 }
 0x3e5   :  { %v7446_v12 = vpop.permute.xlu0 %2085  ;;  %v7448_v22 = vpop.permute.xlu1 %2054 }
 0x3e6   :  { %v2098_v44 = vsel %vm891_vm14, %v2097_v13, %v7446_v12  ;;  %v2067_v34 = vsel %vm891_vm14, %v2066_v16, %v7448_v22  ;;  %v2171_v13 = vrot.slane %v2028_v32, %v5538_v21 }
 0x3e7   :  { %2563 = vrot.lane.b32.xlu0 %v7440_v26, %s8599_s16  ;;  %2586 = vrot.lane.b32.xlu1 %v7440_v26, %s5353_s26 }
 0x3e9   :  { %v7454_v61 = vpop.permute.xlu0 %2057  ;;  %v7456_v48 = vpop.permute.xlu1 %2088 }
 0x3ea   :  { %v2099_v0 = vsel %vm894_vm15, %v2098_v44, %v7456_v48  ;;  %v2147_v48 = vrot.slane %v2028_v32, %v8795_v63 }
 0x3eb   :  { %2589 = vrot.lane.b32.xlu0 %v7440_v26, %s5355_s28  ;;  %2567 = vrot.lane.b32.xlu1 %v2555_v57, %s8582_s1  ;;  %s8805_s1 = smov 88  }
 0x3ed   :  { %v2114_v28 = vpop.permute.xlu0 %2113  ;;  %v7462_v40 = vpop.permute.xlu1 %2060 }
 0x3ee   :  { %v2128_v7 = vsel %vm888_vm13, %v2127_v45, %v2114_v28 }
 0x3ef   :  { %2592 = vrot.lane.b32.xlu0 %v7440_v26, %s5356_s29  ;;  %2570 = vrot.lane.b32.xlu1 %v2555_v57, %s8576_s17  ;;  %s8813_s17 = smov 39  }
 0x3f1   :  { %v2092_v54 = vpop.permute.xlu0 %2091  ;;  %v2117_v42 = vpop.permute.xlu1 %2116 }
 0x3f2   :  { %v2129_v55 = vsel %vm891_vm14, %v2128_v7, %v2117_v42  ;;  %v2100_v12 = vsel %vm897_vm2, %v2099_v0, %v2092_v54 }
 0x3f3   :  { %2595 = vrot.lane.b32.xlu0 %v7440_v26, %s5360_s13  ;;  %2617 = vrot.lane.b32.xlu1 %v7440_v26, %s5359_s12  ;;  %v2142_v2 = vmul.f32 %v2141_v62, %v2100_v12 }
 0x3f5   :  { %v2120_v46 = vpop.permute.xlu0 %2119  ;;  %v2123_v60 = vpop.permute.xlu1 %2122 }
 0x3f6   :  { %v2130_v10 = vsel %vm894_vm15, %v2129_v55, %v2120_v46  ;;  %v2153_v46 = vrot.slane %v2028_v32, %v8687_v8  ;;  %v2180_v55 = vrot.slane %v2028_v32, %v8689_v58 }
 0x3f7   :  { %2620 = vrot.lane.b32.xlu0 %v7440_v26, %s8586_s14  ;;  %2573 = vrot.lane.b32.xlu1 %v2555_v57, %s8797_s2  ;;  %v2131_v42 = vsel %vm897_vm2, %v2130_v10, %v2123_v60  ;;  %s8807_s14 = smov 80  }
 0x3f8   :  { %v2148_v30 = vmul.f32 %v2147_v48, %v2131_v42  ;;  %v2172_v0 = vmul.f32 %v2171_v13, %v2131_v42 }
 0x3f9   :  { %v7474_v52 = vpop.permute.xlu0 %2213  ;;  %v7476_v41 = vpop.permute.xlu1 %2216 }
 0x3fa   :  { %v2174_v48 = vrot.slane %v2172_v0, 1 }
 0x3fb   :  { %2598 = vrot.lane.b32.xlu0 %v2555_v57, %s8580_s15  ;;  %2623 = vrot.lane.b32.xlu1 %v7440_v26, %s8597_s11  ;;  %s8804_s15 = smov 112  }
 0x3fd   :  { %v7481_v6 = vpop.permute.xlu0 %2219  ;;  %v7483_v51 = vpop.permute.xlu1 %2242 }
 0x3ff   :  { %2576 = vrot.lane.b32.xlu0 %v2555_v57, %s8657_s30  ;;  %2601 = vrot.lane.b32.xlu1 %v2555_v57, %s8578_s22  ;;  %s8803_s22 = smov 96  }
 0x401   :  { %v7487_v37 = vpop.permute.xlu0 %2245  ;;  %v7489_v56 = vpop.permute.xlu1 %2223 }
 0x403   :  { %2626 = vrot.lane.b32.xlu0 %v7440_v26, %s8584_s18  ;;  %2604 = vrot.lane.b32.xlu1 %v2555_v57, %s8798_s3  ;;  %s8806_s18 = smov 104  }
 0x405   :  { %v7494_v50 = vpop.permute.xlu0 %2248  ;;  %v7496_v19 = vpop.permute.xlu1 %2226 }
 0x407   :  { %2629 = vrot.lane.b32.xlu0 %v2555_v57, %s8799_s23  ;;  %2607 = vrot.lane.b32.xlu1 %v2555_v57, %s8800_s21 }
 0x409   :  { %v7500_v43 = vpop.permute.xlu0 %2251  ;;  %v7502_v47 = vpop.permute.xlu1 %2273 }
 0x40b   :  { %2632 = vrot.lane.b32.xlu0 %v2555_v57, %s8801_s0  ;;  %2635 = vrot.lane.b32.xlu1 %v2555_v57, %s8802_s20 }
 0x40d   :  { %v7506_v27 = vpop.permute.xlu0 %2276  ;;  %v7508_v11 = vpop.permute.xlu1 %2229 }
 0x40f   :  { %2638 = vrot.lane.b32.xlu0 %v2555_v57, %s8630_s19  ;;  %v2068_v57 = vsel %vm894_vm15, %v2067_v34, %v7454_v61  ;;  %v2162_v61 = vrot.slane %v2028_v32, %v8688_v39 }
 0x410   :  { %v2069_v28 = vsel %vm897_vm2, %v2068_v57, %v7462_v40  ;;  %v2189_v57 = vrot.slane %v2028_v32, %v5509_v14 }
 0x411   :  { %v7511_v23 = vpop.permute.xlu0 %2254  ;;  %v7513_v24 = vpop.permute.xlu1 %2279  ;;  %v2136_v54 = vmul.f32 %v2135_v1, %v2069_v28  ;;  %v2154_v20 = vmul.f32 %v2153_v46, %v2069_v28  ;;  %v2163_v60 = vmul.f32 %v2162_v61, %v2100_v12  ;;  %v2181_v1 = vmul.f32 %v2180_v55, %v2069_v28 }
 0x412   :  { %v2190_v61 = vmul.f32 %v2189_v57, %v2100_v12 }
 0x413   :  { %v2143_v17 = vadd.f32 %v2142_v2, %v2136_v54  ;;  %v2156_v18 = vrot.slane %v2154_v20, 1  ;;  %v2165_v16 = vrot.slane %v2163_v60, 1  ;;  %v7604_v54 = vld [vmem:[%s8515_s4 + $0x8] sm:$0xff] }
 0x414   :  { %v2198_v32 = vrot.slane %v7604_v54, %v8793_v38  ;;  %v2307_v12 = vrot.slane %v7604_v54, %v8794_v9  ;;  %v2192_v55 = vrot.slane %v2190_v61, 2 }
 0x415   :  { %v7515_v25 = vpop.permute.xlu0 %2232  ;;  %v7517_v3 = vpop.permute.xlu1 %2257  ;;  %v2149_v40 = vadd.f32 %v2148_v30, %v2143_v17  ;;  %v2235_v30 = vsel %vm879_vm10, %v7340_v49, %v7474_v52  ;;  %v2183_v17 = vrot.slane %v2181_v1, 2  ;;  %v2266_v49 = vsel %vm879_vm10, %v7483_v51, %v7487_v37 }
 0x416   :  { %v2236_v28 = vsel %vm882_vm11, %v2235_v30, %v7476_v41  ;;  %v2297_v52 = vsel %vm879_vm10, %v7502_v47, %v7506_v27  ;;  %v2199_v27 = vmul.f32 %v2198_v32, %v2131_v42  ;;  %v2325_v30 = vrot.slane %v7604_v54, %v8688_v39 }
 0x417   :  { %v2158_v44 = vadd.f32 %v2156_v18, %v2149_v40  ;;  %v2237_v60 = vsel %vm885_vm12, %v2236_v28, %v7481_v6  ;;  %v2298_v6 = vsel %vm882_vm11, %v2297_v52, %v7513_v24 }
 0x418   :  { %v2238_v41 = vsel %vm888_vm13, %v2237_v60, %v7489_v56 }
 0x419   :  { %v7519_v5 = vpop.permute.xlu0 %2282  ;;  %v7521_v31 = vpop.permute.xlu1 %2260  ;;  %v2167_v34 = vadd.f32 %v2165_v16, %v2158_v44  ;;  %v2267_v44 = vsel %vm882_vm11, %v2266_v49, %v7494_v50  ;;  %v2239_v51 = vsel %vm891_vm14, %v2238_v41, %v7496_v19 }
 0x41a   :  { %v2268_v37 = vsel %vm885_vm12, %v2267_v44, %v7500_v43  ;;  %v2299_v47 = vsel %vm885_vm12, %v2298_v6, %v7519_v5  ;;  %v2240_v56 = vsel %vm894_vm15, %v2239_v51, %v7508_v11  ;;  %v2352_v51 = vrot.slane %v7604_v54, %v5509_v14 }
 0x41b   :  { %v2176_v20 = vadd.f32 %v2174_v48, %v2167_v34  ;;  %v2269_v50 = vsel %vm888_vm13, %v2268_v37, %v7511_v23  ;;  %v2241_v19 = vsel %vm897_vm2, %v2240_v56, %v7515_v25  ;;  %v2201_v34 = vrot.slane %v2199_v27, 2  ;;  %v7678_v37 = vld [vmem:[%s8515_s4 + $0x10] sm:$0xff] }
 0x41c   :  { %v2270_v43 = vsel %vm891_vm14, %v2269_v50, %v7517_v3  ;;  %v2308_v57 = vmul.f32 %v2307_v12, %v2241_v19  ;;  %v2319_v3 = vrot.slane %v7604_v54, %v8687_v8  ;;  %v2326_v28 = vmul.f32 %v2325_v30, %v2241_v19 }
 0x41d   :  { %v7532_v15 = vpop.permute.xlu0 %2285  ;;  %v7534_v4 = vpop.permute.xlu1 %2263  ;;  %v2185_v13 = vadd.f32 %v2183_v17, %v2176_v20  ;;  %v2271_v23 = vsel %vm894_vm15, %v2270_v43, %v7521_v31  ;;  %v2361_v43 = vrot.slane %v7678_v37, %v8793_v38 }
 0x41e   :  { %v2300_v24 = vsel %vm888_vm13, %v2299_v47, %v7532_v15  ;;  %v2313_v15 = vrot.slane %v7604_v54, %v8795_v63  ;;  %v2272_v42 = vsel %vm897_vm2, %v2271_v23, %v7534_v4 }
 0x41f   :  { %v2194_v11 = vadd.f32 %v2192_v55, %v2185_v13  ;;  %v2328_v13 = vrot.slane %v2326_v28, 1 }
 0x420   :  { %v2314_v20 = vmul.f32 %v2313_v15, %v2272_v42 }
 0x421   :  { %v7562_v36 = vpop.permute.xlu0 %2288  ;;  %v7564_v59 = vpop.permute.xlu1 %2291  ;;  %v2203_v31 = vadd.f32 %v2201_v34, %v2194_v11 }
 0x422   :  { %v2301_v5 = vsel %vm891_vm14, %v2300_v24, %v7562_v36 }
 0x423   :  { %v2302_v25 = vsel %vm894_vm15, %v2301_v5, %v7564_v59  ;;  %v2309_v61 = vadd.f32 %v2308_v57, %v2203_v31  ;;  %v2334_v59 = vrot.slane %v7604_v54, %v5538_v21  ;;  %v2353_v5 = vmul.f32 %v2352_v51, %v2241_v19 }
 0x424   :  { %v2370_v31 = vrot.slane %v7678_v37, %v8794_v9 }
 0x425   :  { %v7577_v33 = vpop.permute.xlu0 %2294  ;;  %v7579_v22 = vpop.permute.xlu1 %2385  ;;  %v2315_v60 = vadd.f32 %v2314_v20, %v2309_v61  ;;  %v2335_v41 = vmul.f32 %v2334_v59, %v2272_v42 }
 0x426   :  { %v2303_v48 = vsel %vm897_vm2, %v2302_v25, %v7577_v33  ;;  %v2343_v33 = vrot.slane %v7604_v54, %v8689_v58  ;;  %v2407_v23 = vsel %vm879_vm10, %v7377_v53, %v7579_v22  ;;  %v2362_v25 = vmul.f32 %v2361_v43, %v2272_v42 }
 0x427   :  { %v2320_v4 = vmul.f32 %v2319_v3, %v2303_v48  ;;  %v2337_v47 = vrot.slane %v2335_v41, 1  ;;  %v2355_v3 = vrot.slane %v2353_v5, 2  ;;  %v2371_v28 = vmul.f32 %v2370_v31, %v2303_v48 }
 0x428   :  { %v2344_v27 = vmul.f32 %v2343_v33, %v2303_v48  ;;  %v2485_v48 = vrot.slane %v7678_v37, %v8687_v8 }
 0x429   :  { %v7582_v35 = vpop.permute.xlu0 %2388  ;;  %v7584_v45 = vpop.permute.xlu1 %2391  ;;  %v2321_v49 = vadd.f32 %v2320_v4, %v2315_v60  ;;  %v2373_v41 = vrot.slane %v2371_v28, 2 }
 0x42a   :  { %v2346_v11 = vrot.slane %v2344_v27, 1  ;;  %v2408_v15 = vsel %vm882_vm11, %v2407_v23, %v7582_v35  ;;  %v2479_v35 = vrot.slane %v7678_v37, %v8795_v63 }
 0x42b   :  { %v2330_v44 = vadd.f32 %v2328_v13, %v2321_v49  ;;  %v2409_v19 = vsel %vm885_vm12, %v2408_v15, %v7584_v45 }
 0x42d   :  { %v7587_v7 = vpop.permute.xlu0 %2414  ;;  %v7589_v29 = vpop.permute.xlu1 %2417  ;;  %v2339_v56 = vadd.f32 %v2337_v47, %v2330_v44 }
 0x42e   :  { %v2438_v53 = vsel %vm879_vm10, %v7587_v7, %v7589_v29  ;;  %v2364_v7 = vrot.slane %v2362_v25, 2 }
 0x42f   :  { %v2348_v54 = vadd.f32 %v2346_v11, %v2339_v56 }
 0x431   :  { %v7592_v62 = vpop.permute.xlu0 %2395  ;;  %v7594_v10 = vpop.permute.xlu1 %2420  ;;  %v2357_v30 = vadd.f32 %v2355_v3, %v2348_v54  ;;  %v7742_v3 = vld [vmem:[%s8515_s4 + $0x18] sm:$0xff] }
 0x432   :  { %v2410_v42 = vsel %vm888_vm13, %v2409_v19, %v7592_v62  ;;  %v2439_v20 = vsel %vm882_vm11, %v2438_v53, %v7594_v10  ;;  %v2524_v19 = vrot.slane %v7742_v3, %v8793_v38 }
 0x433   :  { %v2366_v49 = vadd.f32 %v2364_v7, %v2357_v30 }
 0x435   :  { %v7597_v46 = vpop.permute.xlu0 %2398  ;;  %v7599_v2 = vpop.permute.xlu1 %2423  ;;  %v2375_v33 = vadd.f32 %v2373_v41, %v2366_v49 }
 0x436   :  { %v2411_v29 = vsel %vm891_vm14, %v2410_v42, %v7597_v46 }
 0x439   :  { %v7613_v40 = vpop.permute.xlu0 %2445  ;;  %v7615_v18 = vpop.permute.xlu1 %2448 }
 0x43a   :  { %v2469_v22 = vsel %vm879_vm10, %v7613_v40, %v7615_v18  ;;  %v2440_v40 = vsel %vm885_vm12, %v2439_v20, %v7599_v2 }
 0x43d   :  { %v7645_v16 = vpop.permute.xlu0 %2401  ;;  %v7647_v0 = vpop.permute.xlu1 %2426 }
 0x43e   :  { %v2412_v62 = vsel %vm894_vm15, %v2411_v29, %v7645_v16  ;;  %v2441_v10 = vsel %vm888_vm13, %v2440_v40, %v7647_v0 }
 0x441   :  { %v2452_v1 = vpop.permute.xlu0 %2451  ;;  %v2405_v36 = vpop.permute.xlu1 %2404 }
 0x442   :  { %v2470_v45 = vsel %vm882_vm11, %v2469_v22, %v2452_v1  ;;  %v2413_v59 = vsel %vm897_vm2, %v2412_v62, %v2405_v36  ;;  %v2491_v36 = vrot.slane %v7678_v37, %v8688_v39 }
 0x443   :  { %v2525_v20 = vmul.f32 %v2524_v19, %v2413_v59 }
 0x445   :  { %v2430_v17 = vpop.permute.xlu0 %2429  ;;  %v2455_v32 = vpop.permute.xlu1 %2454  ;;  %v2527_v28 = vrot.slane %v2525_v20, 2 }
 0x446   :  { %v2471_v18 = vsel %vm885_vm12, %v2470_v45, %v2455_v32  ;;  %v2442_v60 = vsel %vm891_vm14, %v2441_v10, %v2430_v17  ;;  %v2542_v10 = vrot.slane %v7742_v3, %v8795_v63 }
 0x449   :  { %v2433_v52 = vpop.permute.xlu0 %2432  ;;  %v2458_v12 = vpop.permute.xlu1 %2457 }
 0x44a   :  { %v2472_v1 = vsel %vm888_vm13, %v2471_v18, %v2458_v12  ;;  %v2443_v2 = vsel %vm894_vm15, %v2442_v60, %v2433_v52  ;;  %v2480_v12 = vmul.f32 %v2479_v35, %v2413_v59  ;;  %v2497_v52 = vrot.slane %v7678_v37, %v5538_v21 }
 0x44c   :  { %v2481_v47 = vadd.f32 %v2480_v12, %v2375_v33  ;;  %v2498_v56 = vmul.f32 %v2497_v52, %v2413_v59 }
 0x44d   :  { %v2436_v6 = vpop.permute.xlu0 %2435  ;;  %v2461_v55 = vpop.permute.xlu1 %2460 }
 0x44e   :  { %v2473_v46 = vsel %vm891_vm14, %v2472_v1, %v2461_v55  ;;  %v2444_v0 = vsel %vm897_vm2, %v2443_v2, %v2436_v6  ;;  %v2506_v6 = vrot.slane %v7678_v37, %v8689_v58  ;;  %v2500_v23 = vrot.slane %v2498_v56, 1 }
 0x44f   :  { %v2486_v44 = vmul.f32 %v2485_v48, %v2444_v0  ;;  %v2669_v56 = vrot.slane %v7742_v3, %v8689_v58 }
 0x450   :  { %v2507_v54 = vmul.f32 %v2506_v6, %v2444_v0 }
 0x451   :  { %v2464_v50 = vpop.permute.xlu0 %2463  ;;  %v2467_v24 = vpop.permute.xlu1 %2466 }
 0x452   :  { %v2474_v32 = vsel %vm894_vm15, %v2473_v46, %v2464_v50  ;;  %v2487_v50 = vadd.f32 %v2486_v44, %v2481_v47  ;;  %v2509_v53 = vrot.slane %v2507_v54, 1  ;;  %v2678_v54 = vrot.slane %v7742_v3, %v5509_v14 }
 0x453   :  { %v2475_v17 = vsel %vm897_vm2, %v2474_v32, %v2467_v24  ;;  %v2515_v24 = vrot.slane %v7678_v37, %v5509_v14  ;;  %v2533_v37 = vrot.slane %v7742_v3, %v8794_v9 }
 0x454   :  { %v2492_v27 = vmul.f32 %v2491_v36, %v2475_v17  ;;  %v2543_v41 = vmul.f32 %v2542_v10, %v2475_v17 }
 0x455   :  { %v7687_v34 = vpop.permute.xlu0 %2557  ;;  %v7689_v57 = vpop.permute.xlu1 %2560  ;;  %v2516_v22 = vmul.f32 %v2515_v24, %v2475_v17  ;;  %v2534_v62 = vmul.f32 %v2533_v37, %v2444_v0  ;;  %v2657_v17 = vrot.slane %v7742_v3, %v8688_v39 }
 0x456   :  { %v2493_v11 = vadd.f32 %v2492_v27, %v2487_v50  ;;  %v2579_v40 = vsel %vm879_vm10, %v7440_v26, %v7687_v34  ;;  %v2545_v27 = vrot.slane %v2543_v41, 2 }
 0x457   :  { %v2518_v45 = vrot.slane %v2516_v22, 1  ;;  %v2580_v1 = vsel %vm882_vm11, %v2579_v40, %v7689_v57  ;;  %v2651_v57 = vrot.slane %v7742_v3, %v8687_v8  ;;  %v2536_v0 = vrot.slane %v2534_v62, 2 }
 0x458   :  { %v2502_v31 = vadd.f32 %v2500_v23, %v2493_v11 }
 0x459   :  { %v7708_v61 = vpop.permute.xlu0 %2563  ;;  %v7710_v4 = vpop.permute.xlu1 %2586 }
 0x45a   :  { %v2511_v42 = vadd.f32 %v2509_v53, %v2502_v31  ;;  %v2581_v46 = vsel %vm885_vm12, %v2580_v1, %v7708_v61 }
 0x45c   :  { %v2520_v18 = vadd.f32 %v2518_v45, %v2511_v42 }
 0x45d   :  { %v2590_v16 = vpop.permute.xlu0 %2589  ;;  %v2568_v13 = vpop.permute.xlu1 %2567 }
 0x45e   :  { %v2610_v49 = vsel %vm879_vm10, %v7710_v4, %v2590_v16  ;;  %v2529_v2 = vadd.f32 %v2527_v28, %v2520_v18  ;;  %v2582_v26 = vsel %vm888_vm13, %v2581_v46, %v2568_v13 }
 0x460   :  { %v2538_v52 = vadd.f32 %v2536_v0, %v2529_v2 }
 0x461   :  { %v2593_v55 = vpop.permute.xlu0 %2592  ;;  %v2571_v51 = vpop.permute.xlu1 %2570 }
 0x462   :  { %v2611_v34 = vsel %vm882_vm11, %v2610_v49, %v2593_v55  ;;  %v2583_v48 = vsel %vm891_vm14, %v2582_v26, %v2571_v51  ;;  %v2547_v23 = vadd.f32 %v2545_v27, %v2538_v52 }
 0x465   :  { %v2596_v43 = vpop.permute.xlu0 %2595  ;;  %v2618_v5 = vpop.permute.xlu1 %2617 }
 0x466   :  { %v2612_v32 = vsel %vm885_vm12, %v2611_v34, %v2596_v43 }
 0x469   :  { %v2621_v15 = vpop.permute.xlu0 %2620  ;;  %v2574_v25 = vpop.permute.xlu1 %2573 }
 0x46a   :  { %v2584_v12 = vsel %vm894_vm15, %v2583_v48, %v2574_v25  ;;  %v2641_v16 = vsel %vm879_vm10, %v2618_v5, %v2621_v15  ;;  %v2663_v15 = vrot.slane %v7742_v3, %v5538_v21  ;;  %v2032_v25 = vld [vmem:[%s8515_s4 + $0x20] sm:$0xf]  ;;  %s8808_s4 = smov 72  }
 0x46b   :  { %v2687_v22 = vrot.slane %v2032_v25, %v8793_v38  ;;  %v2696_v42 = vrot.slane %v2032_v25, %v8794_v9  ;;  %v2705_v3 = vrot.slane %v2032_v25, %v8795_v63  ;;  %v2714_v62 = vrot.slane %v2032_v25, %v8687_v8 }
 0x46d   :  { %v2599_v35 = vpop.permute.xlu0 %2598  ;;  %v2624_v30 = vpop.permute.xlu1 %2623 }
 0x46e   :  { %v2613_v61 = vsel %vm888_vm13, %v2612_v32, %v2599_v35  ;;  %v2642_v44 = vsel %vm882_vm11, %v2641_v16, %v2624_v30 }
 0x471   :  { %v2577_v7 = vpop.permute.xlu0 %2576  ;;  %v2602_v29 = vpop.permute.xlu1 %2601 }
 0x472   :  { %v2585_v13 = vsel %vm897_vm2, %v2584_v12, %v2577_v7  ;;  %v2614_v33 = vsel %vm891_vm14, %v2613_v61, %v2602_v29 }
 0x473   :  { %v2652_v6 = vmul.f32 %v2651_v57, %v2585_v13  ;;  %v2670_v19 = vmul.f32 %v2669_v56, %v2585_v13  ;;  %v2697_v18 = vmul.f32 %v2696_v42, %v2585_v13  ;;  %v5176_v57 = vld [vmem:[%s8516_s5] ss:$0 sm:$0xff]  ;;  %s8809_s5 = smov 6  }
 0x475   :  { %v2627_v59 = vpop.permute.xlu0 %2626  ;;  %v2605_v60 = vpop.permute.xlu1 %2604  ;;  %v2653_v31 = vadd.f32 %v2652_v6, %v2547_v23  ;;  %v2672_v7 = vrot.slane %v2670_v19, 1  ;;  %v2699_v46 = vrot.slane %v2697_v18, 2 }
 0x476   :  { %v2615_v55 = vsel %vm894_vm15, %v2614_v33, %v2605_v60  ;;  %v2643_v51 = vsel %vm885_vm12, %v2642_v44, %v2627_v59 }
 0x479   :  { %v2630_v36 = vpop.permute.xlu0 %2629  ;;  %v2608_v4 = vpop.permute.xlu1 %2607 }
 0x47a   :  { %v2616_v47 = vsel %vm897_vm2, %v2615_v55, %v2608_v4  ;;  %v2644_v50 = vsel %vm888_vm13, %v2643_v51, %v2630_v36 }
 0x47b   :  { %v2658_v24 = vmul.f32 %v2657_v17, %v2616_v47  ;;  %v2679_v37 = vmul.f32 %v2678_v54, %v2616_v47  ;;  %v2706_v1 = vmul.f32 %v2705_v3, %v2616_v47 }
 0x47d   :  { %v2633_v43 = vpop.permute.xlu0 %2632  ;;  %v2636_v11 = vpop.permute.xlu1 %2635  ;;  %v2659_v20 = vadd.f32 %v2658_v24, %v2653_v31  ;;  %v2681_v28 = vrot.slane %v2679_v37, 1  ;;  %v2708_v26 = vrot.slane %v2706_v1, 2 }
 0x47e   :  { %v2645_v5 = vsel %vm891_vm14, %v2644_v50, %v2633_v43 }
 0x47f   :  { %v2646_v53 = vsel %vm894_vm15, %v2645_v5, %v2636_v11 }
 0x481   :  { %v2639_v35 = vpop.permute.xlu0 %2638 }
 0x482   :  { %v2647_v30 = vsel %vm897_vm2, %v2646_v53, %v2639_v35 }
 0x483   :  { %v2664_v45 = vmul.f32 %v2663_v15, %v2647_v30  ;;  %v2688_v40 = vmul.f32 %v2687_v22, %v2647_v30  ;;  %v2715_v2 = vmul.f32 %v2714_v62, %v2647_v30 }
 0x485   :  { %v2665_v29 = vadd.f32 %v2664_v45, %v2659_v20  ;;  %v2690_v60 = vrot.slane %v2688_v40, 1  ;;  %v2717_v32 = vrot.slane %v2715_v2, 2 }
 0x487   :  { %v2674_v10 = vadd.f32 %v2672_v7, %v2665_v29 }
 0x489   :  { %v2683_v59 = vadd.f32 %v2681_v28, %v2674_v10 }
 0x48b   :  { %v2692_v49 = vadd.f32 %v2690_v60, %v2683_v59 }
 0x48d   :  { %v2701_v34 = vadd.f32 %v2699_v46, %v2692_v49 }
 0x48f   :  { %v2710_v48 = vadd.f32 %v2708_v26, %v2701_v34  ;;  %v7961_v26 = vld [vmem:[%s8517_s6] sm:$0xff] }
 0x491   :  { %v2719_v0 = vadd.f32 %v2717_v32, %v2710_v48 }
 0x493   :  { %v2726_v41 = vadd.f32 %v5176_v57, %v2719_v0  ;;  %v2841_v0 = vrot.slane %v7961_v26, %v8794_v9 }
 0x495   :  { %v2727_v12 = vmax.f32 %v2726_v41, 0.0 }
 0x497   :  { %2904 = vrot.lane.b32.xlu0 %v2727_v12, %s5376_s25  ;;  %2736 = vrot.lane.b32.xlu1 %v2727_v12, %s8803_s22  ;;  %v7803_v61 = vsel %vm879_vm10, %v2727_v12, 0.0 }
 0x49b   :  { %3076 = vrot.lane.b32.xlu0 %v2727_v12, %s8804_s15  ;;  %2908 = vrot.lane.b32.xlu1 %v2727_v12, %s8805_s1  ;;  %s8811_s15 = smov 32  }
 0x49f   :  { %3248 = vrot.lane.b32.xlu0 %v2727_v12, %s8806_s18  ;;  %3080 = vrot.lane.b32.xlu1 %v2727_v12, %s8807_s14  ;;  %s8810_s14 = smov 22   ;;  %s8812_s18 = smov 31  }
 0x4a3   :  { %3252 = vrot.lane.b32.xlu1 %v2727_v12, %s8808_s4  ;;  %2741 = vrot.lane.b32.xlu0 %v7803_v61, %s5354_s27  ;;  %s8814_s4 = smov 40  }
 0x4a7   :  { %2770 = vrot.lane.b32.xlu1 %v7803_v61, %s5353_s26  ;;  %2773 = vrot.lane.b32.xlu0 %v7803_v61, %s5355_s28 }
 0x4ab   :  { %2744 = vrot.lane.b32.xlu1 %v7803_v61, %s8796_s24  ;;  %2776 = vrot.lane.b32.xlu0 %v7803_v61, %s5356_s29 }
 0x4af   :  { %2747 = vrot.lane.b32.xlu1 %v7803_v61, %s8599_s16  ;;  %2779 = vrot.lane.b32.xlu0 %v7803_v61, %s5360_s13 }
 0x4b3   :  { %2801 = vrot.lane.b32.xlu1 %v7803_v61, %s5359_s12  ;;  %2804 = vrot.lane.b32.xlu0 %v7803_v61, %s8809_s5 }
 0x4b7   :  { %2807 = vrot.lane.b32.xlu1 %v7803_v61, %s8597_s11  ;;  %2810 = vrot.lane.b32.xlu0 %v7803_v61, %s8810_s14 }
 0x509   :  { %v2737_v36 = vpop.permute.xlu1 %2736  ;;  %v2905_v16 = vpop.permute.xlu0 %2904 }
 0x50a   :  { %v2739_v4 = vsel %vm879_vm10, %v2737_v36, 0.0  ;;  %v7842_v13 = vsel %vm879_vm10, %v2905_v16, 0.0 }
 0x50b   :  { %2751 = vrot.lane.b32.xlu1 %v2739_v4, %s8811_s15  ;;  %2782 = vrot.lane.b32.xlu0 %v2739_v4, %s8812_s18 }
 0x50d   :  { %v2909_v33 = vpop.permute.xlu1 %2908  ;;  %v3077_v44 = vpop.permute.xlu0 %3076 }
 0x50e   :  { %v2911_v52 = vsel %vm879_vm10, %v2909_v33, 0.0  ;;  %v7879_v55 = vsel %vm879_vm10, %v3077_v44, 0.0  ;;  %v2847_v44 = vrot.slane %v7961_v26, %v8795_v63 }
 0x50f   :  { %2785 = vrot.lane.b32.xlu1 %v2739_v4, %s8813_s17  ;;  %2754 = vrot.lane.b32.xlu0 %v2739_v4, %s8814_s4 }
 0x511   :  { %v3249_v17 = vpop.permute.xlu0 %3248  ;;  %v3081_v51 = vpop.permute.xlu1 %3080 }
 0x512   :  { %v3083_v47 = vsel %vm879_vm10, %v3081_v51, 0.0  ;;  %v7918_v53 = vsel %vm879_vm10, %v3249_v17, 0.0 }
 0x513   :  { %2757 = vrot.lane.b32.xlu1 %v2739_v4, %s8797_s2  ;;  %2788 = vrot.lane.b32.xlu0 %v2739_v4, %s8798_s3 }
 0x515   :  { %v3253_v27 = vpop.permute.xlu1 %3252  ;;  %v2742_v56 = vpop.permute.xlu0 %2741 }
 0x516   :  { %v7929_v20 = vsel %vm879_vm10, %v3253_v27, 0.0  ;;  %v2763_v1 = vsel %vm879_vm10, %v7803_v61, %v2742_v56  ;;  %v2853_v56 = vrot.slane %v7961_v26, %v8687_v8 }
 0x517   :  { %2813 = vrot.lane.b32.xlu1 %v2739_v4, %s8799_s23  ;;  %2760 = vrot.lane.b32.xlu0 %v2739_v4, %s8657_s30 }
 0x519   :  { %v2771_v6 = vpop.permute.xlu1 %2770  ;;  %v2774_v50 = vpop.permute.xlu0 %2773 }
 0x51a   :  { %v2794_v62 = vsel %vm879_vm10, %v2771_v6, %v2774_v50 }
 0x51b   :  { %2791 = vrot.lane.b32.xlu1 %v2739_v4, %s8800_s21  ;;  %2816 = vrot.lane.b32.xlu0 %v2739_v4, %s8801_s0 }
 0x51d   :  { %v2745_v43 = vpop.permute.xlu1 %2744  ;;  %v2777_v5 = vpop.permute.xlu0 %2776 }
 0x51e   :  { %v2795_v10 = vsel %vm882_vm11, %v2794_v62, %v2777_v5  ;;  %v2764_v46 = vsel %vm882_vm11, %v2763_v1, %v2745_v43  ;;  %v2880_v62 = vrot.slane %v7961_v26, %v8689_v58 }
 0x51f   :  { %2819 = vrot.lane.b32.xlu1 %v2739_v4, %s8802_s20  ;;  %2822 = vrot.lane.b32.xlu0 %v2739_v4, %s8630_s19 }
 0x521   :  { %v2748_v11 = vpop.permute.xlu1 %2747  ;;  %v2780_v23 = vpop.permute.xlu0 %2779 }
 0x522   :  { %v2796_v59 = vsel %vm885_vm12, %v2795_v10, %v2780_v23  ;;  %v2765_v32 = vsel %vm885_vm12, %v2764_v46, %v2748_v11 }
 0x523   :  { %2913 = vrot.lane.b32.xlu1 %v7842_v13, %s5354_s27  ;;  %2916 = vrot.lane.b32.xlu0 %v7842_v13, %s8796_s24 }
 0x525   :  { %v2802_v54 = vpop.permute.xlu1 %2801  ;;  %v2805_v24 = vpop.permute.xlu0 %2804 }
 0x526   :  { %v2825_v29 = vsel %vm879_vm10, %v2802_v54, %v2805_v24  ;;  %v2862_v54 = vrot.slane %v7961_v26, %v8688_v39 }
 0x527   :  { %2919 = vrot.lane.b32.xlu1 %v7842_v13, %s8599_s16  ;;  %2942 = vrot.lane.b32.xlu0 %v7842_v13, %s5353_s26 }
 0x529   :  { %v2808_v15 = vpop.permute.xlu1 %2807  ;;  %v2811_v25 = vpop.permute.xlu0 %2810 }
 0x52a   :  { %v2826_v40 = vsel %vm882_vm11, %v2825_v29, %v2808_v15 }
 0x52b   :  { %2945 = vrot.lane.b32.xlu1 %v7842_v13, %s5355_s28  ;;  %2923 = vrot.lane.b32.xlu0 %v2911_v52, %s8811_s15  ;;  %v2827_v60 = vsel %vm885_vm12, %v2826_v40, %v2811_v25 }
 0x52f   :  { %2948 = vrot.lane.b32.xlu1 %v7842_v13, %s5356_s29  ;;  %2926 = vrot.lane.b32.xlu0 %v2911_v52, %s8814_s4 }
 0x533   :  { %2951 = vrot.lane.b32.xlu1 %v7842_v13, %s5360_s13  ;;  %2973 = vrot.lane.b32.xlu0 %v7842_v13, %s5359_s12 }
 0x537   :  { %2976 = vrot.lane.b32.xlu1 %v7842_v13, %s8809_s5  ;;  %2929 = vrot.lane.b32.xlu0 %v2911_v52, %s8797_s2 }
 0x53b   :  { %2954 = vrot.lane.b32.xlu1 %v2911_v52, %s8812_s18  ;;  %2979 = vrot.lane.b32.xlu0 %v7842_v13, %s8597_s11 }
 0x53f   :  { %2932 = vrot.lane.b32.xlu1 %v2911_v52, %s8657_s30  ;;  %2957 = vrot.lane.b32.xlu0 %v2911_v52, %s8813_s17 }
 0x543   :  { %2982 = vrot.lane.b32.xlu1 %v7842_v13, %s8810_s14  ;;  %2960 = vrot.lane.b32.xlu0 %v2911_v52, %s8798_s3 }
 0x547   :  { %2985 = vrot.lane.b32.xlu1 %v2911_v52, %s8799_s23  ;;  %2963 = vrot.lane.b32.xlu0 %v2911_v52, %s8800_s21 }
 0x54b   :  { %2988 = vrot.lane.b32.xlu1 %v2911_v52, %s8801_s0  ;;  %2991 = vrot.lane.b32.xlu0 %v2911_v52, %s8802_s20 }
 0x54f   :  { %2994 = vrot.lane.b32.xlu1 %v2911_v52, %s8630_s19  ;;  %3085 = vrot.lane.b32.xlu0 %v7879_v55, %s5354_s27  ;;  %v2835_v52 = vrot.slane %v7961_v26, %v8793_v38 }
 0x553   :  { %3088 = vrot.lane.b32.xlu1 %v7879_v55, %s8796_s24  ;;  %3091 = vrot.lane.b32.xlu0 %v7879_v55, %s8599_s16 }
 0x557   :  { %3114 = vrot.lane.b32.xlu1 %v7879_v55, %s5353_s26  ;;  %3117 = vrot.lane.b32.xlu0 %v7879_v55, %s5355_s28 }
 0x55b   :  { %3095 = vrot.lane.b32.xlu1 %v3083_v47, %s8811_s15  ;;  %3120 = vrot.lane.b32.xlu0 %v7879_v55, %s5356_s29 }
 0x55f   :  { %3098 = vrot.lane.b32.xlu1 %v3083_v47, %s8814_s4  ;;  %3123 = vrot.lane.b32.xlu0 %v7879_v55, %s5360_s13 }
 0x563   :  { %3145 = vrot.lane.b32.xlu1 %v7879_v55, %s5359_s12  ;;  %3148 = vrot.lane.b32.xlu0 %v7879_v55, %s8809_s5 }
 0x567   :  { %3101 = vrot.lane.b32.xlu1 %v3083_v47, %s8797_s2  ;;  %3126 = vrot.lane.b32.xlu0 %v3083_v47, %s8812_s18 }
 0x56b   :  { %3151 = vrot.lane.b32.xlu1 %v7879_v55, %s8597_s11  ;;  %3104 = vrot.lane.b32.xlu0 %v3083_v47, %s8657_s30 }
 0x56f   :  { %3129 = vrot.lane.b32.xlu1 %v3083_v47, %s8813_s17  ;;  %3154 = vrot.lane.b32.xlu0 %v7879_v55, %s8810_s14 }
 0x573   :  { %3132 = vrot.lane.b32.xlu1 %v3083_v47, %s8798_s3  ;;  %3157 = vrot.lane.b32.xlu0 %v3083_v47, %s8799_s23 }
 0x577   :  { %3135 = vrot.lane.b32.xlu1 %v3083_v47, %s8800_s21  ;;  %3160 = vrot.lane.b32.xlu0 %v3083_v47, %s8801_s0 }
 0x57b   :  { %3163 = vrot.lane.b32.xlu1 %v3083_v47, %s8802_s20  ;;  %3166 = vrot.lane.b32.xlu0 %v3083_v47, %s8630_s19 }
 0x57d   :  { %v2752_v31 = vpop.permute.xlu1 %2751  ;;  %v2783_v19 = vpop.permute.xlu0 %2782 }
 0x57e   :  { %v2797_v49 = vsel %vm888_vm13, %v2796_v59, %v2783_v19  ;;  %v2766_v12 = vsel %vm888_vm13, %v2765_v32, %v2752_v31 }
 0x57f   :  { %3257 = vrot.lane.b32.xlu1 %v7918_v53, %s5354_s27  ;;  %3260 = vrot.lane.b32.xlu0 %v7918_v53, %s8796_s24  ;;  %s5387_s24 = smov 123   ;;  %s5396_s27 = smov 94  }
 0x581   :  { %v2786_v22 = vpop.permute.xlu1 %2785  ;;  %v2755_v35 = vpop.permute.xlu0 %2754 }
 0x582   :  { %v2798_v57 = vsel %vm891_vm14, %v2797_v49, %v2786_v22  ;;  %v2767_v4 = vsel %vm891_vm14, %v2766_v12, %v2755_v35 }
 0x583   :  { %3263 = vrot.lane.b32.xlu1 %v7918_v53, %s8599_s16  ;;  %3286 = vrot.lane.b32.xlu0 %v7918_v53, %s5353_s26 }
 0x585   :  { %v2758_v30 = vpop.permute.xlu1 %2757  ;;  %v2789_v42 = vpop.permute.xlu0 %2788 }
 0x586   :  { %v2799_v61 = vsel %vm894_vm15, %v2798_v57, %v2789_v42  ;;  %v2768_v33 = vsel %vm894_vm15, %v2767_v4, %v2758_v30  ;;  %v2729_v57 = vld [vmem:[%s8517_s6 + $0x8] sm:$0xff] }
 0x587   :  { %3289 = vrot.lane.b32.xlu1 %v7918_v53, %s5355_s28  ;;  %3267 = vrot.lane.b32.xlu0 %v7929_v20, %s8811_s15  ;;  %s5392_s15 = smov 83   ;;  %s5397_s28 = smov 93  }
 0x589   :  { %v2814_v37 = vpop.permute.xlu1 %2813  ;;  %v2761_v45 = vpop.permute.xlu0 %2760 }
 0x58a   :  { %v2828_v2 = vsel %vm888_vm13, %v2827_v60, %v2814_v37  ;;  %v2769_v47 = vsel %vm897_vm2, %v2768_v33, %v2761_v45 }
 0x58b   :  { %3292 = vrot.lane.b32.xlu1 %v7918_v53, %s5356_s29  ;;  %3270 = vrot.lane.b32.xlu0 %v7929_v20, %s8814_s4  ;;  %v2836_v43 = vmul.f32 %v2835_v52, %v2769_v47  ;;  %v2854_v15 = vmul.f32 %v2853_v56, %v2769_v47  ;;  %v2898_v52 = vrot.slane %v2729_v57, %v8793_v38  ;;  %s8816_s4 = smov 1   ;;  %s5405_s29 = smov 117  }
 0x58d   :  { %v2792_v7 = vpop.permute.xlu1 %2791  ;;  %v2817_v3 = vpop.permute.xlu0 %2816  ;;  %v2856_v45 = vrot.slane %v2854_v15, 1 }
 0x58e   :  { %v2829_v41 = vsel %vm891_vm14, %v2828_v2, %v2817_v3  ;;  %v2800_v16 = vsel %vm897_vm2, %v2799_v61, %v2792_v7  ;;  %v2871_v3 = vrot.slane %v7961_v26, %v5538_v21 }
 0x58f   :  { %3295 = vrot.lane.b32.xlu1 %v7918_v53, %s5360_s13  ;;  %3317 = vrot.lane.b32.xlu0 %v7918_v53, %s5359_s12  ;;  %v2842_v6 = vmul.f32 %v2841_v0, %v2800_v16  ;;  %v2863_v7 = vmul.f32 %v2862_v54, %v2800_v16  ;;  %v3013_v54 = vrot.slane %v2729_v57, %v8795_v63 }
 0x591   :  { %v2820_v18 = vpop.permute.xlu1 %2819  ;;  %v2823_v28 = vpop.permute.xlu0 %2822  ;;  %v2843_v25 = vadd.f32 %v2842_v6, %v2836_v43  ;;  %v2865_v10 = vrot.slane %v2863_v7, 1  ;;  %v3007_v6 = vrot.slane %v2729_v57, %v8794_v9  ;;  %v3034_v7 = vrot.slane %v2729_v57, %v5538_v21 }
 0x592   :  { %v2830_v36 = vsel %vm894_vm15, %v2829_v41, %v2820_v18 }
 0x593   :  { %3320 = vrot.lane.b32.xlu1 %v7918_v53, %s8809_s5  ;;  %3273 = vrot.lane.b32.xlu0 %v7929_v20, %s8797_s2  ;;  %v2831_v27 = vsel %vm897_vm2, %v2830_v36, %v2823_v28  ;;  %s5386_s2 = smov 91   ;;  %s5390_s5 = smov 84  }
 0x594   :  { %v2848_v5 = vmul.f32 %v2847_v44, %v2831_v27  ;;  %v2872_v1 = vmul.f32 %v2871_v3, %v2831_v27  ;;  %v2899_v56 = vmul.f32 %v2898_v52, %v2831_v27  ;;  %v3019_v3 = vrot.slane %v2729_v57, %v8687_v8 }
 0x595   :  { %v2914_v34 = vpop.permute.xlu1 %2913  ;;  %v2917_v48 = vpop.permute.xlu0 %2916 }
 0x596   :  { %v2935_v50 = vsel %vm879_vm10, %v7842_v13, %v2914_v34  ;;  %v2849_v19 = vadd.f32 %v2848_v5, %v2843_v25  ;;  %v2881_v34 = vmul.f32 %v2880_v62, %v2769_v47  ;;  %v2874_v32 = vrot.slane %v2872_v1, 1 }
 0x597   :  { %3298 = vrot.lane.b32.xlu1 %v7929_v20, %s8812_s18  ;;  %3323 = vrot.lane.b32.xlu0 %v7918_v53, %s8597_s11  ;;  %v2936_v31 = vsel %vm882_vm11, %v2935_v50, %v2917_v48  ;;  %v2889_v48 = vrot.slane %v7961_v26, %v5509_v14  ;;  %s5395_s18 = smov 2  }
 0x598   :  { %v2858_v29 = vadd.f32 %v2856_v45, %v2849_v19  ;;  %v2883_v4 = vrot.slane %v2881_v34, 2 }
 0x599   :  { %v2920_v17 = vpop.permute.xlu1 %2919  ;;  %v2943_v51 = vpop.permute.xlu0 %2942  ;;  %v2890_v33 = vmul.f32 %v2889_v48, %v2800_v16 }
 0x59a   :  { %v2937_v13 = vsel %vm885_vm12, %v2936_v31, %v2920_v17  ;;  %v2867_v59 = vadd.f32 %v2865_v10, %v2858_v29  ;;  %v8046_v10 = vld [vmem:[%s8517_s6 + $0x10] sm:$0xff] }
 0x59b   :  { %3276 = vrot.lane.b32.xlu1 %v7929_v20, %s8657_s30  ;;  %3301 = vrot.lane.b32.xlu0 %v7929_v20, %s8813_s17  ;;  %v2892_v47 = vrot.slane %v2890_v33, 2  ;;  %s8815_s17 = smov 97  }
 0x59c   :  { %v2876_v0 = vadd.f32 %v2874_v32, %v2867_v59  ;;  %v3052_v59 = vrot.slane %v2729_v57, %v5509_v14 }
 0x59d   :  { %v2946_v11 = vpop.permute.xlu1 %2945  ;;  %v2924_v23 = vpop.permute.xlu0 %2923 }
 0x59e   :  { %v2966_v24 = vsel %vm879_vm10, %v2943_v51, %v2946_v11  ;;  %v2938_v22 = vsel %vm888_vm13, %v2937_v13, %v2924_v23  ;;  %v2885_v26 = vadd.f32 %v2883_v4, %v2876_v0  ;;  %v2901_v23 = vrot.slane %v2899_v56, 2 }
 0x59f   :  { %3326 = vrot.lane.b32.xlu1 %v7918_v53, %s8810_s14  ;;  %3304 = vrot.lane.b32.xlu0 %v7929_v20, %s8798_s3  ;;  %s5384_s3 = smov 92   ;;  %s5391_s14 = smov 116  }
 0x5a0   :  { %v2894_v50 = vadd.f32 %v2892_v47, %v2885_v26 }
 0x5a1   :  { %v2949_v35 = vpop.permute.xlu1 %2948  ;;  %v2927_v30 = vpop.permute.xlu0 %2926 }
 0x5a2   :  { %v2967_v42 = vsel %vm882_vm11, %v2966_v24, %v2949_v35  ;;  %v2939_v37 = vsel %vm891_vm14, %v2938_v22, %v2927_v30  ;;  %v2903_v24 = vadd.f32 %v2901_v23, %v2894_v50  ;;  %v3025_v22 = vrot.slane %v2729_v57, %v8688_v39 }
 0x5a3   :  { %3329 = vrot.lane.b32.xlu1 %v7929_v20, %s8799_s23  ;;  %3307 = vrot.lane.b32.xlu0 %v7929_v20, %s8800_s21  ;;  %s5383_s23 = smov 95   ;;  %s8818_s21 = smov 121  }
 0x5a5   :  { %v2952_v40 = vpop.permute.xlu1 %2951  ;;  %v2974_v18 = vpop.permute.xlu0 %2973 }
 0x5a6   :  { %v2968_v28 = vsel %vm885_vm12, %v2967_v42, %v2952_v40 }
 0x5a7   :  { %3332 = vrot.lane.b32.xlu1 %v7929_v20, %s8801_s0  ;;  %3335 = vrot.lane.b32.xlu0 %v7929_v20, %s8802_s20  ;;  %s5402_s0 = smov 86   ;;  %s5404_s20 = smov 85  }
 0x5a9   :  { %v2977_v60 = vpop.permute.xlu1 %2976  ;;  %v2930_v46 = vpop.permute.xlu0 %2929 }
 0x5aa   :  { %v2997_v49 = vsel %vm879_vm10, %v2974_v18, %v2977_v60  ;;  %v2940_v2 = vsel %vm894_vm15, %v2939_v37, %v2930_v46  ;;  %v3043_v18 = vrot.slane %v2729_v57, %v8689_v58 }
 0x5ab   :  { %3338 = vrot.lane.b32.xlu1 %v7929_v20, %s8630_s19  ;;  %s5403_s19 = smov 118  }
 0x5ad   :  { %v2955_v41 = vpop.permute.xlu1 %2954  ;;  %v2980_v12 = vpop.permute.xlu0 %2979 }
 0x5ae   :  { %v2969_v61 = vsel %vm888_vm13, %v2968_v28, %v2955_v41  ;;  %v2998_v36 = vsel %vm882_vm11, %v2997_v49, %v2980_v12 }
 0x5b1   :  { %v2933_v44 = vpop.permute.xlu1 %2932  ;;  %v2958_v17 = vpop.permute.xlu0 %2957 }
 0x5b2   :  { %v2941_v20 = vsel %vm897_vm2, %v2940_v2, %v2933_v44  ;;  %v2970_v51 = vsel %vm891_vm14, %v2969_v61, %v2958_v17  ;;  %v3061_v2 = vrot.slane %v8046_v10, %v8793_v38  ;;  %v3070_v61 = vrot.slane %v8046_v10, %v8794_v9 }
 0x5b3   :  { %v3008_v16 = vmul.f32 %v3007_v6, %v2941_v20  ;;  %v3026_v29 = vmul.f32 %v3025_v22, %v2941_v20  ;;  %v3053_v41 = vmul.f32 %v3052_v59, %v2941_v20 }
 0x5b5   :  { %v2983_v43 = vpop.permute.xlu1 %2982  ;;  %v2961_v5 = vpop.permute.xlu0 %2960  ;;  %v3009_v19 = vadd.f32 %v3008_v16, %v2903_v24  ;;  %v3028_v49 = vrot.slane %v3026_v29, 1  ;;  %v3055_v44 = vrot.slane %v3053_v41, 2 }
 0x5b6   :  { %v2999_v11 = vsel %vm885_vm12, %v2998_v36, %v2983_v43  ;;  %v2971_v15 = vsel %vm894_vm15, %v2970_v51, %v2961_v5 }
 0x5b9   :  { %v2986_v25 = vpop.permute.xlu1 %2985  ;;  %v2964_v31 = vpop.permute.xlu0 %2963 }
 0x5ba   :  { %v2972_v13 = vsel %vm897_vm2, %v2971_v15, %v2964_v31  ;;  %v3000_v35 = vsel %vm888_vm13, %v2999_v11, %v2986_v25 }
 0x5bb   :  { %v3014_v27 = vmul.f32 %v3013_v54, %v2972_v13  ;;  %v3035_v60 = vmul.f32 %v3034_v7, %v2972_v13  ;;  %v3062_v4 = vmul.f32 %v3061_v2, %v2972_v13 }
 0x5bd   :  { %v3015_v30 = vadd.f32 %v3014_v27, %v3009_v19  ;;  %v2989_v42 = vpop.permute.xlu1 %2988  ;;  %v2992_v37 = vpop.permute.xlu0 %2991  ;;  %v3037_v12 = vrot.slane %v3035_v60, 1  ;;  %v3064_v47 = vrot.slane %v3062_v4, 2  ;;  %v3185_v4 = vrot.slane %v8046_v10, %v8687_v8 }
 0x5be   :  { %v3001_v45 = vsel %vm891_vm14, %v3000_v35, %v2989_v42 }
 0x5bf   :  { %v3002_v40 = vsel %vm894_vm15, %v3001_v45, %v2992_v37 }
 0x5c1   :  { %v2995_v28 = vpop.permute.xlu1 %2994  ;;  %v3086_v62 = vpop.permute.xlu0 %3085 }
 0x5c2   :  { %v3003_v1 = vsel %vm897_vm2, %v3002_v40, %v2995_v28  ;;  %v3107_v45 = vsel %vm879_vm10, %v7879_v55, %v3086_v62 }
 0x5c3   :  { %v3020_v46 = vmul.f32 %v3019_v3, %v3003_v1  ;;  %v3044_v48 = vmul.f32 %v3043_v18, %v3003_v1  ;;  %v3071_v51 = vmul.f32 %v3070_v61, %v3003_v1 }
 0x5c5   :  { %v3021_v34 = vadd.f32 %v3020_v46, %v3015_v30  ;;  %v3089_v32 = vpop.permute.xlu1 %3088  ;;  %v3092_v0 = vpop.permute.xlu0 %3091  ;;  %v3046_v52 = vrot.slane %v3044_v48, 1  ;;  %v3073_v5 = vrot.slane %v3071_v51, 2 }
 0x5c6   :  { %v3108_v7 = vsel %vm882_vm11, %v3107_v45, %v3089_v32  ;;  %v3179_v32 = vrot.slane %v8046_v10, %v8795_v63 }
 0x5c7   :  { %v3030_v36 = vadd.f32 %v3028_v49, %v3021_v34  ;;  %v3109_v40 = vsel %vm885_vm12, %v3108_v7, %v3092_v0 }
 0x5c9   :  { %v3039_v33 = vadd.f32 %v3037_v12, %v3030_v36  ;;  %v3115_v57 = vpop.permute.xlu1 %3114  ;;  %v3118_v26 = vpop.permute.xlu0 %3117 }
 0x5ca   :  { %v3138_v18 = vsel %vm879_vm10, %v3115_v57, %v3118_v26 }
 0x5cb   :  { %v3048_v17 = vadd.f32 %v3046_v52, %v3039_v33 }
 0x5cd   :  { %v3057_v56 = vadd.f32 %v3055_v44, %v3048_v17  ;;  %v3096_v6 = vpop.permute.xlu1 %3095  ;;  %v3121_v50 = vpop.permute.xlu0 %3120  ;;  %v3191_v17 = vrot.slane %v8046_v10, %v8688_v39 }
 0x5ce   :  { %v3110_v1 = vsel %vm888_vm13, %v3109_v40, %v3096_v6  ;;  %v3139_v59 = vsel %vm882_vm11, %v3138_v18, %v3121_v50 }
 0x5cf   :  { %v3066_v43 = vadd.f32 %v3064_v47, %v3057_v56  ;;  %v3197_v47 = vrot.slane %v8046_v10, %v5538_v21 }
 0x5d1   :  { %v3075_v20 = vadd.f32 %v3073_v5, %v3066_v43  ;;  %v3099_v11 = vpop.permute.xlu1 %3098  ;;  %v3124_v23 = vpop.permute.xlu0 %3123 }
 0x5d2   :  { %v3111_v55 = vsel %vm891_vm14, %v3110_v1, %v3099_v11  ;;  %v3140_v62 = vsel %vm885_vm12, %v3139_v59, %v3124_v23  ;;  %v3206_v23 = vrot.slane %v8046_v10, %v8689_v58 }
 0x5d5   :  { %v3146_v16 = vpop.permute.xlu1 %3145  ;;  %v3149_v54 = vpop.permute.xlu0 %3148 }
 0x5d6   :  { %v3169_v28 = vsel %vm879_vm10, %v3146_v16, %v3149_v54 }
 0x5d9   :  { %v3102_v24 = vpop.permute.xlu1 %3101  ;;  %v3127_v15 = vpop.permute.xlu0 %3126 }
 0x5da   :  { %v3112_v34 = vsel %vm894_vm15, %v3111_v55, %v3102_v24  ;;  %v3141_v48 = vsel %vm888_vm13, %v3140_v62, %v3127_v15 }
 0x5dd   :  { %v3152_v25 = vpop.permute.xlu1 %3151  ;;  %v3105_v31 = vpop.permute.xlu0 %3104 }
 0x5de   :  { %v3170_v60 = vsel %vm882_vm11, %v3169_v28, %v3152_v25  ;;  %v3113_v41 = vsel %vm897_vm2, %v3112_v34, %v3105_v31 }
 0x5df   :  { %v3180_v44 = vmul.f32 %v3179_v32, %v3113_v41  ;;  %v3198_v11 = vmul.f32 %v3197_v47, %v3113_v41 }
 0x5e1   :  { %v3130_v13 = vpop.permute.xlu1 %3129  ;;  %v3155_v19 = vpop.permute.xlu0 %3154  ;;  %v3181_v43 = vadd.f32 %v3180_v44, %v3075_v20  ;;  %v3200_v25 = vrot.slane %v3198_v11, 1  ;;  %v8093_v20 = vld [vmem:[%s8517_s6 + $0x18] sm:$0xff] }
 0x5e2   :  { %v3171_v2 = vsel %vm885_vm12, %v3170_v60, %v3155_v19  ;;  %v3142_v12 = vsel %vm891_vm14, %v3141_v48, %v3130_v13  ;;  %v3215_v13 = vrot.slane %v8046_v10, %v5509_v14  ;;  %v3233_v10 = vrot.slane %v8093_v20, %v8794_v9 }
 0x5e3   :  { %v3369_v11 = vrot.slane %v8093_v20, %v8689_v58 }
 0x5e5   :  { %v3133_v27 = vpop.permute.xlu1 %3132  ;;  %v3158_v22 = vpop.permute.xlu0 %3157 }
 0x5e6   :  { %v3172_v0 = vsel %vm888_vm13, %v3171_v2, %v3158_v22  ;;  %v3143_v36 = vsel %vm894_vm15, %v3142_v12, %v3133_v27  ;;  %v3242_v2 = vrot.slane %v8093_v20, %v8795_v63 }
 0x5e9   :  { %v3136_v35 = vpop.permute.xlu1 %3135  ;;  %v3161_v30 = vpop.permute.xlu0 %3160 }
 0x5ea   :  { %v3173_v61 = vsel %vm891_vm14, %v3172_v0, %v3161_v30  ;;  %v3144_v26 = vsel %vm897_vm2, %v3143_v36, %v3136_v35  ;;  %v3224_v35 = vrot.slane %v8093_v20, %v8793_v38 }
 0x5eb   :  { %v3186_v56 = vmul.f32 %v3185_v4, %v3144_v26  ;;  %v3207_v31 = vmul.f32 %v3206_v23, %v3144_v26  ;;  %v3234_v62 = vmul.f32 %v3233_v10, %v3144_v26  ;;  %v3351_v4 = vrot.slane %v8093_v20, %v8687_v8 }
 0x5ec   :  { %v3225_v40 = vmul.f32 %v3224_v35, %v3113_v41 }
 0x5ed   :  { %v3164_v42 = vpop.permute.xlu1 %3163  ;;  %v3167_v37 = vpop.permute.xlu0 %3166  ;;  %v3187_v16 = vadd.f32 %v3186_v56, %v3181_v43  ;;  %v3209_v30 = vrot.slane %v3207_v31, 1  ;;  %v3378_v31 = vrot.slane %v8093_v20, %v5509_v14 }
 0x5ee   :  { %v3174_v33 = vsel %vm894_vm15, %v3173_v61, %v3164_v42  ;;  %v3227_v55 = vrot.slane %v3225_v40, 2 }
 0x5ef   :  { %v3175_v51 = vsel %vm897_vm2, %v3174_v33, %v3167_v37  ;;  %v3236_v33 = vrot.slane %v3234_v62, 2 }
 0x5f0   :  { %v3192_v5 = vmul.f32 %v3191_v17, %v3175_v51  ;;  %v3216_v42 = vmul.f32 %v3215_v13, %v3175_v51 }
 0x5f1   :  { %v3258_v3 = vpop.permute.xlu1 %3257  ;;  %v8057_v29 = vpop.permute.xlu0 %3260 }
 0x5f2   :  { %v3193_v15 = vadd.f32 %v3192_v5, %v3187_v16  ;;  %v3218_v18 = vrot.slane %v3216_v42, 1  ;;  %v3279_v59 = vsel %vm879_vm10, %v7918_v53, %v3258_v3 }
 0x5f3   :  { %v3280_v34 = vsel %vm882_vm11, %v3279_v59, %v8057_v29  ;;  %v3243_v29 = vmul.f32 %v3242_v2, %v3175_v51  ;;  %v3357_v51 = vrot.slane %v8093_v20, %v8688_v39 }
 0x5f4   :  { %v3202_v22 = vadd.f32 %v3200_v25, %v3193_v15 }
 0x5f5   :  { %v3264_v46 = vpop.permute.xlu1 %3263  ;;  %v3287_v49 = vpop.permute.xlu0 %3286  ;;  %v3245_v5 = vrot.slane %v3243_v29, 2 }
 0x5f6   :  { %v3211_v7 = vadd.f32 %v3209_v30, %v3202_v22  ;;  %v3281_v0 = vsel %vm885_vm12, %v3280_v34, %v3264_v46 }
 0x5f8   :  { %v3220_v60 = vadd.f32 %v3218_v18, %v3211_v7 }
 0x5f9   :  { %v3290_v52 = vpop.permute.xlu1 %3289  ;;  %v3268_v57 = vpop.permute.xlu0 %3267 }
 0x5fa   :  { %v3310_v41 = vsel %vm879_vm10, %v3287_v49, %v3290_v52  ;;  %v3229_v12 = vadd.f32 %v3227_v55, %v3220_v60  ;;  %v3282_v61 = vsel %vm888_vm13, %v3281_v0, %v3268_v57 }
 0x5fc   :  { %v3238_v47 = vadd.f32 %v3236_v33, %v3229_v12 }
 0x5fd   :  { %v3293_v6 = vpop.permute.xlu1 %3292  ;;  %v3271_v50 = vpop.permute.xlu0 %3270 }
 0x5fe   :  { %v3311_v53 = vsel %vm882_vm11, %v3310_v41, %v3293_v6  ;;  %v3283_v3 = vsel %vm891_vm14, %v3282_v61, %v3271_v50  ;;  %v3247_v25 = vadd.f32 %v3245_v5, %v3238_v47  ;;  %v3580_v47 = vld [vmem:[%s8519_s8 + $0x18] sm:$0xff] }
 0x601   :  { %v3296_v54 = vpop.permute.xlu1 %3295  ;;  %v3318_v24 = vpop.permute.xlu0 %3317 }
 0x602   :  { %v3312_v36 = vsel %vm885_vm12, %v3311_v53, %v3296_v54 }
 0x605   :  { %v3321_v19 = vpop.permute.xlu1 %3320  ;;  %v3274_v27 = vpop.permute.xlu0 %3273 }
 0x606   :  { %v3284_v26 = vsel %vm894_vm15, %v3283_v3, %v3274_v27  ;;  %v3341_v52 = vsel %vm879_vm10, %v3318_v24, %v3321_v19  ;;  %v3363_v19 = vrot.slane %v8093_v20, %v5538_v21  ;;  %v2732_v27 = vld [vmem:[%s8517_s6 + $0x20] sm:$0xf] }
 0x607   :  { %v3387_v42 = vrot.slane %v2732_v27, %v8793_v38  ;;  %v3396_v7 = vrot.slane %v2732_v27, %v8794_v9  ;;  %v3405_v20 = vrot.slane %v2732_v27, %v8795_v63  ;;  %v3414_v62 = vrot.slane %v2732_v27, %v8687_v8 }
 0x609   :  { %v3299_v37 = vpop.permute.xlu1 %3298  ;;  %v3324_v45 = vpop.permute.xlu0 %3323 }
 0x60a   :  { %v3313_v46 = vsel %vm888_vm13, %v3312_v36, %v3299_v37  ;;  %v3342_v56 = vsel %vm882_vm11, %v3341_v52, %v3324_v45 }
 0x60d   :  { %v3277_v28 = vpop.permute.xlu1 %3276  ;;  %v3302_v1 = vpop.permute.xlu0 %3301 }
 0x60e   :  { %v3285_v57 = vsel %vm897_vm2, %v3284_v26, %v3277_v28  ;;  %v3314_v17 = vsel %vm891_vm14, %v3313_v46, %v3302_v1 }
 0x60f   :  { %v3352_v23 = vmul.f32 %v3351_v4, %v3285_v57  ;;  %v3370_v35 = vmul.f32 %v3369_v11, %v3285_v57  ;;  %v3397_v60 = vmul.f32 %v3396_v7, %v3285_v57  ;;  %v5177_v4 = vld [vmem:[%s8518_s7] ss:$0 sm:$0xff]  ;;  %s5385_s7 = smov 124   ;;  %v3578_v57 = vld [vmem:[%s8519_s8 + $0x8] sm:$0xff]  ;;  %v3579_v11 = vld [vmem:[%s8519_s8 + $0x10] sm:$0xff] }
 0x611   :  { %v3327_v48 = vpop.permute.xlu1 %3326  ;;  %v3305_v32 = vpop.permute.xlu0 %3304  ;;  %v3353_v22 = vadd.f32 %v3352_v23, %v3247_v25  ;;  %v3372_v28 = vrot.slane %v3370_v35, 1  ;;  %v3399_v0 = vrot.slane %v3397_v60, 2  ;;  %v3611_v23 = vld [vmem:[%s8519_s8 + $0x110] sm:$0xff] }
 0x612   :  { %v3315_v6 = vsel %vm894_vm15, %v3314_v17, %v3305_v32  ;;  %v3343_v50 = vsel %vm885_vm12, %v3342_v56, %v3327_v48  ;;  %v3610_v17 = vld [vmem:[%s8519_s8 + $0x108] sm:$0xff]  ;;  %vm3500_vm12 = vcmask 89088  }
 0x613   :  { %v5194_v56 = vpack.c.bf16 %v3610_v17, %v3578_v57 }
 0x615   :  { %v3330_v44 = vpop.permute.xlu1 %3329  ;;  %v3308_v49 = vpop.permute.xlu0 %3307  ;;  %5195 = vmatprep.subr.bf16.mxu0 %v5194_v56 }
 0x616   :  { %v3316_v43 = vsel %vm897_vm2, %v3315_v6, %v3308_v49  ;;  %v3344_v16 = vsel %vm888_vm13, %v3343_v50, %v3330_v44  ;;  %v3612_v6 = vld [vmem:[%s8519_s8 + $0x118] sm:$0xff]  ;;  %v3609_v50 = vld [vmem:[%s8519_s8 + $0x100] sm:$0xff]  ;;  %vm3502_vm13 = vcmask 97280  }
 0x617   :  { %v3358_v13 = vmul.f32 %v3357_v51, %v3316_v43  ;;  %v3379_v10 = vmul.f32 %v3378_v31, %v3316_v43  ;;  %v3406_v34 = vmul.f32 %v3405_v20, %v3316_v43  ;;  %v3577_v51 = vld [vmem:[%s8519_s8] sm:$0xff]  ;;  %v5198_v43 = vpack.c.bf16 %v3612_v6, %v3580_v47  ;;  %v3616_v31 = vld [vmem:[%s8519_s8 + $0x138] sm:$0xff] }
 0x618   :  { %v5196_v5 = vpack.c.bf16 %v3609_v50, %v3577_v51 }
 0x619   :  { %v3333_v54 = vpop.permute.xlu1 %3332  ;;  %v3336_v15 = vpop.permute.xlu0 %3335  ;;  %v3359_v40 = vadd.f32 %v3358_v13, %v3353_v22  ;;  %v3381_v55 = vrot.slane %v3379_v10, 1  ;;  %v3408_v61 = vrot.slane %v3406_v34, 2  ;;  %5199 = vmatprep.subr.bf16.mxu1 %v5198_v43 }
 0x61a   :  { %v3345_v24 = vsel %vm891_vm14, %v3344_v16, %v3333_v54  ;;  %v5200_v16 = vpack.c.bf16 %v3611_v23, %v3579_v11  ;;  %5197 = vmatpush1.bf16.msra.mxu0 %v5196_v5  ;;  %v3582_v54 = vld [vmem:[%s8519_s8 + $0x28] sm:$0xff]  ;;  %vm3504_vm14 = vcmask 105472  }
 0x61b   :  { %v3346_v30 = vsel %vm894_vm15, %v3345_v24, %v3336_v15  ;;  %v3614_v24 = vld [vmem:[%s8519_s8 + $0x128] sm:$0xff]  ;;  %v3584_v15 = vld [vmem:[%s8519_s8 + $0x38] sm:$0xff]  ;;  %vm3506_vm15 = vcmask 113664  }
 0x61c   :  { %5201 = vmatpush1.bf16.msra.mxu1 %v5200_v16  ;;  %v5202_v25 = vpack.c.bf16 %v3614_v24, %v3582_v54  ;;  %v5206_v13 = vpack.c.bf16 %v3616_v31, %v3584_v15 }
 0x61d   :  { %v3339_v37 = vpop.permute.xlu1 %3338 }
 0x61e   :  { %v3347_v45 = vsel %vm897_vm2, %v3346_v30, %v3339_v37  ;;  %5203 = vmatprep.subr.bf16.mxu0 %v5202_v25  ;;  %5207 = vmatprep.subr.bf16.mxu1 %v5206_v13  ;;  %vm3508_vm2 = vcmask 121856  }
 0x61f   :  { %v3364_v18 = vmul.f32 %v3363_v19, %v3347_v45  ;;  %v3388_v59 = vmul.f32 %v3387_v42, %v3347_v45  ;;  %v3415_v12 = vmul.f32 %v3414_v62, %v3347_v45  ;;  %v5401_v19 = vmov 0.0  }
 0x620   :  { %3876 = vmatprep.mubr.f32.mxu0 %v5401_v19  ;;  %3947 = vmatprep.mubr.f32.mxu1 %v5401_v19 }
 0x621   :  { %v3365_v1 = vadd.f32 %v3364_v18, %v3359_v40  ;;  %v3390_v32 = vrot.slane %v3388_v59, 1  ;;  %v3417_v36 = vrot.slane %v3415_v12, 2 }
 0x623   :  { %v3374_v2 = vadd.f32 %v3372_v28, %v3365_v1 }
 0x625   :  { %v3383_v48 = vadd.f32 %v3381_v55, %v3374_v2 }
 0x627   :  { %v3392_v41 = vadd.f32 %v3390_v32, %v3383_v48 }
 0x629   :  { %v3401_v53 = vadd.f32 %v3399_v0, %v3392_v41 }
 0x62b   :  { %v3410_v3 = vadd.f32 %v3408_v61, %v3401_v53 }
 0x62d   :  { %v3419_v33 = vadd.f32 %v3417_v36, %v3410_v3 }
 0x62f   :  { %v3426_v29 = vadd.f32 %v5177_v4, %v3419_v33 }
 0x631   :  { %v3428_v26 = vrot.slane %v3426_v29, 1 }
 0x633   :  { %v3430_v46 = vmax.f32 %v3426_v29, %v3428_v26 }
 0x635   :  { %3432 = vrot.lane.b32.xlu0 %v3430_v46, %s5353_s26 }
 0x6a7   :  { %v3433_v44 = vpop.permute.xlu0 %3432 }
 0x6a8   :  { %v8145_v49 = vmax.f32 %v3430_v46, %v3433_v44 }
 0x6aa   :  { %3513 = vrot.lane.b32.xlu0 %v8145_v49, %s5383_s23  ;;  %3510 = vrot.lane.b32.xlu1 %v8145_v49, %s8803_s22  ;;  %s5388_s22 = smov 87   ;;  %v3440_v52 = vrot.slane %v8145_v49, 2 }
 0x6ae   :  { %3437 = vrot.lane.b32.xlu0 %v8145_v49, %s5353_s26  ;;  %3522 = vrot.lane.b32.xlu1 %v8145_v49, %s5384_s3  ;;  %s5389_s26 = smov 119   ;;  %s5398_s3 = smov 125  }
 0x6b2   :  { %3447 = vrot.lane.b32.xlu0 %v8145_v49, %s5385_s7  ;;  %3525 = vrot.lane.b32.xlu1 %v8145_v49, %s5386_s2  ;;  %s5399_s7 = smov 90  }
 0x6b6   :  { %3450 = vrot.lane.b32.xlu0 %v8145_v49, %s5387_s24  ;;  %3534 = vrot.lane.b32.xlu1 %v8145_v49, %s8805_s1  ;;  %s5393_s1 = smov 115  }
 0x6ba   :  { %3459 = vrot.lane.b32.xlu0 %v8145_v49, %s5376_s25  ;;  %3537 = vrot.lane.b32.xlu1 %v8145_v49, %s5388_s22  ;;  %s5394_s25 = smov 98  }
 0x6be   :  { %3462 = vrot.lane.b32.xlu0 %v8145_v49, %s5389_s26  ;;  %3546 = vrot.lane.b32.xlu1 %v8145_v49, %s5390_s5 }
 0x6c2   :  { %3471 = vrot.lane.b32.xlu0 %v8145_v49, %s5391_s14  ;;  %3549 = vrot.lane.b32.xlu1 %v8145_v49, %s5392_s15 }
 0x6c6   :  { %3474 = vrot.lane.b32.xlu0 %v8145_v49, %s5393_s1  ;;  %3516 = vrot.lane.b32.xlu1 %v3440_v52, %s5394_s25 }
 0x6ca   :  { %3441 = vrot.lane.b32.xlu0 %v3440_v52, %s5395_s18  ;;  %3519 = vrot.lane.b32.xlu1 %v3440_v52, %s8815_s17 }
 0x6ce   :  { %3444 = vrot.lane.b32.xlu0 %v3440_v52, %s8816_s4  ;;  %3528 = vrot.lane.b32.xlu1 %v3440_v52, %s5396_s27  ;;  %s5400_s27 = smov 122  }
 0x6d2   :  { %3453 = vrot.lane.b32.xlu0 %v3440_v52, %s5359_s12  ;;  %3531 = vrot.lane.b32.xlu1 %v3440_v52, %s5397_s28  ;;  %s8817_s28 = smov 89  }
 0x6d6   :  { %3456 = vrot.lane.b32.xlu0 %v3440_v52, %s5398_s3  ;;  %3540 = vrot.lane.b32.xlu1 %v3440_v52, %s5399_s7 }
 0x6da   :  { %3465 = vrot.lane.b32.xlu0 %v3440_v52, %s5400_s27  ;;  %3543 = vrot.lane.b32.xlu1 %v3440_v52, %s8817_s28 }
 0x6de   :  { %3468 = vrot.lane.b32.xlu0 %v3440_v52, %s8818_s21  ;;  %3552 = vrot.lane.b32.xlu1 %v3440_v52, %s5402_s0 }
 0x6e2   :  { %3477 = vrot.lane.b32.xlu0 %v3440_v52, %s5403_s19  ;;  %3555 = vrot.lane.b32.xlu1 %v3440_v52, %s5404_s20 }
 0x6e6   :  { %3480 = vrot.lane.b32.xlu1 %v3440_v52, %s5405_s29 }
 0x71c   :  { %v3514_v27 = vpop.permute.xlu0 %3513  ;;  %v3511_v22 = vpop.permute.xlu1 %3510 }
 0x71d   :  { %v3558_v55 = vsel %vm814_vm8, %v3511_v22, %v3514_v27  ;;  %v3581_v27 = vld [vmem:[%s8519_s8 + $0x20] sm:$0xff] }
 0x720   :  { %v3438_v35 = vpop.permute.xlu0 %3437  ;;  %v3523_v30 = vpop.permute.xlu1 %3522 }
 0x721   :  { %v3483_v0 = vsel %vm814_vm8, %v8145_v49, %v3438_v35  ;;  %vm3498_vm8 = vcmask 80896  }
 0x724   :  { %v3448_v42 = vpop.permute.xlu0 %3447  ;;  %v3526_v37 = vpop.permute.xlu1 %3525 }
 0x728   :  { %v3451_v45 = vpop.permute.xlu0 %3450  ;;  %v3535_v7 = vpop.permute.xlu1 %3534 }
 0x72c   :  { %v3460_v40 = vpop.permute.xlu0 %3459  ;;  %v3538_v10 = vpop.permute.xlu1 %3537 }
 0x730   :  { %v3463_v18 = vpop.permute.xlu0 %3462  ;;  %v3547_v28 = vpop.permute.xlu1 %3546 }
 0x734   :  { %v3472_v20 = vpop.permute.xlu0 %3471  ;;  %v3550_v1 = vpop.permute.xlu1 %3549 }
 0x738   :  { %v3475_v59 = vpop.permute.xlu0 %3474  ;;  %v3517_v60 = vpop.permute.xlu1 %3516 }
 0x739   :  { %v3559_v62 = vsel %vm3484_vm0, %v3558_v55, %v3517_v60  ;;  %v3585_v55 = vld [vmem:[%s8519_s8 + $0x40] sm:$0xff] }
 0x73c   :  { %v3442_v2 = vpop.permute.xlu0 %3441  ;;  %v3520_v34 = vpop.permute.xlu1 %3519 }
 0x73d   :  { %v3560_v48 = vsel %vm3486_vm1, %v3559_v62, %v3520_v34  ;;  %v3485_v41 = vsel %vm3484_vm0, %v3483_v0, %v3442_v2  ;;  %v3617_v2 = vld [vmem:[%s8519_s8 + $0x140] sm:$0xff]  ;;  %v3587_v34 = vld [vmem:[%s8519_s8 + $0x50] sm:$0xff] }
 0x73e   :  { %v3561_v32 = vsel %vm3488_vm5, %v3560_v48, %v3523_v30  ;;  %v3619_v48 = vld [vmem:[%s8519_s8 + $0x150] sm:$0xff] }
 0x73f   :  { %v3562_v3 = vsel %vm3490_vm6, %v3561_v32, %v3526_v37  ;;  %v3583_v37 = vld [vmem:[%s8519_s8 + $0x30] sm:$0xff] }
 0x740   :  { %v3445_v12 = vpop.permute.xlu0 %3444  ;;  %v3529_v61 = vpop.permute.xlu1 %3528 }
 0x741   :  { %v3487_v53 = vsel %vm3486_vm1, %v3485_v41, %v3445_v12  ;;  %v3563_v4 = vsel %vm3492_vm4, %v3562_v3, %v3529_v61  ;;  %v3590_v12 = vld [vmem:[%s8519_s8 + $0x68] sm:$0xff]  ;;  %v3624_v3 = vld [vmem:[%s8519_s8 + $0x178] sm:$0xff] }
 0x742   :  { %v3489_v36 = vsel %vm3488_vm5, %v3487_v53, %v3448_v42  ;;  %v3613_v42 = vld [vmem:[%s8519_s8 + $0x120] sm:$0xff]  ;;  %v3622_v61 = vld [vmem:[%s8519_s8 + $0x168] sm:$0xff]  ;;  %v3592_v53 = vld [vmem:[%s8519_s8 + $0x78] sm:$0xff] }
 0x743   :  { %v3491_v26 = vsel %vm3490_vm6, %v3489_v36, %v3451_v45  ;;  %v3615_v45 = vld [vmem:[%s8519_s8 + $0x130] sm:$0xff]  ;;  %v5212_v36 = vpack.c.bf16 %v3617_v2, %v3585_v55  ;;  %v3638_v2 = vld [vmem:[%s8519_s8 + $0x1e8] sm:$0xff] }
 0x744   :  { %v3454_v33 = vpop.permute.xlu0 %3453  ;;  %v3532_v29 = vpop.permute.xlu1 %3531  ;;  %v5208_v60 = vpack.c.bf16 %v3615_v45, %v3583_v37  ;;  %v3602_v37 = vld [vmem:[%s8519_s8 + $0xc8] sm:$0xff] }
 0x745   :  { %v3564_v46 = vsel %vm3494_vm7, %v3563_v4, %v3532_v29  ;;  %v3493_v52 = vsel %vm3492_vm4, %v3491_v26, %v3454_v33  ;;  %v5216_v4 = vpack.c.bf16 %v3619_v48, %v3587_v34  ;;  %v3589_v33 = vld [vmem:[%s8519_s8 + $0x60] sm:$0xff]  ;;  %v3591_v26 = vld [vmem:[%s8519_s8 + $0x70] sm:$0xff]  ;;  %v3634_v45 = vld [vmem:[%s8519_s8 + $0x1c8] sm:$0xff] }
 0x746   :  { %v3565_v44 = vsel %vm879_vm10, %v3564_v46, %v3535_v7  ;;  %v3586_v7 = vld [vmem:[%s8519_s8 + $0x48] sm:$0xff]  ;;  %v3621_v29 = vld [vmem:[%s8519_s8 + $0x160] sm:$0xff]  ;;  %v3623_v46 = vld [vmem:[%s8519_s8 + $0x170] sm:$0xff] }
 0x747   :  { %v3566_v49 = vsel %vm816_vm9, %v3565_v44, %v3538_v10  ;;  %v3588_v10 = vld [vmem:[%s8519_s8 + $0x58] sm:$0xff]  ;;  %v5218_v44 = vpack.c.bf16 %v3622_v61, %v3590_v12  ;;  %v3605_v12 = vld [vmem:[%s8519_s8 + $0xe0] sm:$0xff] }
 0x748   :  { %v3457_v57 = vpop.permute.xlu0 %3456  ;;  %v3541_v17 = vpop.permute.xlu1 %3540  ;;  %v3608_v34 = vld [vmem:[%s8519_s8 + $0xf8] sm:$0xff]  ;;  %v3637_v61 = vld [vmem:[%s8519_s8 + $0x1e0] sm:$0xff] }
 0x749   :  { %v3495_v47 = vsel %vm3494_vm7, %v3493_v52, %v3457_v57  ;;  %v3567_v6 = vsel %vm3498_vm8, %v3566_v49, %v3541_v17  ;;  %v5222_v52 = vpack.c.bf16 %v3624_v3, %v3592_v53  ;;  %v3594_v57 = vld [vmem:[%s8519_s8 + $0x88] sm:$0xff]  ;;  %v3628_v49 = vld [vmem:[%s8519_s8 + $0x198] sm:$0xff]  ;;  %v3607_v53 = vld [vmem:[%s8519_s8 + $0xf0] sm:$0xff] }
 0x74a   :  { %v3496_v56 = vsel %vm879_vm10, %v3495_v47, %v3460_v40  ;;  %v3618_v40 = vld [vmem:[%s8519_s8 + $0x148] sm:$0xff]  ;;  %v3596_v47 = vld [vmem:[%s8519_s8 + $0x98] sm:$0xff]  ;;  %v3639_v3 = vld [vmem:[%s8519_s8 + $0x1f0] sm:$0xff] }
 0x74b   :  { %v3497_v43 = vsel %vm816_vm9, %v3496_v56, %v3463_v18  ;;  %v3620_v18 = vld [vmem:[%s8519_s8 + $0x158] sm:$0xff]  ;;  %v5210_v0 = vpack.c.bf16 %v3618_v40, %v3586_v7  ;;  %v3626_v17 = vld [vmem:[%s8519_s8 + $0x188] sm:$0xff]  ;;  %v5220_v56 = vpack.c.bf16 %v3621_v29, %v3589_v33  ;;  %v5252_v33 = vpack.c.bf16 %v3637_v61, %v3605_v12 }
 0x74c   :  { %v3466_v51 = vpop.permute.xlu0 %3465  ;;  %v3544_v50 = vpop.permute.xlu1 %3543  ;;  %v5214_v41 = vpack.c.bf16 %v3620_v18, %v3588_v10  ;;  %v3604_v7 = vld [vmem:[%s8519_s8 + $0xd8] sm:$0xff]  ;;  %v5256_v29 = vpack.c.bf16 %v3639_v3, %v3607_v53 }
 0x74d   :  { %v3568_v5 = vsel %vm3500_vm12, %v3567_v6, %v3544_v50  ;;  %v3499_v23 = vsel %vm3498_vm8, %v3497_v43, %v3466_v51  ;;  %v5224_v6 = vpack.c.bf16 %v3623_v46, %v3591_v26  ;;  %v3593_v51 = vld [vmem:[%s8519_s8 + $0x80] sm:$0xff]  ;;  %v3595_v43 = vld [vmem:[%s8519_s8 + $0x90] sm:$0xff]  ;;  %v3636_v40 = vld [vmem:[%s8519_s8 + $0x1d8] sm:$0xff]  ;;  %v5406_v26 = vmov 1983009808  }
 0x74e   :  { %v3569_v11 = vsel %vm3502_vm13, %v3568_v5, %v3547_v28  ;;  %v3625_v50 = vld [vmem:[%s8519_s8 + $0x180] sm:$0xff]  ;;  %v3627_v5 = vld [vmem:[%s8519_s8 + $0x190] sm:$0xff]  ;;  %v5246_v55 = vpack.c.bf16 %v3636_v40, %v3604_v7  ;;  %v3640_v48 = vld [vmem:[%s8519_s8 + $0x1f8] sm:$0xff]  ;;  %v4983_v46 = vunpack.c.l.s4 %v5406_v26 }
 0x74f   :  { %v3570_v15 = vsel %vm3504_vm14, %v3569_v11, %v3550_v1  ;;  %v5226_v11 = vpack.c.bf16 %v3626_v17, %v3594_v57 }
 0x750   :  { %v3469_v16 = vpop.permute.xlu0 %3468  ;;  %v3553_v54 = vpop.permute.xlu1 %3552  ;;  %v4984_v17 = vunpack.c.0.s8 %v4983_v46 }
 0x751   :  { %v3501_v24 = vsel %vm3500_vm12, %v3499_v23, %v3469_v16  ;;  %v3571_v31 = vsel %vm3506_vm15, %v3570_v15, %v3553_v54  ;;  %v5230_v23 = vpack.c.bf16 %v3628_v49, %v3596_v47  ;;  %v3598_v16 = vld [vmem:[%s8519_s8 + $0xa8] sm:$0xff]  ;;  %v3632_v15 = vld [vmem:[%s8519_s8 + $0x1b8] sm:$0xff] }
 0x752   :  { %v3503_v25 = vsel %vm3502_vm13, %v3501_v24, %v3472_v20  ;;  %v3630_v54 = vld [vmem:[%s8519_s8 + $0x1a8] sm:$0xff]  ;;  %v3600_v24 = vld [vmem:[%s8519_s8 + $0xb8] sm:$0xff] }
 0x753   :  { %v3505_v22 = vsel %vm3504_vm14, %v3503_v25, %v3475_v59  ;;  %v5204_v59 = vpack.c.bf16 %v3613_v42, %v3581_v27  ;;  %v5228_v25 = vpack.c.bf16 %v3625_v50, %v3593_v51  ;;  %v3629_v27 = vld [vmem:[%s8519_s8 + $0x1a0] sm:$0xff]  ;;  %v5238_v42 = vpack.c.bf16 %v3632_v15, %v3600_v24 }
 0x754   :  { %v3556_v13 = vpop.permute.xlu1 %3555  ;;  %v3478_v35 = vpop.permute.xlu0 %3477 }
 0x755   :  { %v3572_v30 = vsel %vm3508_vm2, %v3571_v31, %v3556_v13  ;;  %v3507_v28 = vsel %vm3506_vm15, %v3505_v22, %v3478_v35  ;;  %v5232_v31 = vpack.c.bf16 %v3627_v5, %v3595_v43  ;;  %v3597_v13 = vld [vmem:[%s8519_s8 + $0xa0] sm:$0xff]  ;;  %v3599_v22 = vld [vmem:[%s8519_s8 + $0xb0] sm:$0xff] }
 0x756   :  { %v3574_v20 = vrot.slane %v3572_v30, 7  ;;  %v3631_v35 = vld [vmem:[%s8519_s8 + $0x1b0] sm:$0xff]  ;;  %v5234_v30 = vpack.c.bf16 %v3630_v54, %v3598_v16  ;;  %v5236_v10 = vpack.c.bf16 %v3629_v27, %v3597_v13  ;;  %v8819_v43 = vld [vmem:[#allocation5_spill] sm:$0xff]  ;;  %v3642_v16 = vld [vmem:[%s8520_s9 + $0x8] sm:$0xff] }
 0x757   :  { %v5240_v18 = vpack.c.bf16 %v3631_v35, %v3599_v22  ;;  %v8435_v5 = vsub.s32 %v4984_v17, %v8819_v43  ;;  %v3684_v35 = vrot.slane %v3642_v16, %v8793_v38  ;;  %v3688_v40 = vrot.slane %v3642_v16, %v8794_v9 }
 0x758   :  { %v3481_v1 = vpop.permute.xlu1 %3480  ;;  %v3704_v3 = vrot.slane %v3642_v16, %v5538_v21 }
 0x759   :  { %v3509_v62 = vsel %vm3508_vm2, %v3507_v28, %v3481_v1  ;;  %v3601_v28 = vld [vmem:[%s8519_s8 + $0xc0] sm:$0xff]  ;;  %v3603_v1 = vld [vmem:[%s8519_s8 + $0xd0] sm:$0xff] }
 0x75a   :  { %v8258_v32 = vsel %vm792_vm3, %v3509_v62, %v3574_v20  ;;  %v3633_v20 = vld [vmem:[%s8519_s8 + $0x1c0] sm:$0xff]  ;;  %v3606_v62 = vld [vmem:[%s8519_s8 + $0xe8] sm:$0xff] }
 0x75b   :  { %5178 = vmatmul.mubr.msk.f32.vlgmr.msra.gmra.mrb[0].mxu0 %vm882_vm11, %v8258_v32  ;;  %5179 = vmatmul.mubr.msk.f32.vlgmr.msra.gmra.mrb[0].mxu1 %vm882_vm11, %v8258_v32 }
 0x75c   :  { %5205 = vmatpush1.bf16.msra.mxu0 %v5204_v59  ;;  %5209 = vmatpush1.bf16.msra.mxu1 %v5208_v60  ;;  %v3635_v59 = vld [vmem:[%s8519_s8 + $0x1d0] sm:$0xff]  ;;  %v5242_v60 = vpack.c.bf16 %v3634_v45, %v3602_v37 }
 0x75d   :  { %4018 = vmatprep.mubr.f32.mxu0 %v5401_v19  ;;  %4089 = vmatprep.mubr.f32.mxu1 %v5401_v19 }
 0x75e   :  { %5211 = vmatprep.subr.bf16.mxu0 %v5210_v0  ;;  %5215 = vmatprep.subr.bf16.mxu1 %v5214_v41  ;;  %v5244_v0 = vpack.c.bf16 %v3633_v20, %v3601_v28  ;;  %v5248_v41 = vpack.c.bf16 %v3635_v59, %v3603_v1  ;;  %v3700_v59 = vrot.slane %v3642_v16, %v8688_v39 }
 0x75f   :  { %5180 = vmatmul.mubr.msk.f32.vlgmr.msra.gmra.mrb[2].mxu0 %vm882_vm11, %v8258_v32  ;;  %5181 = vmatmul.mubr.msk.f32.vlgmr.msra.gmra.mrb[2].mxu1 %vm882_vm11, %v8258_v32 }
 0x760   :  { %5213 = vmatpush1.bf16.msra.mxu0 %v5212_v36  ;;  %5217 = vmatpush1.bf16.msra.mxu1 %v5216_v4  ;;  %v5250_v36 = vpack.c.bf16 %v3638_v2, %v3606_v62  ;;  %v5254_v4 = vpack.c.bf16 %v3640_v48, %v3608_v34  ;;  %v3708_v48 = vrot.slane %v3642_v16, %v8689_v58 }
 0x761   :  { %4160 = vmatprep.mubr.f32.mxu0 %v5401_v19  ;;  %4231 = vmatprep.mubr.f32.mxu1 %v5401_v19 }
 0x762   :  { %5219 = vmatprep.subr.bf16.mxu0 %v5218_v44  ;;  %5223 = vmatprep.subr.bf16.mxu1 %v5222_v52  ;;  %v3641_v44 = vld [vmem:[%s8520_s9] sm:$0xff] }
 0x763   :  { %5182 = vmatmul.mubr.msk.f32.vlgmr.msra.gmra.mrb[4].mxu0 %vm882_vm11, %v8258_v32  ;;  %5183 = vmatmul.mubr.msk.f32.vlgmr.msra.gmra.mrb[4].mxu1 %vm882_vm11, %v8258_v32  ;;  %v3652_v52 = vrot.slane %v3641_v44, %v8793_v38  ;;  %v3660_v57 = vrot.slane %v3641_v44, %v8795_v63  ;;  %v3656_v47 = vrot.slane %v3641_v44, %v8794_v9 }
 0x764   :  { %5221 = vmatpush1.bf16.msra.mxu0 %v5220_v56  ;;  %5225 = vmatpush1.bf16.msra.mxu1 %v5224_v6  ;;  %v3668_v6 = vrot.slane %v3641_v44, %v8688_v39  ;;  %v3672_v15 = vrot.slane %v3641_v44, %v5538_v21 }
 0x765   :  { %4302 = vmatprep.mubr.f32.mxu0 %v5401_v19  ;;  %4373 = vmatprep.mubr.f32.mxu1 %v5401_v19 }
 0x766   :  { %5227 = vmatprep.subr.bf16.mxu0 %v5226_v11  ;;  %5231 = vmatprep.subr.bf16.mxu1 %v5230_v23  ;;  %v3676_v23 = vrot.slane %v3641_v44, %v8689_v58 }
 0x767   :  { %5184 = vmatmul.mubr.msk.f32.vlgmr.msra.gmra.mrb[6].mxu0 %vm882_vm11, %v8258_v32  ;;  %5185 = vmatmul.mubr.msk.f32.vlgmr.msra.gmra.mrb[6].mxu1 %vm882_vm11, %v8258_v32 }
 0x768   :  { %5229 = vmatpush1.bf16.msra.mxu0 %v5228_v25  ;;  %5233 = vmatpush1.bf16.msra.mxu1 %v5232_v31  ;;  %v3680_v25 = vrot.slane %v3641_v44, %v5509_v14 }
 0x769   :  { %4444 = vmatprep.mubr.f32.mxu0 %v5401_v19  ;;  %4515 = vmatprep.mubr.f32.mxu1 %v5401_v19 }
 0x76a   :  { %5235 = vmatprep.subr.bf16.mxu0 %v5234_v30  ;;  %5239 = vmatprep.subr.bf16.mxu1 %v5238_v42  ;;  %v3692_v30 = vrot.slane %v3642_v16, %v8795_v63 }
 0x76b   :  { %5186 = vmatmul.mubr.msk.f32.vlgmr.msra.gmra.mrb[8].mxu0 %vm882_vm11, %v8258_v32  ;;  %5187 = vmatmul.mubr.msk.f32.vlgmr.msra.gmra.mrb[8].mxu1 %vm882_vm11, %v8258_v32 }
 0x76c   :  { %5237 = vmatpush1.bf16.msra.mxu0 %v5236_v10  ;;  %5241 = vmatpush1.bf16.msra.mxu1 %v5240_v18  ;;  %v3696_v10 = vrot.slane %v3642_v16, %v8687_v8 }
 0x76d   :  { %4586 = vmatprep.mubr.f32.mxu0 %v5401_v19  ;;  %4657 = vmatprep.mubr.f32.mxu1 %v5401_v19 }
 0x76e   :  { %5243 = vmatprep.subr.bf16.mxu0 %v5242_v60  ;;  %5247 = vmatprep.subr.bf16.mxu1 %v5246_v55 }
 0x76f   :  { %5188 = vmatmul.mubr.msk.f32.vlgmr.msra.gmra.mrb[10].mxu0 %vm882_vm11, %v8258_v32  ;;  %5189 = vmatmul.mubr.msk.f32.vlgmr.msra.gmra.mrb[10].mxu1 %vm882_vm11, %v8258_v32 }
 0x770   :  { %5245 = vmatpush1.bf16.msra.mxu0 %v5244_v0  ;;  %5249 = vmatpush1.bf16.msra.mxu1 %v5248_v41  ;;  %v8454_v0 = vld [vmem:[%s8520_s9 + $0x10] sm:$0xff] }
 0x771   :  { %4728 = vmatprep.mubr.f32.mxu0 %v5401_v19  ;;  %4799 = vmatprep.mubr.f32.mxu1 %v5401_v19  ;;  %v3716_v46 = vrot.slane %v8454_v0, %v8793_v38 }
 0x772   :  { %5251 = vmatprep.subr.bf16.mxu0 %v5250_v36  ;;  %5255 = vmatprep.subr.bf16.mxu1 %v5254_v4  ;;  %v3712_v36 = vrot.slane %v3642_v16, %v5509_v14 }
 0x773   :  { %5190 = vmatmul.mubr.msk.f32.vlgmr.msra.gmra.mrb[12].mxu0 %vm882_vm11, %v8258_v32  ;;  %5191 = vmatmul.mubr.msk.f32.vlgmr.msra.gmra.mrb[12].mxu1 %vm882_vm11, %v8258_v32 }
 0x774   :  { %5253 = vmatpush1.bf16.msra.mxu0 %v5252_v33  ;;  %5257 = vmatpush1.bf16.msra.mxu1 %v5256_v29 }
 0x775   :  { %4870 = vmatprep.mubr.f32.mxu0 %v5401_v19  ;;  %4941 = vmatprep.mubr.f32.mxu1 %v5401_v19  ;;  %v3664_v19 = vrot.slane %v3641_v44, %v8687_v8 }
 0x777   :  { %5192 = vmatmul.mubr.msk.f32.vlgmr.msra.gmra.mrb[14].mxu0 %vm882_vm11, %v8258_v32  ;;  %5193 = vmatmul.mubr.msk.f32.vlgmr.msra.gmra.mrb[14].mxu1 %vm882_vm11, %v8258_v32 }
 0x82e   :  { %v3878_v49 = vpop.f32.mrb[0].mxu0  ;;  %v3949_v56 = vpop.f32.mrb[0].mxu1 }
 0x82f   :  { %v3879_v32 = vadd.f32 %v3878_v49, %v3652_v52  ;;  %v3950_v51 = vadd.f32 %v3949_v56, %v3660_v57  ;;  %v3880_v50 = vpop.f32.mrb[1].mxu0  ;;  %v3951_v11 = vpop.f32.mrb[1].mxu1 }
 0x830   :  { %v3881_v54 = vadd.f32 %v3880_v50, %v3656_v47  ;;  %v3952_v24 = vadd.f32 %v3951_v11, %v3664_v19  ;;  %v3724_v19 = vrot.slane %v8454_v0, %v8795_v63  ;;  %v3728_v50 = vrot.slane %v8454_v0, %v8687_v8 }
 0x832   :  { %v4980_v31 = vcombine.low %v3879_v32, %v3881_v54  ;;  %v4981_v13 = vcombine.low %v3950_v51, %v3952_v24  ;;  %v4020_v27 = vpop.f32.mrb[2].mxu0  ;;  %v4091_v22 = vpop.f32.mrb[2].mxu1  ;;  %v3720_v51 = vrot.slane %v8454_v0, %v8794_v9  ;;  %v3732_v54 = vrot.slane %v8454_v0, %v8688_v39 }
 0x833   :  { %v4021_v42 = vadd.f32 %v4020_v27, %v3668_v6  ;;  %v4092_v37 = vadd.f32 %v4091_v22, %v3676_v23  ;;  %v4022_v45 = vpop.f32.mrb[3].mxu0  ;;  %v4093_v7 = vpop.f32.mrb[3].mxu1  ;;  %v3740_v27 = vrot.slane %v8454_v0, %v8689_v58  ;;  %v3644_v22 = vld [vmem:[%s8520_s9 + $0x18] sm:$0xff]  ;;  %s5407_s9 = smov [#allocation2]  }
 0x834   :  { %v4988_v18 = vrot.slane %v4980_v31, %v8435_v5  ;;  %v4995_v28 = vrot.slane %v4981_v13, %v8435_v5  ;;  %v4023_v20 = vadd.f32 %v4022_v45, %v3672_v15  ;;  %v4094_v1 = vadd.f32 %v4093_v7, %v3680_v25  ;;  %s5138_s29 = sshll.u32 %s5407_s9, 4  ;;  %s5139_s29 = int_to_ptr.vmem [resolvable:$true] %s5138_s29 }
 0x835   :  { %v3736_v45 = vrot.slane %v8454_v0, %v5538_v21  ;;  %v3744_v7 = vrot.slane %v8454_v0, %v5509_v14  ;;  %s5321_s30 = scalar_lea.vmem %s5139_s29, 1024  ;;  %p5326_p1 = scmp.lt.s32.totalorder %s5139_s29, %s5139_s29 }
 0x836   :  { %v4996_v60 = vcombine.low %v4988_v18, %v4995_v28  ;;  %v4997_v55 = vcombine.low %v4021_v42, %v4023_v20  ;;  %v4998_v62 = vcombine.low %v4092_v37, %v4094_v1  ;;  %v4162_v2 = vpop.f32.mrb[4].mxu0  ;;  %v4233_v34 = vpop.f32.mrb[4].mxu1  ;;  %v3748_v20 = vrot.slane %v3644_v22, %v8793_v38  ;;  %p5322_p0 = scmp.ne.s32.totalorder %s5139_s29, %s5321_s30  ;;  %p5327_p2 = scmp.lt.s32.totalorder %s5321_s30, %s5321_s30 }
 0x837   :  { %v4163_v41 = vadd.f32 %v4162_v2, %v3684_v35  ;;  %v4234_v12 = vadd.f32 %v4233_v34, %v3692_v30  ;;  %v4164_v61 = vpop.f32.mrb[5].mxu0  ;;  %v4235_v53 = vpop.f32.mrb[5].mxu1  ;;  %v3756_v2 = vrot.slane %v3644_v22, %v8795_v63 }
 0x838   :  { %5124 = vst [vmem:[#allocation2] sm:$0xff] %v4996_v60  ;;  %v5005_v4 = vrot.slane %v4997_v55, %v8435_v5  ;;  %v5012_v33 = vrot.slane %v4998_v62, %v8435_v5  ;;  %v4165_v29 = vadd.f32 %v4164_v61, %v3688_v40  ;;  %v4236_v26 = vadd.f32 %v4235_v53, %v3696_v10  ;;  %p5328_p3 = por %p5327_p2, %p5326_p1 }
 0x839   :  { %v3760_v61 = vrot.slane %v3644_v22, %v8687_v8 }
 0x83a   :  { %v5013_v44 = vcombine.low %v5005_v4, %v5012_v33  ;;  %v5014_v52 = vcombine.low %v4163_v41, %v4165_v29  ;;  %v5015_v57 = vcombine.low %v4234_v12, %v4236_v26  ;;  %v4304_v17 = vpop.f32.mrb[6].mxu0  ;;  %v4375_v47 = vpop.f32.mrb[6].mxu1  ;;  %v3752_v12 = vrot.slane %v3644_v22, %v8794_v9  ;;  %p5329_p4 = pnand %p5328_p3, %p5322_p0 }
 0x83b   :  { %v4305_v49 = vadd.f32 %v4304_v17, %v3700_v59  ;;  %v4376_v56 = vadd.f32 %v4375_v47, %v3708_v48  ;;  %v4306_v6 = vpop.f32.mrb[7].mxu0  ;;  %v4377_v32 = vpop.f32.mrb[7].mxu1  ;;  %v3764_v4 = vrot.slane %v3644_v22, %v8688_v39  ;;  %v3768_v17 = vrot.slane %v3644_v22, %v5538_v21 }
 0x83c   :  { %5125 = vst [vmem:[#allocation2 + $0x8] sm:$0xff] %v5013_v44  ;;  %v5022_v43 = vrot.slane %v5014_v52, %v8435_v5  ;;  %v5029_v11 = vrot.slane %v5015_v57, %v8435_v5  ;;  %v4307_v23 = vadd.f32 %v4306_v6, %v3704_v3  ;;  %v4378_v16 = vadd.f32 %v4377_v32, %v3712_v36 }
 0x83d   :  { %v3772_v44 = vrot.slane %v3644_v22, %v8689_v58  ;;  %v3776_v47 = vrot.slane %v3644_v22, %v5509_v14 }
 0x83e   :  { %v5030_v24 = vcombine.low %v5022_v43, %v5029_v11  ;;  %v5031_v15 = vcombine.low %v4305_v49, %v4307_v23  ;;  %v5032_v25 = vcombine.low %v4376_v56, %v4378_v16  ;;  %v4446_v31 = vpop.f32.mrb[8].mxu0  ;;  %v4517_v13 = vpop.f32.mrb[8].mxu1 }
 0x83f   :  { %v4447_v35 = vadd.f32 %v4446_v31, %v3716_v46  ;;  %v4518_v30 = vadd.f32 %v4517_v13, %v3724_v19  ;;  %v4448_v42 = vpop.f32.mrb[9].mxu0  ;;  %v4519_v37 = vpop.f32.mrb[9].mxu1 }
 0x840   :  { %5126 = vst [vmem:[#allocation2 + $0x10] sm:$0xff] %v5030_v24  ;;  %v5039_v40 = vrot.slane %v5031_v15, %v8435_v5  ;;  %v5046_v10 = vrot.slane %v5032_v25, %v8435_v5  ;;  %v4449_v18 = vadd.f32 %v4448_v42, %v3720_v51  ;;  %v4520_v28 = vadd.f32 %v4519_v37, %v3728_v50 }
 0x842   :  { %v5047_v1 = vcombine.low %v5039_v40, %v5046_v10  ;;  %v5048_v59 = vcombine.low %v4447_v35, %v4449_v18  ;;  %v5049_v60 = vcombine.low %v4518_v30, %v4520_v28  ;;  %v4588_v55 = vpop.f32.mrb[10].mxu0  ;;  %v4659_v62 = vpop.f32.mrb[10].mxu1 }
 0x843   :  { %v4589_v34 = vadd.f32 %v4588_v55, %v3732_v54  ;;  %v4660_v48 = vadd.f32 %v4659_v62, %v3740_v27  ;;  %v4590_v41 = vpop.f32.mrb[11].mxu0  ;;  %v4661_v0 = vpop.f32.mrb[11].mxu1 }
 0x844   :  { %5127 = vst [vmem:[#allocation2 + $0x18] sm:$0xff] %v5047_v1  ;;  %v5056_v53 = vrot.slane %v5048_v59, %v8435_v5  ;;  %v5063_v38 = vrot.slane %v5049_v60, %v8435_v5  ;;  %v4591_v3 = vadd.f32 %v4590_v41, %v3736_v45  ;;  %v4662_v36 = vadd.f32 %v4661_v0, %v3744_v7 }
 0x846   :  { %v5064_v33 = vcombine.low %v5056_v53, %v5063_v38  ;;  %v5065_v29 = vcombine.low %v4589_v34, %v4591_v3  ;;  %v5066_v63 = vcombine.low %v4660_v48, %v4662_v36  ;;  %v4730_v26 = vpop.f32.mrb[12].mxu0  ;;  %v4801_v46 = vpop.f32.mrb[12].mxu1 }
 0x847   :  { %v4731_v52 = vadd.f32 %v4730_v26, %v3748_v20  ;;  %v4802_v9 = vadd.f32 %v4801_v46, %v3756_v2  ;;  %v4732_v57 = vpop.f32.mrb[13].mxu0  ;;  %v4803_v8 = vpop.f32.mrb[13].mxu1 }
 0x848   :  { %5128 = vst [vmem:[#allocation2 + $0x20] sm:$0xff] %v5064_v33  ;;  %v5073_v19 = vrot.slane %v5065_v29, %v8435_v5  ;;  %v5080_v39 = vrot.slane %v5066_v63, %v8435_v5  ;;  %v4733_v49 = vadd.f32 %v4732_v57, %v3752_v12  ;;  %v4804_v56 = vadd.f32 %v4803_v8, %v3760_v61 }
 0x84a   :  { %v5081_v6 = vcombine.low %v5073_v19, %v5080_v39  ;;  %v5082_v32 = vcombine.low %v4731_v52, %v4733_v49  ;;  %v5083_v51 = vcombine.low %v4802_v9, %v4804_v56  ;;  %v4872_v50 = vpop.f32.mrb[14].mxu0  ;;  %v4943_v58 = vpop.f32.mrb[14].mxu1 }
 0x84b   :  { %v4873_v43 = vadd.f32 %v4872_v50, %v3764_v4  ;;  %v4944_v11 = vadd.f32 %v4943_v58, %v3772_v44  ;;  %v4874_v23 = vpop.f32.mrb[15].mxu0  ;;  %v4945_v16 = vpop.f32.mrb[15].mxu1 }
 0x84c   :  { %5129 = vst [vmem:[#allocation2 + $0x28] sm:$0xff] %v5081_v6  ;;  %v5090_v21 = vrot.slane %v5082_v32, %v8435_v5  ;;  %v5097_v14 = vrot.slane %v5083_v51, %v8435_v5  ;;  %v4875_v54 = vadd.f32 %v4874_v23, %v3768_v17  ;;  %v4946_v24 = vadd.f32 %v4945_v16, %v3776_v47 }
 0x84e   :  { %v5098_v15 = vcombine.low %v5090_v21, %v5097_v14  ;;  %v5099_v25 = vcombine.low %v4873_v43, %v4875_v54  ;;  %v5100_v31 = vcombine.low %v4944_v11, %v4946_v24 }
 0x850   :  { %5130 = vst [vmem:[#allocation2 + $0x30] sm:$0xff] %v5098_v15  ;;  %v5107_v13 = vrot.slane %v5099_v25, %v8435_v5  ;;  %v5114_v27 = vrot.slane %v5100_v31, %v8435_v5 }
 0x852   :  { %v5115_v22 = vcombine.low %v5107_v13, %v5114_v27 }
 0x854   :  { %5131 = vst [vmem:[#allocation2 + $0x38] sm:$0xff] %v5115_v22 }
 0x855   :  { %5332 = shalt.err (!%p5329_p4)
}
 0x856   :  { %s5333_s12 = scalar_lea.hbm %s8521_s10, 1024 }
 0x857   :  { %p5334_p5 = scmp.ne.s32.totalorder %s8521_s10, %s5333_s12  ;;  %p5337_p6 = scmp.lt.u32.totalorder %s5333_s12, %s8521_s10 }
 0x859   :  { %p5339_p7 = pnand %p5337_p6, %p5334_p5 }
 0x85b   :  { %5342 = shalt.err (!%p5339_p7)
}
 0x85c   :  { %5141 = dma.vmem_to_hbm [thread:$0]  %s5139_s29, 1024, %s8521_s10, [#allocation3]  }
 0x85d   :  { %5343 = dma.done.wait [#allocation3], 1024  }
 0x85e   :  { %5344 = vsyncadd [#allocation3], 4294966272 }
 0x85f   :  { %5145 = vsyncpa [#allocation3], 1 }

</bundles_post_ra>
